<compile_context>
chip_gen: v6e
topology: v6e:2x2x1
jax: 0.10.0
libtpu: 0.0.40
codegen_flags: <defaults>
</compile_context>

<pallas_src>
import functools
import math

import jax
import jax.numpy as jnp
from jax.experimental import pallas as pl
from jax.experimental.pallas import tpu as pltpu

INPUT_CHANNELS = 6
LANE = 128


def _rup(c, m=LANE):
    return ((c + m - 1) // m) * m


def _elu(x):
    # ELU(alpha=1).  exp(min(x, 0)) keeps the EUP exp in range; the "- 1" is a
    # cheap VPU op.  (expm1 would be marginally more accurate near 0; exp-1 is
    # used to stay on the guaranteed exp lowering path.)
    return jnp.where(x > 0, x, jnp.exp(jnp.minimum(x, 0.0)) - 1.0)


def _tap(ref, k, length, stride):
    """Tap k of a padded VMEM scratch: rows k, k+stride, ... (strided conv)."""
    if stride > 1:
        return ref[pl.ds(k, length, stride=stride), :]
    return ref[pl.ds(k, length), :]


# -----------------------------------------------------------------------------
# Pallas kernels
# -----------------------------------------------------------------------------
def _stem_kernel(x_ref, w_ref, o_ref, xpad, *, l_in, l_out):
    """Conv1d(1, C, k=7, s=3, p=3, bias=False) + ELU, pure VPU broadcast-FMA."""
    c_p = o_ref.shape[2]
    zrow = jnp.zeros((3, 1), jnp.float32)
    xpad[0:3, :] = zrow                                   # left zero pad (p=3)
    xpad[l_in + 3:l_in + 6, :] = zrow                     # right zero pad
    xpad[pl.ds(3, l_in), :] = x_ref[0]

    acc = jnp.zeros((l_out, c_p), jnp.float32)
    for k in range(7):                                    # (l_out,1)*(1,C) FMA
        acc = acc + _tap(xpad, k, l_out, 3) * w_ref[k]
    o_ref[0] = _elu(acc)


def _block_kernel(x_ref, w1_ref, w2_ref, b2_ref, w3_ref, *rest,
                  stride, l_in, l_out, has_down):
    """One fused BasicBlock1D; all intermediates stay in VMEM scratch.

    x_ref : (1, L_in, C_in_p) f32
    w1    : (3, C_in_p, C2_p) bf16   conv1 (stride=s, pad=1, no bias)
    w2    : (1, C2_p,  C3_p)  bf16   conv2 (k=1, bias)
    b2    : (1, C3_p)         f32
    w3    : (3, C3_p, C_out_p) bf16  conv3 (stride=1, pad=1, no bias)
    wd    : (1, C_in_p, C_out_p) bf16  optional downsample (k=1, stride=s)
    o_ref : (1, L_out, C_out_p) f32
    """
    if has_down:
        wd_ref, o_ref, xpad, h1, h2pad = rest
    else:
        o_ref, xpad, h1, h2pad = rest

    c_in_p = x_ref.shape[2]
    c2_p = w1_ref.shape[2]
    c3_p = w2_ref.shape[2]
    c_out_p = o_ref.shape[2]
    f32, bf16 = jnp.float32, jnp.bfloat16

    # ---- in-kernel zero padding (pad=1) of the block input ------------------
    zrow = jnp.zeros((1, c_in_p), f32)
    xpad[0:1, :] = zrow
    xpad[l_in + 1:l_in + 2, :] = zrow
    xpad[pl.ds(1, l_in), :] = x_ref[0]

    # ---- conv1: k=3, stride=s, pad=1, bias=False, ELU ------------------------
    acc = jnp.zeros((l_out, c2_p), f32)
    for k in range(3):
        acc = acc + jnp.dot(_tap(xpad, k, l_out, stride).astype(bf16),
                            w1_ref[k], preferred_element_type=f32)
    h1[...] = _elu(acc).astype(bf16)

    # ---- conv2: k=1, stride=1, bias=True, ELU (stored padded for conv3) -----
    acc = jnp.dot(h1[...], w2_ref[0], preferred_element_type=f32) + b2_ref[...]
    zrow3 = jnp.zeros((1, c3_p), bf16)
    h2pad[0:1, :] = zrow3
    h2pad[l_out + 1:l_out + 2, :] = zrow3
    h2pad[pl.ds(1, l_out), :] = _elu(acc).astype(bf16)

    # ---- conv3: k=3, stride=1, pad=1, bias=False, ELU ------------------------
    acc = jnp.zeros((l_out, c_out_p), f32)
    for k in range(3):
        acc = acc + jnp.dot(h2pad[pl.ds(k, l_out), :], w3_ref[k],
                            preferred_element_type=f32)
    out = _elu(acc)

    # ---- identity / downsample (Conv1d k=1 stride=s bias=False + ELU) -------
    if has_down:
        ident = _elu(jnp.dot(_tap(xpad, 1, l_out, stride).astype(bf16),
                             wd_ref[0], preferred_element_type=f32))
    else:
        ident = x_ref[0]          # stride==1 and C_in==C_out in this case

    # Residual added AFTER the branch ELUs, no activation on the sum
    # (matches BasicBlock1D.forward: out = conv1(x); out = out + identity).
    o_ref[0] = out + ident


def _head_kernel(x_ref, g_ref, beta_ref, w_ref, b_ref, o_ref, *, f_true):
    """AvgPool1d(1)*MaxPool1d(1) -> flatten -> LayerNorm -> Linear -> Sigmoid."""
    x = x_ref[...]                                        # (N, L, C_p)
    feat = jnp.mean(x, axis=1) * jnp.max(x, axis=1)       # (N, C_p)
    # LayerNorm over the TRUE feature count (padded channels are exactly 0).
    mask = jax.lax.broadcasted_iota(jnp.int32, feat.shape, 1) < f_true
    mu = jnp.sum(feat, axis=-1, keepdims=True) / f_true
    diff = jnp.where(mask, feat - mu, 0.0)
    var = jnp.sum(diff * diff, axis=-1, keepdims=True) / f_true
    h = diff * jax.lax.rsqrt(var + 1e-5) * g_ref[...] + beta_ref[...]
    y = jnp.dot(h, w_ref[...], preferred_element_type=jnp.float32) + b_ref[...]
    o_ref[...] = 1.0 / (1.0 + jnp.exp(-y))                # sigmoid


# -----------------------------------------------------------------------------
# Pallas wrappers
# -----------------------------------------------------------------------------
def stem_conv(x, w):
    """x: (N, L, 1) f32; w: (7, 1, C_p) f32 -> (N, L_out, C_p) f32."""
    n, l_in, _ = x.shape
    c_p = w.shape[2]
    l_out = (l_in + 2 * 3 - 7) // 3 + 1
    return pl.pallas_call(
        functools.partial(_stem_kernel, l_in=l_in, l_out=l_out),
        out_shape=jax.ShapeDtypeStruct((n, l_out, c_p), jnp.float32),
        grid=(n,),
        in_specs=[pl.BlockSpec((1, l_in, 1), lambda i: (i, 0, 0)),
                  pl.BlockSpec((7, 1, c_p), lambda i: (0, 0, 0))],
        out_specs=pl.BlockSpec((1, l_out, c_p), lambda i: (i, 0, 0)),
        scratch_shapes=[pltpu.VMEM((l_in + 6, 1), jnp.float32)],
        compiler_params=pltpu.CompilerParams(dimension_semantics=("parallel",)),
    )(x, w)


def basic_block(x, blk, *, stride):
    """Fused BasicBlock1D. x: (N, L, C_in_p) f32 -> (N, L_out, C_out_p) f32."""
    n, l_in, c_in_p = x.shape
    w1 = blk["conv1"]["w"]
    w2, b2 = blk["conv2"]["w"], blk["conv2"]["b"]
    w3 = blk["conv3"]["w"]
    c2_p, c3_p, c_out_p = w1.shape[2], w2.shape[2], w3.shape[2]
    l_out = (l_in - 1) // stride + 1                      # (L + 2*1 - 3)//s + 1
    has_down = "downsample" in blk

    in_specs = [
        pl.BlockSpec((1, l_in, c_in_p), lambda i: (i, 0, 0)),
        pl.BlockSpec((3, c_in_p, c2_p), lambda i: (0, 0, 0)),
        pl.BlockSpec((1, c2_p, c3_p), lambda i: (0, 0, 0)),
        pl.BlockSpec((1, c3_p), lambda i: (0, 0)),
        pl.BlockSpec((3, c3_p, c_out_p), lambda i: (0, 0, 0)),
    ]
    args = [x, w1, w2, b2, w3]
    weight_bytes = 2 * (w1.size + w2.size + w3.size) + 4 * b2.size
    flops = 2 * l_out * (3 * c_in_p * c2_p + c2_p * c3_p + 3 * c3_p * c_out_p)
    trans = l_out * (c2_p + c3_p + c_out_p)
    if has_down:
        wd = blk["downsample"]["w"]
        in_specs.append(pl.BlockSpec((1, c_in_p, c_out_p), lambda i: (0, 0, 0)))
        args.append(wd)
        weight_bytes += 2 * wd.size
        flops += 2 * l_out * c_in_p * c_out_p
        trans += l_out * c_out_p

    cost = pl.CostEstimate(
        flops=n * flops,
        transcendentals=n * trans,
        bytes_accessed=4 * (x.size + n * l_out * c_out_p) + weight_bytes)

    return pl.pallas_call(
        functools.partial(_block_kernel, stride=stride, l_in=l_in,
                          l_out=l_out, has_down=has_down),
        out_shape=jax.ShapeDtypeStruct((n, l_out, c_out_p), jnp.float32),
        grid=(n,),
        in_specs=in_specs,
        out_specs=pl.BlockSpec((1, l_out, c_out_p), lambda i: (i, 0, 0)),
        scratch_shapes=[pltpu.VMEM((l_in + 2, c_in_p), jnp.float32),   # padded x
                        pltpu.VMEM((l_out, c2_p), jnp.bfloat16),       # conv1 out
                        pltpu.VMEM((l_out + 2, c3_p), jnp.bfloat16)],  # padded conv2 out
        compiler_params=pltpu.CompilerParams(dimension_semantics=("parallel",)),
        cost_estimate=cost,
    )(*args)


def head(x, fc, *, num_features):
    """Fused global avg*max pool -> LayerNorm -> Linear -> Sigmoid."""
    n, l, c_p = x.shape
    classes = fc["w"].shape[1]
    return pl.pallas_call(
        functools.partial(_head_kernel, f_true=num_features),
        out_shape=jax.ShapeDtypeStruct((n, classes), jnp.float32),
        grid=(1,),
        in_specs=[pl.BlockSpec((n, l, c_p), lambda i: (0, 0, 0)),
                  pl.BlockSpec((1, c_p), lambda i: (0, 0)),
                  pl.BlockSpec((1, c_p), lambda i: (0, 0)),
                  pl.BlockSpec((c_p, classes), lambda i: (0, 0)),
                  pl.BlockSpec((1, classes), lambda i: (0, 0))],
        out_specs=pl.BlockSpec((n, classes), lambda i: (0, 0)),
    )(x, fc["gamma"], fc["beta"], fc["w"], fc["b"])


# -----------------------------------------------------------------------------
# Parameter initialization (synthetic, deterministic; stored channel-padded)
# -----------------------------------------------------------------------------
def _init_conv(key, c_in, c_out, ksize, with_bias, *, pad_in=True,
               w_dtype=jnp.bfloat16):
    """Conv1d weights stored (K, C_in_p, C_out_p); zero-padded to 128 lanes."""
    wk, bk = jax.random.split(key)
    fan_in = c_in * ksize
    c_in_p = _rup(c_in) if pad_in else c_in
    c_out_p = _rup(c_out)
    w = jax.random.normal(wk, (ksize, c_in, c_out), jnp.float32) / math.sqrt(fan_in)
    w = jnp.pad(w, ((0, 0), (0, c_in_p - c_in), (0, c_out_p - c_out))).astype(w_dtype)
    params = {"w": w}
    if with_bias:
        b = jax.random.normal(bk, (1, c_out), jnp.float32) / math.sqrt(fan_in)
        params["b"] = jnp.pad(b, ((0, 0), (0, c_out_p - c_out)))
    return params


def _init_block(key, c_in, c_out, stride):
    k1, k2, k3, k4 = jax.random.split(key, 4)
    blk = {
        "conv1": _init_conv(k1, c_in, 2 * c_out, 3, with_bias=False),
        "conv2": _init_conv(k2, 2 * c_out, 3 * c_out, 1, with_bias=True),
        "conv3": _init_conv(k3, 3 * c_out, c_out, 3, with_bias=False),
    }
    if stride != 1 or c_in != c_out:                      # downsample branch
        blk["downsample"] = _init_conv(k4, c_in, c_out, 1, with_bias=False)
    return blk


def init_resnet1d(key, classes, *, layers=10, input_channels=INPUT_CHANNELS,
                  channel_step=100, blocks=3):
    keys = jax.random.split(key, layers + 2)
    params = {"stem": _init_conv(keys[0], 1, input_channels, 7, with_bias=False,
                                 pad_in=False, w_dtype=jnp.float32)}
    layer_params = []
    start, end = input_channels, input_channels + channel_step
    for li in range(layers):
        stride = 1 if li == 0 else 2
        bkeys = jax.random.split(keys[1 + li], blocks)
        blist = [_init_block(bkeys[0], start, end, stride)]
        for bi in range(1, blocks):
            blist.append(_init_block(bkeys[bi], end, end, 1))
        layer_params.append(blist)
        start, end = end, end + channel_step
    params["layers"] = layer_params

    features = start
    f_p = _rup(features)
    wk, bk = jax.random.split(keys[-1])
    w = jax.random.normal(wk, (features, classes), jnp.float32) / math.sqrt(features)
    params["fc"] = {
        "gamma": jnp.pad(jnp.ones((1, features), jnp.float32),
                         ((0, 0), (0, f_p - features))),      # LayerNorm weight
        "beta": jnp.zeros((1, f_p), jnp.float32),              # LayerNorm bias
        "w": jnp.pad(w, ((0, f_p - features), (0, 0))),        # Linear (F_p, classes)
        "b": jax.random.normal(bk, (1, classes), jnp.float32) * 0.01,
    }
    return params, features


# -----------------------------------------------------------------------------
# Forward pass (mirrors ResNet1D.forward / BasicBlock1D.forward)
# -----------------------------------------------------------------------------
def resnet1d_forward(params, x, *, num_features):
    # x arrives in PyTorch NCL layout (N, 1, L) -> internal NLC (N, L, 1)
    x = jnp.transpose(x, (0, 2, 1)).astype(jnp.float32)
    x = stem_conv(x, params["stem"]["w"])                  # Conv(1,C,7,s=3,p=3)+ELU
    for li, layer in enumerate(params["layers"]):
        layer_stride = 1 if li == 0 else 2
        for bi, blk in enumerate(layer):
            x = basic_block(x, blk, stride=layer_stride if bi == 0 else 1)
    return head(x, params["fc"], num_features=num_features)


# -----------------------------------------------------------------------------
if __name__ == "__main__":
    key = jax.random.PRNGKey(0)
    pkey, xkey = jax.random.split(key)

    # Scaled-down instance of the same architecture for a fast demo.
    # (Reference model: layers=10, channel_step=100, blocks=3 -> 1006 features.)
    classes = 3
    params, num_features = init_resnet1d(pkey, classes, layers=3,
                                         channel_step=16, blocks=3)

    # Input matches the PyTorch module: (batch, 1, length)
    x = jax.random.normal(xkey, (2, 1, 96), jnp.float32)

    fwd = jax.jit(functools.partial(resnet1d_forward, num_features=num_features))
    out = fwd(params, x)
    jax.block_until_ready(out)

    assert out.shape == (2, classes)
    assert bool(jnp.all(jnp.isfinite(out)))
    assert bool(jnp.all((out >= 0.0) & (out <= 1.0)))      # sigmoid output range
    print("KERNEL_OK")
</pallas_src>

<mosaic_0001>
module attributes {stable_mosaic.version = 11 : i64} {
  func.func @_stem_kernel(%arg0: i32, %arg1: memref<1x96x1xf32, #tpu.memory_space<vmem>>, %arg2: memref<7x1x128xf32, #tpu.memory_space<vmem>>, %arg3: memref<1x32x128xf32, #tpu.memory_space<vmem>>, %arg4: memref<102x1xf32, #tpu.memory_space<vmem>>) attributes {dimension_semantics = [#tpu.dimension_semantics<parallel>], iteration_bounds = array<i64: 2>, scalar_prefetch = 0 : i64, scratch_operands = 1 : i64, tpu.core_type = #tpu.core_type<tc>, window_params = [{transform_indices = @transform_0, window_bounds = array<i64: 1, 96, 1>}, {pipeline_mode = #tpu.pipeline_mode<synchronous>, transform_indices = @transform_1, window_bounds = array<i64: 7, 1, 128>}, {transform_indices = @transform_2, window_bounds = array<i64: 1, 32, 128>}]} {
    %cst = arith.constant 0.000000e+00 : f32
    %0 = vector.broadcast %cst : f32 to vector<3x1xf32>
    %c0 = arith.constant 0 : index
    %c0_0 = arith.constant 0 : index
    %1 = vector.load %arg4[%c0, %c0_0] : memref<102x1xf32, #tpu.memory_space<vmem>>, vector<3x1xf32>
    tpu.vector_store %arg4[%c0, %c0_0], %0 {strides = array<i32>} : memref<102x1xf32, #tpu.memory_space<vmem>>, vector<3x1xf32>,
    %c99 = arith.constant 99 : index
    %c0_1 = arith.constant 0 : index
    %2 = vector.load %arg4[%c99, %c0_1] : memref<102x1xf32, #tpu.memory_space<vmem>>, vector<3x1xf32>
    tpu.vector_store %arg4[%c99, %c0_1], %0 {strides = array<i32>} : memref<102x1xf32, #tpu.memory_space<vmem>>, vector<3x1xf32>,
    %c0_2 = arith.constant 0 : index
    %c0_3 = arith.constant 0 : index
    %c0_4 = arith.constant 0 : index
    %3 = vector.load %arg1[%c0_2, %c0_3, %c0_4] : memref<1x96x1xf32, #tpu.memory_space<vmem>>, vector<1x96x1xf32>
    %4 = vector.shape_cast %3 : vector<1x96x1xf32> to vector<96x1xf32>
    %c3 = arith.constant 3 : index
    %c0_5 = arith.constant 0 : index
    %5 = vector.load %arg4[%c3, %c0_5] : memref<102x1xf32, #tpu.memory_space<vmem>>, vector<96x1xf32>
    tpu.vector_store %arg4[%c3, %c0_5], %4 {strides = array<i32>} : memref<102x1xf32, #tpu.memory_space<vmem>>, vector<96x1xf32>,
    %cst_6 = arith.constant 0.000000e+00 : f32
    %6 = vector.broadcast %cst_6 : f32 to vector<32x128xf32>
    %c0_7 = arith.constant 0 : index
    %c0_8 = arith.constant 0 : index
    %7 = tpu.strided_load %arg4[%c0_7, %c0_8] {strides = array<i32: 3, 1>} : memref<102x1xf32, #tpu.memory_space<vmem>>, vector<32x1xf32>
    %c0_9 = arith.constant 0 : index
    %c0_10 = arith.constant 0 : index
    %c0_11 = arith.constant 0 : index
    %8 = vector.load %arg2[%c0_9, %c0_10, %c0_11] : memref<7x1x128xf32, #tpu.memory_space<vmem>>, vector<1x1x128xf32>
    %9 = vector.shape_cast %8 : vector<1x1x128xf32> to vector<1x128xf32>
    %10 = vector.broadcast %7 : vector<32x1xf32> to vector<32x128xf32>
    %11 = vector.broadcast %9 : vector<1x128xf32> to vector<32x128xf32>
    %12 = arith.mulf %10, %11 : vector<32x128xf32>
    %13 = arith.addf %6, %12 : vector<32x128xf32>
    %c1 = arith.constant 1 : index
    %c0_12 = arith.constant 0 : index
    %14 = tpu.strided_load %arg4[%c1, %c0_12] {strides = array<i32: 3, 1>} : memref<102x1xf32, #tpu.memory_space<vmem>>, vector<32x1xf32>
    %c1_13 = arith.constant 1 : index
    %c0_14 = arith.constant 0 : index
    %c0_15 = arith.constant 0 : index
    %15 = vector.load %arg2[%c1_13, %c0_14, %c0_15] : memref<7x1x128xf32, #tpu.memory_space<vmem>>, vector<1x1x128xf32>
    %16 = vector.shape_cast %15 : vector<1x1x128xf32> to vector<1x128xf32>
    %17 = vector.broadcast %14 : vector<32x1xf32> to vector<32x128xf32>
    %18 = vector.broadcast %16 : vector<1x128xf32> to vector<32x128xf32>
    %19 = arith.mulf %17, %18 : vector<32x128xf32>
    %20 = arith.addf %13, %19 : vector<32x128xf32>
    %c2 = arith.constant 2 : index
    %c0_16 = arith.constant 0 : index
    %21 = tpu.strided_load %arg4[%c2, %c0_16] {strides = array<i32: 3, 1>} : memref<102x1xf32, #tpu.memory_space<vmem>>, vector<32x1xf32>
    %c2_17 = arith.constant 2 : index
    %c0_18 = arith.constant 0 : index
    %c0_19 = arith.constant 0 : index
    %22 = vector.load %arg2[%c2_17, %c0_18, %c0_19] : memref<7x1x128xf32, #tpu.memory_space<vmem>>, vector<1x1x128xf32>
    %23 = vector.shape_cast %22 : vector<1x1x128xf32> to vector<1x128xf32>
    %24 = vector.broadcast %21 : vector<32x1xf32> to vector<32x128xf32>
    %25 = vector.broadcast %23 : vector<1x128xf32> to vector<32x128xf32>
    %26 = arith.mulf %24, %25 : vector<32x128xf32>
    %27 = arith.addf %20, %26 : vector<32x128xf32>
    %c3_20 = arith.constant 3 : index
    %c0_21 = arith.constant 0 : index
    %28 = tpu.strided_load %arg4[%c3_20, %c0_21] {strides = array<i32: 3, 1>} : memref<102x1xf32, #tpu.memory_space<vmem>>, vector<32x1xf32>
    %c3_22 = arith.constant 3 : index
    %c0_23 = arith.constant 0 : index
    %c0_24 = arith.constant 0 : index
    %29 = vector.load %arg2[%c3_22, %c0_23, %c0_24] : memref<7x1x128xf32, #tpu.memory_space<vmem>>, vector<1x1x128xf32>
    %30 = vector.shape_cast %29 : vector<1x1x128xf32> to vector<1x128xf32>
    %31 = vector.broadcast %28 : vector<32x1xf32> to vector<32x128xf32>
    %32 = vector.broadcast %30 : vector<1x128xf32> to vector<32x128xf32>
    %33 = arith.mulf %31, %32 : vector<32x128xf32>
    %34 = arith.addf %27, %33 : vector<32x128xf32>
    %c4 = arith.constant 4 : index
    %c0_25 = arith.constant 0 : index
    %35 = tpu.strided_load %arg4[%c4, %c0_25] {strides = array<i32: 3, 1>} : memref<102x1xf32, #tpu.memory_space<vmem>>, vector<32x1xf32>
    %c4_26 = arith.constant 4 : index
    %c0_27 = arith.constant 0 : index
    %c0_28 = arith.constant 0 : index
    %36 = vector.load %arg2[%c4_26, %c0_27, %c0_28] : memref<7x1x128xf32, #tpu.memory_space<vmem>>, vector<1x1x128xf32>
    %37 = vector.shape_cast %36 : vector<1x1x128xf32> to vector<1x128xf32>
    %38 = vector.broadcast %35 : vector<32x1xf32> to vector<32x128xf32>
    %39 = vector.broadcast %37 : vector<1x128xf32> to vector<32x128xf32>
    %40 = arith.mulf %38, %39 : vector<32x128xf32>
    %41 = arith.addf %34, %40 : vector<32x128xf32>
    %c5 = arith.constant 5 : index
    %c0_29 = arith.constant 0 : index
    %42 = tpu.strided_load %arg4[%c5, %c0_29] {strides = array<i32: 3, 1>} : memref<102x1xf32, #tpu.memory_space<vmem>>, vector<32x1xf32>
    %c5_30 = arith.constant 5 : index
    %c0_31 = arith.constant 0 : index
    %c0_32 = arith.constant 0 : index
    %43 = vector.load %arg2[%c5_30, %c0_31, %c0_32] : memref<7x1x128xf32, #tpu.memory_space<vmem>>, vector<1x1x128xf32>
    %44 = vector.shape_cast %43 : vector<1x1x128xf32> to vector<1x128xf32>
    %45 = vector.broadcast %42 : vector<32x1xf32> to vector<32x128xf32>
    %46 = vector.broadcast %44 : vector<1x128xf32> to vector<32x128xf32>
    %47 = arith.mulf %45, %46 : vector<32x128xf32>
    %48 = arith.addf %41, %47 : vector<32x128xf32>
    %c6 = arith.constant 6 : index
    %c0_33 = arith.constant 0 : index
    %49 = tpu.strided_load %arg4[%c6, %c0_33] {strides = array<i32: 3, 1>} : memref<102x1xf32, #tpu.memory_space<vmem>>, vector<32x1xf32>
    %c6_34 = arith.constant 6 : index
    %c0_35 = arith.constant 0 : index
    %c0_36 = arith.constant 0 : index
    %50 = vector.load %arg2[%c6_34, %c0_35, %c0_36] : memref<7x1x128xf32, #tpu.memory_space<vmem>>, vector<1x1x128xf32>
    %51 = vector.shape_cast %50 : vector<1x1x128xf32> to vector<1x128xf32>
    %52 = vector.broadcast %49 : vector<32x1xf32> to vector<32x128xf32>
    %53 = vector.broadcast %51 : vector<1x128xf32> to vector<32x128xf32>
    %54 = arith.mulf %52, %53 : vector<32x128xf32>
    %55 = arith.addf %48, %54 : vector<32x128xf32>
    %cst_37 = arith.constant 0.000000e+00 : f32
    %56 = vector.broadcast %cst_37 : f32 to vector<32x128xf32>
    %57 = arith.cmpf ogt, %55, %56 : vector<32x128xf32>
    %cst_38 = arith.constant 0.000000e+00 : f32
    %58 = vector.broadcast %cst_38 : f32 to vector<32x128xf32>
    %59 = arith.minimumf %55, %58 : vector<32x128xf32>
    %60 = math.exp %59 : vector<32x128xf32>
    %cst_39 = arith.constant 1.000000e+00 : f32
    %61 = vector.broadcast %cst_39 : f32 to vector<32x128xf32>
    %62 = arith.subf %60, %61 : vector<32x128xf32>
    %63 = arith.select %57, %55, %62 : vector<32x128xi1>, vector<32x128xf32>
    %c0_40 = arith.constant 0 : index
    %c0_41 = arith.constant 0 : index
    %c0_42 = arith.constant 0 : index
    %64 = vector.load %arg3[%c0_40, %c0_41, %c0_42] : memref<1x32x128xf32, #tpu.memory_space<vmem>>, vector<1x32x128xf32>
    %65 = vector.shape_cast %64 : vector<1x32x128xf32> to vector<32x128xf32>
    %66 = vector.shape_cast %63 : vector<32x128xf32> to vector<1x32x128xf32>
    tpu.vector_store %arg3[%c0_40, %c0_41, %c0_42], %66 {strides = array<i32>} : memref<1x32x128xf32, #tpu.memory_space<vmem>>, vector<1x32x128xf32>,
    return
  }
  func.func @transform_0(%arg0: i32) -> (i32, i32, i32) {
    %c0_i32 = arith.constant 0 : i32
    %c0_i32_0 = arith.constant 0 : i32
    %c0_i32_1 = arith.constant 0 : i32
    return %arg0, %c0_i32, %c0_i32_0 : i32, i32, i32
  }
  func.func @transform_1(%arg0: i32) -> (i32, i32, i32) {
    %c0_i32 = arith.constant 0 : i32
    %c0_i32_0 = arith.constant 0 : i32
    %c0_i32_1 = arith.constant 0 : i32
    %c0_i32_2 = arith.constant 0 : i32
    return %c0_i32, %c0_i32_0, %c0_i32_1 : i32, i32, i32
  }
  func.func @transform_2(%arg0: i32) -> (i32, i32, i32) {
    %c0_i32 = arith.constant 0 : i32
    %c0_i32_0 = arith.constant 0 : i32
    %c0_i32_1 = arith.constant 0 : i32
    return %arg0, %c0_i32, %c0_i32_0 : i32, i32, i32
  }
}

module attributes {stable_mosaic.version = 11 : i64} {
  func.func @_block_kernel(%arg0: i32, %arg1: memref<1x32x128xf32, #tpu.memory_space<vmem>>, %arg2: memref<3x128x128xbf16, #tpu.memory_space<vmem>>, %arg3: memref<1x128x128xbf16, #tpu.memory_space<vmem>>, %arg4: memref<1x128xf32, #tpu.memory_space<vmem>>, %arg5: memref<3x128x128xbf16, #tpu.memory_space<vmem>>, %arg6: memref<1x128x128xbf16, #tpu.memory_space<vmem>>, %arg7: memref<1x32x128xf32, #tpu.memory_space<vmem>>, %arg8: memref<34x128xf32, #tpu.memory_space<vmem>>, %arg9: memref<32x128xbf16, #tpu.memory_space<vmem>>, %arg10: memref<34x128xbf16, #tpu.memory_space<vmem>>) attributes {dimension_semantics = [#tpu.dimension_semantics<parallel>], iteration_bounds = array<i64: 2>, scalar_prefetch = 0 : i64, scratch_operands = 3 : i64, tpu.core_type = #tpu.core_type<tc>, window_params = [{transform_indices = @transform_0, window_bounds = array<i64: 1, 32, 128>}, {pipeline_mode = #tpu.pipeline_mode<synchronous>, transform_indices = @transform_1, window_bounds = array<i64: 3, 128, 128>}, {pipeline_mode = #tpu.pipeline_mode<synchronous>, transform_indices = @transform_2, window_bounds = array<i64: 1, 128, 128>}, {pipeline_mode = #tpu.pipeline_mode<synchronous>, transform_indices = @transform_3, window_bounds = array<i64: 1, 128>}, {pipeline_mode = #tpu.pipeline_mode<synchronous>, transform_indices = @transform_4, window_bounds = array<i64: 3, 128, 128>}, {pipeline_mode = #tpu.pipeline_mode<synchronous>, transform_indices = @transform_5, window_bounds = array<i64: 1, 128, 128>}, {transform_indices = @transform_6, window_bounds = array<i64: 1, 32, 128>}]} {
    %cst = arith.constant 0.000000e+00 : f32
    %0 = vector.broadcast %cst : f32 to vector<1x128xf32>
    %c0 = arith.constant 0 : index
    %c0_0 = arith.constant 0 : index
    %1 = vector.load %arg8[%c0, %c0_0] : memref<34x128xf32, #tpu.memory_space<vmem>>, vector<1x128xf32>
    tpu.vector_store %arg8[%c0, %c0_0], %0 {strides = array<i32>} : memref<34x128xf32, #tpu.memory_space<vmem>>, vector<1x128xf32>,
    %c33 = arith.constant 33 : index
    %c0_1 = arith.constant 0 : index
    %2 = vector.load %arg8[%c33, %c0_1] : memref<34x128xf32, #tpu.memory_space<vmem>>, vector<1x128xf32>
    tpu.vector_store %arg8[%c33, %c0_1], %0 {strides = array<i32>} : memref<34x128xf32, #tpu.memory_space<vmem>>, vector<1x128xf32>,
    %c0_2 = arith.constant 0 : index
    %c0_3 = arith.constant 0 : index
    %c0_4 = arith.constant 0 : index
    %3 = vector.load %arg1[%c0_2, %c0_3, %c0_4] : memref<1x32x128xf32, #tpu.memory_space<vmem>>, vector<1x32x128xf32>
    %4 = vector.shape_cast %3 : vector<1x32x128xf32> to vector<32x128xf32>
    %c1 = arith.constant 1 : index
    %c0_5 = arith.constant 0 : index
    %5 = vector.load %arg8[%c1, %c0_5] : memref<34x128xf32, #tpu.memory_space<vmem>>, vector<32x128xf32>
    tpu.vector_store %arg8[%c1, %c0_5], %4 {strides = array<i32>} : memref<34x128xf32, #tpu.memory_space<vmem>>, vector<32x128xf32>,
    %cst_6 = arith.constant 0.000000e+00 : f32
    %6 = vector.broadcast %cst_6 : f32 to vector<32x128xf32>
    %c0_7 = arith.constant 0 : index
    %c0_8 = arith.constant 0 : index
    %7 = vector.load %arg8[%c0_7, %c0_8] : memref<34x128xf32, #tpu.memory_space<vmem>>, vector<32x128xf32>
    %8 = arith.truncf %7 : vector<32x128xf32> to vector<32x128xbf16>
    %c0_9 = arith.constant 0 : index
    %c0_10 = arith.constant 0 : index
    %c0_11 = arith.constant 0 : index
    %9 = vector.load %arg2[%c0_9, %c0_10, %c0_11] : memref<3x128x128xbf16, #tpu.memory_space<vmem>>, vector<1x128x128xbf16>
    %10 = vector.shape_cast %9 : vector<1x128x128xbf16> to vector<128x128xbf16>
    %cst_12 = arith.constant dense<0.000000e+00> : vector<32x128xf32>
    %11 = tpu.matmul %8, %10, %cst_12 {dimension_numbers = #tpu.dot_dimension_numbers<[1], [0], [0], [1], [0, 0, 1, 1], [], []>} : vector<32x128xbf16>, vector<128x128xbf16>, vector<32x128xf32> -> vector<32x128xf32>
    %12 = arith.addf %6, %11 : vector<32x128xf32>
    %c1_13 = arith.constant 1 : index
    %c0_14 = arith.constant 0 : index
    %13 = vector.load %arg8[%c1_13, %c0_14] : memref<34x128xf32, #tpu.memory_space<vmem>>, vector<32x128xf32>
    %14 = arith.truncf %13 : vector<32x128xf32> to vector<32x128xbf16>
    %c1_15 = arith.constant 1 : index
    %c0_16 = arith.constant 0 : index
    %c0_17 = arith.constant 0 : index
    %15 = vector.load %arg2[%c1_15, %c0_16, %c0_17] : memref<3x128x128xbf16, #tpu.memory_space<vmem>>, vector<1x128x128xbf16>
    %16 = vector.shape_cast %15 : vector<1x128x128xbf16> to vector<128x128xbf16>
    %cst_18 = arith.constant dense<0.000000e+00> : vector<32x128xf32>
    %17 = tpu.matmul %14, %16, %cst_18 {dimension_numbers = #tpu.dot_dimension_numbers<[1], [0], [0], [1], [0, 0, 1, 1], [], []>} : vector<32x128xbf16>, vector<128x128xbf16>, vector<32x128xf32> -> vector<32x128xf32>
    %18 = arith.addf %12, %17 : vector<32x128xf32>
    %c2 = arith.constant 2 : index
    %c0_19 = arith.constant 0 : index
    %19 = vector.load %arg8[%c2, %c0_19] : memref<34x128xf32, #tpu.memory_space<vmem>>, vector<32x128xf32>
    %20 = arith.truncf %19 : vector<32x128xf32> to vector<32x128xbf16>
    %c2_20 = arith.constant 2 : index
    %c0_21 = arith.constant 0 : index
    %c0_22 = arith.constant 0 : index
    %21 = vector.load %arg2[%c2_20, %c0_21, %c0_22] : memref<3x128x128xbf16, #tpu.memory_space<vmem>>, vector<1x128x128xbf16>
    %22 = vector.shape_cast %21 : vector<1x128x128xbf16> to vector<128x128xbf16>
    %cst_23 = arith.constant dense<0.000000e+00> : vector<32x128xf32>
    %23 = tpu.matmul %20, %22, %cst_23 {dimension_numbers = #tpu.dot_dimension_numbers<[1], [0], [0], [1], [0, 0, 1, 1], [], []>} : vector<32x128xbf16>, vector<128x128xbf16>, vector<32x128xf32> -> vector<32x128xf32>
    %24 = arith.addf %18, %23 : vector<32x128xf32>
    %cst_24 = arith.constant 0.000000e+00 : f32
    %25 = vector.broadcast %cst_24 : f32 to vector<32x128xf32>
    %26 = arith.cmpf ogt, %24, %25 : vector<32x128xf32>
    %cst_25 = arith.constant 0.000000e+00 : f32
    %27 = vector.broadcast %cst_25 : f32 to vector<32x128xf32>
    %28 = arith.minimumf %24, %27 : vector<32x128xf32>
    %29 = math.exp %28 : vector<32x128xf32>
    %cst_26 = arith.constant 1.000000e+00 : f32
    %30 = vector.broadcast %cst_26 : f32 to vector<32x128xf32>
    %31 = arith.subf %29, %30 : vector<32x128xf32>
    %32 = arith.select %26, %24, %31 : vector<32x128xi1>, vector<32x128xf32>
    %33 = arith.truncf %32 : vector<32x128xf32> to vector<32x128xbf16>
    %c0_27 = arith.constant 0 : index
    %c0_28 = arith.constant 0 : index
    %34 = vector.load %arg9[%c0_27, %c0_28] : memref<32x128xbf16, #tpu.memory_space<vmem>>, vector<32x128xbf16>
    tpu.vector_store %arg9[%c0_27, %c0_28], %33 {strides = array<i32>} : memref<32x128xbf16, #tpu.memory_space<vmem>>, vector<32x128xbf16>,
    %c0_29 = arith.constant 0 : index
    %c0_30 = arith.constant 0 : index
    %35 = vector.load %arg9[%c0_29, %c0_30] : memref<32x128xbf16, #tpu.memory_space<vmem>>, vector<32x128xbf16>
    %c0_31 = arith.constant 0 : index
    %c0_32 = arith.constant 0 : index
    %c0_33 = arith.constant 0 : index
    %36 = vector.load %arg3[%c0_31, %c0_32, %c0_33] : memref<1x128x128xbf16, #tpu.memory_space<vmem>>, vector<1x128x128xbf16>
    %37 = vector.shape_cast %36 : vector<1x128x128xbf16> to vector<128x128xbf16>
    %cst_34 = arith.constant dense<0.000000e+00> : vector<32x128xf32>
    %38 = tpu.matmul %35, %37, %cst_34 {dimension_numbers = #tpu.dot_dimension_numbers<[1], [0], [0], [1], [0, 0, 1, 1], [], []>} : vector<32x128xbf16>, vector<128x128xbf16>, vector<32x128xf32> -> vector<32x128xf32>
    %c0_35 = arith.constant 0 : index
    %c0_36 = arith.constant 0 : index
    %39 = vector.load %arg4[%c0_35, %c0_36] : memref<1x128xf32, #tpu.memory_space<vmem>>, vector<1x128xf32>
    %40 = vector.broadcast %39 : vector<1x128xf32> to vector<32x128xf32>
    %41 = arith.addf %38, %40 : vector<32x128xf32>
    %cst_37 = arith.constant 0.000000e+00 : bf16
    %42 = vector.broadcast %cst_37 : bf16 to vector<1x128xbf16>
    %c0_38 = arith.constant 0 : index
    %c0_39 = arith.constant 0 : index
    %43 = vector.load %arg10[%c0_38, %c0_39] : memref<34x128xbf16, #tpu.memory_space<vmem>>, vector<1x128xbf16>
    tpu.vector_store %arg10[%c0_38, %c0_39], %42 {strides = array<i32>} : memref<34x128xbf16, #tpu.memory_space<vmem>>, vector<1x128xbf16>,
    %c33_40 = arith.constant 33 : index
    %c0_41 = arith.constant 0 : index
    %44 = vector.load %arg10[%c33_40, %c0_41] : memref<34x128xbf16, #tpu.memory_space<vmem>>, vector<1x128xbf16>
    tpu.vector_store %arg10[%c33_40, %c0_41], %42 {strides = array<i32>} : memref<34x128xbf16, #tpu.memory_space<vmem>>, vector<1x128xbf16>,
    %cst_42 = arith.constant 0.000000e+00 : f32
    %45 = vector.broadcast %cst_42 : f32 to vector<32x128xf32>
    %46 = arith.cmpf ogt, %41, %45 : vector<32x128xf32>
    %cst_43 = arith.constant 0.000000e+00 : f32
    %47 = vector.broadcast %cst_43 : f32 to vector<32x128xf32>
    %48 = arith.minimumf %41, %47 : vector<32x128xf32>
    %49 = math.exp %48 : vector<32x128xf32>
    %cst_44 = arith.constant 1.000000e+00 : f32
    %50 = vector.broadcast %cst_44 : f32 to vector<32x128xf32>
    %51 = arith.subf %49, %50 : vector<32x128xf32>
    %52 = arith.select %46, %41, %51 : vector<32x128xi1>, vector<32x128xf32>
    %53 = arith.truncf %52 : vector<32x128xf32> to vector<32x128xbf16>
    %c1_45 = arith.constant 1 : index
    %c0_46 = arith.constant 0 : index
    %54 = vector.load %arg10[%c1_45, %c0_46] : memref<34x128xbf16, #tpu.memory_space<vmem>>, vector<32x128xbf16>
    tpu.vector_store %arg10[%c1_45, %c0_46], %53 {strides = array<i32>} : memref<34x128xbf16, #tpu.memory_space<vmem>>, vector<32x128xbf16>,
    %cst_47 = arith.constant 0.000000e+00 : f32
    %55 = vector.broadcast %cst_47 : f32 to vector<32x128xf32>
    %c0_48 = arith.constant 0 : index
    %c0_49 = arith.constant 0 : index
    %56 = vector.load %arg10[%c0_48, %c0_49] : memref<34x128xbf16, #tpu.memory_space<vmem>>, vector<32x128xbf16>
    %c0_50 = arith.constant 0 : index
    %c0_51 = arith.constant 0 : index
    %c0_52 = arith.constant 0 : index
    %57 = vector.load %arg5[%c0_50, %c0_51, %c0_52] : memref<3x128x128xbf16, #tpu.memory_space<vmem>>, vector<1x128x128xbf16>
    %58 = vector.shape_cast %57 : vector<1x128x128xbf16> to vector<128x128xbf16>
    %cst_53 = arith.constant dense<0.000000e+00> : vector<32x128xf32>
    %59 = tpu.matmul %56, %58, %cst_53 {dimension_numbers = #tpu.dot_dimension_numbers<[1], [0], [0], [1], [0, 0, 1, 1], [], []>} : vector<32x128xbf16>, vector<128x128xbf16>, vector<32x128xf32> -> vector<32x128xf32>
    %60 = arith.addf %55, %59 : vector<32x128xf32>
    %c1_54 = arith.constant 1 : index
    %c0_55 = arith.constant 0 : index
    %61 = vector.load %arg10[%c1_54, %c0_55] : memref<34x128xbf16, #tpu.memory_space<vmem>>, vector<32x128xbf16>
    %c1_56 = arith.constant 1 : index
    %c0_57 = arith.constant 0 : index
    %c0_58 = arith.constant 0 : index
    %62 = vector.load %arg5[%c1_56, %c0_57, %c0_58] : memref<3x128x128xbf16, #tpu.memory_space<vmem>>, vector<1x128x128xbf16>
    %63 = vector.shape_cast %62 : vector<1x128x128xbf16> to vector<128x128xbf16>
    %cst_59 = arith.constant dense<0.000000e+00> : vector<32x128xf32>
    %64 = tpu.matmul %61, %63, %cst_59 {dimension_numbers = #tpu.dot_dimension_numbers<[1], [0], [0], [1], [0, 0, 1, 1], [], []>} : vector<32x128xbf16>, vector<128x128xbf16>, vector<32x128xf32> -> vector<32x128xf32>
    %65 = arith.addf %60, %64 : vector<32x128xf32>
    %c2_60 = arith.constant 2 : index
    %c0_61 = arith.constant 0 : index
    %66 = vector.load %arg10[%c2_60, %c0_61] : memref<34x128xbf16, #tpu.memory_space<vmem>>, vector<32x128xbf16>
    %c2_62 = arith.constant 2 : index
    %c0_63 = arith.constant 0 : index
    %c0_64 = arith.constant 0 : index
    %67 = vector.load %arg5[%c2_62, %c0_63, %c0_64] : memref<3x128x128xbf16, #tpu.memory_space<vmem>>, vector<1x128x128xbf16>
    %68 = vector.shape_cast %67 : vector<1x128x128xbf16> to vector<128x128xbf16>
    %cst_65 = arith.constant dense<0.000000e+00> : vector<32x128xf32>
    %69 = tpu.matmul %66, %68, %cst_65 {dimension_numbers = #tpu.dot_dimension_numbers<[1], [0], [0], [1], [0, 0, 1, 1], [], []>} : vector<32x128xbf16>, vector<128x128xbf16>, vector<32x128xf32> -> vector<32x128xf32>
    %70 = arith.addf %65, %69 : vector<32x128xf32>
    %cst_66 = arith.constant 0.000000e+00 : f32
    %71 = vector.broadcast %cst_66 : f32 to vector<32x128xf32>
    %72 = arith.cmpf ogt, %70, %71 : vector<32x128xf32>
    %cst_67 = arith.constant 0.000000e+00 : f32
    %73 = vector.broadcast %cst_67 : f32 to vector<32x128xf32>
    %74 = arith.minimumf %70, %73 : vector<32x128xf32>
    %75 = math.exp %74 : vector<32x128xf32>
    %cst_68 = arith.constant 1.000000e+00 : f32
    %76 = vector.broadcast %cst_68 : f32 to vector<32x128xf32>
    %77 = arith.subf %75, %76 : vector<32x128xf32>
    %78 = arith.select %72, %70, %77 : vector<32x128xi1>, vector<32x128xf32>
    %c1_69 = arith.constant 1 : index
    %c0_70 = arith.constant 0 : index
    %79 = vector.load %arg8[%c1_69, %c0_70] : memref<34x128xf32, #tpu.memory_space<vmem>>, vector<32x128xf32>
    %80 = arith.truncf %79 : vector<32x128xf32> to vector<32x128xbf16>
    %c0_71 = arith.constant 0 : index
    %c0_72 = arith.constant 0 : index
    %c0_73 = arith.constant 0 : index
    %81 = vector.load %arg6[%c0_71, %c0_72, %c0_73] : memref<1x128x128xbf16, #tpu.memory_space<vmem>>, vector<1x128x128xbf16>
    %82 = vector.shape_cast %81 : vector<1x128x128xbf16> to vector<128x128xbf16>
    %cst_74 = arith.constant dense<0.000000e+00> : vector<32x128xf32>
    %83 = tpu.matmul %80, %82, %cst_74 {dimension_numbers = #tpu.dot_dimension_numbers<[1], [0], [0], [1], [0, 0, 1, 1], [], []>} : vector<32x128xbf16>, vector<128x128xbf16>, vector<32x128xf32> -> vector<32x128xf32>
    %cst_75 = arith.constant 0.000000e+00 : f32
    %84 = vector.broadcast %cst_75 : f32 to vector<32x128xf32>
    %85 = arith.cmpf ogt, %83, %84 : vector<32x128xf32>
    %cst_76 = arith.constant 0.000000e+00 : f32
    %86 = vector.broadcast %cst_76 : f32 to vector<32x128xf32>
    %87 = arith.minimumf %83, %86 : vector<32x128xf32>
    %88 = math.exp %87 : vector<32x128xf32>
    %cst_77 = arith.constant 1.000000e+00 : f32
    %89 = vector.broadcast %cst_77 : f32 to vector<32x128xf32>
    %90 = arith.subf %88, %89 : vector<32x128xf32>
    %91 = arith.select %85, %83, %90 : vector<32x128xi1>, vector<32x128xf32>
    %92 = arith.addf %78, %91 : vector<32x128xf32>
    %c0_78 = arith.constant 0 : index
    %c0_79 = arith.constant 0 : index
    %c0_80 = arith.constant 0 : index
    %93 = vector.load %arg7[%c0_78, %c0_79, %c0_80] : memref<1x32x128xf32, #tpu.memory_space<vmem>>, vector<1x32x128xf32>
    %94 = vector.shape_cast %93 : vector<1x32x128xf32> to vector<32x128xf32>
    %95 = vector.shape_cast %92 : vector<32x128xf32> to vector<1x32x128xf32>
    tpu.vector_store %arg7[%c0_78, %c0_79, %c0_80], %95 {strides = array<i32>} : memref<1x32x128xf32, #tpu.memory_space<vmem>>, vector<1x32x128xf32>,
    return
  }
  func.func @transform_0(%arg0: i32) -> (i32, i32, i32) {
    %c0_i32 = arith.constant 0 : i32
    %c0_i32_0 = arith.constant 0 : i32
    %c0_i32_1 = arith.constant 0 : i32
    return %arg0, %c0_i32, %c0_i32_0 : i32, i32, i32
  }
  func.func @transform_1(%arg0: i32) -> (i32, i32, i32) {
    %c0_i32 = arith.constant 0 : i32
    %c0_i32_0 = arith.constant 0 : i32
    %c0_i32_1 = arith.constant 0 : i32
    %c0_i32_2 = arith.constant 0 : i32
    return %c0_i32, %c0_i32_0, %c0_i32_1 : i32, i32, i32
  }
  func.func @transform_2(%arg0: i32) -> (i32, i32, i32) {
    %c0_i32 = arith.constant 0 : i32
    %c0_i32_0 = arith.constant 0 : i32
    %c0_i32_1 = arith.constant 0 : i32
    %c0_i32_2 = arith.constant 0 : i32
    return %c0_i32, %c0_i32_0, %c0_i32_1 : i32, i32, i32
  }
  func.func @transform_3(%arg0: i32) -> (i32, i32) {
    %c0_i32 = arith.constant 0 : i32
    %c0_i32_0 = arith.constant 0 : i32
    %c0_i32_1 = arith.constant 0 : i32
    return %c0_i32, %c0_i32_0 : i32, i32
  }
  func.func @transform_4(%arg0: i32) -> (i32, i32, i32) {
    %c0_i32 = arith.constant 0 : i32
    %c0_i32_0 = arith.constant 0 : i32
    %c0_i32_1 = arith.constant 0 : i32
    %c0_i32_2 = arith.constant 0 : i32
    return %c0_i32, %c0_i32_0, %c0_i32_1 : i32, i32, i32
  }
  func.func @transform_5(%arg0: i32) -> (i32, i32, i32) {
    %c0_i32 = arith.constant 0 : i32
    %c0_i32_0 = arith.constant 0 : i32
    %c0_i32_1 = arith.constant 0 : i32
    %c0_i32_2 = arith.constant 0 : i32
    return %c0_i32, %c0_i32_0, %c0_i32_1 : i32, i32, i32
  }
  func.func @transform_6(%arg0: i32) -> (i32, i32, i32) {
    %c0_i32 = arith.constant 0 : i32
    %c0_i32_0 = arith.constant 0 : i32
    %c0_i32_1 = arith.constant 0 : i32
    return %arg0, %c0_i32, %c0_i32_0 : i32, i32, i32
  }
}

module attributes {stable_mosaic.version = 11 : i64} {
  func.func @_block_kernel(%arg0: i32, %arg1: memref<1x32x128xf32, #tpu.memory_space<vmem>>, %arg2: memref<3x128x128xbf16, #tpu.memory_space<vmem>>, %arg3: memref<1x128x128xbf16, #tpu.memory_space<vmem>>, %arg4: memref<1x128xf32, #tpu.memory_space<vmem>>, %arg5: memref<3x128x128xbf16, #tpu.memory_space<vmem>>, %arg6: memref<1x32x128xf32, #tpu.memory_space<vmem>>, %arg7: memref<34x128xf32, #tpu.memory_space<vmem>>, %arg8: memref<32x128xbf16, #tpu.memory_space<vmem>>, %arg9: memref<34x128xbf16, #tpu.memory_space<vmem>>) attributes {dimension_semantics = [#tpu.dimension_semantics<parallel>], iteration_bounds = array<i64: 2>, scalar_prefetch = 0 : i64, scratch_operands = 3 : i64, tpu.core_type = #tpu.core_type<tc>, window_params = [{transform_indices = @transform_0, window_bounds = array<i64: 1, 32, 128>}, {pipeline_mode = #tpu.pipeline_mode<synchronous>, transform_indices = @transform_1, window_bounds = array<i64: 3, 128, 128>}, {pipeline_mode = #tpu.pipeline_mode<synchronous>, transform_indices = @transform_2, window_bounds = array<i64: 1, 128, 128>}, {pipeline_mode = #tpu.pipeline_mode<synchronous>, transform_indices = @transform_3, window_bounds = array<i64: 1, 128>}, {pipeline_mode = #tpu.pipeline_mode<synchronous>, transform_indices = @transform_4, window_bounds = array<i64: 3, 128, 128>}, {transform_indices = @transform_5, window_bounds = array<i64: 1, 32, 128>}]} {
    %cst = arith.constant 0.000000e+00 : f32
    %0 = vector.broadcast %cst : f32 to vector<1x128xf32>
    %c0 = arith.constant 0 : index
    %c0_0 = arith.constant 0 : index
    %1 = vector.load %arg7[%c0, %c0_0] : memref<34x128xf32, #tpu.memory_space<vmem>>, vector<1x128xf32>
    tpu.vector_store %arg7[%c0, %c0_0], %0 {strides = array<i32>} : memref<34x128xf32, #tpu.memory_space<vmem>>, vector<1x128xf32>,
    %c33 = arith.constant 33 : index
    %c0_1 = arith.constant 0 : index
    %2 = vector.load %arg7[%c33, %c0_1] : memref<34x128xf32, #tpu.memory_space<vmem>>, vector<1x128xf32>
    tpu.vector_store %arg7[%c33, %c0_1], %0 {strides = array<i32>} : memref<34x128xf32, #tpu.memory_space<vmem>>, vector<1x128xf32>,
    %c0_2 = arith.constant 0 : index
    %c0_3 = arith.constant 0 : index
    %c0_4 = arith.constant 0 : index
    %3 = vector.load %arg1[%c0_2, %c0_3, %c0_4] : memref<1x32x128xf32, #tpu.memory_space<vmem>>, vector<1x32x128xf32>
    %4 = vector.shape_cast %3 : vector<1x32x128xf32> to vector<32x128xf32>
    %c1 = arith.constant 1 : index
    %c0_5 = arith.constant 0 : index
    %5 = vector.load %arg7[%c1, %c0_5] : memref<34x128xf32, #tpu.memory_space<vmem>>, vector<32x128xf32>
    tpu.vector_store %arg7[%c1, %c0_5], %4 {strides = array<i32>} : memref<34x128xf32, #tpu.memory_space<vmem>>, vector<32x128xf32>,
    %cst_6 = arith.constant 0.000000e+00 : f32
    %6 = vector.broadcast %cst_6 : f32 to vector<32x128xf32>
    %c0_7 = arith.constant 0 : index
    %c0_8 = arith.constant 0 : index
    %7 = vector.load %arg7[%c0_7, %c0_8] : memref<34x128xf32, #tpu.memory_space<vmem>>, vector<32x128xf32>
    %8 = arith.truncf %7 : vector<32x128xf32> to vector<32x128xbf16>
    %c0_9 = arith.constant 0 : index
    %c0_10 = arith.constant 0 : index
    %c0_11 = arith.constant 0 : index
    %9 = vector.load %arg2[%c0_9, %c0_10, %c0_11] : memref<3x128x128xbf16, #tpu.memory_space<vmem>>, vector<1x128x128xbf16>
    %10 = vector.shape_cast %9 : vector<1x128x128xbf16> to vector<128x128xbf16>
    %cst_12 = arith.constant dense<0.000000e+00> : vector<32x128xf32>
    %11 = tpu.matmul %8, %10, %cst_12 {dimension_numbers = #tpu.dot_dimension_numbers<[1], [0], [0], [1], [0, 0, 1, 1], [], []>} : vector<32x128xbf16>, vector<128x128xbf16>, vector<32x128xf32> -> vector<32x128xf32>
    %12 = arith.addf %6, %11 : vector<32x128xf32>
    %c1_13 = arith.constant 1 : index
    %c0_14 = arith.constant 0 : index
    %13 = vector.load %arg7[%c1_13, %c0_14] : memref<34x128xf32, #tpu.memory_space<vmem>>, vector<32x128xf32>
    %14 = arith.truncf %13 : vector<32x128xf32> to vector<32x128xbf16>
    %c1_15 = arith.constant 1 : index
    %c0_16 = arith.constant 0 : index
    %c0_17 = arith.constant 0 : index
    %15 = vector.load %arg2[%c1_15, %c0_16, %c0_17] : memref<3x128x128xbf16, #tpu.memory_space<vmem>>, vector<1x128x128xbf16>
    %16 = vector.shape_cast %15 : vector<1x128x128xbf16> to vector<128x128xbf16>
    %cst_18 = arith.constant dense<0.000000e+00> : vector<32x128xf32>
    %17 = tpu.matmul %14, %16, %cst_18 {dimension_numbers = #tpu.dot_dimension_numbers<[1], [0], [0], [1], [0, 0, 1, 1], [], []>} : vector<32x128xbf16>, vector<128x128xbf16>, vector<32x128xf32> -> vector<32x128xf32>
    %18 = arith.addf %12, %17 : vector<32x128xf32>
    %c2 = arith.constant 2 : index
    %c0_19 = arith.constant 0 : index
    %19 = vector.load %arg7[%c2, %c0_19] : memref<34x128xf32, #tpu.memory_space<vmem>>, vector<32x128xf32>
    %20 = arith.truncf %19 : vector<32x128xf32> to vector<32x128xbf16>
    %c2_20 = arith.constant 2 : index
    %c0_21 = arith.constant 0 : index
    %c0_22 = arith.constant 0 : index
    %21 = vector.load %arg2[%c2_20, %c0_21, %c0_22] : memref<3x128x128xbf16, #tpu.memory_space<vmem>>, vector<1x128x128xbf16>
    %22 = vector.shape_cast %21 : vector<1x128x128xbf16> to vector<128x128xbf16>
    %cst_23 = arith.constant dense<0.000000e+00> : vector<32x128xf32>
    %23 = tpu.matmul %20, %22, %cst_23 {dimension_numbers = #tpu.dot_dimension_numbers<[1], [0], [0], [1], [0, 0, 1, 1], [], []>} : vector<32x128xbf16>, vector<128x128xbf16>, vector<32x128xf32> -> vector<32x128xf32>
    %24 = arith.addf %18, %23 : vector<32x128xf32>
    %cst_24 = arith.constant 0.000000e+00 : f32
    %25 = vector.broadcast %cst_24 : f32 to vector<32x128xf32>
    %26 = arith.cmpf ogt, %24, %25 : vector<32x128xf32>
    %cst_25 = arith.constant 0.000000e+00 : f32
    %27 = vector.broadcast %cst_25 : f32 to vector<32x128xf32>
    %28 = arith.minimumf %24, %27 : vector<32x128xf32>
    %29 = math.exp %28 : vector<32x128xf32>
    %cst_26 = arith.constant 1.000000e+00 : f32
    %30 = vector.broadcast %cst_26 : f32 to vector<32x128xf32>
    %31 = arith.subf %29, %30 : vector<32x128xf32>
    %32 = arith.select %26, %24, %31 : vector<32x128xi1>, vector<32x128xf32>
    %33 = arith.truncf %32 : vector<32x128xf32> to vector<32x128xbf16>
    %c0_27 = arith.constant 0 : index
    %c0_28 = arith.constant 0 : index
    %34 = vector.load %arg8[%c0_27, %c0_28] : memref<32x128xbf16, #tpu.memory_space<vmem>>, vector<32x128xbf16>
    tpu.vector_store %arg8[%c0_27, %c0_28], %33 {strides = array<i32>} : memref<32x128xbf16, #tpu.memory_space<vmem>>, vector<32x128xbf16>,
    %c0_29 = arith.constant 0 : index
    %c0_30 = arith.constant 0 : index
    %35 = vector.load %arg8[%c0_29, %c0_30] : memref<32x128xbf16, #tpu.memory_space<vmem>>, vector<32x128xbf16>
    %c0_31 = arith.constant 0 : index
    %c0_32 = arith.constant 0 : index
    %c0_33 = arith.constant 0 : index
    %36 = vector.load %arg3[%c0_31, %c0_32, %c0_33] : memref<1x128x128xbf16, #tpu.memory_space<vmem>>, vector<1x128x128xbf16>
    %37 = vector.shape_cast %36 : vector<1x128x128xbf16> to vector<128x128xbf16>
    %cst_34 = arith.constant dense<0.000000e+00> : vector<32x128xf32>
    %38 = tpu.matmul %35, %37, %cst_34 {dimension_numbers = #tpu.dot_dimension_numbers<[1], [0], [0], [1], [0, 0, 1, 1], [], []>} : vector<32x128xbf16>, vector<128x128xbf16>, vector<32x128xf32> -> vector<32x128xf32>
    %c0_35 = arith.constant 0 : index
    %c0_36 = arith.constant 0 : index
    %39 = vector.load %arg4[%c0_35, %c0_36] : memref<1x128xf32, #tpu.memory_space<vmem>>, vector<1x128xf32>
    %40 = vector.broadcast %39 : vector<1x128xf32> to vector<32x128xf32>
    %41 = arith.addf %38, %40 : vector<32x128xf32>
    %cst_37 = arith.constant 0.000000e+00 : bf16
    %42 = vector.broadcast %cst_37 : bf16 to vector<1x128xbf16>
    %c0_38 = arith.constant 0 : index
    %c0_39 = arith.constant 0 : index
    %43 = vector.load %arg9[%c0_38, %c0_39] : memref<34x128xbf16, #tpu.memory_space<vmem>>, vector<1x128xbf16>
    tpu.vector_store %arg9[%c0_38, %c0_39], %42 {strides = array<i32>} : memref<34x128xbf16, #tpu.memory_space<vmem>>, vector<1x128xbf16>,
    %c33_40 = arith.constant 33 : index
    %c0_41 = arith.constant 0 : index
    %44 = vector.load %arg9[%c33_40, %c0_41] : memref<34x128xbf16, #tpu.memory_space<vmem>>, vector<1x128xbf16>
    tpu.vector_store %arg9[%c33_40, %c0_41], %42 {strides = array<i32>} : memref<34x128xbf16, #tpu.memory_space<vmem>>, vector<1x128xbf16>,
    %cst_42 = arith.constant 0.000000e+00 : f32
    %45 = vector.broadcast %cst_42 : f32 to vector<32x128xf32>
    %46 = arith.cmpf ogt, %41, %45 : vector<32x128xf32>
    %cst_43 = arith.constant 0.000000e+00 : f32
    %47 = vector.broadcast %cst_43 : f32 to vector<32x128xf32>
    %48 = arith.minimumf %41, %47 : vector<32x128xf32>
    %49 = math.exp %48 : vector<32x128xf32>
    %cst_44 = arith.constant 1.000000e+00 : f32
    %50 = vector.broadcast %cst_44 : f32 to vector<32x128xf32>
    %51 = arith.subf %49, %50 : vector<32x128xf32>
    %52 = arith.select %46, %41, %51 : vector<32x128xi1>, vector<32x128xf32>
    %53 = arith.truncf %52 : vector<32x128xf32> to vector<32x128xbf16>
    %c1_45 = arith.constant 1 : index
    %c0_46 = arith.constant 0 : index
    %54 = vector.load %arg9[%c1_45, %c0_46] : memref<34x128xbf16, #tpu.memory_space<vmem>>, vector<32x128xbf16>
    tpu.vector_store %arg9[%c1_45, %c0_46], %53 {strides = array<i32>} : memref<34x128xbf16, #tpu.memory_space<vmem>>, vector<32x128xbf16>,
    %cst_47 = arith.constant 0.000000e+00 : f32
    %55 = vector.broadcast %cst_47 : f32 to vector<32x128xf32>
    %c0_48 = arith.constant 0 : index
    %c0_49 = arith.constant 0 : index
    %56 = vector.load %arg9[%c0_48, %c0_49] : memref<34x128xbf16, #tpu.memory_space<vmem>>, vector<32x128xbf16>
    %c0_50 = arith.constant 0 : index
    %c0_51 = arith.constant 0 : index
    %c0_52 = arith.constant 0 : index
    %57 = vector.load %arg5[%c0_50, %c0_51, %c0_52] : memref<3x128x128xbf16, #tpu.memory_space<vmem>>, vector<1x128x128xbf16>
    %58 = vector.shape_cast %57 : vector<1x128x128xbf16> to vector<128x128xbf16>
    %cst_53 = arith.constant dense<0.000000e+00> : vector<32x128xf32>
    %59 = tpu.matmul %56, %58, %cst_53 {dimension_numbers = #tpu.dot_dimension_numbers<[1], [0], [0], [1], [0, 0, 1, 1], [], []>} : vector<32x128xbf16>, vector<128x128xbf16>, vector<32x128xf32> -> vector<32x128xf32>
    %60 = arith.addf %55, %59 : vector<32x128xf32>
    %c1_54 = arith.constant 1 : index
    %c0_55 = arith.constant 0 : index
    %61 = vector.load %arg9[%c1_54, %c0_55] : memref<34x128xbf16, #tpu.memory_space<vmem>>, vector<32x128xbf16>
    %c1_56 = arith.constant 1 : index
    %c0_57 = arith.constant 0 : index
    %c0_58 = arith.constant 0 : index
    %62 = vector.load %arg5[%c1_56, %c0_57, %c0_58] : memref<3x128x128xbf16, #tpu.memory_space<vmem>>, vector<1x128x128xbf16>
    %63 = vector.shape_cast %62 : vector<1x128x128xbf16> to vector<128x128xbf16>
    %cst_59 = arith.constant dense<0.000000e+00> : vector<32x128xf32>
    %64 = tpu.matmul %61, %63, %cst_59 {dimension_numbers = #tpu.dot_dimension_numbers<[1], [0], [0], [1], [0, 0, 1, 1], [], []>} : vector<32x128xbf16>, vector<128x128xbf16>, vector<32x128xf32> -> vector<32x128xf32>
    %65 = arith.addf %60, %64 : vector<32x128xf32>
    %c2_60 = arith.constant 2 : index
    %c0_61 = arith.constant 0 : index
    %66 = vector.load %arg9[%c2_60, %c0_61] : memref<34x128xbf16, #tpu.memory_space<vmem>>, vector<32x128xbf16>
    %c2_62 = arith.constant 2 : index
    %c0_63 = arith.constant 0 : index
    %c0_64 = arith.constant 0 : index
    %67 = vector.load %arg5[%c2_62, %c0_63, %c0_64] : memref<3x128x128xbf16, #tpu.memory_space<vmem>>, vector<1x128x128xbf16>
    %68 = vector.shape_cast %67 : vector<1x128x128xbf16> to vector<128x128xbf16>
    %cst_65 = arith.constant dense<0.000000e+00> : vector<32x128xf32>
    %69 = tpu.matmul %66, %68, %cst_65 {dimension_numbers = #tpu.dot_dimension_numbers<[1], [0], [0], [1], [0, 0, 1, 1], [], []>} : vector<32x128xbf16>, vector<128x128xbf16>, vector<32x128xf32> -> vector<32x128xf32>
    %70 = arith.addf %65, %69 : vector<32x128xf32>
    %cst_66 = arith.constant 0.000000e+00 : f32
    %71 = vector.broadcast %cst_66 : f32 to vector<32x128xf32>
    %72 = arith.cmpf ogt, %70, %71 : vector<32x128xf32>
    %cst_67 = arith.constant 0.000000e+00 : f32
    %73 = vector.broadcast %cst_67 : f32 to vector<32x128xf32>
    %74 = arith.minimumf %70, %73 : vector<32x128xf32>
    %75 = math.exp %74 : vector<32x128xf32>
    %cst_68 = arith.constant 1.000000e+00 : f32
    %76 = vector.broadcast %cst_68 : f32 to vector<32x128xf32>
    %77 = arith.subf %75, %76 : vector<32x128xf32>
    %78 = arith.select %72, %70, %77 : vector<32x128xi1>, vector<32x128xf32>
    %c0_69 = arith.constant 0 : index
    %c0_70 = arith.constant 0 : index
    %c0_71 = arith.constant 0 : index
    %79 = vector.load %arg1[%c0_69, %c0_70, %c0_71] : memref<1x32x128xf32, #tpu.memory_space<vmem>>, vector<1x32x128xf32>
    %80 = vector.shape_cast %79 : vector<1x32x128xf32> to vector<32x128xf32>
    %81 = arith.addf %78, %80 : vector<32x128xf32>
    %c0_72 = arith.constant 0 : index
    %c0_73 = arith.constant 0 : index
    %c0_74 = arith.constant 0 : index
    %82 = vector.load %arg6[%c0_72, %c0_73, %c0_74] : memref<1x32x128xf32, #tpu.memory_space<vmem>>, vector<1x32x128xf32>
    %83 = vector.shape_cast %82 : vector<1x32x128xf32> to vector<32x128xf32>
    %84 = vector.shape_cast %81 : vector<32x128xf32> to vector<1x32x128xf32>
    tpu.vector_store %arg6[%c0_72, %c0_73, %c0_74], %84 {strides = array<i32>} : memref<1x32x128xf32, #tpu.memory_space<vmem>>, vector<1x32x128xf32>,
    return
  }
  func.func @transform_0(%arg0: i32) -> (i32, i32, i32) {
    %c0_i32 = arith.constant 0 : i32
    %c0_i32_0 = arith.constant 0 : i32
    %c0_i32_1 = arith.constant 0 : i32
    return %arg0, %c0_i32, %c0_i32_0 : i32, i32, i32
  }
  func.func @transform_1(%arg0: i32) -> (i32, i32, i32) {
    %c0_i32 = arith.constant 0 : i32
    %c0_i32_0 = arith.constant 0 : i32
    %c0_i32_1 = arith.constant 0 : i32
    %c0_i32_2 = arith.constant 0 : i32
    return %c0_i32, %c0_i32_0, %c0_i32_1 : i32, i32, i32
  }
  func.func @transform_2(%arg0: i32) -> (i32, i32, i32) {
    %c0_i32 = arith.constant 0 : i32
    %c0_i32_0 = arith.constant 0 : i32
    %c0_i32_1 = arith.constant 0 : i32
    %c0_i32_2 = arith.constant 0 : i32
    return %c0_i32, %c0_i32_0, %c0_i32_1 : i32, i32, i32
  }
  func.func @transform_3(%arg0: i32) -> (i32, i32) {
    %c0_i32 = arith.constant 0 : i32
    %c0_i32_0 = arith.constant 0 : i32
    %c0_i32_1 = arith.constant 0 : i32
    return %c0_i32, %c0_i32_0 : i32, i32
  }
  func.func @transform_4(%arg0: i32) -> (i32, i32, i32) {
    %c0_i32 = arith.constant 0 : i32
    %c0_i32_0 = arith.constant 0 : i32
    %c0_i32_1 = arith.constant 0 : i32
    %c0_i32_2 = arith.constant 0 : i32
    return %c0_i32, %c0_i32_0, %c0_i32_1 : i32, i32, i32
  }
  func.func @transform_5(%arg0: i32) -> (i32, i32, i32) {
    %c0_i32 = arith.constant 0 : i32
    %c0_i32_0 = arith.constant 0 : i32
    %c0_i32_1 = arith.constant 0 : i32
    return %arg0, %c0_i32, %c0_i32_0 : i32, i32, i32
  }
}

module attributes {stable_mosaic.version = 11 : i64} {
  func.func @_block_kernel(%arg0: i32, %arg1: memref<1x32x128xf32, #tpu.memory_space<vmem>>, %arg2: memref<3x128x128xbf16, #tpu.memory_space<vmem>>, %arg3: memref<1x128x128xbf16, #tpu.memory_space<vmem>>, %arg4: memref<1x128xf32, #tpu.memory_space<vmem>>, %arg5: memref<3x128x128xbf16, #tpu.memory_space<vmem>>, %arg6: memref<1x128x128xbf16, #tpu.memory_space<vmem>>, %arg7: memref<1x16x128xf32, #tpu.memory_space<vmem>>, %arg8: memref<34x128xf32, #tpu.memory_space<vmem>>, %arg9: memref<16x128xbf16, #tpu.memory_space<vmem>>, %arg10: memref<18x128xbf16, #tpu.memory_space<vmem>>) attributes {dimension_semantics = [#tpu.dimension_semantics<parallel>], iteration_bounds = array<i64: 2>, scalar_prefetch = 0 : i64, scratch_operands = 3 : i64, tpu.core_type = #tpu.core_type<tc>, window_params = [{transform_indices = @transform_0, window_bounds = array<i64: 1, 32, 128>}, {pipeline_mode = #tpu.pipeline_mode<synchronous>, transform_indices = @transform_1, window_bounds = array<i64: 3, 128, 128>}, {pipeline_mode = #tpu.pipeline_mode<synchronous>, transform_indices = @transform_2, window_bounds = array<i64: 1, 128, 128>}, {pipeline_mode = #tpu.pipeline_mode<synchronous>, transform_indices = @transform_3, window_bounds = array<i64: 1, 128>}, {pipeline_mode = #tpu.pipeline_mode<synchronous>, transform_indices = @transform_4, window_bounds = array<i64: 3, 128, 128>}, {pipeline_mode = #tpu.pipeline_mode<synchronous>, transform_indices = @transform_5, window_bounds = array<i64: 1, 128, 128>}, {transform_indices = @transform_6, window_bounds = array<i64: 1, 16, 128>}]} {
    %cst = arith.constant 0.000000e+00 : f32
    %0 = vector.broadcast %cst : f32 to vector<1x128xf32>
    %c0 = arith.constant 0 : index
    %c0_0 = arith.constant 0 : index
    %1 = vector.load %arg8[%c0, %c0_0] : memref<34x128xf32, #tpu.memory_space<vmem>>, vector<1x128xf32>
    tpu.vector_store %arg8[%c0, %c0_0], %0 {strides = array<i32>} : memref<34x128xf32, #tpu.memory_space<vmem>>, vector<1x128xf32>,
    %c33 = arith.constant 33 : index
    %c0_1 = arith.constant 0 : index
    %2 = vector.load %arg8[%c33, %c0_1] : memref<34x128xf32, #tpu.memory_space<vmem>>, vector<1x128xf32>
    tpu.vector_store %arg8[%c33, %c0_1], %0 {strides = array<i32>} : memref<34x128xf32, #tpu.memory_space<vmem>>, vector<1x128xf32>,
    %c0_2 = arith.constant 0 : index
    %c0_3 = arith.constant 0 : index
    %c0_4 = arith.constant 0 : index
    %3 = vector.load %arg1[%c0_2, %c0_3, %c0_4] : memref<1x32x128xf32, #tpu.memory_space<vmem>>, vector<1x32x128xf32>
    %4 = vector.shape_cast %3 : vector<1x32x128xf32> to vector<32x128xf32>
    %c1 = arith.constant 1 : index
    %c0_5 = arith.constant 0 : index
    %5 = vector.load %arg8[%c1, %c0_5] : memref<34x128xf32, #tpu.memory_space<vmem>>, vector<32x128xf32>
    tpu.vector_store %arg8[%c1, %c0_5], %4 {strides = array<i32>} : memref<34x128xf32, #tpu.memory_space<vmem>>, vector<32x128xf32>,
    %cst_6 = arith.constant 0.000000e+00 : f32
    %6 = vector.broadcast %cst_6 : f32 to vector<16x128xf32>
    %c0_7 = arith.constant 0 : index
    %c0_8 = arith.constant 0 : index
    %7 = tpu.strided_load %arg8[%c0_7, %c0_8] {strides = array<i32: 2, 1>} : memref<34x128xf32, #tpu.memory_space<vmem>>, vector<16x128xf32>
    %8 = arith.truncf %7 : vector<16x128xf32> to vector<16x128xbf16>
    %c0_9 = arith.constant 0 : index
    %c0_10 = arith.constant 0 : index
    %c0_11 = arith.constant 0 : index
    %9 = vector.load %arg2[%c0_9, %c0_10, %c0_11] : memref<3x128x128xbf16, #tpu.memory_space<vmem>>, vector<1x128x128xbf16>
    %10 = vector.shape_cast %9 : vector<1x128x128xbf16> to vector<128x128xbf16>
    %cst_12 = arith.constant dense<0.000000e+00> : vector<16x128xf32>
    %11 = tpu.matmul %8, %10, %cst_12 {dimension_numbers = #tpu.dot_dimension_numbers<[1], [0], [0], [1], [0, 0, 1, 1], [], []>} : vector<16x128xbf16>, vector<128x128xbf16>, vector<16x128xf32> -> vector<16x128xf32>
    %12 = arith.addf %6, %11 : vector<16x128xf32>
    %c1_13 = arith.constant 1 : index
    %c0_14 = arith.constant 0 : index
    %13 = tpu.strided_load %arg8[%c1_13, %c0_14] {strides = array<i32: 2, 1>} : memref<34x128xf32, #tpu.memory_space<vmem>>, vector<16x128xf32>
    %14 = arith.truncf %13 : vector<16x128xf32> to vector<16x128xbf16>
    %c1_15 = arith.constant 1 : index
    %c0_16 = arith.constant 0 : index
    %c0_17 = arith.constant 0 : index
    %15 = vector.load %arg2[%c1_15, %c0_16, %c0_17] : memref<3x128x128xbf16, #tpu.memory_space<vmem>>, vector<1x128x128xbf16>
    %16 = vector.shape_cast %15 : vector<1x128x128xbf16> to vector<128x128xbf16>
    %cst_18 = arith.constant dense<0.000000e+00> : vector<16x128xf32>
    %17 = tpu.matmul %14, %16, %cst_18 {dimension_numbers = #tpu.dot_dimension_numbers<[1], [0], [0], [1], [0, 0, 1, 1], [], []>} : vector<16x128xbf16>, vector<128x128xbf16>, vector<16x128xf32> -> vector<16x128xf32>
    %18 = arith.addf %12, %17 : vector<16x128xf32>
    %c2 = arith.constant 2 : index
    %c0_19 = arith.constant 0 : index
    %19 = tpu.strided_load %arg8[%c2, %c0_19] {strides = array<i32: 2, 1>} : memref<34x128xf32, #tpu.memory_space<vmem>>, vector<16x128xf32>
    %20 = arith.truncf %19 : vector<16x128xf32> to vector<16x128xbf16>
    %c2_20 = arith.constant 2 : index
    %c0_21 = arith.constant 0 : index
    %c0_22 = arith.constant 0 : index
    %21 = vector.load %arg2[%c2_20, %c0_21, %c0_22] : memref<3x128x128xbf16, #tpu.memory_space<vmem>>, vector<1x128x128xbf16>
    %22 = vector.shape_cast %21 : vector<1x128x128xbf16> to vector<128x128xbf16>
    %cst_23 = arith.constant dense<0.000000e+00> : vector<16x128xf32>
    %23 = tpu.matmul %20, %22, %cst_23 {dimension_numbers = #tpu.dot_dimension_numbers<[1], [0], [0], [1], [0, 0, 1, 1], [], []>} : vector<16x128xbf16>, vector<128x128xbf16>, vector<16x128xf32> -> vector<16x128xf32>
    %24 = arith.addf %18, %23 : vector<16x128xf32>
    %cst_24 = arith.constant 0.000000e+00 : f32
    %25 = vector.broadcast %cst_24 : f32 to vector<16x128xf32>
    %26 = arith.cmpf ogt, %24, %25 : vector<16x128xf32>
    %cst_25 = arith.constant 0.000000e+00 : f32
    %27 = vector.broadcast %cst_25 : f32 to vector<16x128xf32>
    %28 = arith.minimumf %24, %27 : vector<16x128xf32>
    %29 = math.exp %28 : vector<16x128xf32>
    %cst_26 = arith.constant 1.000000e+00 : f32
    %30 = vector.broadcast %cst_26 : f32 to vector<16x128xf32>
    %31 = arith.subf %29, %30 : vector<16x128xf32>
    %32 = arith.select %26, %24, %31 : vector<16x128xi1>, vector<16x128xf32>
    %33 = arith.truncf %32 : vector<16x128xf32> to vector<16x128xbf16>
    %c0_27 = arith.constant 0 : index
    %c0_28 = arith.constant 0 : index
    %34 = vector.load %arg9[%c0_27, %c0_28] : memref<16x128xbf16, #tpu.memory_space<vmem>>, vector<16x128xbf16>
    tpu.vector_store %arg9[%c0_27, %c0_28], %33 {strides = array<i32>} : memref<16x128xbf16, #tpu.memory_space<vmem>>, vector<16x128xbf16>,
    %c0_29 = arith.constant 0 : index
    %c0_30 = arith.constant 0 : index
    %35 = vector.load %arg9[%c0_29, %c0_30] : memref<16x128xbf16, #tpu.memory_space<vmem>>, vector<16x128xbf16>
    %c0_31 = arith.constant 0 : index
    %c0_32 = arith.constant 0 : index
    %c0_33 = arith.constant 0 : index
    %36 = vector.load %arg3[%c0_31, %c0_32, %c0_33] : memref<1x128x128xbf16, #tpu.memory_space<vmem>>, vector<1x128x128xbf16>
    %37 = vector.shape_cast %36 : vector<1x128x128xbf16> to vector<128x128xbf16>
    %cst_34 = arith.constant dense<0.000000e+00> : vector<16x128xf32>
    %38 = tpu.matmul %35, %37, %cst_34 {dimension_numbers = #tpu.dot_dimension_numbers<[1], [0], [0], [1], [0, 0, 1, 1], [], []>} : vector<16x128xbf16>, vector<128x128xbf16>, vector<16x128xf32> -> vector<16x128xf32>
    %c0_35 = arith.constant 0 : index
    %c0_36 = arith.constant 0 : index
    %39 = vector.load %arg4[%c0_35, %c0_36] : memref<1x128xf32, #tpu.memory_space<vmem>>, vector<1x128xf32>
    %40 = vector.broadcast %39 : vector<1x128xf32> to vector<16x128xf32>
    %41 = arith.addf %38, %40 : vector<16x128xf32>
    %cst_37 = arith.constant 0.000000e+00 : bf16
    %42 = vector.broadcast %cst_37 : bf16 to vector<1x128xbf16>
    %c0_38 = arith.constant 0 : index
    %c0_39 = arith.constant 0 : index
    %43 = vector.load %arg10[%c0_38, %c0_39] : memref<18x128xbf16, #tpu.memory_space<vmem>>, vector<1x128xbf16>
    tpu.vector_store %arg10[%c0_38, %c0_39], %42 {strides = array<i32>} : memref<18x128xbf16, #tpu.memory_space<vmem>>, vector<1x128xbf16>,
    %c17 = arith.constant 17 : index
    %c0_40 = arith.constant 0 : index
    %44 = vector.load %arg10[%c17, %c0_40] : memref<18x128xbf16, #tpu.memory_space<vmem>>, vector<1x128xbf16>
    tpu.vector_store %arg10[%c17, %c0_40], %42 {strides = array<i32>} : memref<18x128xbf16, #tpu.memory_space<vmem>>, vector<1x128xbf16>,
    %cst_41 = arith.constant 0.000000e+00 : f32
    %45 = vector.broadcast %cst_41 : f32 to vector<16x128xf32>
    %46 = arith.cmpf ogt, %41, %45 : vector<16x128xf32>
    %cst_42 = arith.constant 0.000000e+00 : f32
    %47 = vector.broadcast %cst_42 : f32 to vector<16x128xf32>
    %48 = arith.minimumf %41, %47 : vector<16x128xf32>
    %49 = math.exp %48 : vector<16x128xf32>
    %cst_43 = arith.constant 1.000000e+00 : f32
    %50 = vector.broadcast %cst_43 : f32 to vector<16x128xf32>
    %51 = arith.subf %49, %50 : vector<16x128xf32>
    %52 = arith.select %46, %41, %51 : vector<16x128xi1>, vector<16x128xf32>
    %53 = arith.truncf %52 : vector<16x128xf32> to vector<16x128xbf16>
    %c1_44 = arith.constant 1 : index
    %c0_45 = arith.constant 0 : index
    %54 = vector.load %arg10[%c1_44, %c0_45] : memref<18x128xbf16, #tpu.memory_space<vmem>>, vector<16x128xbf16>
    tpu.vector_store %arg10[%c1_44, %c0_45], %53 {strides = array<i32>} : memref<18x128xbf16, #tpu.memory_space<vmem>>, vector<16x128xbf16>,
    %cst_46 = arith.constant 0.000000e+00 : f32
    %55 = vector.broadcast %cst_46 : f32 to vector<16x128xf32>
    %c0_47 = arith.constant 0 : index
    %c0_48 = arith.constant 0 : index
    %56 = vector.load %arg10[%c0_47, %c0_48] : memref<18x128xbf16, #tpu.memory_space<vmem>>, vector<16x128xbf16>
    %c0_49 = arith.constant 0 : index
    %c0_50 = arith.constant 0 : index
    %c0_51 = arith.constant 0 : index
    %57 = vector.load %arg5[%c0_49, %c0_50, %c0_51] : memref<3x128x128xbf16, #tpu.memory_space<vmem>>, vector<1x128x128xbf16>
    %58 = vector.shape_cast %57 : vector<1x128x128xbf16> to vector<128x128xbf16>
    %cst_52 = arith.constant dense<0.000000e+00> : vector<16x128xf32>
    %59 = tpu.matmul %56, %58, %cst_52 {dimension_numbers = #tpu.dot_dimension_numbers<[1], [0], [0], [1], [0, 0, 1, 1], [], []>} : vector<16x128xbf16>, vector<128x128xbf16>, vector<16x128xf32> -> vector<16x128xf32>
    %60 = arith.addf %55, %59 : vector<16x128xf32>
    %c1_53 = arith.constant 1 : index
    %c0_54 = arith.constant 0 : index
    %61 = vector.load %arg10[%c1_53, %c0_54] : memref<18x128xbf16, #tpu.memory_space<vmem>>, vector<16x128xbf16>
    %c1_55 = arith.constant 1 : index
    %c0_56 = arith.constant 0 : index
    %c0_57 = arith.constant 0 : index
    %62 = vector.load %arg5[%c1_55, %c0_56, %c0_57] : memref<3x128x128xbf16, #tpu.memory_space<vmem>>, vector<1x128x128xbf16>
    %63 = vector.shape_cast %62 : vector<1x128x128xbf16> to vector<128x128xbf16>
    %cst_58 = arith.constant dense<0.000000e+00> : vector<16x128xf32>
    %64 = tpu.matmul %61, %63, %cst_58 {dimension_numbers = #tpu.dot_dimension_numbers<[1], [0], [0], [1], [0, 0, 1, 1], [], []>} : vector<16x128xbf16>, vector<128x128xbf16>, vector<16x128xf32> -> vector<16x128xf32>
    %65 = arith.addf %60, %64 : vector<16x128xf32>
    %c2_59 = arith.constant 2 : index
    %c0_60 = arith.constant 0 : index
    %66 = vector.load %arg10[%c2_59, %c0_60] : memref<18x128xbf16, #tpu.memory_space<vmem>>, vector<16x128xbf16>
    %c2_61 = arith.constant 2 : index
    %c0_62 = arith.constant 0 : index
    %c0_63 = arith.constant 0 : index
    %67 = vector.load %arg5[%c2_61, %c0_62, %c0_63] : memref<3x128x128xbf16, #tpu.memory_space<vmem>>, vector<1x128x128xbf16>
    %68 = vector.shape_cast %67 : vector<1x128x128xbf16> to vector<128x128xbf16>
    %cst_64 = arith.constant dense<0.000000e+00> : vector<16x128xf32>
    %69 = tpu.matmul %66, %68, %cst_64 {dimension_numbers = #tpu.dot_dimension_numbers<[1], [0], [0], [1], [0, 0, 1, 1], [], []>} : vector<16x128xbf16>, vector<128x128xbf16>, vector<16x128xf32> -> vector<16x128xf32>
    %70 = arith.addf %65, %69 : vector<16x128xf32>
    %cst_65 = arith.constant 0.000000e+00 : f32
    %71 = vector.broadcast %cst_65 : f32 to vector<16x128xf32>
    %72 = arith.cmpf ogt, %70, %71 : vector<16x128xf32>
    %cst_66 = arith.constant 0.000000e+00 : f32
    %73 = vector.broadcast %cst_66 : f32 to vector<16x128xf32>
    %74 = arith.minimumf %70, %73 : vector<16x128xf32>
    %75 = math.exp %74 : vector<16x128xf32>
    %cst_67 = arith.constant 1.000000e+00 : f32
    %76 = vector.broadcast %cst_67 : f32 to vector<16x128xf32>
    %77 = arith.subf %75, %76 : vector<16x128xf32>
    %78 = arith.select %72, %70, %77 : vector<16x128xi1>, vector<16x128xf32>
    %c1_68 = arith.constant 1 : index
    %c0_69 = arith.constant 0 : index
    %79 = tpu.strided_load %arg8[%c1_68, %c0_69] {strides = array<i32: 2, 1>} : memref<34x128xf32, #tpu.memory_space<vmem>>, vector<16x128xf32>
    %80 = arith.truncf %79 : vector<16x128xf32> to vector<16x128xbf16>
    %c0_70 = arith.constant 0 : index
    %c0_71 = arith.constant 0 : index
    %c0_72 = arith.constant 0 : index
    %81 = vector.load %arg6[%c0_70, %c0_71, %c0_72] : memref<1x128x128xbf16, #tpu.memory_space<vmem>>, vector<1x128x128xbf16>
    %82 = vector.shape_cast %81 : vector<1x128x128xbf16> to vector<128x128xbf16>
    %cst_73 = arith.constant dense<0.000000e+00> : vector<16x128xf32>
    %83 = tpu.matmul %80, %82, %cst_73 {dimension_numbers = #tpu.dot_dimension_numbers<[1], [0], [0], [1], [0, 0, 1, 1], [], []>} : vector<16x128xbf16>, vector<128x128xbf16>, vector<16x128xf32> -> vector<16x128xf32>
    %cst_74 = arith.constant 0.000000e+00 : f32
    %84 = vector.broadcast %cst_74 : f32 to vector<16x128xf32>
    %85 = arith.cmpf ogt, %83, %84 : vector<16x128xf32>
    %cst_75 = arith.constant 0.000000e+00 : f32
    %86 = vector.broadcast %cst_75 : f32 to vector<16x128xf32>
    %87 = arith.minimumf %83, %86 : vector<16x128xf32>
    %88 = math.exp %87 : vector<16x128xf32>
    %cst_76 = arith.constant 1.000000e+00 : f32
    %89 = vector.broadcast %cst_76 : f32 to vector<16x128xf32>
    %90 = arith.subf %88, %89 : vector<16x128xf32>
    %91 = arith.select %85, %83, %90 : vector<16x128xi1>, vector<16x128xf32>
    %92 = arith.addf %78, %91 : vector<16x128xf32>
    %c0_77 = arith.constant 0 : index
    %c0_78 = arith.constant 0 : index
    %c0_79 = arith.constant 0 : index
    %93 = vector.load %arg7[%c0_77, %c0_78, %c0_79] : memref<1x16x128xf32, #tpu.memory_space<vmem>>, vector<1x16x128xf32>
    %94 = vector.shape_cast %93 : vector<1x16x128xf32> to vector<16x128xf32>
    %95 = vector.shape_cast %92 : vector<16x128xf32> to vector<1x16x128xf32>
    tpu.vector_store %arg7[%c0_77, %c0_78, %c0_79], %95 {strides = array<i32>} : memref<1x16x128xf32, #tpu.memory_space<vmem>>, vector<1x16x128xf32>,
    return
  }
  func.func @transform_0(%arg0: i32) -> (i32, i32, i32) {
    %c0_i32 = arith.constant 0 : i32
    %c0_i32_0 = arith.constant 0 : i32
    %c0_i32_1 = arith.constant 0 : i32
    return %arg0, %c0_i32, %c0_i32_0 : i32, i32, i32
  }
  func.func @transform_1(%arg0: i32) -> (i32, i32, i32) {
    %c0_i32 = arith.constant 0 : i32
    %c0_i32_0 = arith.constant 0 : i32
    %c0_i32_1 = arith.constant 0 : i32
    %c0_i32_2 = arith.constant 0 : i32
    return %c0_i32, %c0_i32_0, %c0_i32_1 : i32, i32, i32
  }
  func.func @transform_2(%arg0: i32) -> (i32, i32, i32) {
    %c0_i32 = arith.constant 0 : i32
    %c0_i32_0 = arith.constant 0 : i32
    %c0_i32_1 = arith.constant 0 : i32
    %c0_i32_2 = arith.constant 0 : i32
    return %c0_i32, %c0_i32_0, %c0_i32_1 : i32, i32, i32
  }
  func.func @transform_3(%arg0: i32) -> (i32, i32) {
    %c0_i32 = arith.constant 0 : i32
    %c0_i32_0 = arith.constant 0 : i32
    %c0_i32_1 = arith.constant 0 : i32
    return %c0_i32, %c0_i32_0 : i32, i32
  }
  func.func @transform_4(%arg0: i32) -> (i32, i32, i32) {
    %c0_i32 = arith.constant 0 : i32
    %c0_i32_0 = arith.constant 0 : i32
    %c0_i32_1 = arith.constant 0 : i32
    %c0_i32_2 = arith.constant 0 : i32
    return %c0_i32, %c0_i32_0, %c0_i32_1 : i32, i32, i32
  }
  func.func @transform_5(%arg0: i32) -> (i32, i32, i32) {
    %c0_i32 = arith.constant 0 : i32
    %c0_i32_0 = arith.constant 0 : i32
    %c0_i32_1 = arith.constant 0 : i32
    %c0_i32_2 = arith.constant 0 : i32
    return %c0_i32, %c0_i32_0, %c0_i32_1 : i32, i32, i32
  }
  func.func @transform_6(%arg0: i32) -> (i32, i32, i32) {
    %c0_i32 = arith.constant 0 : i32
    %c0_i32_0 = arith.constant 0 : i32
    %c0_i32_1 = arith.constant 0 : i32
    return %arg0, %c0_i32, %c0_i32_0 : i32, i32, i32
  }
}

module attributes {stable_mosaic.version = 11 : i64} {
  func.func @_block_kernel(%arg0: i32, %arg1: memref<1x16x128xf32, #tpu.memory_space<vmem>>, %arg2: memref<3x128x128xbf16, #tpu.memory_space<vmem>>, %arg3: memref<1x128x128xbf16, #tpu.memory_space<vmem>>, %arg4: memref<1x128xf32, #tpu.memory_space<vmem>>, %arg5: memref<3x128x128xbf16, #tpu.memory_space<vmem>>, %arg6: memref<1x16x128xf32, #tpu.memory_space<vmem>>, %arg7: memref<18x128xf32, #tpu.memory_space<vmem>>, %arg8: memref<16x128xbf16, #tpu.memory_space<vmem>>, %arg9: memref<18x128xbf16, #tpu.memory_space<vmem>>) attributes {dimension_semantics = [#tpu.dimension_semantics<parallel>], iteration_bounds = array<i64: 2>, scalar_prefetch = 0 : i64, scratch_operands = 3 : i64, tpu.core_type = #tpu.core_type<tc>, window_params = [{transform_indices = @transform_0, window_bounds = array<i64: 1, 16, 128>}, {pipeline_mode = #tpu.pipeline_mode<synchronous>, transform_indices = @transform_1, window_bounds = array<i64: 3, 128, 128>}, {pipeline_mode = #tpu.pipeline_mode<synchronous>, transform_indices = @transform_2, window_bounds = array<i64: 1, 128, 128>}, {pipeline_mode = #tpu.pipeline_mode<synchronous>, transform_indices = @transform_3, window_bounds = array<i64: 1, 128>}, {pipeline_mode = #tpu.pipeline_mode<synchronous>, transform_indices = @transform_4, window_bounds = array<i64: 3, 128, 128>}, {transform_indices = @transform_5, window_bounds = array<i64: 1, 16, 128>}]} {
    %cst = arith.constant 0.000000e+00 : f32
    %0 = vector.broadcast %cst : f32 to vector<1x128xf32>
    %c0 = arith.constant 0 : index
    %c0_0 = arith.constant 0 : index
    %1 = vector.load %arg7[%c0, %c0_0] : memref<18x128xf32, #tpu.memory_space<vmem>>, vector<1x128xf32>
    tpu.vector_store %arg7[%c0, %c0_0], %0 {strides = array<i32>} : memref<18x128xf32, #tpu.memory_space<vmem>>, vector<1x128xf32>,
    %c17 = arith.constant 17 : index
    %c0_1 = arith.constant 0 : index
    %2 = vector.load %arg7[%c17, %c0_1] : memref<18x128xf32, #tpu.memory_space<vmem>>, vector<1x128xf32>
    tpu.vector_store %arg7[%c17, %c0_1], %0 {strides = array<i32>} : memref<18x128xf32, #tpu.memory_space<vmem>>, vector<1x128xf32>,
    %c0_2 = arith.constant 0 : index
    %c0_3 = arith.constant 0 : index
    %c0_4 = arith.constant 0 : index
    %3 = vector.load %arg1[%c0_2, %c0_3, %c0_4] : memref<1x16x128xf32, #tpu.memory_space<vmem>>, vector<1x16x128xf32>
    %4 = vector.shape_cast %3 : vector<1x16x128xf32> to vector<16x128xf32>
    %c1 = arith.constant 1 : index
    %c0_5 = arith.constant 0 : index
    %5 = vector.load %arg7[%c1, %c0_5] : memref<18x128xf32, #tpu.memory_space<vmem>>, vector<16x128xf32>
    tpu.vector_store %arg7[%c1, %c0_5], %4 {strides = array<i32>} : memref<18x128xf32, #tpu.memory_space<vmem>>, vector<16x128xf32>,
    %cst_6 = arith.constant 0.000000e+00 : f32
    %6 = vector.broadcast %cst_6 : f32 to vector<16x128xf32>
    %c0_7 = arith.constant 0 : index
    %c0_8 = arith.constant 0 : index
    %7 = vector.load %arg7[%c0_7, %c0_8] : memref<18x128xf32, #tpu.memory_space<vmem>>, vector<16x128xf32>
    %8 = arith.truncf %7 : vector<16x128xf32> to vector<16x128xbf16>
    %c0_9 = arith.constant 0 : index
    %c0_10 = arith.constant 0 : index
    %c0_11 = arith.constant 0 : index
    %9 = vector.load %arg2[%c0_9, %c0_10, %c0_11] : memref<3x128x128xbf16, #tpu.memory_space<vmem>>, vector<1x128x128xbf16>
    %10 = vector.shape_cast %9 : vector<1x128x128xbf16> to vector<128x128xbf16>
    %cst_12 = arith.constant dense<0.000000e+00> : vector<16x128xf32>
    %11 = tpu.matmul %8, %10, %cst_12 {dimension_numbers = #tpu.dot_dimension_numbers<[1], [0], [0], [1], [0, 0, 1, 1], [], []>} : vector<16x128xbf16>, vector<128x128xbf16>, vector<16x128xf32> -> vector<16x128xf32>
    %12 = arith.addf %6, %11 : vector<16x128xf32>
    %c1_13 = arith.constant 1 : index
    %c0_14 = arith.constant 0 : index
    %13 = vector.load %arg7[%c1_13, %c0_14] : memref<18x128xf32, #tpu.memory_space<vmem>>, vector<16x128xf32>
    %14 = arith.truncf %13 : vector<16x128xf32> to vector<16x128xbf16>
    %c1_15 = arith.constant 1 : index
    %c0_16 = arith.constant 0 : index
    %c0_17 = arith.constant 0 : index
    %15 = vector.load %arg2[%c1_15, %c0_16, %c0_17] : memref<3x128x128xbf16, #tpu.memory_space<vmem>>, vector<1x128x128xbf16>
    %16 = vector.shape_cast %15 : vector<1x128x128xbf16> to vector<128x128xbf16>
    %cst_18 = arith.constant dense<0.000000e+00> : vector<16x128xf32>
    %17 = tpu.matmul %14, %16, %cst_18 {dimension_numbers = #tpu.dot_dimension_numbers<[1], [0], [0], [1], [0, 0, 1, 1], [], []>} : vector<16x128xbf16>, vector<128x128xbf16>, vector<16x128xf32> -> vector<16x128xf32>
    %18 = arith.addf %12, %17 : vector<16x128xf32>
    %c2 = arith.constant 2 : index
    %c0_19 = arith.constant 0 : index
    %19 = vector.load %arg7[%c2, %c0_19] : memref<18x128xf32, #tpu.memory_space<vmem>>, vector<16x128xf32>
    %20 = arith.truncf %19 : vector<16x128xf32> to vector<16x128xbf16>
    %c2_20 = arith.constant 2 : index
    %c0_21 = arith.constant 0 : index
    %c0_22 = arith.constant 0 : index
    %21 = vector.load %arg2[%c2_20, %c0_21, %c0_22] : memref<3x128x128xbf16, #tpu.memory_space<vmem>>, vector<1x128x128xbf16>
    %22 = vector.shape_cast %21 : vector<1x128x128xbf16> to vector<128x128xbf16>
    %cst_23 = arith.constant dense<0.000000e+00> : vector<16x128xf32>
    %23 = tpu.matmul %20, %22, %cst_23 {dimension_numbers = #tpu.dot_dimension_numbers<[1], [0], [0], [1], [0, 0, 1, 1], [], []>} : vector<16x128xbf16>, vector<128x128xbf16>, vector<16x128xf32> -> vector<16x128xf32>
    %24 = arith.addf %18, %23 : vector<16x128xf32>
    %cst_24 = arith.constant 0.000000e+00 : f32
    %25 = vector.broadcast %cst_24 : f32 to vector<16x128xf32>
    %26 = arith.cmpf ogt, %24, %25 : vector<16x128xf32>
    %cst_25 = arith.constant 0.000000e+00 : f32
    %27 = vector.broadcast %cst_25 : f32 to vector<16x128xf32>
    %28 = arith.minimumf %24, %27 : vector<16x128xf32>
    %29 = math.exp %28 : vector<16x128xf32>
    %cst_26 = arith.constant 1.000000e+00 : f32
    %30 = vector.broadcast %cst_26 : f32 to vector<16x128xf32>
    %31 = arith.subf %29, %30 : vector<16x128xf32>
    %32 = arith.select %26, %24, %31 : vector<16x128xi1>, vector<16x128xf32>
    %33 = arith.truncf %32 : vector<16x128xf32> to vector<16x128xbf16>
    %c0_27 = arith.constant 0 : index
    %c0_28 = arith.constant 0 : index
    %34 = vector.load %arg8[%c0_27, %c0_28] : memref<16x128xbf16, #tpu.memory_space<vmem>>, vector<16x128xbf16>
    tpu.vector_store %arg8[%c0_27, %c0_28], %33 {strides = array<i32>} : memref<16x128xbf16, #tpu.memory_space<vmem>>, vector<16x128xbf16>,
    %c0_29 = arith.constant 0 : index
    %c0_30 = arith.constant 0 : index
    %35 = vector.load %arg8[%c0_29, %c0_30] : memref<16x128xbf16, #tpu.memory_space<vmem>>, vector<16x128xbf16>
    %c0_31 = arith.constant 0 : index
    %c0_32 = arith.constant 0 : index
    %c0_33 = arith.constant 0 : index
    %36 = vector.load %arg3[%c0_31, %c0_32, %c0_33] : memref<1x128x128xbf16, #tpu.memory_space<vmem>>, vector<1x128x128xbf16>
    %37 = vector.shape_cast %36 : vector<1x128x128xbf16> to vector<128x128xbf16>
    %cst_34 = arith.constant dense<0.000000e+00> : vector<16x128xf32>
    %38 = tpu.matmul %35, %37, %cst_34 {dimension_numbers = #tpu.dot_dimension_numbers<[1], [0], [0], [1], [0, 0, 1, 1], [], []>} : vector<16x128xbf16>, vector<128x128xbf16>, vector<16x128xf32> -> vector<16x128xf32>
    %c0_35 = arith.constant 0 : index
    %c0_36 = arith.constant 0 : index
    %39 = vector.load %arg4[%c0_35, %c0_36] : memref<1x128xf32, #tpu.memory_space<vmem>>, vector<1x128xf32>
    %40 = vector.broadcast %39 : vector<1x128xf32> to vector<16x128xf32>
    %41 = arith.addf %38, %40 : vector<16x128xf32>
    %cst_37 = arith.constant 0.000000e+00 : bf16
    %42 = vector.broadcast %cst_37 : bf16 to vector<1x128xbf16>
    %c0_38 = arith.constant 0 : index
    %c0_39 = arith.constant 0 : index
    %43 = vector.load %arg9[%c0_38, %c0_39] : memref<18x128xbf16, #tpu.memory_space<vmem>>, vector<1x128xbf16>
    tpu.vector_store %arg9[%c0_38, %c0_39], %42 {strides = array<i32>} : memref<18x128xbf16, #tpu.memory_space<vmem>>, vector<1x128xbf16>,
    %c17_40 = arith.constant 17 : index
    %c0_41 = arith.constant 0 : index
    %44 = vector.load %arg9[%c17_40, %c0_41] : memref<18x128xbf16, #tpu.memory_space<vmem>>, vector<1x128xbf16>
    tpu.vector_store %arg9[%c17_40, %c0_41], %42 {strides = array<i32>} : memref<18x128xbf16, #tpu.memory_space<vmem>>, vector<1x128xbf16>,
    %cst_42 = arith.constant 0.000000e+00 : f32
    %45 = vector.broadcast %cst_42 : f32 to vector<16x128xf32>
    %46 = arith.cmpf ogt, %41, %45 : vector<16x128xf32>
    %cst_43 = arith.constant 0.000000e+00 : f32
    %47 = vector.broadcast %cst_43 : f32 to vector<16x128xf32>
    %48 = arith.minimumf %41, %47 : vector<16x128xf32>
    %49 = math.exp %48 : vector<16x128xf32>
    %cst_44 = arith.constant 1.000000e+00 : f32
    %50 = vector.broadcast %cst_44 : f32 to vector<16x128xf32>
    %51 = arith.subf %49, %50 : vector<16x128xf32>
    %52 = arith.select %46, %41, %51 : vector<16x128xi1>, vector<16x128xf32>
    %53 = arith.truncf %52 : vector<16x128xf32> to vector<16x128xbf16>
    %c1_45 = arith.constant 1 : index
    %c0_46 = arith.constant 0 : index
    %54 = vector.load %arg9[%c1_45, %c0_46] : memref<18x128xbf16, #tpu.memory_space<vmem>>, vector<16x128xbf16>
    tpu.vector_store %arg9[%c1_45, %c0_46], %53 {strides = array<i32>} : memref<18x128xbf16, #tpu.memory_space<vmem>>, vector<16x128xbf16>,
    %cst_47 = arith.constant 0.000000e+00 : f32
    %55 = vector.broadcast %cst_47 : f32 to vector<16x128xf32>
    %c0_48 = arith.constant 0 : index
    %c0_49 = arith.constant 0 : index
    %56 = vector.load %arg9[%c0_48, %c0_49] : memref<18x128xbf16, #tpu.memory_space<vmem>>, vector<16x128xbf16>
    %c0_50 = arith.constant 0 : index
    %c0_51 = arith.constant 0 : index
    %c0_52 = arith.constant 0 : index
    %57 = vector.load %arg5[%c0_50, %c0_51, %c0_52] : memref<3x128x128xbf16, #tpu.memory_space<vmem>>, vector<1x128x128xbf16>
    %58 = vector.shape_cast %57 : vector<1x128x128xbf16> to vector<128x128xbf16>
    %cst_53 = arith.constant dense<0.000000e+00> : vector<16x128xf32>
    %59 = tpu.matmul %56, %58, %cst_53 {dimension_numbers = #tpu.dot_dimension_numbers<[1], [0], [0], [1], [0, 0, 1, 1], [], []>} : vector<16x128xbf16>, vector<128x128xbf16>, vector<16x128xf32> -> vector<16x128xf32>
    %60 = arith.addf %55, %59 : vector<16x128xf32>
    %c1_54 = arith.constant 1 : index
    %c0_55 = arith.constant 0 : index
    %61 = vector.load %arg9[%c1_54, %c0_55] : memref<18x128xbf16, #tpu.memory_space<vmem>>, vector<16x128xbf16>
    %c1_56 = arith.constant 1 : index
    %c0_57 = arith.constant 0 : index
    %c0_58 = arith.constant 0 : index
    %62 = vector.load %arg5[%c1_56, %c0_57, %c0_58] : memref<3x128x128xbf16, #tpu.memory_space<vmem>>, vector<1x128x128xbf16>
    %63 = vector.shape_cast %62 : vector<1x128x128xbf16> to vector<128x128xbf16>
    %cst_59 = arith.constant dense<0.000000e+00> : vector<16x128xf32>
    %64 = tpu.matmul %61, %63, %cst_59 {dimension_numbers = #tpu.dot_dimension_numbers<[1], [0], [0], [1], [0, 0, 1, 1], [], []>} : vector<16x128xbf16>, vector<128x128xbf16>, vector<16x128xf32> -> vector<16x128xf32>
    %65 = arith.addf %60, %64 : vector<16x128xf32>
    %c2_60 = arith.constant 2 : index
    %c0_61 = arith.constant 0 : index
    %66 = vector.load %arg9[%c2_60, %c0_61] : memref<18x128xbf16, #tpu.memory_space<vmem>>, vector<16x128xbf16>
    %c2_62 = arith.constant 2 : index
    %c0_63 = arith.constant 0 : index
    %c0_64 = arith.constant 0 : index
    %67 = vector.load %arg5[%c2_62, %c0_63, %c0_64] : memref<3x128x128xbf16, #tpu.memory_space<vmem>>, vector<1x128x128xbf16>
    %68 = vector.shape_cast %67 : vector<1x128x128xbf16> to vector<128x128xbf16>
    %cst_65 = arith.constant dense<0.000000e+00> : vector<16x128xf32>
    %69 = tpu.matmul %66, %68, %cst_65 {dimension_numbers = #tpu.dot_dimension_numbers<[1], [0], [0], [1], [0, 0, 1, 1], [], []>} : vector<16x128xbf16>, vector<128x128xbf16>, vector<16x128xf32> -> vector<16x128xf32>
    %70 = arith.addf %65, %69 : vector<16x128xf32>
    %cst_66 = arith.constant 0.000000e+00 : f32
    %71 = vector.broadcast %cst_66 : f32 to vector<16x128xf32>
    %72 = arith.cmpf ogt, %70, %71 : vector<16x128xf32>
    %cst_67 = arith.constant 0.000000e+00 : f32
    %73 = vector.broadcast %cst_67 : f32 to vector<16x128xf32>
    %74 = arith.minimumf %70, %73 : vector<16x128xf32>
    %75 = math.exp %74 : vector<16x128xf32>
    %cst_68 = arith.constant 1.000000e+00 : f32
    %76 = vector.broadcast %cst_68 : f32 to vector<16x128xf32>
    %77 = arith.subf %75, %76 : vector<16x128xf32>
    %78 = arith.select %72, %70, %77 : vector<16x128xi1>, vector<16x128xf32>
    %c0_69 = arith.constant 0 : index
    %c0_70 = arith.constant 0 : index
    %c0_71 = arith.constant 0 : index
    %79 = vector.load %arg1[%c0_69, %c0_70, %c0_71] : memref<1x16x128xf32, #tpu.memory_space<vmem>>, vector<1x16x128xf32>
    %80 = vector.shape_cast %79 : vector<1x16x128xf32> to vector<16x128xf32>
    %81 = arith.addf %78, %80 : vector<16x128xf32>
    %c0_72 = arith.constant 0 : index
    %c0_73 = arith.constant 0 : index
    %c0_74 = arith.constant 0 : index
    %82 = vector.load %arg6[%c0_72, %c0_73, %c0_74] : memref<1x16x128xf32, #tpu.memory_space<vmem>>, vector<1x16x128xf32>
    %83 = vector.shape_cast %82 : vector<1x16x128xf32> to vector<16x128xf32>
    %84 = vector.shape_cast %81 : vector<16x128xf32> to vector<1x16x128xf32>
    tpu.vector_store %arg6[%c0_72, %c0_73, %c0_74], %84 {strides = array<i32>} : memref<1x16x128xf32, #tpu.memory_space<vmem>>, vector<1x16x128xf32>,
    return
  }
  func.func @transform_0(%arg0: i32) -> (i32, i32, i32) {
    %c0_i32 = arith.constant 0 : i32
    %c0_i32_0 = arith.constant 0 : i32
    %c0_i32_1 = arith.constant 0 : i32
    return %arg0, %c0_i32, %c0_i32_0 : i32, i32, i32
  }
  func.func @transform_1(%arg0: i32) -> (i32, i32, i32) {
    %c0_i32 = arith.constant 0 : i32
    %c0_i32_0 = arith.constant 0 : i32
    %c0_i32_1 = arith.constant 0 : i32
    %c0_i32_2 = arith.constant 0 : i32
    return %c0_i32, %c0_i32_0, %c0_i32_1 : i32, i32, i32
  }
  func.func @transform_2(%arg0: i32) -> (i32, i32, i32) {
    %c0_i32 = arith.constant 0 : i32
    %c0_i32_0 = arith.constant 0 : i32
    %c0_i32_1 = arith.constant 0 : i32
    %c0_i32_2 = arith.constant 0 : i32
    return %c0_i32, %c0_i32_0, %c0_i32_1 : i32, i32, i32
  }
  func.func @transform_3(%arg0: i32) -> (i32, i32) {
    %c0_i32 = arith.constant 0 : i32
    %c0_i32_0 = arith.constant 0 : i32
    %c0_i32_1 = arith.constant 0 : i32
    return %c0_i32, %c0_i32_0 : i32, i32
  }
  func.func @transform_4(%arg0: i32) -> (i32, i32, i32) {
    %c0_i32 = arith.constant 0 : i32
    %c0_i32_0 = arith.constant 0 : i32
    %c0_i32_1 = arith.constant 0 : i32
    %c0_i32_2 = arith.constant 0 : i32
    return %c0_i32, %c0_i32_0, %c0_i32_1 : i32, i32, i32
  }
  func.func @transform_5(%arg0: i32) -> (i32, i32, i32) {
    %c0_i32 = arith.constant 0 : i32
    %c0_i32_0 = arith.constant 0 : i32
    %c0_i32_1 = arith.constant 0 : i32
    return %arg0, %c0_i32, %c0_i32_0 : i32, i32, i32
  }
}

module attributes {stable_mosaic.version = 11 : i64} {
  func.func @_block_kernel(%arg0: i32, %arg1: memref<1x8x128xf32, #tpu.memory_space<vmem>>, %arg2: memref<3x128x128xbf16, #tpu.memory_space<vmem>>, %arg3: memref<1x128x256xbf16, #tpu.memory_space<vmem>>, %arg4: memref<1x256xf32, #tpu.memory_space<vmem>>, %arg5: memref<3x256x128xbf16, #tpu.memory_space<vmem>>, %arg6: memref<1x8x128xf32, #tpu.memory_space<vmem>>, %arg7: memref<10x128xf32, #tpu.memory_space<vmem>>, %arg8: memref<8x128xbf16, #tpu.memory_space<vmem>>, %arg9: memref<10x256xbf16, #tpu.memory_space<vmem>>) attributes {dimension_semantics = [#tpu.dimension_semantics<parallel>], iteration_bounds = array<i64: 2>, scalar_prefetch = 0 : i64, scratch_operands = 3 : i64, tpu.core_type = #tpu.core_type<tc>, window_params = [{transform_indices = @transform_0, window_bounds = array<i64: 1, 8, 128>}, {pipeline_mode = #tpu.pipeline_mode<synchronous>, transform_indices = @transform_1, window_bounds = array<i64: 3, 128, 128>}, {pipeline_mode = #tpu.pipeline_mode<synchronous>, transform_indices = @transform_2, window_bounds = array<i64: 1, 128, 256>}, {pipeline_mode = #tpu.pipeline_mode<synchronous>, transform_indices = @transform_3, window_bounds = array<i64: 1, 256>}, {pipeline_mode = #tpu.pipeline_mode<synchronous>, transform_indices = @transform_4, window_bounds = array<i64: 3, 256, 128>}, {transform_indices = @transform_5, window_bounds = array<i64: 1, 8, 128>}]} {
    %cst = arith.constant 0.000000e+00 : f32
    %0 = vector.broadcast %cst : f32 to vector<1x128xf32>
    %c0 = arith.constant 0 : index
    %c0_0 = arith.constant 0 : index
    %1 = vector.load %arg7[%c0, %c0_0] : memref<10x128xf32, #tpu.memory_space<vmem>>, vector<1x128xf32>
    tpu.vector_store %arg7[%c0, %c0_0], %0 {strides = array<i32>} : memref<10x128xf32, #tpu.memory_space<vmem>>, vector<1x128xf32>,
    %c9 = arith.constant 9 : index
    %c0_1 = arith.constant 0 : index
    %2 = vector.load %arg7[%c9, %c0_1] : memref<10x128xf32, #tpu.memory_space<vmem>>, vector<1x128xf32>
    tpu.vector_store %arg7[%c9, %c0_1], %0 {strides = array<i32>} : memref<10x128xf32, #tpu.memory_space<vmem>>, vector<1x128xf32>,
    %c0_2 = arith.constant 0 : index
    %c0_3 = arith.constant 0 : index
    %c0_4 = arith.constant 0 : index
    %3 = vector.load %arg1[%c0_2, %c0_3, %c0_4] : memref<1x8x128xf32, #tpu.memory_space<vmem>>, vector<1x8x128xf32>
    %4 = vector.shape_cast %3 : vector<1x8x128xf32> to vector<8x128xf32>
    %c1 = arith.constant 1 : index
    %c0_5 = arith.constant 0 : index
    %5 = vector.load %arg7[%c1, %c0_5] : memref<10x128xf32, #tpu.memory_space<vmem>>, vector<8x128xf32>
    tpu.vector_store %arg7[%c1, %c0_5], %4 {strides = array<i32>} : memref<10x128xf32, #tpu.memory_space<vmem>>, vector<8x128xf32>,
    %cst_6 = arith.constant 0.000000e+00 : f32
    %6 = vector.broadcast %cst_6 : f32 to vector<8x128xf32>
    %c0_7 = arith.constant 0 : index
    %c0_8 = arith.constant 0 : index
    %7 = vector.load %arg7[%c0_7, %c0_8] : memref<10x128xf32, #tpu.memory_space<vmem>>, vector<8x128xf32>
    %8 = arith.truncf %7 : vector<8x128xf32> to vector<8x128xbf16>
    %c0_9 = arith.constant 0 : index
    %c0_10 = arith.constant 0 : index
    %c0_11 = arith.constant 0 : index
    %9 = vector.load %arg2[%c0_9, %c0_10, %c0_11] : memref<3x128x128xbf16, #tpu.memory_space<vmem>>, vector<1x128x128xbf16>
    %10 = vector.shape_cast %9 : vector<1x128x128xbf16> to vector<128x128xbf16>
    %cst_12 = arith.constant dense<0.000000e+00> : vector<8x128xf32>
    %11 = tpu.matmul %8, %10, %cst_12 {dimension_numbers = #tpu.dot_dimension_numbers<[1], [0], [0], [1], [0, 0, 1, 1], [], []>} : vector<8x128xbf16>, vector<128x128xbf16>, vector<8x128xf32> -> vector<8x128xf32>
    %12 = arith.addf %6, %11 : vector<8x128xf32>
    %c1_13 = arith.constant 1 : index
    %c0_14 = arith.constant 0 : index
    %13 = vector.load %arg7[%c1_13, %c0_14] : memref<10x128xf32, #tpu.memory_space<vmem>>, vector<8x128xf32>
    %14 = arith.truncf %13 : vector<8x128xf32> to vector<8x128xbf16>
    %c1_15 = arith.constant 1 : index
    %c0_16 = arith.constant 0 : index
    %c0_17 = arith.constant 0 : index
    %15 = vector.load %arg2[%c1_15, %c0_16, %c0_17] : memref<3x128x128xbf16, #tpu.memory_space<vmem>>, vector<1x128x128xbf16>
    %16 = vector.shape_cast %15 : vector<1x128x128xbf16> to vector<128x128xbf16>
    %cst_18 = arith.constant dense<0.000000e+00> : vector<8x128xf32>
    %17 = tpu.matmul %14, %16, %cst_18 {dimension_numbers = #tpu.dot_dimension_numbers<[1], [0], [0], [1], [0, 0, 1, 1], [], []>} : vector<8x128xbf16>, vector<128x128xbf16>, vector<8x128xf32> -> vector<8x128xf32>
    %18 = arith.addf %12, %17 : vector<8x128xf32>
    %c2 = arith.constant 2 : index
    %c0_19 = arith.constant 0 : index
    %19 = vector.load %arg7[%c2, %c0_19] : memref<10x128xf32, #tpu.memory_space<vmem>>, vector<8x128xf32>
    %20 = arith.truncf %19 : vector<8x128xf32> to vector<8x128xbf16>
    %c2_20 = arith.constant 2 : index
    %c0_21 = arith.constant 0 : index
    %c0_22 = arith.constant 0 : index
    %21 = vector.load %arg2[%c2_20, %c0_21, %c0_22] : memref<3x128x128xbf16, #tpu.memory_space<vmem>>, vector<1x128x128xbf16>
    %22 = vector.shape_cast %21 : vector<1x128x128xbf16> to vector<128x128xbf16>
    %cst_23 = arith.constant dense<0.000000e+00> : vector<8x128xf32>
    %23 = tpu.matmul %20, %22, %cst_23 {dimension_numbers = #tpu.dot_dimension_numbers<[1], [0], [0], [1], [0, 0, 1, 1], [], []>} : vector<8x128xbf16>, vector<128x128xbf16>, vector<8x128xf32> -> vector<8x128xf32>
    %24 = arith.addf %18, %23 : vector<8x128xf32>
    %cst_24 = arith.constant 0.000000e+00 : f32
    %25 = vector.broadcast %cst_24 : f32 to vector<8x128xf32>
    %26 = arith.cmpf ogt, %24, %25 : vector<8x128xf32>
    %cst_25 = arith.constant 0.000000e+00 : f32
    %27 = vector.broadcast %cst_25 : f32 to vector<8x128xf32>
    %28 = arith.minimumf %24, %27 : vector<8x128xf32>
    %29 = math.exp %28 : vector<8x128xf32>
    %cst_26 = arith.constant 1.000000e+00 : f32
    %30 = vector.broadcast %cst_26 : f32 to vector<8x128xf32>
    %31 = arith.subf %29, %30 : vector<8x128xf32>
    %32 = arith.select %26, %24, %31 : vector<8x128xi1>, vector<8x128xf32>
    %33 = arith.truncf %32 : vector<8x128xf32> to vector<8x128xbf16>
    %c0_27 = arith.constant 0 : index
    %c0_28 = arith.constant 0 : index
    %34 = vector.load %arg8[%c0_27, %c0_28] : memref<8x128xbf16, #tpu.memory_space<vmem>>, vector<8x128xbf16>
    tpu.vector_store %arg8[%c0_27, %c0_28], %33 {strides = array<i32>} : memref<8x128xbf16, #tpu.memory_space<vmem>>, vector<8x128xbf16>,
    %c0_29 = arith.constant 0 : index
    %c0_30 = arith.constant 0 : index
    %35 = vector.load %arg8[%c0_29, %c0_30] : memref<8x128xbf16, #tpu.memory_space<vmem>>, vector<8x128xbf16>
    %c0_31 = arith.constant 0 : index
    %c0_32 = arith.constant 0 : index
    %c0_33 = arith.constant 0 : index
    %36 = vector.load %arg3[%c0_31, %c0_32, %c0_33] : memref<1x128x256xbf16, #tpu.memory_space<vmem>>, vector<1x128x256xbf16>
    %37 = vector.shape_cast %36 : vector<1x128x256xbf16> to vector<128x256xbf16>
    %cst_34 = arith.constant dense<0.000000e+00> : vector<8x256xf32>
    %38 = tpu.matmul %35, %37, %cst_34 {dimension_numbers = #tpu.dot_dimension_numbers<[1], [0], [0], [1], [0, 0, 1, 1], [], []>} : vector<8x128xbf16>, vector<128x256xbf16>, vector<8x256xf32> -> vector<8x256xf32>
    %c0_35 = arith.constant 0 : index
    %c0_36 = arith.constant 0 : index
    %39 = vector.load %arg4[%c0_35, %c0_36] : memref<1x256xf32, #tpu.memory_space<vmem>>, vector<1x256xf32>
    %40 = vector.broadcast %39 : vector<1x256xf32> to vector<8x256xf32>
    %41 = arith.addf %38, %40 : vector<8x256xf32>
    %cst_37 = arith.constant 0.000000e+00 : bf16
    %42 = vector.broadcast %cst_37 : bf16 to vector<1x256xbf16>
    %c0_38 = arith.constant 0 : index
    %c0_39 = arith.constant 0 : index
    %43 = vector.load %arg9[%c0_38, %c0_39] : memref<10x256xbf16, #tpu.memory_space<vmem>>, vector<1x256xbf16>
    tpu.vector_store %arg9[%c0_38, %c0_39], %42 {strides = array<i32>} : memref<10x256xbf16, #tpu.memory_space<vmem>>, vector<1x256xbf16>,
    %c9_40 = arith.constant 9 : index
    %c0_41 = arith.constant 0 : index
    %44 = vector.load %arg9[%c9_40, %c0_41] : memref<10x256xbf16, #tpu.memory_space<vmem>>, vector<1x256xbf16>
    tpu.vector_store %arg9[%c9_40, %c0_41], %42 {strides = array<i32>} : memref<10x256xbf16, #tpu.memory_space<vmem>>, vector<1x256xbf16>,
    %cst_42 = arith.constant 0.000000e+00 : f32
    %45 = vector.broadcast %cst_42 : f32 to vector<8x256xf32>
    %46 = arith.cmpf ogt, %41, %45 : vector<8x256xf32>
    %cst_43 = arith.constant 0.000000e+00 : f32
    %47 = vector.broadcast %cst_43 : f32 to vector<8x256xf32>
    %48 = arith.minimumf %41, %47 : vector<8x256xf32>
    %49 = math.exp %48 : vector<8x256xf32>
    %cst_44 = arith.constant 1.000000e+00 : f32
    %50 = vector.broadcast %cst_44 : f32 to vector<8x256xf32>
    %51 = arith.subf %49, %50 : vector<8x256xf32>
    %52 = arith.select %46, %41, %51 : vector<8x256xi1>, vector<8x256xf32>
    %53 = arith.truncf %52 : vector<8x256xf32> to vector<8x256xbf16>
    %c1_45 = arith.constant 1 : index
    %c0_46 = arith.constant 0 : index
    %54 = vector.load %arg9[%c1_45, %c0_46] : memref<10x256xbf16, #tpu.memory_space<vmem>>, vector<8x256xbf16>
    tpu.vector_store %arg9[%c1_45, %c0_46], %53 {strides = array<i32>} : memref<10x256xbf16, #tpu.memory_space<vmem>>, vector<8x256xbf16>,
    %cst_47 = arith.constant 0.000000e+00 : f32
    %55 = vector.broadcast %cst_47 : f32 to vector<8x128xf32>
    %c0_48 = arith.constant 0 : index
    %c0_49 = arith.constant 0 : index
    %56 = vector.load %arg9[%c0_48, %c0_49] : memref<10x256xbf16, #tpu.memory_space<vmem>>, vector<8x256xbf16>
    %c0_50 = arith.constant 0 : index
    %c0_51 = arith.constant 0 : index
    %c0_52 = arith.constant 0 : index
    %57 = vector.load %arg5[%c0_50, %c0_51, %c0_52] : memref<3x256x128xbf16, #tpu.memory_space<vmem>>, vector<1x256x128xbf16>
    %58 = vector.shape_cast %57 : vector<1x256x128xbf16> to vector<256x128xbf16>
    %cst_53 = arith.constant dense<0.000000e+00> : vector<8x128xf32>
    %59 = tpu.matmul %56, %58, %cst_53 {dimension_numbers = #tpu.dot_dimension_numbers<[1], [0], [0], [1], [0, 0, 1, 1], [], []>} : vector<8x256xbf16>, vector<256x128xbf16>, vector<8x128xf32> -> vector<8x128xf32>
    %60 = arith.addf %55, %59 : vector<8x128xf32>
    %c1_54 = arith.constant 1 : index
    %c0_55 = arith.constant 0 : index
    %61 = vector.load %arg9[%c1_54, %c0_55] : memref<10x256xbf16, #tpu.memory_space<vmem>>, vector<8x256xbf16>
    %c1_56 = arith.constant 1 : index
    %c0_57 = arith.constant 0 : index
    %c0_58 = arith.constant 0 : index
    %62 = vector.load %arg5[%c1_56, %c0_57, %c0_58] : memref<3x256x128xbf16, #tpu.memory_space<vmem>>, vector<1x256x128xbf16>
    %63 = vector.shape_cast %62 : vector<1x256x128xbf16> to vector<256x128xbf16>
    %cst_59 = arith.constant dense<0.000000e+00> : vector<8x128xf32>
    %64 = tpu.matmul %61, %63, %cst_59 {dimension_numbers = #tpu.dot_dimension_numbers<[1], [0], [0], [1], [0, 0, 1, 1], [], []>} : vector<8x256xbf16>, vector<256x128xbf16>, vector<8x128xf32> -> vector<8x128xf32>
    %65 = arith.addf %60, %64 : vector<8x128xf32>
    %c2_60 = arith.constant 2 : index
    %c0_61 = arith.constant 0 : index
    %66 = vector.load %arg9[%c2_60, %c0_61] : memref<10x256xbf16, #tpu.memory_space<vmem>>, vector<8x256xbf16>
    %c2_62 = arith.constant 2 : index
    %c0_63 = arith.constant 0 : index
    %c0_64 = arith.constant 0 : index
    %67 = vector.load %arg5[%c2_62, %c0_63, %c0_64] : memref<3x256x128xbf16, #tpu.memory_space<vmem>>, vector<1x256x128xbf16>
    %68 = vector.shape_cast %67 : vector<1x256x128xbf16> to vector<256x128xbf16>
    %cst_65 = arith.constant dense<0.000000e+00> : vector<8x128xf32>
    %69 = tpu.matmul %66, %68, %cst_65 {dimension_numbers = #tpu.dot_dimension_numbers<[1], [0], [0], [1], [0, 0, 1, 1], [], []>} : vector<8x256xbf16>, vector<256x128xbf16>, vector<8x128xf32> -> vector<8x128xf32>
    %70 = arith.addf %65, %69 : vector<8x128xf32>
    %cst_66 = arith.constant 0.000000e+00 : f32
    %71 = vector.broadcast %cst_66 : f32 to vector<8x128xf32>
    %72 = arith.cmpf ogt, %70, %71 : vector<8x128xf32>
    %cst_67 = arith.constant 0.000000e+00 : f32
    %73 = vector.broadcast %cst_67 : f32 to vector<8x128xf32>
    %74 = arith.minimumf %70, %73 : vector<8x128xf32>
    %75 = math.exp %74 : vector<8x128xf32>
    %cst_68 = arith.constant 1.000000e+00 : f32
    %76 = vector.broadcast %cst_68 : f32 to vector<8x128xf32>
    %77 = arith.subf %75, %76 : vector<8x128xf32>
    %78 = arith.select %72, %70, %77 : vector<8x128xi1>, vector<8x128xf32>
    %c0_69 = arith.constant 0 : index
    %c0_70 = arith.constant 0 : index
    %c0_71 = arith.constant 0 : index
    %79 = vector.load %arg1[%c0_69, %c0_70, %c0_71] : memref<1x8x128xf32, #tpu.memory_space<vmem>>, vector<1x8x128xf32>
    %80 = vector.shape_cast %79 : vector<1x8x128xf32> to vector<8x128xf32>
    %81 = arith.addf %78, %80 : vector<8x128xf32>
    %c0_72 = arith.constant 0 : index
    %c0_73 = arith.constant 0 : index
    %c0_74 = arith.constant 0 : index
    %82 = vector.load %arg6[%c0_72, %c0_73, %c0_74] : memref<1x8x128xf32, #tpu.memory_space<vmem>>, vector<1x8x128xf32>
    %83 = vector.shape_cast %82 : vector<1x8x128xf32> to vector<8x128xf32>
    %84 = vector.shape_cast %81 : vector<8x128xf32> to vector<1x8x128xf32>
    tpu.vector_store %arg6[%c0_72, %c0_73, %c0_74], %84 {strides = array<i32>} : memref<1x8x128xf32, #tpu.memory_space<vmem>>, vector<1x8x128xf32>,
    return
  }
  func.func @transform_0(%arg0: i32) -> (i32, i32, i32) {
    %c0_i32 = arith.constant 0 : i32
    %c0_i32_0 = arith.constant 0 : i32
    %c0_i32_1 = arith.constant 0 : i32
    return %arg0, %c0_i32, %c0_i32_0 : i32, i32, i32
  }
  func.func @transform_1(%arg0: i32) -> (i32, i32, i32) {
    %c0_i32 = arith.constant 0 : i32
    %c0_i32_0 = arith.constant 0 : i32
    %c0_i32_1 = arith.constant 0 : i32
    %c0_i32_2 = arith.constant 0 : i32
    return %c0_i32, %c0_i32_0, %c0_i32_1 : i32, i32, i32
  }
  func.func @transform_2(%arg0: i32) -> (i32, i32, i32) {
    %c0_i32 = arith.constant 0 : i32
    %c0_i32_0 = arith.constant 0 : i32
    %c0_i32_1 = arith.constant 0 : i32
    %c0_i32_2 = arith.constant 0 : i32
    return %c0_i32, %c0_i32_0, %c0_i32_1 : i32, i32, i32
  }
  func.func @transform_3(%arg0: i32) -> (i32, i32) {
    %c0_i32 = arith.constant 0 : i32
    %c0_i32_0 = arith.constant 0 : i32
    %c0_i32_1 = arith.constant 0 : i32
    return %c0_i32, %c0_i32_0 : i32, i32
  }
  func.func @transform_4(%arg0: i32) -> (i32, i32, i32) {
    %c0_i32 = arith.constant 0 : i32
    %c0_i32_0 = arith.constant 0 : i32
    %c0_i32_1 = arith.constant 0 : i32
    %c0_i32_2 = arith.constant 0 : i32
    return %c0_i32, %c0_i32_0, %c0_i32_1 : i32, i32, i32
  }
  func.func @transform_5(%arg0: i32) -> (i32, i32, i32) {
    %c0_i32 = arith.constant 0 : i32
    %c0_i32_0 = arith.constant 0 : i32
    %c0_i32_1 = arith.constant 0 : i32
    return %arg0, %c0_i32, %c0_i32_0 : i32, i32, i32
  }
}

module attributes {stable_mosaic.version = 11 : i64} {
  func.func @_block_kernel(%arg0: i32, %arg1: memref<1x16x128xf32, #tpu.memory_space<vmem>>, %arg2: memref<3x128x128xbf16, #tpu.memory_space<vmem>>, %arg3: memref<1x128x256xbf16, #tpu.memory_space<vmem>>, %arg4: memref<1x256xf32, #tpu.memory_space<vmem>>, %arg5: memref<3x256x128xbf16, #tpu.memory_space<vmem>>, %arg6: memref<1x128x128xbf16, #tpu.memory_space<vmem>>, %arg7: memref<1x8x128xf32, #tpu.memory_space<vmem>>, %arg8: memref<18x128xf32, #tpu.memory_space<vmem>>, %arg9: memref<8x128xbf16, #tpu.memory_space<vmem>>, %arg10: memref<10x256xbf16, #tpu.memory_space<vmem>>) attributes {dimension_semantics = [#tpu.dimension_semantics<parallel>], iteration_bounds = array<i64: 2>, scalar_prefetch = 0 : i64, scratch_operands = 3 : i64, tpu.core_type = #tpu.core_type<tc>, window_params = [{transform_indices = @transform_0, window_bounds = array<i64: 1, 16, 128>}, {pipeline_mode = #tpu.pipeline_mode<synchronous>, transform_indices = @transform_1, window_bounds = array<i64: 3, 128, 128>}, {pipeline_mode = #tpu.pipeline_mode<synchronous>, transform_indices = @transform_2, window_bounds = array<i64: 1, 128, 256>}, {pipeline_mode = #tpu.pipeline_mode<synchronous>, transform_indices = @transform_3, window_bounds = array<i64: 1, 256>}, {pipeline_mode = #tpu.pipeline_mode<synchronous>, transform_indices = @transform_4, window_bounds = array<i64: 3, 256, 128>}, {pipeline_mode = #tpu.pipeline_mode<synchronous>, transform_indices = @transform_5, window_bounds = array<i64: 1, 128, 128>}, {transform_indices = @transform_6, window_bounds = array<i64: 1, 8, 128>}]} {
    %cst = arith.constant 0.000000e+00 : f32
    %0 = vector.broadcast %cst : f32 to vector<1x128xf32>
    %c0 = arith.constant 0 : index
    %c0_0 = arith.constant 0 : index
    %1 = vector.load %arg8[%c0, %c0_0] : memref<18x128xf32, #tpu.memory_space<vmem>>, vector<1x128xf32>
    tpu.vector_store %arg8[%c0, %c0_0], %0 {strides = array<i32>} : memref<18x128xf32, #tpu.memory_space<vmem>>, vector<1x128xf32>,
    %c17 = arith.constant 17 : index
    %c0_1 = arith.constant 0 : index
    %2 = vector.load %arg8[%c17, %c0_1] : memref<18x128xf32, #tpu.memory_space<vmem>>, vector<1x128xf32>
    tpu.vector_store %arg8[%c17, %c0_1], %0 {strides = array<i32>} : memref<18x128xf32, #tpu.memory_space<vmem>>, vector<1x128xf32>,
    %c0_2 = arith.constant 0 : index
    %c0_3 = arith.constant 0 : index
    %c0_4 = arith.constant 0 : index
    %3 = vector.load %arg1[%c0_2, %c0_3, %c0_4] : memref<1x16x128xf32, #tpu.memory_space<vmem>>, vector<1x16x128xf32>
    %4 = vector.shape_cast %3 : vector<1x16x128xf32> to vector<16x128xf32>
    %c1 = arith.constant 1 : index
    %c0_5 = arith.constant 0 : index
    %5 = vector.load %arg8[%c1, %c0_5] : memref<18x128xf32, #tpu.memory_space<vmem>>, vector<16x128xf32>
    tpu.vector_store %arg8[%c1, %c0_5], %4 {strides = array<i32>} : memref<18x128xf32, #tpu.memory_space<vmem>>, vector<16x128xf32>,
    %cst_6 = arith.constant 0.000000e+00 : f32
    %6 = vector.broadcast %cst_6 : f32 to vector<8x128xf32>
    %c0_7 = arith.constant 0 : index
    %c0_8 = arith.constant 0 : index
    %7 = tpu.strided_load %arg8[%c0_7, %c0_8] {strides = array<i32: 2, 1>} : memref<18x128xf32, #tpu.memory_space<vmem>>, vector<8x128xf32>
    %8 = arith.truncf %7 : vector<8x128xf32> to vector<8x128xbf16>
    %c0_9 = arith.constant 0 : index
    %c0_10 = arith.constant 0 : index
    %c0_11 = arith.constant 0 : index
    %9 = vector.load %arg2[%c0_9, %c0_10, %c0_11] : memref<3x128x128xbf16, #tpu.memory_space<vmem>>, vector<1x128x128xbf16>
    %10 = vector.shape_cast %9 : vector<1x128x128xbf16> to vector<128x128xbf16>
    %cst_12 = arith.constant dense<0.000000e+00> : vector<8x128xf32>
    %11 = tpu.matmul %8, %10, %cst_12 {dimension_numbers = #tpu.dot_dimension_numbers<[1], [0], [0], [1], [0, 0, 1, 1], [], []>} : vector<8x128xbf16>, vector<128x128xbf16>, vector<8x128xf32> -> vector<8x128xf32>
    %12 = arith.addf %6, %11 : vector<8x128xf32>
    %c1_13 = arith.constant 1 : index
    %c0_14 = arith.constant 0 : index
    %13 = tpu.strided_load %arg8[%c1_13, %c0_14] {strides = array<i32: 2, 1>} : memref<18x128xf32, #tpu.memory_space<vmem>>, vector<8x128xf32>
    %14 = arith.truncf %13 : vector<8x128xf32> to vector<8x128xbf16>
    %c1_15 = arith.constant 1 : index
    %c0_16 = arith.constant 0 : index
    %c0_17 = arith.constant 0 : index
    %15 = vector.load %arg2[%c1_15, %c0_16, %c0_17] : memref<3x128x128xbf16, #tpu.memory_space<vmem>>, vector<1x128x128xbf16>
    %16 = vector.shape_cast %15 : vector<1x128x128xbf16> to vector<128x128xbf16>
    %cst_18 = arith.constant dense<0.000000e+00> : vector<8x128xf32>
    %17 = tpu.matmul %14, %16, %cst_18 {dimension_numbers = #tpu.dot_dimension_numbers<[1], [0], [0], [1], [0, 0, 1, 1], [], []>} : vector<8x128xbf16>, vector<128x128xbf16>, vector<8x128xf32> -> vector<8x128xf32>
    %18 = arith.addf %12, %17 : vector<8x128xf32>
    %c2 = arith.constant 2 : index
    %c0_19 = arith.constant 0 : index
    %19 = tpu.strided_load %arg8[%c2, %c0_19] {strides = array<i32: 2, 1>} : memref<18x128xf32, #tpu.memory_space<vmem>>, vector<8x128xf32>
    %20 = arith.truncf %19 : vector<8x128xf32> to vector<8x128xbf16>
    %c2_20 = arith.constant 2 : index
    %c0_21 = arith.constant 0 : index
    %c0_22 = arith.constant 0 : index
    %21 = vector.load %arg2[%c2_20, %c0_21, %c0_22] : memref<3x128x128xbf16, #tpu.memory_space<vmem>>, vector<1x128x128xbf16>
    %22 = vector.shape_cast %21 : vector<1x128x128xbf16> to vector<128x128xbf16>
    %cst_23 = arith.constant dense<0.000000e+00> : vector<8x128xf32>
    %23 = tpu.matmul %20, %22, %cst_23 {dimension_numbers = #tpu.dot_dimension_numbers<[1], [0], [0], [1], [0, 0, 1, 1], [], []>} : vector<8x128xbf16>, vector<128x128xbf16>, vector<8x128xf32> -> vector<8x128xf32>
    %24 = arith.addf %18, %23 : vector<8x128xf32>
    %cst_24 = arith.constant 0.000000e+00 : f32
    %25 = vector.broadcast %cst_24 : f32 to vector<8x128xf32>
    %26 = arith.cmpf ogt, %24, %25 : vector<8x128xf32>
    %cst_25 = arith.constant 0.000000e+00 : f32
    %27 = vector.broadcast %cst_25 : f32 to vector<8x128xf32>
    %28 = arith.minimumf %24, %27 : vector<8x128xf32>
    %29 = math.exp %28 : vector<8x128xf32>
    %cst_26 = arith.constant 1.000000e+00 : f32
    %30 = vector.broadcast %cst_26 : f32 to vector<8x128xf32>
    %31 = arith.subf %29, %30 : vector<8x128xf32>
    %32 = arith.select %26, %24, %31 : vector<8x128xi1>, vector<8x128xf32>
    %33 = arith.truncf %32 : vector<8x128xf32> to vector<8x128xbf16>
    %c0_27 = arith.constant 0 : index
    %c0_28 = arith.constant 0 : index
    %34 = vector.load %arg9[%c0_27, %c0_28] : memref<8x128xbf16, #tpu.memory_space<vmem>>, vector<8x128xbf16>
    tpu.vector_store %arg9[%c0_27, %c0_28], %33 {strides = array<i32>} : memref<8x128xbf16, #tpu.memory_space<vmem>>, vector<8x128xbf16>,
    %c0_29 = arith.constant 0 : index
    %c0_30 = arith.constant 0 : index
    %35 = vector.load %arg9[%c0_29, %c0_30] : memref<8x128xbf16, #tpu.memory_space<vmem>>, vector<8x128xbf16>
    %c0_31 = arith.constant 0 : index
    %c0_32 = arith.constant 0 : index
    %c0_33 = arith.constant 0 : index
    %36 = vector.load %arg3[%c0_31, %c0_32, %c0_33] : memref<1x128x256xbf16, #tpu.memory_space<vmem>>, vector<1x128x256xbf16>
    %37 = vector.shape_cast %36 : vector<1x128x256xbf16> to vector<128x256xbf16>
    %cst_34 = arith.constant dense<0.000000e+00> : vector<8x256xf32>
    %38 = tpu.matmul %35, %37, %cst_34 {dimension_numbers = #tpu.dot_dimension_numbers<[1], [0], [0], [1], [0, 0, 1, 1], [], []>} : vector<8x128xbf16>, vector<128x256xbf16>, vector<8x256xf32> -> vector<8x256xf32>
    %c0_35 = arith.constant 0 : index
    %c0_36 = arith.constant 0 : index
    %39 = vector.load %arg4[%c0_35, %c0_36] : memref<1x256xf32, #tpu.memory_space<vmem>>, vector<1x256xf32>
    %40 = vector.broadcast %39 : vector<1x256xf32> to vector<8x256xf32>
    %41 = arith.addf %38, %40 : vector<8x256xf32>
    %cst_37 = arith.constant 0.000000e+00 : bf16
    %42 = vector.broadcast %cst_37 : bf16 to vector<1x256xbf16>
    %c0_38 = arith.constant 0 : index
    %c0_39 = arith.constant 0 : index
    %43 = vector.load %arg10[%c0_38, %c0_39] : memref<10x256xbf16, #tpu.memory_space<vmem>>, vector<1x256xbf16>
    tpu.vector_store %arg10[%c0_38, %c0_39], %42 {strides = array<i32>} : memref<10x256xbf16, #tpu.memory_space<vmem>>, vector<1x256xbf16>,
    %c9 = arith.constant 9 : index
    %c0_40 = arith.constant 0 : index
    %44 = vector.load %arg10[%c9, %c0_40] : memref<10x256xbf16, #tpu.memory_space<vmem>>, vector<1x256xbf16>
    tpu.vector_store %arg10[%c9, %c0_40], %42 {strides = array<i32>} : memref<10x256xbf16, #tpu.memory_space<vmem>>, vector<1x256xbf16>,
    %cst_41 = arith.constant 0.000000e+00 : f32
    %45 = vector.broadcast %cst_41 : f32 to vector<8x256xf32>
    %46 = arith.cmpf ogt, %41, %45 : vector<8x256xf32>
    %cst_42 = arith.constant 0.000000e+00 : f32
    %47 = vector.broadcast %cst_42 : f32 to vector<8x256xf32>
    %48 = arith.minimumf %41, %47 : vector<8x256xf32>
    %49 = math.exp %48 : vector<8x256xf32>
    %cst_43 = arith.constant 1.000000e+00 : f32
    %50 = vector.broadcast %cst_43 : f32 to vector<8x256xf32>
    %51 = arith.subf %49, %50 : vector<8x256xf32>
    %52 = arith.select %46, %41, %51 : vector<8x256xi1>, vector<8x256xf32>
    %53 = arith.truncf %52 : vector<8x256xf32> to vector<8x256xbf16>
    %c1_44 = arith.constant 1 : index
    %c0_45 = arith.constant 0 : index
    %54 = vector.load %arg10[%c1_44, %c0_45] : memref<10x256xbf16, #tpu.memory_space<vmem>>, vector<8x256xbf16>
    tpu.vector_store %arg10[%c1_44, %c0_45], %53 {strides = array<i32>} : memref<10x256xbf16, #tpu.memory_space<vmem>>, vector<8x256xbf16>,
    %cst_46 = arith.constant 0.000000e+00 : f32
    %55 = vector.broadcast %cst_46 : f32 to vector<8x128xf32>
    %c0_47 = arith.constant 0 : index
    %c0_48 = arith.constant 0 : index
    %56 = vector.load %arg10[%c0_47, %c0_48] : memref<10x256xbf16, #tpu.memory_space<vmem>>, vector<8x256xbf16>
    %c0_49 = arith.constant 0 : index
    %c0_50 = arith.constant 0 : index
    %c0_51 = arith.constant 0 : index
    %57 = vector.load %arg5[%c0_49, %c0_50, %c0_51] : memref<3x256x128xbf16, #tpu.memory_space<vmem>>, vector<1x256x128xbf16>
    %58 = vector.shape_cast %57 : vector<1x256x128xbf16> to vector<256x128xbf16>
    %cst_52 = arith.constant dense<0.000000e+00> : vector<8x128xf32>
    %59 = tpu.matmul %56, %58, %cst_52 {dimension_numbers = #tpu.dot_dimension_numbers<[1], [0], [0], [1], [0, 0, 1, 1], [], []>} : vector<8x256xbf16>, vector<256x128xbf16>, vector<8x128xf32> -> vector<8x128xf32>
    %60 = arith.addf %55, %59 : vector<8x128xf32>
    %c1_53 = arith.constant 1 : index
    %c0_54 = arith.constant 0 : index
    %61 = vector.load %arg10[%c1_53, %c0_54] : memref<10x256xbf16, #tpu.memory_space<vmem>>, vector<8x256xbf16>
    %c1_55 = arith.constant 1 : index
    %c0_56 = arith.constant 0 : index
    %c0_57 = arith.constant 0 : index
    %62 = vector.load %arg5[%c1_55, %c0_56, %c0_57] : memref<3x256x128xbf16, #tpu.memory_space<vmem>>, vector<1x256x128xbf16>
    %63 = vector.shape_cast %62 : vector<1x256x128xbf16> to vector<256x128xbf16>
    %cst_58 = arith.constant dense<0.000000e+00> : vector<8x128xf32>
    %64 = tpu.matmul %61, %63, %cst_58 {dimension_numbers = #tpu.dot_dimension_numbers<[1], [0], [0], [1], [0, 0, 1, 1], [], []>} : vector<8x256xbf16>, vector<256x128xbf16>, vector<8x128xf32> -> vector<8x128xf32>
    %65 = arith.addf %60, %64 : vector<8x128xf32>
    %c2_59 = arith.constant 2 : index
    %c0_60 = arith.constant 0 : index
    %66 = vector.load %arg10[%c2_59, %c0_60] : memref<10x256xbf16, #tpu.memory_space<vmem>>, vector<8x256xbf16>
    %c2_61 = arith.constant 2 : index
    %c0_62 = arith.constant 0 : index
    %c0_63 = arith.constant 0 : index
    %67 = vector.load %arg5[%c2_61, %c0_62, %c0_63] : memref<3x256x128xbf16, #tpu.memory_space<vmem>>, vector<1x256x128xbf16>
    %68 = vector.shape_cast %67 : vector<1x256x128xbf16> to vector<256x128xbf16>
    %cst_64 = arith.constant dense<0.000000e+00> : vector<8x128xf32>
    %69 = tpu.matmul %66, %68, %cst_64 {dimension_numbers = #tpu.dot_dimension_numbers<[1], [0], [0], [1], [0, 0, 1, 1], [], []>} : vector<8x256xbf16>, vector<256x128xbf16>, vector<8x128xf32> -> vector<8x128xf32>
    %70 = arith.addf %65, %69 : vector<8x128xf32>
    %cst_65 = arith.constant 0.000000e+00 : f32
    %71 = vector.broadcast %cst_65 : f32 to vector<8x128xf32>
    %72 = arith.cmpf ogt, %70, %71 : vector<8x128xf32>
    %cst_66 = arith.constant 0.000000e+00 : f32
    %73 = vector.broadcast %cst_66 : f32 to vector<8x128xf32>
    %74 = arith.minimumf %70, %73 : vector<8x128xf32>
    %75 = math.exp %74 : vector<8x128xf32>
    %cst_67 = arith.constant 1.000000e+00 : f32
    %76 = vector.broadcast %cst_67 : f32 to vector<8x128xf32>
    %77 = arith.subf %75, %76 : vector<8x128xf32>
    %78 = arith.select %72, %70, %77 : vector<8x128xi1>, vector<8x128xf32>
    %c1_68 = arith.constant 1 : index
    %c0_69 = arith.constant 0 : index
    %79 = tpu.strided_load %arg8[%c1_68, %c0_69] {strides = array<i32: 2, 1>} : memref<18x128xf32, #tpu.memory_space<vmem>>, vector<8x128xf32>
    %80 = arith.truncf %79 : vector<8x128xf32> to vector<8x128xbf16>
    %c0_70 = arith.constant 0 : index
    %c0_71 = arith.constant 0 : index
    %c0_72 = arith.constant 0 : index
    %81 = vector.load %arg6[%c0_70, %c0_71, %c0_72] : memref<1x128x128xbf16, #tpu.memory_space<vmem>>, vector<1x128x128xbf16>
    %82 = vector.shape_cast %81 : vector<1x128x128xbf16> to vector<128x128xbf16>
    %cst_73 = arith.constant dense<0.000000e+00> : vector<8x128xf32>
    %83 = tpu.matmul %80, %82, %cst_73 {dimension_numbers = #tpu.dot_dimension_numbers<[1], [0], [0], [1], [0, 0, 1, 1], [], []>} : vector<8x128xbf16>, vector<128x128xbf16>, vector<8x128xf32> -> vector<8x128xf32>
    %cst_74 = arith.constant 0.000000e+00 : f32
    %84 = vector.broadcast %cst_74 : f32 to vector<8x128xf32>
    %85 = arith.cmpf ogt, %83, %84 : vector<8x128xf32>
    %cst_75 = arith.constant 0.000000e+00 : f32
    %86 = vector.broadcast %cst_75 : f32 to vector<8x128xf32>
    %87 = arith.minimumf %83, %86 : vector<8x128xf32>
    %88 = math.exp %87 : vector<8x128xf32>
    %cst_76 = arith.constant 1.000000e+00 : f32
    %89 = vector.broadcast %cst_76 : f32 to vector<8x128xf32>
    %90 = arith.subf %88, %89 : vector<8x128xf32>
    %91 = arith.select %85, %83, %90 : vector<8x128xi1>, vector<8x128xf32>
    %92 = arith.addf %78, %91 : vector<8x128xf32>
    %c0_77 = arith.constant 0 : index
    %c0_78 = arith.constant 0 : index
    %c0_79 = arith.constant 0 : index
    %93 = vector.load %arg7[%c0_77, %c0_78, %c0_79] : memref<1x8x128xf32, #tpu.memory_space<vmem>>, vector<1x8x128xf32>
    %94 = vector.shape_cast %93 : vector<1x8x128xf32> to vector<8x128xf32>
    %95 = vector.shape_cast %92 : vector<8x128xf32> to vector<1x8x128xf32>
    tpu.vector_store %arg7[%c0_77, %c0_78, %c0_79], %95 {strides = array<i32>} : memref<1x8x128xf32, #tpu.memory_space<vmem>>, vector<1x8x128xf32>,
    return
  }
  func.func @transform_0(%arg0: i32) -> (i32, i32, i32) {
    %c0_i32 = arith.constant 0 : i32
    %c0_i32_0 = arith.constant 0 : i32
    %c0_i32_1 = arith.constant 0 : i32
    return %arg0, %c0_i32, %c0_i32_0 : i32, i32, i32
  }
  func.func @transform_1(%arg0: i32) -> (i32, i32, i32) {
    %c0_i32 = arith.constant 0 : i32
    %c0_i32_0 = arith.constant 0 : i32
    %c0_i32_1 = arith.constant 0 : i32
    %c0_i32_2 = arith.constant 0 : i32
    return %c0_i32, %c0_i32_0, %c0_i32_1 : i32, i32, i32
  }
  func.func @transform_2(%arg0: i32) -> (i32, i32, i32) {
    %c0_i32 = arith.constant 0 : i32
    %c0_i32_0 = arith.constant 0 : i32
    %c0_i32_1 = arith.constant 0 : i32
    %c0_i32_2 = arith.constant 0 : i32
    return %c0_i32, %c0_i32_0, %c0_i32_1 : i32, i32, i32
  }
  func.func @transform_3(%arg0: i32) -> (i32, i32) {
    %c0_i32 = arith.constant 0 : i32
    %c0_i32_0 = arith.constant 0 : i32
    %c0_i32_1 = arith.constant 0 : i32
    return %c0_i32, %c0_i32_0 : i32, i32
  }
  func.func @transform_4(%arg0: i32) -> (i32, i32, i32) {
    %c0_i32 = arith.constant 0 : i32
    %c0_i32_0 = arith.constant 0 : i32
    %c0_i32_1 = arith.constant 0 : i32
    %c0_i32_2 = arith.constant 0 : i32
    return %c0_i32, %c0_i32_0, %c0_i32_1 : i32, i32, i32
  }
  func.func @transform_5(%arg0: i32) -> (i32, i32, i32) {
    %c0_i32 = arith.constant 0 : i32
    %c0_i32_0 = arith.constant 0 : i32
    %c0_i32_1 = arith.constant 0 : i32
    %c0_i32_2 = arith.constant 0 : i32
    return %c0_i32, %c0_i32_0, %c0_i32_1 : i32, i32, i32
  }
  func.func @transform_6(%arg0: i32) -> (i32, i32, i32) {
    %c0_i32 = arith.constant 0 : i32
    %c0_i32_0 = arith.constant 0 : i32
    %c0_i32_1 = arith.constant 0 : i32
    return %arg0, %c0_i32, %c0_i32_0 : i32, i32, i32
  }
}

module attributes {stable_mosaic.version = 11 : i64} {
  func.func @_head_kernel(%arg0: i32, %arg1: memref<2x8x128xf32, #tpu.memory_space<vmem>>, %arg2: memref<1x128xf32, #tpu.memory_space<vmem>>, %arg3: memref<1x128xf32, #tpu.memory_space<vmem>>, %arg4: memref<128x3xf32, #tpu.memory_space<vmem>>, %arg5: memref<1x3xf32, #tpu.memory_space<vmem>>, %arg6: memref<2x3xf32, #tpu.memory_space<vmem>>) attributes {dimension_semantics = [#tpu.dimension_semantics<arbitrary>], iteration_bounds = array<i64: 1>, scalar_prefetch = 0 : i64, scratch_operands = 0 : i64, tpu.core_type = #tpu.core_type<tc>, window_params = [{pipeline_mode = #tpu.pipeline_mode<synchronous>, transform_indices = @transform_0, window_bounds = array<i64: 2, 8, 128>}, {pipeline_mode = #tpu.pipeline_mode<synchronous>, transform_indices = @transform_1, window_bounds = array<i64: 1, 128>}, {pipeline_mode = #tpu.pipeline_mode<synchronous>, transform_indices = @transform_2, window_bounds = array<i64: 1, 128>}, {pipeline_mode = #tpu.pipeline_mode<synchronous>, transform_indices = @transform_3, window_bounds = array<i64: 128, 3>}, {pipeline_mode = #tpu.pipeline_mode<synchronous>, transform_indices = @transform_4, window_bounds = array<i64: 1, 3>}, {pipeline_mode = #tpu.pipeline_mode<synchronous>, transform_indices = @transform_5, window_bounds = array<i64: 2, 3>}]} {
    %c0 = arith.constant 0 : index
    %c0_0 = arith.constant 0 : index
    %c0_1 = arith.constant 0 : index
    %0 = vector.load %arg1[%c0, %c0_0, %c0_1] : memref<2x8x128xf32, #tpu.memory_space<vmem>>, vector<2x8x128xf32>
    %cst = arith.constant dense<0.000000e+00> : vector<2x128xf32>
    %1 = vector.multi_reduction <add>, %0, %cst [1] : vector<2x8x128xf32> to vector<2x128xf32>
    %cst_2 = arith.constant 8.000000e+00 : f32
    %2 = vector.broadcast %cst_2 : f32 to vector<2x128xf32>
    %3 = arith.divf %1, %2 : vector<2x128xf32>
    %cst_3 = arith.constant dense<0xFF800000> : vector<2x128xf32>
    %4 = vector.multi_reduction <maximumf>, %0, %cst_3 [1] : vector<2x8x128xf32> to vector<2x128xf32>
    %5 = arith.mulf %3, %4 : vector<2x128xf32>
    %6 = tpu.iota {dimensions = array<i32: 1>} : vector<2x128xi32>
    %c54_i32 = arith.constant 54 : i32
    %7 = vector.broadcast %c54_i32 : i32 to vector<2x128xi32>
    %8 = arith.cmpi slt, %6, %7 : vector<2x128xi32>
    %cst_4 = arith.constant dense<0.000000e+00> : vector<2xf32>
    %9 = vector.multi_reduction <add>, %5, %cst_4 [1] : vector<2x128xf32> to vector<2xf32>
    %10 = vector.shape_cast %9 : vector<2xf32> to vector<2x1xf32>
    %cst_5 = arith.constant 5.400000e+01 : f32
    %11 = vector.broadcast %cst_5 : f32 to vector<2x1xf32>
    %12 = arith.divf %10, %11 : vector<2x1xf32>
    %13 = vector.broadcast %12 : vector<2x1xf32> to vector<2x128xf32>
    %14 = arith.subf %5, %13 : vector<2x128xf32>
    %cst_6 = arith.constant 0.000000e+00 : f32
    %15 = vector.broadcast %cst_6 : f32 to vector<2x128xf32>
    %16 = arith.select %8, %14, %15 : vector<2x128xi1>, vector<2x128xf32>
    %17 = arith.mulf %16, %16 : vector<2x128xf32>
    %cst_7 = arith.constant dense<0.000000e+00> : vector<2xf32>
    %18 = vector.multi_reduction <add>, %17, %cst_7 [1] : vector<2x128xf32> to vector<2xf32>
    %19 = vector.shape_cast %18 : vector<2xf32> to vector<2x1xf32>
    %cst_8 = arith.constant 5.400000e+01 : f32
    %20 = vector.broadcast %cst_8 : f32 to vector<2x1xf32>
    %21 = arith.divf %19, %20 : vector<2x1xf32>
    %cst_9 = arith.constant 9.99999974E-6 : f32
    %22 = vector.broadcast %cst_9 : f32 to vector<2x1xf32>
    %23 = arith.addf %21, %22 : vector<2x1xf32>
    %24 = math.rsqrt %23 : vector<2x1xf32>
    %25 = vector.broadcast %24 : vector<2x1xf32> to vector<2x128xf32>
    %26 = arith.mulf %16, %25 : vector<2x128xf32>
    %c0_10 = arith.constant 0 : index
    %c0_11 = arith.constant 0 : index
    %27 = vector.load %arg2[%c0_10, %c0_11] : memref<1x128xf32, #tpu.memory_space<vmem>>, vector<1x128xf32>
    %28 = vector.broadcast %27 : vector<1x128xf32> to vector<2x128xf32>
    %29 = arith.mulf %26, %28 : vector<2x128xf32>
    %c0_12 = arith.constant 0 : index
    %c0_13 = arith.constant 0 : index
    %30 = vector.load %arg3[%c0_12, %c0_13] : memref<1x128xf32, #tpu.memory_space<vmem>>, vector<1x128xf32>
    %31 = vector.broadcast %30 : vector<1x128xf32> to vector<2x128xf32>
    %32 = arith.addf %29, %31 : vector<2x128xf32>
    %c0_14 = arith.constant 0 : index
    %c0_15 = arith.constant 0 : index
    %33 = vector.load %arg4[%c0_14, %c0_15] : memref<128x3xf32, #tpu.memory_space<vmem>>, vector<128x3xf32>
    %cst_16 = arith.constant dense<0.000000e+00> : vector<2x3xf32>
    %34 = tpu.matmul %32, %33, %cst_16 {dimension_numbers = #tpu.dot_dimension_numbers<[1], [0], [0], [1], [0, 0, 1, 1], [], []>} : vector<2x128xf32>, vector<128x3xf32>, vector<2x3xf32> -> vector<2x3xf32>
    %c0_17 = arith.constant 0 : index
    %c0_18 = arith.constant 0 : index
    %35 = vector.load %arg5[%c0_17, %c0_18] : memref<1x3xf32, #tpu.memory_space<vmem>>, vector<1x3xf32>
    %36 = vector.broadcast %35 : vector<1x3xf32> to vector<2x3xf32>
    %37 = arith.addf %34, %36 : vector<2x3xf32>
    %cst_19 = arith.constant 0.000000e+00 : f32
    %38 = vector.broadcast %cst_19 : f32 to vector<2x3xf32>
    %39 = arith.subf %38, %37 : vector<2x3xf32>
    %40 = math.exp %39 : vector<2x3xf32>
    %cst_20 = arith.constant 1.000000e+00 : f32
    %41 = vector.broadcast %cst_20 : f32 to vector<2x3xf32>
    %42 = arith.addf %41, %40 : vector<2x3xf32>
    %cst_21 = arith.constant 1.000000e+00 : f32
    %43 = vector.broadcast %cst_21 : f32 to vector<2x3xf32>
    %44 = arith.divf %43, %42 : vector<2x3xf32>
    %c0_22 = arith.constant 0 : index
    %c0_23 = arith.constant 0 : index
    %45 = vector.load %arg6[%c0_22, %c0_23] : memref<2x3xf32, #tpu.memory_space<vmem>>, vector<2x3xf32>
    tpu.vector_store %arg6[%c0_22, %c0_23], %44 {strides = array<i32>} : memref<2x3xf32, #tpu.memory_space<vmem>>, vector<2x3xf32>,
    return
  }
  func.func @transform_0(%arg0: i32) -> (i32, i32, i32) {
    %c0_i32 = arith.constant 0 : i32
    %c0_i32_0 = arith.constant 0 : i32
    %c0_i32_1 = arith.constant 0 : i32
    %c0_i32_2 = arith.constant 0 : i32
    return %c0_i32, %c0_i32_0, %c0_i32_1 : i32, i32, i32
  }
  func.func @transform_1(%arg0: i32) -> (i32, i32) {
    %c0_i32 = arith.constant 0 : i32
    %c0_i32_0 = arith.constant 0 : i32
    %c0_i32_1 = arith.constant 0 : i32
    return %c0_i32, %c0_i32_0 : i32, i32
  }
  func.func @transform_2(%arg0: i32) -> (i32, i32) {
    %c0_i32 = arith.constant 0 : i32
    %c0_i32_0 = arith.constant 0 : i32
    %c0_i32_1 = arith.constant 0 : i32
    return %c0_i32, %c0_i32_0 : i32, i32
  }
  func.func @transform_3(%arg0: i32) -> (i32, i32) {
    %c0_i32 = arith.constant 0 : i32
    %c0_i32_0 = arith.constant 0 : i32
    %c0_i32_1 = arith.constant 0 : i32
    return %c0_i32, %c0_i32_0 : i32, i32
  }
  func.func @transform_4(%arg0: i32) -> (i32, i32) {
    %c0_i32 = arith.constant 0 : i32
    %c0_i32_0 = arith.constant 0 : i32
    %c0_i32_1 = arith.constant 0 : i32
    return %c0_i32, %c0_i32_0 : i32, i32
  }
  func.func @transform_5(%arg0: i32) -> (i32, i32) {
    %c0_i32 = arith.constant 0 : i32
    %c0_i32_0 = arith.constant 0 : i32
    %c0_i32_1 = arith.constant 0 : i32
    return %c0_i32, %c0_i32_0 : i32, i32
  }
}

</mosaic_0001>

<bundles_post_ra>
// kernel: resnet1d_forward.11
= control target key start
LH: loop header
LB: loop body
LE: loop exit
PB: predicated region body
PF: predicated region fallthrough
CT: control target
= control target key end

     0   :  { %s635_s9 = smov 0   ;;  %s689_s0 = inlined_call_operand.vmem [shape: f32[2,96,1], index: 0, kind: input, shape index: {}]   ;;  %s690_s1 = inlined_call_operand.vmem [shape: f32[7,1,128], index: 1, kind: input, shape index: {}]   ;;  %s691_s2 = inlined_call_operand.vmem [shape: f32[2,32,128], index: 2, kind: output, shape index: {}]  }
   0x1 LB: > { %s561_s10 = sadd.s32 4294967295, %s616_s9   ;;  %p565_p0 = scmp.ge.s32.totalorder %s616_s9, 1  ;;  %s616_s9 = sphi %s635_s9, %s12_s9  }
   0x2   : > { %p112_p1 = scmp.lt.s32.totalorder %s616_s9, 3 }
   0x4   : > { %p113_p2 = pnand %p565_p0, %p112_p1 }
   0x5   : > { %p134_p3 = scmp.lt.s32.totalorder (!%p113_p2), %s561_s10, 1 }
   0x6   : > { %116 = sbr.rel (%p113_p2) target bundleno = 229 (0xe5), region = 28 }
   0xb   : > { %vm144_vm0 = vcmask 2048   ;;  %v618_v0 = vmov 0   ;;  %v619_v1 = vmov 0.0   ;;  %s693_s10 = smov (!%p134_p3, %s561_s10), 1  ;;  %vm159_vm1 = vcmask 7168  }
   0xc   : > { %601 = vset.pattern.permute.xlu1 %v618_v0  ;;  %600 = vset.pattern.permute.xlu0 %v618_v0  ;;  %145 = vst.msk [vmem:[#allocation2] sm:$0x7] %vm144_vm0, %v619_v1  ;;  %146 = vst.msk [vmem:[#allocation2 + $0x63] sm:$0x7] %vm144_vm0, %v619_v1  ;;  %s589_s11 = smul.u32 96, %s693_s10  ;;  %s588_s29 = sshll.u32 %s693_s10, 5 }
   0xd   : > { %v571_v60 = vld [vmem:[%s690_s1 + $0x1] ss:$0 sm:$0xff]  ;;  %v573_v61 = vld [vmem:[%s690_s1 + $0x2] ss:$0 sm:$0xff]  ;;  %v569_v63 = vld [vmem:[%s690_s1] ss:$0 sm:$0xff]  ;;  %s143_s4 = scalar_lea.vmem %s691_s2, %s588_s29 }
   0xe   : > { %s138_s14 = scalar_lea.vmem %s689_s0, %s589_s11 }
   0xf   : > { %v152_v2 = vld [vmem:[%s138_s14 + $0x28] sm:$0xff]  ;;  %v153_v3 = vld [vmem:[%s138_s14 + $0x30] sm:$0xff]  ;;  %v154_v4 = vld [vmem:[%s138_s14 + $0x38] sm:$0xff] }
  0x10   : > { %v155_v5 = vld [vmem:[%s138_s14 + $0x40] sm:$0xff]  ;;  %165 = vst.msk [vmem:[#allocation2 + $0x2b] sm:$0xff] %vm159_vm1, %v152_v2  ;;  %166 = vst.msk [vmem:[#allocation2 + $0x33] sm:$0xff] %vm159_vm1, %v153_v3  ;;  %v148_v7 = vld [vmem:[%s138_s14 + $0x8] sm:$0xff] }
  0x11   : > { %167 = vst.msk [vmem:[#allocation2 + $0x3b] sm:$0xff] %vm159_vm1, %v154_v4  ;;  %v147_v6 = vld [vmem:[%s138_s14] sm:$0xff]  ;;  %168 = vst.msk [vmem:[#allocation2 + $0x43] sm:$0xff] %vm159_vm1, %v155_v5  ;;  %v149_v8 = vld [vmem:[%s138_s14 + $0x10] sm:$0xff] }
  0x12   : > { %160 = vst.msk [vmem:[#allocation2 + $0x3] sm:$0xff] %vm159_vm1, %v147_v6  ;;  %161 = vst.msk [vmem:[#allocation2 + $0xb] sm:$0xff] %vm159_vm1, %v148_v7  ;;  %v156_v9 = vld [vmem:[%s138_s14 + $0x48] sm:$0xff]  ;;  %v157_v10 = vld [vmem:[%s138_s14 + $0x50] sm:$0xff] }
  0x13   : > { %162 = vst.msk [vmem:[#allocation2 + $0x13] sm:$0xff] %vm159_vm1, %v149_v8  ;;  %v158_v11 = vld [vmem:[%s138_s14 + $0x58] sm:$0xff]  ;;  %169 = vst.msk [vmem:[#allocation2 + $0x4b] sm:$0xff] %vm159_vm1, %v156_v9  ;;  %v151_v13 = vld [vmem:[%s138_s14 + $0x20] sm:$0xff] }
  0x14   : > { %170 = vst.msk [vmem:[#allocation2 + $0x53] sm:$0xff] %vm159_vm1, %v157_v10  ;;  %v150_v12 = vld [vmem:[%s138_s14 + $0x18] sm:$0xff]  ;;  %171 = vst.msk [vmem:[#allocation2 + $0x5b] sm:$0xff] %vm159_vm1, %v158_v11  ;;  %v575_v3 = vld [vmem:[%s690_s1 + $0x3] ss:$0 sm:$0xff] }
  0x15   : > { %163 = vst.msk [vmem:[#allocation2 + $0x1b] sm:$0xff] %vm159_vm1, %v150_v12  ;;  %164 = vst.msk [vmem:[#allocation2 + $0x23] sm:$0xff] %vm159_vm1, %v151_v13  ;;  %v577_v8 = vld [vmem:[%s690_s1 + $0x4] ss:$0 sm:$0xff] }
  0x18   : > { %v176_v14 = vld [vmem:[#allocation2 + $0x30] ss:$3 sm:$0xff]  ;;  %v219_v21 = vld [vmem:[#allocation2 + $0x31] ss:$3 sm:$0xff]  ;;  %v263_v25 = vld [vmem:[#allocation2 + $0x32] ss:$3 sm:$0xff] }
  0x19   : > { %192 = vperm.xlu1 %601, %v176_v14   ;;  %v307_v29 = vld [vmem:[#allocation2 + $0x33] ss:$3 sm:$0xff]  ;;  %v351_v33 = vld [vmem:[#allocation2 + $0x34] ss:$3 sm:$0xff]  ;;  %v395_v37 = vld [vmem:[#allocation2 + $0x35] ss:$3 sm:$0xff] }
  0x1a   : > { %v172_v15 = vld [vmem:[#allocation2] ss:$3 sm:$0xff]  ;;  %v215_v19 = vld [vmem:[#allocation2 + $0x1] ss:$3 sm:$0xff]  ;;  %v259_v23 = vld [vmem:[#allocation2 + $0x2] ss:$3 sm:$0xff] }
  0x1b   : > { %182 = vperm.xlu0 %600, %v172_v15   ;;  %v178_v16 = vld [vmem:[#allocation2 + $0x48] ss:$3 sm:$0xff]  ;;  %v221_v20 = vld [vmem:[#allocation2 + $0x49] ss:$3 sm:$0xff]  ;;  %v265_v24 = vld [vmem:[#allocation2 + $0x4a] ss:$3 sm:$0xff] }
  0x1c   : > { %v174_v17 = vld [vmem:[#allocation2 + $0x18] ss:$3 sm:$0xff]  ;;  %v217_v18 = vld [vmem:[#allocation2 + $0x19] ss:$3 sm:$0xff]  ;;  %v261_v22 = vld [vmem:[#allocation2 + $0x1a] ss:$3 sm:$0xff] }
  0x1d   : > { %197 = vperm.xlu1 %601, %v178_v16   ;;  %v305_v26 = vld [vmem:[#allocation2 + $0x1b] ss:$3 sm:$0xff]  ;;  %v303_v27 = vld [vmem:[#allocation2 + $0x3] ss:$3 sm:$0xff]  ;;  %v309_v28 = vld [vmem:[#allocation2 + $0x4b] ss:$3 sm:$0xff] }
  0x1e   : > { %v349_v30 = vld [vmem:[#allocation2 + $0x1c] ss:$3 sm:$0xff]  ;;  %v347_v31 = vld [vmem:[#allocation2 + $0x4] ss:$3 sm:$0xff]  ;;  %v353_v32 = vld [vmem:[#allocation2 + $0x4c] ss:$3 sm:$0xff] }
  0x1f   : > { %187 = vperm.xlu0 %600, %v174_v17   ;;  %v393_v34 = vld [vmem:[#allocation2 + $0x1d] ss:$3 sm:$0xff]  ;;  %v391_v35 = vld [vmem:[#allocation2 + $0x5] ss:$3 sm:$0xff]  ;;  %v397_v36 = vld [vmem:[#allocation2 + $0x4d] ss:$3 sm:$0xff] }
  0x20   : > { %v437_v38 = vld [vmem:[#allocation2 + $0x1e] ss:$3 sm:$0xff]  ;;  %v435_v39 = vld [vmem:[#allocation2 + $0x6] ss:$3 sm:$0xff]  ;;  %v441_v40 = vld [vmem:[#allocation2 + $0x4e] ss:$3 sm:$0xff] }
  0x21   : > { %231 = vperm.xlu1 %601, %v217_v18   ;;  %v439_v41 = vld [vmem:[#allocation2 + $0x36] ss:$3 sm:$0xff] }
  0x22   : > { %v579_v17 = vld [vmem:[%s690_s1 + $0x5] ss:$0 sm:$0xff] }
  0x23   : > { %226 = vperm.xlu0 %600, %v215_v19  }
  0x25   : > { %241 = vperm.xlu1 %601, %v221_v20  }
  0x27   : > { %236 = vperm.xlu0 %600, %v219_v21  }
  0x29   : > { %275 = vperm.xlu1 %601, %v261_v22  }
  0x2b   : > { %270 = vperm.xlu0 %600, %v259_v23  }
  0x2d   : > { %285 = vperm.xlu1 %601, %v265_v24  }
  0x2f   : > { %280 = vperm.xlu0 %600, %v263_v25  }
  0x31   : > { %319 = vperm.xlu1 %601, %v305_v26  }
  0x33   : > { %314 = vperm.xlu0 %600, %v303_v27  }
  0x35   : > { %329 = vperm.xlu1 %601, %v309_v28  }
  0x37   : > { %324 = vperm.xlu0 %600, %v307_v29  }
  0x39   : > { %363 = vperm.xlu1 %601, %v349_v30  }
  0x3b   : > { %358 = vperm.xlu0 %600, %v347_v31  }
  0x3d   : > { %373 = vperm.xlu1 %601, %v353_v32  }
  0x3f   : > { %368 = vperm.xlu0 %600, %v351_v33  }
  0x41   : > { %407 = vperm.xlu1 %601, %v393_v34  }
  0x43   : > { %402 = vperm.xlu0 %600, %v391_v35  }
  0x45   : > { %417 = vperm.xlu1 %601, %v397_v36   ;;  %v581_v36 = vld [vmem:[%s690_s1 + $0x6] ss:$0 sm:$0xff] }
  0x47   : > { %412 = vperm.xlu0 %600, %v395_v37  }
  0x49   : > { %451 = vperm.xlu1 %601, %v437_v38  }
  0x4b   : > { %446 = vperm.xlu0 %600, %v435_v39  }
  0x4d   : > { %461 = vperm.xlu1 %601, %v441_v40  }
  0x4f   : > { %456 = vperm.xlu0 %600, %v439_v41  }
  0x94   : > { %v193_v42 = vpop.permute.xlu1 %192 }
  0x95   : > { %v208_v22 = vmul.f32 %v569_v63, %v193_v42 }
  0x96   : > { %v183_v43 = vpop.permute.xlu0 %182 }
  0x97   : > { %v206_v6 = vmul.f32 %v569_v63, %v183_v43 }
  0x98   : > { %v198_v44 = vpop.permute.xlu1 %197 }
  0x99   : > { %v209_v18 = vmul.f32 %v569_v63, %v198_v44 }
  0x9a   : > { %v188_v45 = vpop.permute.xlu0 %187 }
  0x9b   : > { %v207_v4 = vmul.f32 %v569_v63, %v188_v45 }
  0x9c   : > { %v232_v46 = vpop.permute.xlu1 %231 }
  0x9d   : > { %v251_v0 = vmul.f32 %v571_v60, %v232_v46 }
  0x9e   : > { %v227_v47 = vpop.permute.xlu0 %226 }
  0x9f   : > { %v250_v2 = vmul.f32 %v571_v60, %v227_v47  ;;  %v255_v10 = vadd.f32 %v251_v0, %v207_v4 }
  0xa0   : > { %v242_v48 = vpop.permute.xlu1 %241 }
  0xa1   : > { %v253_v11 = vmul.f32 %v571_v60, %v242_v48  ;;  %v254_v14 = vadd.f32 %v250_v2, %v206_v6 }
  0xa2   : > { %v237_v49 = vpop.permute.xlu0 %236 }
  0xa3   : > { %v252_v15 = vmul.f32 %v571_v60, %v237_v49  ;;  %v257_v27 = vadd.f32 %v253_v11, %v209_v18 }
  0xa4   : > { %v276_v50 = vpop.permute.xlu1 %275 }
  0xa5   : > { %v295_v5 = vmul.f32 %v573_v61, %v276_v50  ;;  %v256_v32 = vadd.f32 %v252_v15, %v208_v22 }
  0xa6   : > { %v271_v51 = vpop.permute.xlu0 %270 }
  0xa7   : > { %v294_v7 = vmul.f32 %v573_v61, %v271_v51  ;;  %v299_v19 = vadd.f32 %v295_v5, %v255_v10 }
  0xa8   : > { %v286_v52 = vpop.permute.xlu1 %285 }
  0xa9   : > { %v297_v20 = vmul.f32 %v573_v61, %v286_v52  ;;  %v298_v23 = vadd.f32 %v294_v7, %v254_v14 }
  0xaa   : > { %v281_v53 = vpop.permute.xlu0 %280 }
  0xab   : > { %v296_v24 = vmul.f32 %v573_v61, %v281_v53  ;;  %v301_v37 = vadd.f32 %v297_v20, %v257_v27 }
  0xac   : > { %v320_v54 = vpop.permute.xlu1 %319 }
  0xad   : > { %v339_v12 = vmul.f32 %v575_v3, %v320_v54  ;;  %v300_v40 = vadd.f32 %v296_v24, %v256_v32 }
  0xae   : > { %v315_v55 = vpop.permute.xlu0 %314 }
  0xaf   : > { %v338_v16 = vmul.f32 %v575_v3, %v315_v55  ;;  %v343_v28 = vadd.f32 %v339_v12, %v299_v19 }
  0xb0   : > { %v330_v56 = vpop.permute.xlu1 %329 }
  0xb1   : > { %v341_v29 = vmul.f32 %v575_v3, %v330_v56  ;;  %v342_v33 = vadd.f32 %v338_v16, %v298_v23 }
  0xb2   : > { %v325_v57 = vpop.permute.xlu0 %324 }
  0xb3   : > { %v340_v34 = vmul.f32 %v575_v3, %v325_v57  ;;  %v345_v44 = vadd.f32 %v341_v29, %v301_v37 }
  0xb4   : > { %v364_v58 = vpop.permute.xlu1 %363 }
  0xb5   : > { %v383_v21 = vmul.f32 %v577_v8, %v364_v58  ;;  %v344_v49 = vadd.f32 %v340_v34, %v300_v40 }
  0xb6   : > { %v359_v59 = vpop.permute.xlu0 %358 }
  0xb7   : > { %v382_v25 = vmul.f32 %v577_v8, %v359_v59  ;;  %v387_v38 = vadd.f32 %v383_v21, %v343_v28 }
  0xb8   : > { %v374_v62 = vpop.permute.xlu1 %373 }
  0xb9   : > { %v385_v39 = vmul.f32 %v577_v8, %v374_v62  ;;  %v386_v41 = vadd.f32 %v382_v25, %v342_v33 }
  0xba   : > { %v369_v1 = vpop.permute.xlu0 %368 }
  0xbb   : > { %v384_v42 = vmul.f32 %v577_v8, %v369_v1  ;;  %v389_v53 = vadd.f32 %v385_v39, %v345_v44 }
  0xbc   : > { %v408_v9 = vpop.permute.xlu1 %407 }
  0xbd   : > { %v427_v30 = vmul.f32 %v579_v17, %v408_v9  ;;  %v388_v55 = vadd.f32 %v384_v42, %v344_v49 }
  0xbe   : > { %v403_v13 = vpop.permute.xlu0 %402 }
  0xbf   : > { %v426_v35 = vmul.f32 %v579_v17, %v403_v13  ;;  %v431_v45 = vadd.f32 %v427_v30, %v387_v38 }
  0xc0   : > { %v418_v26 = vpop.permute.xlu1 %417 }
  0xc1   : > { %v429_v46 = vmul.f32 %v579_v17, %v418_v26  ;;  %v430_v50 = vadd.f32 %v426_v35, %v386_v41 }
  0xc2   : > { %v413_v31 = vpop.permute.xlu0 %412 }
  0xc3   : > { %v428_v51 = vmul.f32 %v579_v17, %v413_v31  ;;  %v433_v58 = vadd.f32 %v429_v46, %v389_v53 }
  0xc4   : > { %v452_v43 = vpop.permute.xlu1 %451 }
  0xc5   : > { %v471_v47 = vmul.f32 %v581_v36, %v452_v43  ;;  %v432_v62 = vadd.f32 %v428_v51, %v388_v55 }
  0xc6   : > { %v447_v48 = vpop.permute.xlu0 %446 }
  0xc7   : > { %v470_v52 = vmul.f32 %v581_v36, %v447_v48  ;;  %v475_v54 = vadd.f32 %v471_v47, %v431_v45 }
  0xc8   : > { %v462_v57 = vpop.permute.xlu1 %461 }
  0xc9   : > { %v474_v56 = vadd.f32 %v470_v52, %v430_v50  ;;  %v483_v59 = vmin.f32 %v475_v54, 0.0  ;;  %v473_v60 = vmul.f32 %v581_v36, %v462_v57  ;;  %vm479_vm2 = vcmp.gt.f32.partialorder %v475_v54, 0.0 }
  0xca   : > { %v457_v61 = vpop.permute.xlu0 %456 }
  0xcb   : > { %v482_v63 = vmin.f32 %v474_v56, 0.0  ;;  %v472_v0 = vmul.f32 %v581_v36, %v457_v61  ;;  %v488_v1 = vmul.f32 1.442695, %v483_v59  ;;  %v477_v2 = vadd.f32 %v473_v60, %v433_v58 }
  0xcc   : > { %vm478_vm3 = vcmp.gt.f32.partialorder %v474_v56, 0.0 }
  0xcd   : > { %v486_v3 = vmul.f32 1.442695, %v482_v63  ;;  %v476_v4 = vadd.f32 %v472_v0, %v432_v62  ;;  %602 = vpow2.f32 %v488_v1  ;;  %v485_v5 = vmin.f32 %v477_v2, 0.0 }
  0xce   : > { %vm481_vm4 = vcmp.gt.f32.partialorder %v477_v2, 0.0 }
  0xcf   : > { %604 = vpow2.f32 %v486_v3  ;;  %v484_v6 = vmin.f32 %v476_v4, 0.0  ;;  %v492_v7 = vmul.f32 1.442695, %v485_v5  ;;  %vm480_vm5 = vcmp.gt.f32.partialorder %v476_v4, 0.0 }
  0xd1   : > { %v490_v8 = vmul.f32 1.442695, %v484_v6  ;;  %606 = vpow2.f32 %v492_v7 }
  0xd3   : > { %608 = vpow2.f32 %v490_v8 }
  0xda   : > { %v603_v9 = vpop.eup %602 }
  0xdb   : > { %v583_v11 = vadd.f32 -1.0, %v603_v9 }
  0xdc   : > { %v605_v10 = vpop.eup %604 }
  0xdd   : > { %v582_v12 = vadd.f32 -1.0, %v605_v10  ;;  %v499_v13 = vsel %vm479_vm2, %v475_v54, %v583_v11 }
  0xde   : > { %v607_v14 = vpop.eup %606  ;;  %503 = vst [vmem:[%s143_s4 + $0x8] sm:$0xff] %v499_v13 }
  0xdf   : > { %v498_v15 = vsel %vm478_vm3, %v474_v56, %v582_v12  ;;  %v585_v17 = vadd.f32 -1.0, %v607_v14 }
  0xe0   : > { %v609_v16 = vpop.eup %608  ;;  %502 = vst [vmem:[%s143_s4] sm:$0xff] %v498_v15 }
  0xe1   : > { %v584_v18 = vadd.f32 -1.0, %v609_v16  ;;  %v501_v19 = vsel %vm481_vm4, %v477_v2, %v585_v17 }
  0xe2   : > { %505 = vst [vmem:[%s143_s4 + $0x18] sm:$0xff] %v501_v19 }
  0xe3   : > { %v500_v20 = vsel %vm480_vm5, %v476_v4, %v584_v18 }
  0xe4   : > { %504 = vst [vmem:[%s143_s4 + $0x10] sm:$0xff] %v500_v20 }
  0xe5 PF: > { %s12_s9 = sadd.s32 1, %s616_s9  }
  0xe6   : > { %p9_p4 = scmp.ge.s32.totalorder %s12_s9, 4  }
  0xe8   :  { %11 = sbr.rel (!%p9_p4) target bundleno = 1 (0x1), region = 91 }

// kernel: resnet1d_forward.12
= control target key start
LH: loop header
LB: loop body
LE: loop exit
PB: predicated region body
PF: predicated region fallthrough
CT: control target
= control target key end

     0   :  { %s2122_s21 = smov 0   ;;  %s2401_s0 = inlined_call_operand.vmem [shape: f32[2,32,128], index: 0, kind: input, shape index: {}]   ;;  %s2402_s1 = inlined_call_operand.vmem [shape: bf16[3,128,128], index: 1, kind: input, shape index: {}]   ;;  %s2403_s2 = inlined_call_operand.vmem [shape: bf16[1,128,128], index: 2, kind: input, shape index: {}]   ;;  %s2404_s3 = inlined_call_operand.vmem [shape: f32[1,128], index: 3, kind: input, shape index: {}]   ;;  %s2405_s4 = inlined_call_operand.vmem [shape: bf16[3,128,128], index: 4, kind: input, shape index: {}]   ;;  %s2406_s5 = inlined_call_operand.vmem [shape: bf16[1,128,128], index: 5, kind: input, shape index: {}]   ;;  %s2407_s6 = inlined_call_operand.vmem [shape: f32[2,32,128], index: 6, kind: output, shape index: {}]  }
   0x1 LB: > { %s1536_s22 = sadd.s32 4294967295, %s2084_s21   ;;  %p1540_p0 = scmp.ge.s32.totalorder %s2084_s21, 1  ;;  %s2084_s21 = sphi %s2122_s21, %s16_s21  }
   0x2   : > { %p212_p1 = scmp.lt.s32.totalorder %s2084_s21, 3 }
   0x4   : > { %p213_p2 = pnand %p1540_p0, %p212_p1 }
   0x5   : > { %p242_p3 = scmp.lt.s32.totalorder (!%p213_p2), %s1536_s22, 1 }
   0x6   : > { %216 = sbr.rel (%p213_p2) target bundleno = 815 (0x32f), region = 44 }
   0xb   : > { %v1976_v0 = vld [vmem:[%s2402_s1 + $0x78] sm:$0xff]   ;;  %v1978_v2 = vld [vmem:[%s2402_s1 + $0x70] sm:$0xff]   ;;  %v2086_v3 = vmov 0.0   ;;  %v1980_v5 = vld [vmem:[%s2402_s1 + $0x68] sm:$0xff]   ;;  %s2413_s22 = smov (!%p242_p3, %s1536_s22), 1  ;;  %vm806_vm4 = vcmask 1040384  }
   0xc   : > { %v1977_v1 = vld [vmem:[%s2402_s1 + $0x38] sm:$0xff]   ;;  %1807 = vmatprep.subr.bf16.mxu0 %v1976_v0  ;;  %253 = vst [vmem:[#allocation2] sm:$0x1] %v2086_v3  ;;  %254 = vst [vmem:[#allocation2 + $0x21] sm:$0x1] %v2086_v3  ;;  %v1979_v4 = vld [vmem:[%s2402_s1 + $0x30] sm:$0xff]  }
   0xd   : > { %1827 = vmatprep.subr.bf16.mxu1 %v1977_v1  ;;  %1808 = vmatpush3.bf16.msra.mxu0 %v1976_v0  ;;  %v1981_v6 = vld [vmem:[%s2402_s1 + $0x28] sm:$0xff]   ;;  %v1982_v7 = vld [vmem:[%s2402_s1 + $0x60] sm:$0xff]   ;;  %s1706_s15 = sshll.u32 %s2413_s22, 5  ;;  %v1984_v9 = vld [vmem:[%s2402_s1 + $0x58] sm:$0xff]   ;;  %vm807_vm5 = vsmask.f32 256 }
   0xe   : > { %1828 = vmatpush3.bf16.msra.mxu1 %v1977_v1  ;;  %1809 = vmatprep.subr.bf16.mxu0 %v1978_v2  ;;  %v1983_v8 = vld [vmem:[%s2402_s1 + $0x20] sm:$0xff]   ;;  %v1985_v10 = vld [vmem:[%s2402_s1 + $0x18] sm:$0xff]   ;;  %s246_s24 = scalar_lea.vmem %s2401_s0, %s1706_s15  ;;  %v1986_v11 = vld [vmem:[%s2402_s1 + $0x50] sm:$0xff]   ;;  %vm812_vm7 = vsmask.f32 7938  ;;  %vm895_vm12 = vcmask 1043456   ;;  %s251_s8 = scalar_lea.vmem %s2407_s6, %s1706_s15 }
   0xf   : > { %1829 = vmatprep.subr.bf16.mxu1 %v1979_v4  ;;  %v1987_v12 = vld [vmem:[%s2402_s1 + $0x10] sm:$0xff]   ;;  %v255_v13 = vld [vmem:[%s246_s24] sm:$0xff]  ;;  %v256_v14 = vld [vmem:[%s246_s24 + $0x8] sm:$0xff]  ;;  %vm853_vm13 = vsmask.f32 4368 }
  0x10   : > { %v257_v15 = vld [vmem:[%s246_s24 + $0x10] sm:$0xff]  ;;  %259 = vst [vmem:[#allocation2 + $0x1] sm:$0xff] %v255_v13  ;;  %260 = vst [vmem:[#allocation2 + $0x9] sm:$0xff] %v256_v14  ;;  %v2174_v16 = vpack.c.bf16 %v256_v14, %v255_v13  ;;  %v258_v17 = vld [vmem:[%s246_s24 + $0x18] sm:$0xff] }
  0x11   : > { %1810 = vmatpush3.bf16.msra.mxu0 %v1978_v2  ;;  %261 = vst [vmem:[#allocation2 + $0x11] sm:$0xff] %v257_v15  ;;  %262 = vst [vmem:[#allocation2 + $0x19] sm:$0xff] %v258_v17  ;;  %v1988_v18 = vld [vmem:[%s2402_s1 + $0x48] sm:$0xff]   ;;  %v1990_v20 = vld [vmem:[%s2402_s1 + $0x40] sm:$0xff]   ;;  %v2192_v30 = vpack.c.bf16 %v258_v17, %v257_v15 }
  0x12   : > { %1830 = vmatpush3.bf16.msra.mxu1 %v1979_v4  ;;  %1811 = vmatprep.subr.bf16.mxu0 %v1980_v5  ;;  %v1989_v19 = vld [vmem:[%s2402_s1 + $0x8] sm:$0xff]   ;;  %v1991_v23 = vld [vmem:[%s2402_s1] sm:$0xff]   ;;  %v1992_v26 = vld [vmem:[%s2402_s1 + $0xb8] sm:$0xff]  }
  0x13   : > { %1831 = vmatprep.subr.bf16.mxu1 %v1981_v6  ;;  %1823 = vmatprep.mubr.bf16.mxu0 %v2174_v16  ;;  %v1993_v31 = vld [vmem:[%s2402_s1 + $0xb0] sm:$0xff]   ;;  %v1994_v34 = vld [vmem:[%s2402_s1 + $0xa8] sm:$0xff]   ;;  %v1995_v35 = vld [vmem:[%s2402_s1 + $0xa0] sm:$0xff]  }
  0x14   : > { %v1996_v36 = vld [vmem:[%s2402_s1 + $0x98] sm:$0xff]   ;;  %v1997_v37 = vld [vmem:[%s2402_s1 + $0x90] sm:$0xff]   ;;  %v1998_v38 = vld [vmem:[%s2402_s1 + $0x88] sm:$0xff]  }
  0x15   : > { %1812 = vmatpush3.bf16.msra.mxu0 %v1980_v5  ;;  %v1999_v39 = vld [vmem:[%s2402_s1 + $0x80] sm:$0xff]   ;;  %v2000_v43 = vld [vmem:[%s2403_s2 + $0x38] sm:$0xff]   ;;  %v2001_v44 = vld [vmem:[%s2403_s2 + $0x30] sm:$0xff]  }
  0x16   : > { %1832 = vmatpush3.bf16.msra.mxu1 %v1981_v6  ;;  %1813 = vmatprep.subr.bf16.mxu0 %v1982_v7  ;;  %v2002_v45 = vld [vmem:[%s2403_s2 + $0x28] sm:$0xff]   ;;  %v2003_v46 = vld [vmem:[%s2403_s2 + $0x20] sm:$0xff]   ;;  %v2004_v47 = vld [vmem:[%s2403_s2 + $0x18] sm:$0xff]  }
  0x17   : > { %1833 = vmatprep.subr.bf16.mxu1 %v1983_v8  ;;  %v263_v21 = vld [vmem:[#allocation2] sm:$0xff]  ;;  %v264_v22 = vld [vmem:[#allocation2 + $0x8] sm:$0xff]  ;;  %v2005_v48 = vld [vmem:[%s2403_s2 + $0x10] sm:$0xff]  }
  0x18   : > { %v267_v24 = vpack.c.bf16 %v264_v22, %v263_v21  ;;  %v265_v25 = vld [vmem:[#allocation2 + $0x10] sm:$0xff]  ;;  %v266_v27 = vld [vmem:[#allocation2 + $0x18] sm:$0xff]  ;;  %v502_v28 = vld [vmem:[#allocation2 + $0x2] sm:$0xff] }
  0x19   : > { %1814 = vmatpush3.bf16.msra.mxu0 %v1982_v7  ;;  %v503_v29 = vld [vmem:[#allocation2 + $0xa] sm:$0xff]  ;;  %v268_v32 = vpack.c.bf16 %v266_v27, %v265_v25  ;;  %v504_v40 = vld [vmem:[#allocation2 + $0x12] sm:$0xff]  ;;  %v505_v41 = vld [vmem:[#allocation2 + $0x1a] sm:$0xff] }
  0x1a   : > { %1834 = vmatpush3.bf16.msra.mxu1 %v1983_v8  ;;  %1815 = vmatprep.subr.bf16.mxu0 %v1984_v9  ;;  %v506_v33 = vpack.c.bf16 %v503_v29, %v502_v28  ;;  %v507_v42 = vpack.c.bf16 %v505_v41, %v504_v40  ;;  %v2006_v49 = vld [vmem:[%s2403_s2 + $0x8] sm:$0xff]   ;;  %v2007_v50 = vld [vmem:[%s2403_s2] sm:$0xff]   ;;  %vm2247_vm6 = vmand %vm806_vm4, %vm807_vm5 }
  0x1b   : > { %1835 = vmatprep.subr.bf16.mxu1 %v1985_v10  ;;  %1843 = vmatprep.mubr.bf16.mxu1 %v267_v24  ;;  %vm813_vm8 = vmand %vm806_vm4, %vm812_vm7  ;;  %v2013_v40 = vld [vmem:[%s2405_s4 + $0x28] sm:$0xff]  }
  0x1c   : > { %vm896_vm15 = vmand %vm895_vm12, %vm812_vm7 }
  0x1d   : > { %1816 = vmatpush3.bf16.msra.mxu0 %v1984_v9 }
  0x1e   : > { %1836 = vmatpush3.bf16.msra.mxu1 %v1985_v10  ;;  %1817 = vmatprep.subr.bf16.mxu0 %v1986_v11 }
  0x1f   : > { %1837 = vmatprep.subr.bf16.mxu1 %v1987_v12 }
  0x21   : > { %1818 = vmatpush3.bf16.msra.mxu0 %v1986_v11 }
  0x22   : > { %1838 = vmatpush3.bf16.msra.mxu1 %v1987_v12  ;;  %1819 = vmatprep.subr.bf16.mxu0 %v1988_v18 }
  0x23   : > { %1839 = vmatprep.subr.bf16.mxu1 %v1989_v19 }
  0x25   : > { %1820 = vmatpush3.bf16.msra.mxu0 %v1988_v18 }
  0x26   : > { %1840 = vmatpush3.bf16.msra.mxu1 %v1989_v19  ;;  %1821 = vmatprep.subr.bf16.mxu0 %v1990_v20 }
  0x27   : > { %1841 = vmatprep.subr.bf16.mxu1 %v1991_v23 }
  0x29   : > { %1822 = vmatpush3.bf16.msra.mxu0 %v1990_v20 }
  0x2a   : > { %1842 = vmatpush3.bf16.msra.mxu1 %v1991_v23  ;;  %1847 = vmatprep.subr.bf16.mxu0 %v1992_v26 }
  0x2b   : > { %1867 = vmatprep.subr.bf16.mxu1 %v2000_v43 }
  0x2c   : > { %1824 = vmatmul.mubr.bf16.vlgmr.msra.gmra.mxu0 %v2192_v30 }
  0x2d   : > { %1844 = vmatmul.mubr.bf16.vlgmr.msra.gmra.mxu1 %v268_v32  ;;  %1848 = vmatpush3.bf16.msra.mxu0 %v1992_v26 }
  0x2e   : > { %1849 = vmatprep.subr.bf16.mxu0 %v1993_v31  ;;  %1863 = vmatprep.mubr.bf16.mxu0 %v506_v33  ;;  %v2010_v33 = vld [vmem:[%s2405_s4 + $0x38] sm:$0xff]  }
  0x2f   : > { %1868 = vmatpush3.bf16.msra.mxu1 %v2000_v43  ;;  %v2015_v43 = vld [vmem:[%s2405_s4 + $0x20] sm:$0xff]  }
  0x30   : > { %1869 = vmatprep.subr.bf16.mxu1 %v2001_v44 }
  0x31   : > { %1850 = vmatpush3.bf16.msra.mxu0 %v1993_v31 }
  0x32   : > { %1851 = vmatprep.subr.bf16.mxu0 %v1994_v34 }
  0x33   : > { %1870 = vmatpush3.bf16.msra.mxu1 %v2001_v44  ;;  %v2016_v44 = vld [vmem:[%s2405_s4 + $0x68] sm:$0xff]  }
  0x34   : > { %1871 = vmatprep.subr.bf16.mxu1 %v2002_v45 }
  0x35   : > { %1852 = vmatpush3.bf16.msra.mxu0 %v1994_v34  ;;  %v2011_v34 = vld [vmem:[%s2405_s4 + $0x30] sm:$0xff]  }
  0x36   : > { %1853 = vmatprep.subr.bf16.mxu0 %v1995_v35 }
  0x37   : > { %1872 = vmatpush3.bf16.msra.mxu1 %v2002_v45  ;;  %v2017_v45 = vld [vmem:[%s2405_s4 + $0x18] sm:$0xff]  }
  0x38   : > { %1873 = vmatprep.subr.bf16.mxu1 %v2003_v46 }
  0x39   : > { %1854 = vmatpush3.bf16.msra.mxu0 %v1995_v35 }
  0x3a   : > { %1855 = vmatprep.subr.bf16.mxu0 %v1996_v36 }
  0x3b   : > { %1874 = vmatpush3.bf16.msra.mxu1 %v2003_v46  ;;  %v2018_v46 = vld [vmem:[%s2405_s4 + $0x60] sm:$0xff]  }
  0x3c   : > { %1875 = vmatprep.subr.bf16.mxu1 %v2004_v47 }
  0x3d   : > { %1856 = vmatpush3.bf16.msra.mxu0 %v1996_v36  ;;  %v809_v36 = vld [vmem:[#allocation4] sm:$0x1] }
  0x3e   : > { %1857 = vmatprep.subr.bf16.mxu0 %v1997_v37 }
  0x3f   : > { %1876 = vmatpush3.bf16.msra.mxu1 %v2004_v47  ;;  %v2019_v47 = vld [vmem:[%s2405_s4 + $0x10] sm:$0xff]  }
  0x40   : > { %1877 = vmatprep.subr.bf16.mxu1 %v2005_v48 }
  0x41   : > { %1858 = vmatpush3.bf16.msra.mxu0 %v1997_v37  ;;  %v810_v37 = vsel %vm2247_vm6, 0, %v809_v36 }
  0x42   : > { %1859 = vmatprep.subr.bf16.mxu0 %v1998_v38  ;;  %811 = vst [vmem:[#allocation4] sm:$0x1] %v810_v37 }
  0x43   : > { %1878 = vmatpush3.bf16.msra.mxu1 %v2005_v48  ;;  %v2020_v48 = vld [vmem:[%s2405_s4 + $0x58] sm:$0xff]  }
  0x44   : > { %1879 = vmatprep.subr.bf16.mxu1 %v2006_v49 }
  0x45   : > { %1860 = vmatpush3.bf16.msra.mxu0 %v1998_v38  ;;  %v2012_v38 = vld [vmem:[%s2405_s4 + $0x78] sm:$0xff]  }
  0x46   : > { %1861 = vmatprep.subr.bf16.mxu0 %v1999_v39 }
  0x47   : > { %1880 = vmatpush3.bf16.msra.mxu1 %v2006_v49  ;;  %v2021_v49 = vld [vmem:[%s2405_s4 + $0x8] sm:$0xff]  }
  0x48   : > { %1881 = vmatprep.subr.bf16.mxu1 %v2007_v50 }
  0x49   : > { %1862 = vmatpush3.bf16.msra.mxu0 %v1999_v39  ;;  %v814_v39 = vld [vmem:[#allocation4 + $0x10] sm:$0x1] }
  0x4a   : > { %v815_v41 = vsel %vm813_vm8, 0, %v814_v39  ;;  %1887 = vmatprep.subr.bf16.mxu0 %v2012_v38 }
  0x4b   : > { %1882 = vmatpush3.bf16.msra.mxu1 %v2007_v50  ;;  %816 = vst [vmem:[#allocation4 + $0x10] sm:$0x1] %v815_v41  ;;  %v2022_v50 = vld [vmem:[%s2405_s4 + $0x50] sm:$0xff]  }
  0x4c   : > { %1864 = vmatmul.mubr.bf16.vlgmr.msra.gmra.mxu0 %v507_v42  ;;  %1907 = vmatprep.subr.bf16.mxu1 %v2010_v33  ;;  %v2014_v42 = vld [vmem:[%s2405_s4 + $0x70] sm:$0xff]  }
  0x4d   : > { %1888 = vmatpush3.bf16.msra.mxu0 %v2012_v38 }
  0x4e   : > { %1889 = vmatprep.subr.bf16.mxu0 %v2014_v42 }
  0x51   : > { %1890 = vmatpush3.bf16.msra.mxu0 %v2014_v42 }
  0x52   : > { %1891 = vmatprep.subr.bf16.mxu0 %v2016_v44 }
  0x55   : > { %1892 = vmatpush3.bf16.msra.mxu0 %v2016_v44 }
  0x56   : > { %1893 = vmatprep.subr.bf16.mxu0 %v2018_v46 }
  0x59   : > { %1894 = vmatpush3.bf16.msra.mxu0 %v2018_v46 }
  0x5a   : > { %1895 = vmatprep.subr.bf16.mxu0 %v2020_v48 }
  0x5d   : > { %1896 = vmatpush3.bf16.msra.mxu0 %v2020_v48 }
  0x5e   : > { %1897 = vmatprep.subr.bf16.mxu0 %v2022_v50 }
  0x61   : > { %1898 = vmatpush3.bf16.msra.mxu0 %v2022_v50 }
  0xec   : > { %v1825_v51 = vpop.f32.mrf.mxu0 }
  0xed   : > { %v1845_v53 = vpop.f32.mrf.mxu1 }
  0xee   : > { %v390_v52 = vpop.f32.mrf.mxu0  ;;  %v496_v57 = vadd.f32 %v1845_v53, %v1825_v51  ;;  %v2023_v51 = vld [vmem:[%s2405_s4] sm:$0xff]   ;;  %v2296_v53 = vld [vmem:[%s2406_s5 + $0x38] sm:$0xff]  }
  0xef   : > { %v487_v55 = vpop.f32.mrf.mxu1 }
  0xf0   : > { %v1826_v54 = vpop.f32.mrf.mxu0  ;;  %v488_v60 = vadd.f32 %v487_v55, %v390_v52  ;;  %v2024_v52 = vld [vmem:[%s2405_s4 + $0x48] sm:$0xff]   ;;  %v2305_v55 = vld [vmem:[%s2405_s4 + $0xb8] sm:$0xff]  }
  0xf1   : > { %v1846_v58 = vpop.f32.mrf.mxu1  ;;  %1899 = vmatprep.subr.bf16.mxu0 %v2024_v52 }
  0xf2   : > { %v393_v56 = vpop.f32.mrf.mxu0  ;;  %v499_v63 = vadd.f32 %v1846_v58, %v1826_v54  ;;  %1900 = vmatpush3.bf16.msra.mxu0 %v2024_v52  ;;  %v2029_v54 = vld [vmem:[%s2405_s4 + $0x40] sm:$0xff]  }
  0xf3   : > { %v490_v0 = vpop.f32.mrf.mxu1  ;;  %1901 = vmatprep.subr.bf16.mxu0 %v2029_v54 }
  0xf4   : > { %v491_v7 = vadd.f32 %v490_v0, %v393_v56  ;;  %v1609_v56 = vld [vmem:[%s2404_s3] ss:$0 sm:$0xff] }
  0xf6   : > { %1902 = vmatpush3.bf16.msra.mxu0 %v2029_v54 }
  0xf7   : > { %1927 = vmatprep.subr.bf16.mxu0 %v2305_v55 }
 0x10c   : > { %v1865_v59 = vpop.f32.mrf.mxu0 }
 0x10d   : > { %v624_v61 = vadd.f32 %v1865_v59, %v496_v57 }
 0x10e   : > { %v607_v62 = vpop.f32.mrf.mxu0 }
 0x10f   : > { %v632_v1 = vmin.f32 %v624_v61, 0.0  ;;  %v622_v2 = vadd.f32 %v607_v62, %v488_v60  ;;  %vm628_vm0 = vcmp.gt.f32.partialorder %v624_v61, 0.0 }
 0x110   : > { %v1866_v3 = vpop.f32.mrf.mxu0 }
 0x111   : > { %v638_v4 = vmul.f32 1.442695, %v632_v1  ;;  %v630_v5 = vmin.f32 %v622_v2, 0.0  ;;  %v625_v6 = vadd.f32 %v1866_v3, %v499_v63  ;;  %vm626_vm2 = vcmp.gt.f32.partialorder %v622_v2, 0.0 }
 0x112   : > { %v610_v8 = vpop.f32.mrf.mxu0 }
 0x113   : > { %2046 = vpow2.f32 %v638_v4  ;;  %v634_v9 = vmul.f32 1.442695, %v630_v5  ;;  %v633_v10 = vmin.f32 %v625_v6, 0.0  ;;  %v623_v11 = vadd.f32 %v610_v8, %v491_v7 }
 0x114   : > { %vm629_vm1 = vcmp.gt.f32.partialorder %v625_v6, 0.0 }
 0x115   : > { %v640_v12 = vmul.f32 1.442695, %v633_v10  ;;  %2048 = vpow2.f32 %v634_v9  ;;  %v631_v13 = vmin.f32 %v623_v11, 0.0  ;;  %vm627_vm3 = vcmp.gt.f32.partialorder %v623_v11, 0.0 }
 0x117   : > { %2050 = vpow2.f32 %v640_v12  ;;  %v636_v14 = vmul.f32 1.442695, %v631_v13 }
 0x119   : > { %2052 = vpow2.f32 %v636_v14 }
 0x120   : > { %v2047_v15 = vpop.eup %2046 }
 0x121   : > { %v1603_v18 = vadd.f32 -1.0, %v2047_v15 }
 0x122   : > { %v2049_v17 = vpop.eup %2048 }
 0x123   : > { %v1601_v21 = vadd.f32 -1.0, %v2049_v17  ;;  %v648_v23 = vsel %vm628_vm0, %v624_v61, %v1603_v18  ;;  %vm2313_vm0 = vmor %vm807_vm5, %vm853_vm13 }
 0x124   : > { %v2051_v19 = vpop.eup %2050 }
 0x125   : > { %v1604_v20 = vadd.f32 -1.0, %v2051_v19  ;;  %v646_v27 = vsel %vm626_vm2, %v622_v2, %v1601_v21  ;;  %vm1197_vm2 = vcmask 1046528  }
 0x126   : > { %v2053_v22 = vpop.eup %2052 }
 0x127   : > { %v649_v24 = vsel %vm629_vm1, %v625_v6, %v1604_v20  ;;  %v1602_v26 = vadd.f32 -1.0, %v2053_v22  ;;  %vm957_vm1 = vsmask.f32 7424 }
 0x128   : > { %v1724_v25 = vpack.c.bf16 %v649_v24, %v648_v23 }
 0x129   : > { %v647_v28 = vsel %vm627_vm3, %v623_v11, %v1602_v26 }
 0x12a   : > { %1726 = vst [vmem:[#allocation3 + $0x8] sm:$0xff] %v1724_v25   ;;  %v1719_v29 = vpack.c.bf16 %v647_v28, %v646_v27 }
 0x12c   : > { %1720 = vst [vmem:[#allocation3] sm:$0xff] %v1719_v29  }
 0x131   : > { %v2009_v32 = vld [vmem:[#allocation3 + $0x8] sm:$0xff]  }
 0x133   : > { %v2008_v31 = vld [vmem:[#allocation3] sm:$0xff]  }
 0x134   : > { %1883 = vmatprep.mubr.bf16.mxu1 %v2008_v31  ;;  %v897_v31 = vld [vmem:[#allocation4] sm:$0xf] }
 0x135   : > { %1884 = vmatmul.mubr.bf16.vlgmr.msra.gmra.mxu1 %v2009_v32 }
 0x136   : > { %1908 = vmatpush3.bf16.msra.mxu1 %v2010_v33 }
 0x137   : > { %1909 = vmatprep.subr.bf16.mxu1 %v2011_v34 }
 0x13a   : > { %1910 = vmatpush3.bf16.msra.mxu1 %v2011_v34 }
 0x13b   : > { %1911 = vmatprep.subr.bf16.mxu1 %v2013_v40 }
 0x13e   : > { %1912 = vmatpush3.bf16.msra.mxu1 %v2013_v40  ;;  %v903_v40 = vld [vmem:[#allocation4 + $0x10] sm:$0x1] }
 0x13f   : > { %1913 = vmatprep.subr.bf16.mxu1 %v2015_v43 }
 0x142   : > { %1914 = vmatpush3.bf16.msra.mxu1 %v2015_v43 }
 0x143   : > { %1915 = vmatprep.subr.bf16.mxu1 %v2017_v45 }
 0x146   : > { %1916 = vmatpush3.bf16.msra.mxu1 %v2017_v45 }
 0x147   : > { %1917 = vmatprep.subr.bf16.mxu1 %v2019_v47 }
 0x14a   : > { %1918 = vmatpush3.bf16.msra.mxu1 %v2019_v47 }
 0x14b   : > { %1919 = vmatprep.subr.bf16.mxu1 %v2021_v49 }
 0x14e   : > { %1920 = vmatpush3.bf16.msra.mxu1 %v2021_v49 }
 0x14f   : > { %1921 = vmatprep.subr.bf16.mxu1 %v2023_v51 }
 0x152   : > { %1922 = vmatpush3.bf16.msra.mxu1 %v2023_v51 }
 0x153   : > { %1947 = vmatprep.subr.bf16.mxu1 %v2296_v53 }
 0x1f5   : > { %v1885_v57 = vpop.f32.mrf.mxu1 }
 0x1f6   : > { %v800_v58 = vadd.f32 %v1885_v57, %v1609_v56 }
 0x1f7   : > { %v791_v59 = vpop.f32.mrf.mxu1 }
 0x1f8   : > { %v823_v60 = vmin.f32 %v800_v58, 0.0  ;;  %v792_v61 = vadd.f32 %v1609_v56, %v791_v59  ;;  %vm819_vm9 = vcmp.gt.f32.partialorder %v800_v58, 0.0 }
 0x1f9   : > { %v1886_v62 = vpop.f32.mrf.mxu1 }
 0x1fa   : > { %v829_v63 = vmul.f32 1.442695, %v823_v60  ;;  %v821_v0 = vmin.f32 %v792_v61, 0.0  ;;  %v803_v1 = vadd.f32 %v1886_v62, %v1609_v56  ;;  %vm817_vm10 = vcmp.gt.f32.partialorder %v792_v61, 0.0 }
 0x1fb   : > { %v794_v2 = vpop.f32.mrf.mxu1 }
 0x1fc   : > { %2054 = vpow2.f32 %v829_v63  ;;  %v825_v3 = vmul.f32 1.442695, %v821_v0  ;;  %v824_v4 = vmin.f32 %v803_v1, 0.0  ;;  %v795_v5 = vadd.f32 %v1609_v56, %v794_v2  ;;  %v2030_v63 = vld [vmem:[%s2406_s5 + $0x30] sm:$0xff]  }
 0x1fd   : > { %vm820_vm11 = vcmp.gt.f32.partialorder %v803_v1, 0.0 }
 0x1fe   : > { %2056 = vpow2.f32 %v825_v3  ;;  %v831_v6 = vmul.f32 1.442695, %v824_v4  ;;  %v822_v7 = vmin.f32 %v795_v5, 0.0  ;;  %vm818_vm14 = vcmp.gt.f32.partialorder %v795_v5, 0.0 }
 0x200   : > { %2058 = vpow2.f32 %v831_v6  ;;  %v827_v8 = vmul.f32 1.442695, %v822_v7 }
 0x202   : > { %2060 = vpow2.f32 %v827_v8 }
 0x209   : > { %v2055_v9 = vpop.eup %2054 }
 0x20a   : > { %v1622_v10 = vadd.f32 -1.0, %v2055_v9  ;;  %v2033_v9 = vld [vmem:[%s2406_s5 + $0x28] sm:$0xff]  }
 0x20b   : > { %v2057_v11 = vpop.eup %2056 }
 0x20c   : > { %v839_v12 = vsel %vm819_vm9, %v800_v58, %v1622_v10  ;;  %v1620_v13 = vadd.f32 -1.0, %v2057_v11 }
 0x20d   : > { %v2059_v14 = vpop.eup %2058  ;;  %v1714_v15 = vpack.c.bf16 %v839_v12, %v839_v12 }
 0x20e   : > { %v837_v17 = vsel %vm817_vm10, %v792_v61, %v1620_v13  ;;  %v1623_v18 = vadd.f32 -1.0, %v2059_v14 }
 0x20f   : > { %v873_v19 = vshrl.u32 %v1714_v15, 16  ;;  %v1712_v20 = vpack.c.bf16 %v837_v17, %v837_v17  ;;  %v2061_v21 = vpop.eup %2060  ;;  %v876_v45 = vshll.u32 %v1714_v15, 16  ;;  %v2035_v15 = vld [vmem:[%s2406_s5 + $0x20] sm:$0xff]  }
 0x210   : > { %v840_v22 = vsel %vm820_vm11, %v803_v1, %v1623_v18  ;;  %v1621_v26 = vadd.f32 -1.0, %v2061_v21  ;;  %v2036_v18 = vld [vmem:[%s2405_s4 + $0xa8] sm:$0xff]   ;;  %v2040_v21 = vld [vmem:[%s2405_s4 + $0x98] sm:$0xff]  }
 0x211   : > { %v856_v23 = vshrl.u32 %v1712_v20, 16  ;;  %v1715_v24 = vpack.c.bf16 %v840_v22, %v840_v22  ;;  %v875_v25 = vrot.slane %v873_v19, 7  ;;  %v859_v28 = vshll.u32 %v1712_v20, 16  ;;  %v2037_v19 = vld [vmem:[%s2406_s5 + $0x18] sm:$0xff]   ;;  %v2038_v20 = vld [vmem:[%s2405_s4 + $0xa0] sm:$0xff]   ;;  %v2041_v22 = vld [vmem:[%s2406_s5 + $0x8] sm:$0xff]  }
 0x212   : > { %v838_v32 = vsel %vm818_vm14, %v795_v5, %v1621_v26  ;;  %v2045_v26 = vld [vmem:[%s2405_s4 + $0x80] sm:$0xff]  }
 0x213   : > { %v858_v27 = vrot.slane %v856_v23, 7  ;;  %v882_v29 = vshrl.u32 %v1715_v24, 16  ;;  %v885_v36 = vshll.u32 %v1715_v24, 16  ;;  %v1713_v37 = vpack.c.bf16 %v838_v32, %v838_v32  ;;  %v2042_v23 = vld [vmem:[%s2405_s4 + $0x90] sm:$0xff]   ;;  %v2043_v24 = vld [vmem:[%s2406_s5] sm:$0xff]  }
 0x214   : > { %v880_v38 = vrot.slane %v875_v25, 4  ;;  %v878_v50 = vor.u32 %v876_v45, %v875_v25  ;;  %v2044_v25 = vld [vmem:[%s2405_s4 + $0x88] sm:$0xff]  }
 0x215   : > { %v861_v33 = vor.u32 %v859_v28, %v858_v27  ;;  %v884_v34 = vrot.slane %v882_v29, 7  ;;  %v864_v44 = vshrl.u32 %v1713_v37, 16  ;;  %v867_v49 = vshll.u32 %v1713_v37, 16 }
 0x216   : > { %v862_v51 = vrot.slane %v858_v27, 4 }
 0x217   : > { %v898_v41 = vsel %vm896_vm15, %v861_v33, %v897_v31  ;;  %v887_v42 = vor.u32 %v885_v36, %v884_v34  ;;  %v889_v43 = vrot.slane %v884_v34, 4  ;;  %v866_v48 = vrot.slane %v864_v44, 7 }
 0x218   : > { %899 = vst [vmem:[#allocation4] sm:$0xf] %v898_v41 }
 0x219   : > { %v888_v46 = vsel %vm2313_vm0, %v880_v38, %v887_v42  ;;  %v904_v47 = vsel %vm2247_vm6, %v889_v43, %v903_v40  ;;  %v869_v52 = vor.u32 %v867_v49, %v866_v48  ;;  %v871_v54 = vrot.slane %v866_v48, 4 }
 0x21a   : > { %902 = vst [vmem:[#allocation4 + $0xc] sm:$0xf] %v888_v46  ;;  %905 = vst [vmem:[#allocation4 + $0x10] sm:$0x1] %v904_v47 }
 0x21b   : > { %v870_v56 = vsel %vm2313_vm0, %v862_v51, %v869_v52  ;;  %v879_v57 = vsel %vm2313_vm0, %v871_v54, %v878_v50 }
 0x21c   : > { %900 = vst [vmem:[#allocation4 + $0x4] sm:$0xf] %v870_v56  ;;  %901 = vst [vmem:[#allocation4 + $0x8] sm:$0xf] %v879_v57 }
 0x21f   : > { %v906_v58 = vld [vmem:[#allocation4] sm:$0xf] }
 0x220   : > { %v1176_v62 = vld [vmem:[#allocation4] sm:$0xe] }
 0x221   : > { %v2325_v59 = vld [vmem:[#allocation4 + $0x10] ss:$0 sps:$4 sm:$0x11]  }
 0x222   : > { %v974_v5 = vshll.u32 %v2325_v59, 16  ;;  %v1201_v27 = vrot.slane %v2325_v59, 1 }
 0x223   : > { %v907_v35 = vld [vmem:[#allocation4 + $0x4] sm:$0xf]  ;;  %v2327_v60 = vld [vmem:[#allocation4 + $0x8] sm:$0xff]  }
 0x224   : > { %v1644_v61 = vcombine.low %v906_v58, %v907_v35  ;;  %v966_v0 = vshll.u32 %v2327_v60, 16  ;;  %v1679_v2 = vcombine.low %v1176_v62, %v907_v35  ;;  %v970_v4 = vshrl.u32 %v2327_v60, 16 }
 0x225   : > { %v1199_v12 = vrot.slane %v2327_v60, 1  ;;  %v976_v13 = vrot.slane %v974_v5, 1 }
 0x226   : > { %v961_v1 = vshll.u32 %v1644_v61, 16  ;;  %1923 = vmatprep.mubr.bf16.mxu1 %v1644_v61  ;;  %v968_v3 = vrot.slane %v966_v0, 1  ;;  %v959_v6 = vshrl.u32 %v1644_v61, 16  ;;  %v1198_v11 = vrot.slane %v1679_v2, 1 }
 0x227   : > { %1924 = vmatmul.mubr.bf16.vlgmr.msra.gmra.mxu1 %v2327_v60  ;;  %v1202_v28 = vsel %vm1197_vm2, %v1199_v12, %v1201_v27 }
 0x228   : > { %1948 = vmatpush3.bf16.msra.mxu1 %v2296_v53  ;;  %v963_v7 = vrot.slane %v961_v1, 1  ;;  %1963 = vmatprep.mubr.bf16.mxu1 %v2174_v16  ;;  %v972_v8 = vor.u32 %v970_v4, %v968_v3  ;;  %v2034_v53 = vld [vmem:[%s2405_s4 + $0xb0] sm:$0xff]   ;;  %v1200_v17 = vsel %vm1197_vm2, %v1198_v11, %v1199_v12 }
 0x229   : > { %1949 = vmatprep.subr.bf16.mxu1 %v2030_v63 }
 0x22a   : > { %v964_v10 = vor.u32 %v963_v7, %v959_v6  ;;  %v977_v16 = vsel %vm957_vm1, %v972_v8, %v976_v13 }
 0x22c   : > { %1950 = vmatpush3.bf16.msra.mxu1 %v2030_v63  ;;  %v969_v14 = vsel %vm957_vm1, %v964_v10, %v968_v3 }
 0x22d   : > { %1903 = vmatprep.mubr.bf16.mxu0 %v969_v14  ;;  %1951 = vmatprep.subr.bf16.mxu1 %v2033_v9 }
 0x22e   : > { %1904 = vmatmul.mubr.bf16.vlgmr.msra.gmra.mxu0 %v977_v16 }
 0x22f   : > { %1928 = vmatpush3.bf16.msra.mxu0 %v2305_v55  ;;  %1943 = vmatprep.mubr.bf16.mxu0 %v1200_v17  ;;  %v2039_v55 = vld [vmem:[%s2406_s5 + $0x10] sm:$0xff]  }
 0x230   : > { %1952 = vmatpush3.bf16.msra.mxu1 %v2033_v9  ;;  %1929 = vmatprep.subr.bf16.mxu0 %v2034_v53 }
 0x231   : > { %1953 = vmatprep.subr.bf16.mxu1 %v2035_v15 }
 0x233   : > { %1930 = vmatpush3.bf16.msra.mxu0 %v2034_v53 }
 0x234   : > { %1954 = vmatpush3.bf16.msra.mxu1 %v2035_v15  ;;  %1931 = vmatprep.subr.bf16.mxu0 %v2036_v18 }
 0x235   : > { %1955 = vmatprep.subr.bf16.mxu1 %v2037_v19 }
 0x237   : > { %1932 = vmatpush3.bf16.msra.mxu0 %v2036_v18 }
 0x238   : > { %1956 = vmatpush3.bf16.msra.mxu1 %v2037_v19  ;;  %1933 = vmatprep.subr.bf16.mxu0 %v2038_v20 }
 0x239   : > { %1957 = vmatprep.subr.bf16.mxu1 %v2039_v55 }
 0x23b   : > { %1934 = vmatpush3.bf16.msra.mxu0 %v2038_v20 }
 0x23c   : > { %1958 = vmatpush3.bf16.msra.mxu1 %v2039_v55  ;;  %1935 = vmatprep.subr.bf16.mxu0 %v2040_v21 }
 0x23d   : > { %1959 = vmatprep.subr.bf16.mxu1 %v2041_v22 }
 0x23f   : > { %1936 = vmatpush3.bf16.msra.mxu0 %v2040_v21 }
 0x240   : > { %1960 = vmatpush3.bf16.msra.mxu1 %v2041_v22  ;;  %1937 = vmatprep.subr.bf16.mxu0 %v2042_v23 }
 0x241   : > { %1961 = vmatprep.subr.bf16.mxu1 %v2043_v24 }
 0x243   : > { %1938 = vmatpush3.bf16.msra.mxu0 %v2042_v23 }
 0x244   : > { %1962 = vmatpush3.bf16.msra.mxu1 %v2043_v24  ;;  %1939 = vmatprep.subr.bf16.mxu0 %v2044_v25 }
 0x247   : > { %1940 = vmatpush3.bf16.msra.mxu0 %v2044_v25  ;;  %1964 = vmatmul.mubr.bf16.vlgmr.msra.gmra.mxu1 %v2192_v30 }
 0x248   : > { %1941 = vmatprep.subr.bf16.mxu0 %v2045_v26 }
 0x24b   : > { %1942 = vmatpush3.bf16.msra.mxu0 %v2045_v26 }
 0x24e   : > { %1944 = vmatmul.mubr.bf16.vlgmr.msra.gmra.mxu0 %v1202_v28 }
 0x2e7   : > { %v1925_v29 = vpop.f32.mrf.mxu1 }
 0x2e9   : > { %v1161_v31 = vpop.f32.mrf.mxu1 }
 0x2eb   : > { %v1926_v33 = vpop.f32.mrf.mxu1 }
 0x2ed   : > { %v1164_v36 = vpop.f32.mrf.mxu1 }
 0x2ee   : > { %v1905_v32 = vpop.f32.mrf.mxu0 }
 0x2ef   : > { %v1170_v44 = vadd.f32 %v1925_v29, %v1905_v32 }
 0x2f0   : > { %v1062_v34 = vpop.f32.mrf.mxu0 }
 0x2f1   : > { %v1162_v48 = vadd.f32 %v1161_v31, %v1062_v34 }
 0x2f2   : > { %v1906_v38 = vpop.f32.mrf.mxu0 }
 0x2f3   : > { %v1173_v56 = vadd.f32 %v1926_v33, %v1906_v38 }
 0x2f4   : > { %v1065_v30 = vpop.f32.mrf.mxu0 }
 0x2f5   : > { %v1165_v62 = vadd.f32 %v1164_v36, %v1065_v30 }
 0x307   : > { %v1965_v37 = vpop.f32.mrf.mxu1 }
 0x308   : > { %v1455_v39 = vmin.f32 %v1965_v37, 0.0  ;;  %vm1451_vm3 = vcmp.gt.f32.partialorder %v1965_v37, 0.0 }
 0x309   : > { %v1434_v40 = vpop.f32.mrf.mxu1 }
 0x30a   : > { %v1453_v41 = vmin.f32 %v1434_v40, 0.0  ;;  %v1461_v45 = vmul.f32 1.442695, %v1455_v39  ;;  %vm1449_vm5 = vcmp.gt.f32.partialorder %v1434_v40, 0.0 }
 0x30b   : > { %v2383_v42 = vpop.f32.mrf.mxu1 }
 0x30c   : > { %v1456_v43 = vmin.f32 %v2383_v42, 0.0  ;;  %v1457_v49 = vmul.f32 1.442695, %v1453_v41  ;;  %2062 = vpow2.f32 %v1461_v45  ;;  %vm1452_vm7 = vcmp.gt.f32.partialorder %v2383_v42, 0.0 }
 0x30d   : > { %v2386_v46 = vpop.f32.mrf.mxu1 }
 0x30e   : > { %v1945_v47 = vpop.f32.mrf.mxu0  ;;  %v1463_v51 = vmul.f32 1.442695, %v1456_v43  ;;  %v1454_v52 = vmin.f32 %v2386_v46, 0.0  ;;  %2064 = vpow2.f32 %v1457_v49  ;;  %vm1450_vm9 = vcmp.gt.f32.partialorder %v2386_v46, 0.0 }
 0x30f   : > { %v1304_v50 = vadd.f32 %v1945_v47, %v1170_v44 }
 0x310   : > { %v1287_v54 = vpop.f32.mrf.mxu0  ;;  %2066 = vpow2.f32 %v1463_v51  ;;  %v1459_v63 = vmul.f32 1.442695, %v1454_v52 }
 0x311   : > { %v1312_v57 = vmin.f32 %v1304_v50, 0.0  ;;  %v1302_v58 = vadd.f32 %v1287_v54, %v1162_v48  ;;  %vm1308_vm4 = vcmp.gt.f32.partialorder %v1304_v50, 0.0 }
 0x312   : > { %v1946_v59 = vpop.f32.mrf.mxu0 }
 0x313   : > { %v1318_v35 = vmul.f32 1.442695, %v1312_v57  ;;  %v1310_v60 = vmin.f32 %v1302_v58, 0.0  ;;  %v1305_v61 = vadd.f32 %v1946_v59, %v1173_v56  ;;  %vm1306_vm6 = vcmp.gt.f32.partialorder %v1302_v58, 0.0 }
 0x314   : > { %v1290_v0 = vpop.f32.mrf.mxu0 }
 0x315   : > { %2068 = vpow2.f32 %v1318_v35  ;;  %v1314_v1 = vmul.f32 1.442695, %v1310_v60  ;;  %v1313_v2 = vmin.f32 %v1305_v61, 0.0  ;;  %v1303_v3 = vadd.f32 %v1290_v0, %v1165_v62 }
 0x316   : > { %vm1309_vm8 = vcmp.gt.f32.partialorder %v1305_v61, 0.0 }
 0x317   : > { %2070 = vpow2.f32 %v1314_v1  ;;  %v1320_v4 = vmul.f32 1.442695, %v1313_v2  ;;  %v1311_v5 = vmin.f32 %v1303_v3, 0.0  ;;  %vm1307_vm10 = vcmp.gt.f32.partialorder %v1303_v3, 0.0 }
 0x318   : > { %2072 = vpow2.f32 %v1459_v63 }
 0x319   : > { %2074 = vpow2.f32 %v1320_v4  ;;  %v1316_v6 = vmul.f32 1.442695, %v1311_v5  ;;  %v2063_v7 = vpop.eup %2062 }
 0x31a   : > { %v1702_v10 = vadd.f32 -1.0, %v2063_v7 }
 0x31b   : > { %2076 = vpow2.f32 %v1316_v6  ;;  %v2065_v8 = vpop.eup %2064 }
 0x31c   : > { %v1700_v12 = vadd.f32 -1.0, %v2065_v8  ;;  %v1471_v16 = vsel %vm1451_vm3, %v1965_v37, %v1702_v10 }
 0x31d   : > { %v2067_v9 = vpop.eup %2066 }
 0x31e   : > { %v1703_v15 = vadd.f32 -1.0, %v2067_v9  ;;  %v1469_v55 = vsel %vm1449_vm5, %v1434_v40, %v1700_v12 }
 0x320   : > { %v1472_v26 = vsel %vm1452_vm7, %v2383_v42, %v1703_v15 }
 0x322   : > { %v2069_v11 = vpop.eup %2068 }
 0x323   : > { %v1690_v13 = vadd.f32 -1.0, %v2069_v11 }
 0x324   : > { %v2071_v14 = vpop.eup %2070 }
 0x325   : > { %v2073_v53 = vpop.eup %2072  ;;  %v1328_v17 = vsel %vm1308_vm4, %v1304_v50, %v1690_v13  ;;  %v1688_v18 = vadd.f32 -1.0, %v2071_v14 }
 0x326   : > { %v2075_v19 = vpop.eup %2074  ;;  %v1475_v20 = vadd.f32 %v1471_v16, %v1328_v17  ;;  %v1701_v23 = vadd.f32 -1.0, %v2073_v53 }
 0x327   : > { %v1326_v21 = vsel %vm1306_vm6, %v1302_v58, %v1688_v18  ;;  %v1691_v22 = vadd.f32 -1.0, %v2075_v19 }
 0x328   : > { %1479 = vst [vmem:[%s251_s8 + $0x10] sm:$0xff] %v1475_v20  ;;  %v1473_v24 = vadd.f32 %v1469_v55, %v1326_v21  ;;  %v2077_v25 = vpop.eup %2076  ;;  %v1470_v31 = vsel %vm1450_vm9, %v2386_v46, %v1701_v23 }
 0x329   : > { %v1329_v27 = vsel %vm1309_vm8, %v1305_v61, %v1691_v22  ;;  %v1689_v29 = vadd.f32 -1.0, %v2077_v25 }
 0x32a   : > { %1477 = vst [vmem:[%s251_s8] sm:$0xff] %v1473_v24  ;;  %v1476_v28 = vadd.f32 %v1472_v26, %v1329_v27 }
 0x32b   : > { %v1327_v32 = vsel %vm1307_vm10, %v1303_v3, %v1689_v29 }
 0x32c   : > { %1480 = vst [vmem:[%s251_s8 + $0x18] sm:$0xff] %v1476_v28  ;;  %v1474_v33 = vadd.f32 %v1470_v31, %v1327_v32 }
 0x32e   : > { %1478 = vst [vmem:[%s251_s8 + $0x8] sm:$0xff] %v1474_v33 }
 0x32f PF: > { %s16_s21 = sadd.s32 1, %s2084_s21  }
 0x330   : > { %p13_p4 = scmp.ge.s32.totalorder %s16_s21, 4  }
 0x332   :  { %15 = sbr.rel (!%p13_p4) target bundleno = 1 (0x1), region = 78 }

// kernel: resnet1d_forward.13
= control target key start
LH: loop header
LB: loop body
LE: loop exit
PB: predicated region body
PF: predicated region fallthrough
CT: control target
= control target key end

     0   :  { %s1893_s18 = smov 0   ;;  %s2136_s0 = inlined_call_operand.vmem [shape: f32[2,32,128], index: 0, kind: input, shape index: {}]   ;;  %s2137_s1 = inlined_call_operand.vmem [shape: bf16[3,128,128], index: 1, kind: input, shape index: {}]   ;;  %s2138_s2 = inlined_call_operand.vmem [shape: bf16[1,128,128], index: 2, kind: input, shape index: {}]   ;;  %s2139_s3 = inlined_call_operand.vmem [shape: f32[1,128], index: 3, kind: input, shape index: {}]   ;;  %s2140_s4 = inlined_call_operand.vmem [shape: bf16[3,128,128], index: 4, kind: input, shape index: {}]   ;;  %s2141_s5 = inlined_call_operand.vmem [shape: f32[2,32,128], index: 5, kind: output, shape index: {}]  }
   0x1 LB: > { %s1370_s19 = sadd.s32 4294967295, %s1860_s18   ;;  %p1374_p0 = scmp.ge.s32.totalorder %s1860_s18, 1  ;;  %s1860_s18 = sphi %s1893_s18, %s15_s18  }
   0x2   : > { %p187_p1 = scmp.lt.s32.totalorder %s1860_s18, 3 }
   0x4   : > { %p188_p2 = pnand %p1374_p0, %p187_p1 }
   0x5   : > { %p215_p3 = scmp.lt.s32.totalorder (!%p188_p2), %s1370_s19, 1 }
   0x6   : > { %191 = sbr.rel (%p188_p2) target bundleno = 815 (0x32f), region = 40 }
   0xb   : > { %v1768_v0 = vld [vmem:[%s2137_s1 + $0x78] sm:$0xff]   ;;  %v1770_v2 = vld [vmem:[%s2137_s1 + $0x70] sm:$0xff]   ;;  %v1862_v3 = vmov 0.0   ;;  %v1772_v5 = vld [vmem:[%s2137_s1 + $0x68] sm:$0xff]   ;;  %s2147_s19 = smov (!%p215_p3, %s1370_s19), 1  ;;  %vm779_vm4 = vcmask 1040384  }
   0xc   : > { %v1769_v1 = vld [vmem:[%s2137_s1 + $0x38] sm:$0xff]   ;;  %1619 = vmatprep.subr.bf16.mxu0 %v1768_v0  ;;  %226 = vst [vmem:[#allocation2] sm:$0x1] %v1862_v3  ;;  %227 = vst [vmem:[#allocation2 + $0x21] sm:$0x1] %v1862_v3  ;;  %v1771_v4 = vld [vmem:[%s2137_s1 + $0x30] sm:$0xff]  }
   0xd   : > { %1639 = vmatprep.subr.bf16.mxu1 %v1769_v1  ;;  %1620 = vmatpush3.bf16.msra.mxu0 %v1768_v0  ;;  %v1773_v6 = vld [vmem:[%s2137_s1 + $0x28] sm:$0xff]   ;;  %v1774_v7 = vld [vmem:[%s2137_s1 + $0x60] sm:$0xff]   ;;  %s1528_s11 = sshll.u32 %s2147_s19, 5  ;;  %v1776_v9 = vld [vmem:[%s2137_s1 + $0x58] sm:$0xff]   ;;  %vm780_vm5 = vsmask.f32 256 }
   0xe   : > { %1640 = vmatpush3.bf16.msra.mxu1 %v1769_v1  ;;  %1621 = vmatprep.subr.bf16.mxu0 %v1770_v2  ;;  %v1775_v8 = vld [vmem:[%s2137_s1 + $0x20] sm:$0xff]   ;;  %v1777_v10 = vld [vmem:[%s2137_s1 + $0x18] sm:$0xff]   ;;  %s219_s20 = scalar_lea.vmem %s2136_s0, %s1528_s11  ;;  %v1778_v11 = vld [vmem:[%s2137_s1 + $0x50] sm:$0xff]   ;;  %vm785_vm7 = vsmask.f32 7938  ;;  %vm868_vm12 = vcmask 1043456   ;;  %s224_s29 = scalar_lea.vmem %s2141_s5, %s1528_s11 }
   0xf   : > { %1641 = vmatprep.subr.bf16.mxu1 %v1771_v4  ;;  %v1779_v12 = vld [vmem:[%s2137_s1 + $0x10] sm:$0xff]   ;;  %v1945_v13 = vld [vmem:[%s219_s20] sm:$0xff]  ;;  %v1947_v14 = vld [vmem:[%s219_s20 + $0x8] sm:$0xff]  ;;  %vm826_vm13 = vsmask.f32 4368 }
  0x10   : > { %v1949_v15 = vld [vmem:[%s219_s20 + $0x10] sm:$0xff]  ;;  %232 = vst [vmem:[#allocation2 + $0x1] sm:$0xff] %v1945_v13  ;;  %233 = vst [vmem:[#allocation2 + $0x9] sm:$0xff] %v1947_v14  ;;  %v262_v16 = vpack.c.bf16 %v1947_v14, %v1945_v13  ;;  %v1955_v17 = vld [vmem:[%s219_s20 + $0x18] sm:$0xff] }
  0x11   : > { %1622 = vmatpush3.bf16.msra.mxu0 %v1770_v2  ;;  %234 = vst [vmem:[#allocation2 + $0x11] sm:$0xff] %v1949_v15  ;;  %235 = vst [vmem:[#allocation2 + $0x19] sm:$0xff] %v1955_v17  ;;  %v1780_v18 = vld [vmem:[%s2137_s1 + $0x48] sm:$0xff]   ;;  %v1782_v20 = vld [vmem:[%s2137_s1 + $0x40] sm:$0xff]   ;;  %v263_v30 = vpack.c.bf16 %v1955_v17, %v1949_v15 }
  0x12   : > { %1642 = vmatpush3.bf16.msra.mxu1 %v1771_v4  ;;  %1623 = vmatprep.subr.bf16.mxu0 %v1772_v5  ;;  %v1781_v19 = vld [vmem:[%s2137_s1 + $0x8] sm:$0xff]   ;;  %v1783_v23 = vld [vmem:[%s2137_s1] sm:$0xff]   ;;  %v1784_v26 = vld [vmem:[%s2137_s1 + $0xb8] sm:$0xff]  }
  0x13   : > { %1643 = vmatprep.subr.bf16.mxu1 %v1773_v6  ;;  %1635 = vmatprep.mubr.bf16.mxu0 %v262_v16  ;;  %v1785_v31 = vld [vmem:[%s2137_s1 + $0xb0] sm:$0xff]   ;;  %v1786_v34 = vld [vmem:[%s2137_s1 + $0xa8] sm:$0xff]   ;;  %v1787_v35 = vld [vmem:[%s2137_s1 + $0xa0] sm:$0xff]  }
  0x14   : > { %v1788_v36 = vld [vmem:[%s2137_s1 + $0x98] sm:$0xff]   ;;  %v1789_v37 = vld [vmem:[%s2137_s1 + $0x90] sm:$0xff]   ;;  %v1790_v38 = vld [vmem:[%s2137_s1 + $0x88] sm:$0xff]  }
  0x15   : > { %1624 = vmatpush3.bf16.msra.mxu0 %v1772_v5  ;;  %v1791_v39 = vld [vmem:[%s2137_s1 + $0x80] sm:$0xff]   ;;  %v1792_v43 = vld [vmem:[%s2138_s2 + $0x38] sm:$0xff]   ;;  %v1793_v44 = vld [vmem:[%s2138_s2 + $0x30] sm:$0xff]  }
  0x16   : > { %1644 = vmatpush3.bf16.msra.mxu1 %v1773_v6  ;;  %1625 = vmatprep.subr.bf16.mxu0 %v1774_v7  ;;  %v1794_v45 = vld [vmem:[%s2138_s2 + $0x28] sm:$0xff]   ;;  %v1795_v46 = vld [vmem:[%s2138_s2 + $0x20] sm:$0xff]   ;;  %v1796_v47 = vld [vmem:[%s2138_s2 + $0x18] sm:$0xff]  }
  0x17   : > { %1645 = vmatprep.subr.bf16.mxu1 %v1775_v8  ;;  %v236_v21 = vld [vmem:[#allocation2] sm:$0xff]  ;;  %v237_v22 = vld [vmem:[#allocation2 + $0x8] sm:$0xff]  ;;  %v1797_v48 = vld [vmem:[%s2138_s2 + $0x10] sm:$0xff]  }
  0x18   : > { %v240_v24 = vpack.c.bf16 %v237_v22, %v236_v21  ;;  %v238_v25 = vld [vmem:[#allocation2 + $0x10] sm:$0xff]  ;;  %v239_v27 = vld [vmem:[#allocation2 + $0x18] sm:$0xff]  ;;  %v475_v28 = vld [vmem:[#allocation2 + $0x2] sm:$0xff] }
  0x19   : > { %1626 = vmatpush3.bf16.msra.mxu0 %v1774_v7  ;;  %v476_v29 = vld [vmem:[#allocation2 + $0xa] sm:$0xff]  ;;  %v241_v32 = vpack.c.bf16 %v239_v27, %v238_v25  ;;  %v477_v40 = vld [vmem:[#allocation2 + $0x12] sm:$0xff]  ;;  %v478_v41 = vld [vmem:[#allocation2 + $0x1a] sm:$0xff] }
  0x1a   : > { %1646 = vmatpush3.bf16.msra.mxu1 %v1775_v8  ;;  %1627 = vmatprep.subr.bf16.mxu0 %v1776_v9  ;;  %v479_v33 = vpack.c.bf16 %v476_v29, %v475_v28  ;;  %v480_v42 = vpack.c.bf16 %v478_v41, %v477_v40  ;;  %v1798_v49 = vld [vmem:[%s2138_s2 + $0x8] sm:$0xff]   ;;  %v1799_v50 = vld [vmem:[%s2138_s2] sm:$0xff]   ;;  %vm2028_vm6 = vmand %vm779_vm4, %vm780_vm5 }
  0x1b   : > { %1647 = vmatprep.subr.bf16.mxu1 %v1777_v10  ;;  %1655 = vmatprep.mubr.bf16.mxu1 %v240_v24  ;;  %v1804_v40 = vld [vmem:[%s2140_s4 + $0x78] sm:$0xff]   ;;  %vm786_vm8 = vmand %vm779_vm4, %vm785_vm7  ;;  %v787_v41 = vld [vmem:[#allocation4 + $0x10] sm:$0x1] }
  0x1c   : > { %vm869_vm15 = vmand %vm868_vm12, %vm785_vm7 }
  0x1d   : > { %1628 = vmatpush3.bf16.msra.mxu0 %v1776_v9 }
  0x1e   : > { %1648 = vmatpush3.bf16.msra.mxu1 %v1777_v10  ;;  %1629 = vmatprep.subr.bf16.mxu0 %v1778_v11 }
  0x1f   : > { %1649 = vmatprep.subr.bf16.mxu1 %v1779_v12 }
  0x21   : > { %1630 = vmatpush3.bf16.msra.mxu0 %v1778_v11 }
  0x22   : > { %1650 = vmatpush3.bf16.msra.mxu1 %v1779_v12  ;;  %1631 = vmatprep.subr.bf16.mxu0 %v1780_v18 }
  0x23   : > { %1651 = vmatprep.subr.bf16.mxu1 %v1781_v19 }
  0x25   : > { %1632 = vmatpush3.bf16.msra.mxu0 %v1780_v18 }
  0x26   : > { %1652 = vmatpush3.bf16.msra.mxu1 %v1781_v19  ;;  %1633 = vmatprep.subr.bf16.mxu0 %v1782_v20 }
  0x27   : > { %1653 = vmatprep.subr.bf16.mxu1 %v1783_v23 }
  0x29   : > { %1634 = vmatpush3.bf16.msra.mxu0 %v1782_v20 }
  0x2a   : > { %1654 = vmatpush3.bf16.msra.mxu1 %v1783_v23  ;;  %1659 = vmatprep.subr.bf16.mxu0 %v1784_v26 }
  0x2b   : > { %1679 = vmatprep.subr.bf16.mxu1 %v1792_v43 }
  0x2c   : > { %1636 = vmatmul.mubr.bf16.vlgmr.msra.gmra.mxu0 %v263_v30 }
  0x2d   : > { %1656 = vmatmul.mubr.bf16.vlgmr.msra.gmra.mxu1 %v241_v32  ;;  %1660 = vmatpush3.bf16.msra.mxu0 %v1784_v26 }
  0x2e   : > { %1661 = vmatprep.subr.bf16.mxu0 %v1785_v31  ;;  %1675 = vmatprep.mubr.bf16.mxu0 %v479_v33 }
  0x2f   : > { %1680 = vmatpush3.bf16.msra.mxu1 %v1792_v43  ;;  %v1805_v43 = vld [vmem:[%s2140_s4 + $0x28] sm:$0xff]  }
  0x30   : > { %1681 = vmatprep.subr.bf16.mxu1 %v1793_v44 }
  0x31   : > { %1662 = vmatpush3.bf16.msra.mxu0 %v1785_v31 }
  0x32   : > { %1663 = vmatprep.subr.bf16.mxu0 %v1786_v34 }
  0x33   : > { %1682 = vmatpush3.bf16.msra.mxu1 %v1793_v44  ;;  %v1806_v44 = vld [vmem:[%s2140_s4 + $0x70] sm:$0xff]  }
  0x34   : > { %1683 = vmatprep.subr.bf16.mxu1 %v1794_v45 }
  0x35   : > { %1664 = vmatpush3.bf16.msra.mxu0 %v1786_v34 }
  0x36   : > { %1665 = vmatprep.subr.bf16.mxu0 %v1787_v35 }
  0x37   : > { %1684 = vmatpush3.bf16.msra.mxu1 %v1794_v45  ;;  %v1807_v45 = vld [vmem:[%s2140_s4 + $0x20] sm:$0xff]  }
  0x38   : > { %1685 = vmatprep.subr.bf16.mxu1 %v1795_v46 }
  0x39   : > { %1666 = vmatpush3.bf16.msra.mxu0 %v1787_v35  ;;  %v1802_v35 = vld [vmem:[%s2140_s4 + $0x38] sm:$0xff]  }
  0x3a   : > { %1667 = vmatprep.subr.bf16.mxu0 %v1788_v36 }
  0x3b   : > { %1686 = vmatpush3.bf16.msra.mxu1 %v1795_v46  ;;  %v1808_v46 = vld [vmem:[%s2140_s4 + $0x68] sm:$0xff]  }
  0x3c   : > { %1687 = vmatprep.subr.bf16.mxu1 %v1796_v47 }
  0x3d   : > { %1668 = vmatpush3.bf16.msra.mxu0 %v1788_v36  ;;  %v1803_v36 = vld [vmem:[%s2140_s4 + $0x30] sm:$0xff]  }
  0x3e   : > { %1669 = vmatprep.subr.bf16.mxu0 %v1789_v37 }
  0x3f   : > { %1688 = vmatpush3.bf16.msra.mxu1 %v1796_v47  ;;  %v1809_v47 = vld [vmem:[%s2140_s4 + $0x18] sm:$0xff]  }
  0x40   : > { %1689 = vmatprep.subr.bf16.mxu1 %v1797_v48 }
  0x41   : > { %1670 = vmatpush3.bf16.msra.mxu0 %v1789_v37 }
  0x42   : > { %1671 = vmatprep.subr.bf16.mxu0 %v1790_v38 }
  0x43   : > { %1690 = vmatpush3.bf16.msra.mxu1 %v1797_v48  ;;  %v1810_v48 = vld [vmem:[%s2140_s4 + $0x60] sm:$0xff]  }
  0x44   : > { %1691 = vmatprep.subr.bf16.mxu1 %v1798_v49 }
  0x45   : > { %1672 = vmatpush3.bf16.msra.mxu0 %v1790_v38  ;;  %v782_v38 = vld [vmem:[#allocation4] sm:$0x1] }
  0x46   : > { %1673 = vmatprep.subr.bf16.mxu0 %v1791_v39 }
  0x47   : > { %1692 = vmatpush3.bf16.msra.mxu1 %v1798_v49  ;;  %v1811_v49 = vld [vmem:[%s2140_s4 + $0x10] sm:$0xff]  }
  0x48   : > { %1693 = vmatprep.subr.bf16.mxu1 %v1799_v50 }
  0x49   : > { %1674 = vmatpush3.bf16.msra.mxu0 %v1791_v39  ;;  %v783_v39 = vsel %vm2028_vm6, 0, %v782_v38 }
  0x4a   : > { %784 = vst [vmem:[#allocation4] sm:$0x1] %v783_v39  ;;  %1699 = vmatprep.subr.bf16.mxu0 %v1804_v40 }
  0x4b   : > { %1694 = vmatpush3.bf16.msra.mxu1 %v1799_v50  ;;  %v1812_v50 = vld [vmem:[%s2140_s4 + $0x58] sm:$0xff]  }
  0x4c   : > { %1676 = vmatmul.mubr.bf16.vlgmr.msra.gmra.mxu0 %v480_v42  ;;  %1719 = vmatprep.subr.bf16.mxu1 %v1802_v35  ;;  %v788_v42 = vsel %vm786_vm8, 0, %v787_v41 }
  0x4d   : > { %789 = vst [vmem:[#allocation4 + $0x10] sm:$0x1] %v788_v42  ;;  %1700 = vmatpush3.bf16.msra.mxu0 %v1804_v40 }
  0x4e   : > { %1701 = vmatprep.subr.bf16.mxu0 %v1806_v44 }
  0x51   : > { %1702 = vmatpush3.bf16.msra.mxu0 %v1806_v44 }
  0x52   : > { %1703 = vmatprep.subr.bf16.mxu0 %v1808_v46 }
  0x55   : > { %1704 = vmatpush3.bf16.msra.mxu0 %v1808_v46 }
  0x56   : > { %1705 = vmatprep.subr.bf16.mxu0 %v1810_v48 }
  0x59   : > { %1706 = vmatpush3.bf16.msra.mxu0 %v1810_v48 }
  0x5a   : > { %1707 = vmatprep.subr.bf16.mxu0 %v1812_v50 }
  0x5d   : > { %1708 = vmatpush3.bf16.msra.mxu0 %v1812_v50 }
  0xec   : > { %v1637_v51 = vpop.f32.mrf.mxu0 }
  0xed   : > { %v1657_v53 = vpop.f32.mrf.mxu1 }
  0xee   : > { %v363_v52 = vpop.f32.mrf.mxu0  ;;  %v469_v57 = vadd.f32 %v1657_v53, %v1637_v51  ;;  %v1813_v51 = vld [vmem:[%s2140_s4 + $0x8] sm:$0xff]   ;;  %v1815_v53 = vld [vmem:[%s2140_s4] sm:$0xff]  }
  0xef   : > { %v460_v55 = vpop.f32.mrf.mxu1 }
  0xf0   : > { %v1638_v54 = vpop.f32.mrf.mxu0  ;;  %v461_v60 = vadd.f32 %v460_v55, %v363_v52  ;;  %v1814_v52 = vld [vmem:[%s2140_s4 + $0x50] sm:$0xff]   ;;  %v1820_v55 = vld [vmem:[%s2140_s4 + $0x40] sm:$0xff]  }
  0xf1   : > { %v1658_v58 = vpop.f32.mrf.mxu1  ;;  %1709 = vmatprep.subr.bf16.mxu0 %v1814_v52 }
  0xf2   : > { %v366_v56 = vpop.f32.mrf.mxu0  ;;  %v472_v63 = vadd.f32 %v1658_v58, %v1638_v54  ;;  %v1816_v54 = vld [vmem:[%s2140_s4 + $0x48] sm:$0xff]   ;;  %1710 = vmatpush3.bf16.msra.mxu0 %v1814_v52 }
  0xf3   : > { %v463_v0 = vpop.f32.mrf.mxu1  ;;  %1711 = vmatprep.subr.bf16.mxu0 %v1816_v54 }
  0xf4   : > { %v464_v7 = vadd.f32 %v463_v0, %v366_v56  ;;  %v2080_v56 = vld [vmem:[%s2140_s4 + $0xb8] sm:$0xff]  }
  0xf6   : > { %1712 = vmatpush3.bf16.msra.mxu0 %v1816_v54 }
  0xf7   : > { %1713 = vmatprep.subr.bf16.mxu0 %v1820_v55 }
  0xfa   : > { %1714 = vmatpush3.bf16.msra.mxu0 %v1820_v55 }
  0xfb   : > { %1739 = vmatprep.subr.bf16.mxu0 %v2080_v56 }
 0x10c   : > { %v1677_v59 = vpop.f32.mrf.mxu0 }
 0x10d   : > { %v597_v61 = vadd.f32 %v1677_v59, %v469_v57  ;;  %v1443_v57 = vld [vmem:[%s2139_s3] ss:$0 sm:$0xff] }
 0x10e   : > { %v580_v62 = vpop.f32.mrf.mxu0 }
 0x10f   : > { %v605_v1 = vmin.f32 %v597_v61, 0.0  ;;  %v595_v2 = vadd.f32 %v580_v62, %v461_v60  ;;  %vm601_vm0 = vcmp.gt.f32.partialorder %v597_v61, 0.0 }
 0x110   : > { %v1678_v3 = vpop.f32.mrf.mxu0 }
 0x111   : > { %v611_v4 = vmul.f32 1.442695, %v605_v1  ;;  %v603_v5 = vmin.f32 %v595_v2, 0.0  ;;  %v598_v6 = vadd.f32 %v1678_v3, %v472_v63  ;;  %vm599_vm2 = vcmp.gt.f32.partialorder %v595_v2, 0.0 }
 0x112   : > { %v583_v8 = vpop.f32.mrf.mxu0 }
 0x113   : > { %1830 = vpow2.f32 %v611_v4  ;;  %v607_v9 = vmul.f32 1.442695, %v603_v5  ;;  %v606_v10 = vmin.f32 %v598_v6, 0.0  ;;  %v596_v11 = vadd.f32 %v583_v8, %v464_v7 }
 0x114   : > { %vm602_vm1 = vcmp.gt.f32.partialorder %v598_v6, 0.0 }
 0x115   : > { %v613_v12 = vmul.f32 1.442695, %v606_v10  ;;  %1832 = vpow2.f32 %v607_v9  ;;  %v604_v16 = vmin.f32 %v596_v11, 0.0  ;;  %vm600_vm3 = vcmp.gt.f32.partialorder %v596_v11, 0.0 }
 0x117   : > { %1834 = vpow2.f32 %v613_v12  ;;  %v609_v18 = vmul.f32 1.442695, %v604_v16 }
 0x119   : > { %1836 = vpow2.f32 %v609_v18 }
 0x120   : > { %v1831_v19 = vpop.eup %1830 }
 0x121   : > { %v1437_v21 = vadd.f32 -1.0, %v1831_v19 }
 0x122   : > { %v1833_v20 = vpop.eup %1832 }
 0x123   : > { %v1435_v24 = vadd.f32 -1.0, %v1833_v20  ;;  %v621_v26 = vsel %vm601_vm0, %v597_v61, %v1437_v21  ;;  %vm2088_vm0 = vmor %vm780_vm5, %vm826_vm13 }
 0x124   : > { %v1835_v22 = vpop.eup %1834 }
 0x125   : > { %v1438_v23 = vadd.f32 -1.0, %v1835_v22  ;;  %v619_v30 = vsel %vm599_vm2, %v595_v2, %v1435_v24  ;;  %vm1170_vm2 = vcmask 1046528  }
 0x126   : > { %v1837_v25 = vpop.eup %1836 }
 0x127   : > { %v622_v27 = vsel %vm602_vm1, %v598_v6, %v1438_v23  ;;  %v1436_v29 = vadd.f32 -1.0, %v1837_v25  ;;  %vm930_vm1 = vsmask.f32 7424 }
 0x128   : > { %v1546_v28 = vpack.c.bf16 %v622_v27, %v621_v26 }
 0x129   : > { %v620_v31 = vsel %vm600_vm3, %v596_v11, %v1436_v29 }
 0x12a   : > { %1548 = vst [vmem:[#allocation3 + $0x8] sm:$0xff] %v1546_v28   ;;  %v1541_v32 = vpack.c.bf16 %v620_v31, %v619_v30 }
 0x12c   : > { %1542 = vst [vmem:[#allocation3] sm:$0xff] %v1541_v32  }
 0x131   : > { %v1801_v34 = vld [vmem:[#allocation3 + $0x8] sm:$0xff]  }
 0x133   : > { %v1800_v33 = vld [vmem:[#allocation3] sm:$0xff]  }
 0x134   : > { %1695 = vmatprep.mubr.bf16.mxu1 %v1800_v33 }
 0x135   : > { %1696 = vmatmul.mubr.bf16.vlgmr.msra.gmra.mxu1 %v1801_v34  ;;  %v870_v34 = vld [vmem:[#allocation4] sm:$0xf] }
 0x136   : > { %1720 = vmatpush3.bf16.msra.mxu1 %v1802_v35 }
 0x137   : > { %1721 = vmatprep.subr.bf16.mxu1 %v1803_v36 }
 0x13a   : > { %1722 = vmatpush3.bf16.msra.mxu1 %v1803_v36 }
 0x13b   : > { %1723 = vmatprep.subr.bf16.mxu1 %v1805_v43 }
 0x13e   : > { %1724 = vmatpush3.bf16.msra.mxu1 %v1805_v43  ;;  %v876_v43 = vld [vmem:[#allocation4 + $0x10] sm:$0x1] }
 0x13f   : > { %1725 = vmatprep.subr.bf16.mxu1 %v1807_v45 }
 0x142   : > { %1726 = vmatpush3.bf16.msra.mxu1 %v1807_v45 }
 0x143   : > { %1727 = vmatprep.subr.bf16.mxu1 %v1809_v47 }
 0x146   : > { %1728 = vmatpush3.bf16.msra.mxu1 %v1809_v47 }
 0x147   : > { %1729 = vmatprep.subr.bf16.mxu1 %v1811_v49 }
 0x14a   : > { %1730 = vmatpush3.bf16.msra.mxu1 %v1811_v49 }
 0x14b   : > { %1731 = vmatprep.subr.bf16.mxu1 %v1813_v51 }
 0x14e   : > { %1732 = vmatpush3.bf16.msra.mxu1 %v1813_v51 }
 0x14f   : > { %1733 = vmatprep.subr.bf16.mxu1 %v1815_v53 }
 0x152   : > { %1734 = vmatpush3.bf16.msra.mxu1 %v1815_v53 }
 0x1f5   : > { %v1697_v58 = vpop.f32.mrf.mxu1 }
 0x1f6   : > { %v773_v59 = vadd.f32 %v1697_v58, %v1443_v57 }
 0x1f7   : > { %v764_v60 = vpop.f32.mrf.mxu1 }
 0x1f8   : > { %v796_v61 = vmin.f32 %v773_v59, 0.0  ;;  %v765_v62 = vadd.f32 %v1443_v57, %v764_v60  ;;  %vm792_vm9 = vcmp.gt.f32.partialorder %v773_v59, 0.0 }
 0x1f9   : > { %v1698_v63 = vpop.f32.mrf.mxu1 }
 0x1fa   : > { %v802_v0 = vmul.f32 1.442695, %v796_v61  ;;  %v794_v1 = vmin.f32 %v765_v62, 0.0  ;;  %v776_v2 = vadd.f32 %v1698_v63, %v1443_v57  ;;  %vm790_vm10 = vcmp.gt.f32.partialorder %v765_v62, 0.0 }
 0x1fb   : > { %v767_v3 = vpop.f32.mrf.mxu1 }
 0x1fc   : > { %1838 = vpow2.f32 %v802_v0  ;;  %v798_v4 = vmul.f32 1.442695, %v794_v1  ;;  %v797_v5 = vmin.f32 %v776_v2, 0.0  ;;  %v768_v6 = vadd.f32 %v1443_v57, %v767_v3 }
 0x1fd   : > { %vm793_vm11 = vcmp.gt.f32.partialorder %v776_v2, 0.0 }
 0x1fe   : > { %1840 = vpow2.f32 %v798_v4  ;;  %v804_v7 = vmul.f32 1.442695, %v797_v5  ;;  %v795_v8 = vmin.f32 %v768_v6, 0.0  ;;  %vm791_vm14 = vcmp.gt.f32.partialorder %v768_v6, 0.0 }
 0x200   : > { %1842 = vpow2.f32 %v804_v7  ;;  %v800_v9 = vmul.f32 1.442695, %v795_v8 }
 0x202   : > { %1844 = vpow2.f32 %v800_v9 }
 0x209   : > { %v1839_v10 = vpop.eup %1838 }
 0x20a   : > { %v1456_v11 = vadd.f32 -1.0, %v1839_v10 }
 0x20b   : > { %v1841_v12 = vpop.eup %1840 }
 0x20c   : > { %v812_v16 = vsel %vm792_vm9, %v773_v59, %v1456_v11  ;;  %v1454_v18 = vadd.f32 -1.0, %v1841_v12 }
 0x20d   : > { %v1843_v19 = vpop.eup %1842  ;;  %v1536_v20 = vpack.c.bf16 %v812_v16, %v812_v16 }
 0x20e   : > { %v810_v21 = vsel %vm790_vm10, %v765_v62, %v1454_v18  ;;  %v1457_v22 = vadd.f32 -1.0, %v1843_v19  ;;  %v1823_v19 = vld [vmem:[%s2140_s4 + $0xb0] sm:$0xff]  }
 0x20f   : > { %v846_v23 = vshrl.u32 %v1536_v20, 16  ;;  %v1534_v24 = vpack.c.bf16 %v810_v21, %v810_v21  ;;  %v1845_v25 = vpop.eup %1844  ;;  %v849_v48 = vshll.u32 %v1536_v20, 16 }
 0x210   : > { %v813_v26 = vsel %vm793_vm11, %v776_v2, %v1457_v22  ;;  %v1455_v30 = vadd.f32 -1.0, %v1845_v25  ;;  %v1824_v22 = vld [vmem:[%s2140_s4 + $0xa8] sm:$0xff]  }
 0x211   : > { %v829_v27 = vshrl.u32 %v1534_v24, 16  ;;  %v1537_v28 = vpack.c.bf16 %v813_v26, %v813_v26  ;;  %v848_v29 = vrot.slane %v846_v23, 7  ;;  %v832_v32 = vshll.u32 %v1534_v24, 16  ;;  %v1825_v23 = vld [vmem:[%s2140_s4 + $0xa0] sm:$0xff]   ;;  %v1826_v24 = vld [vmem:[%s2140_s4 + $0x98] sm:$0xff]   ;;  %v1828_v25 = vld [vmem:[%s2140_s4 + $0x88] sm:$0xff]  }
 0x212   : > { %v811_v35 = vsel %vm791_vm14, %v768_v6, %v1455_v30  ;;  %v1829_v26 = vld [vmem:[%s2140_s4 + $0x80] sm:$0xff]  }
 0x213   : > { %v831_v31 = vrot.slane %v829_v27, 7  ;;  %v855_v33 = vshrl.u32 %v1537_v28, 16  ;;  %v858_v39 = vshll.u32 %v1537_v28, 16  ;;  %v1535_v40 = vpack.c.bf16 %v811_v35, %v811_v35 }
 0x214   : > { %v853_v41 = vrot.slane %v848_v29, 4  ;;  %v851_v53 = vor.u32 %v849_v48, %v848_v29 }
 0x215   : > { %v834_v36 = vor.u32 %v832_v32, %v831_v31  ;;  %v857_v38 = vrot.slane %v855_v33, 7  ;;  %v837_v47 = vshrl.u32 %v1535_v40, 16  ;;  %v840_v52 = vshll.u32 %v1535_v40, 16 }
 0x216   : > { %v835_v54 = vrot.slane %v831_v31, 4 }
 0x217   : > { %v871_v44 = vsel %vm869_vm15, %v834_v36, %v870_v34  ;;  %v860_v45 = vor.u32 %v858_v39, %v857_v38  ;;  %v862_v46 = vrot.slane %v857_v38, 4  ;;  %v839_v51 = vrot.slane %v837_v47, 7 }
 0x218   : > { %872 = vst [vmem:[#allocation4] sm:$0xf] %v871_v44 }
 0x219   : > { %v861_v49 = vsel %vm2088_vm0, %v853_v41, %v860_v45  ;;  %v877_v50 = vsel %vm2028_vm6, %v862_v46, %v876_v43  ;;  %v842_v55 = vor.u32 %v840_v52, %v839_v51  ;;  %v844_v57 = vrot.slane %v839_v51, 4 }
 0x21a   : > { %875 = vst [vmem:[#allocation4 + $0xc] sm:$0xf] %v861_v49  ;;  %878 = vst [vmem:[#allocation4 + $0x10] sm:$0x1] %v877_v50 }
 0x21b   : > { %v843_v58 = vsel %vm2088_vm0, %v835_v54, %v842_v55  ;;  %v852_v59 = vsel %vm2088_vm0, %v844_v57, %v851_v53 }
 0x21c   : > { %873 = vst [vmem:[#allocation4 + $0x4] sm:$0xf] %v843_v58  ;;  %874 = vst [vmem:[#allocation4 + $0x8] sm:$0xf] %v852_v59 }
 0x21f   : > { %v879_v60 = vld [vmem:[#allocation4] sm:$0xf] }
 0x220   : > { %v1149_v0 = vld [vmem:[#allocation4] sm:$0xe] }
 0x221   : > { %v1822_v61 = vld [vmem:[#allocation4 + $0x10] ss:$0 sps:$4 sm:$0x11]  }
 0x222   : > { %v947_v6 = vshll.u32 %v1822_v61, 16  ;;  %v1174_v27 = vrot.slane %v1822_v61, 1 }
 0x223   : > { %v880_v37 = vld [vmem:[#allocation4 + $0x4] sm:$0xf]  ;;  %v1819_v62 = vld [vmem:[#allocation4 + $0x8] sm:$0xff]  }
 0x224   : > { %v1478_v63 = vcombine.low %v879_v60, %v880_v37  ;;  %v939_v1 = vshll.u32 %v1819_v62, 16  ;;  %v1513_v3 = vcombine.low %v1149_v0, %v880_v37  ;;  %v943_v5 = vshrl.u32 %v1819_v62, 16 }
 0x225   : > { %v1172_v12 = vrot.slane %v1819_v62, 1  ;;  %v949_v16 = vrot.slane %v947_v6, 1 }
 0x226   : > { %v934_v2 = vshll.u32 %v1478_v63, 16  ;;  %1735 = vmatprep.mubr.bf16.mxu1 %v1478_v63  ;;  %v941_v4 = vrot.slane %v939_v1, 1  ;;  %v932_v7 = vshrl.u32 %v1478_v63, 16  ;;  %v1171_v11 = vrot.slane %v1513_v3, 1 }
 0x227   : > { %1736 = vmatmul.mubr.bf16.vlgmr.msra.gmra.mxu1 %v1819_v62  ;;  %v1175_v28 = vsel %vm1170_vm2, %v1172_v12, %v1174_v27 }
 0x228   : > { %v936_v8 = vrot.slane %v934_v2, 1  ;;  %v945_v9 = vor.u32 %v943_v5, %v941_v4  ;;  %v1173_v21 = vsel %vm1170_vm2, %v1171_v11, %v1172_v12 }
 0x22a   : > { %v937_v10 = vor.u32 %v936_v8, %v932_v7  ;;  %v950_v20 = vsel %vm930_vm1, %v945_v9, %v949_v16 }
 0x22c   : > { %v942_v18 = vsel %vm930_vm1, %v937_v10, %v941_v4 }
 0x22d   : > { %1715 = vmatprep.mubr.bf16.mxu0 %v942_v18 }
 0x22e   : > { %1716 = vmatmul.mubr.bf16.vlgmr.msra.gmra.mxu0 %v950_v20 }
 0x22f   : > { %1740 = vmatpush3.bf16.msra.mxu0 %v2080_v56  ;;  %1755 = vmatprep.mubr.bf16.mxu0 %v1173_v21  ;;  %v1827_v56 = vld [vmem:[%s2140_s4 + $0x90] sm:$0xff]  }
 0x230   : > { %1741 = vmatprep.subr.bf16.mxu0 %v1823_v19 }
 0x233   : > { %1742 = vmatpush3.bf16.msra.mxu0 %v1823_v19 }
 0x234   : > { %1743 = vmatprep.subr.bf16.mxu0 %v1824_v22 }
 0x237   : > { %1744 = vmatpush3.bf16.msra.mxu0 %v1824_v22 }
 0x238   : > { %1745 = vmatprep.subr.bf16.mxu0 %v1825_v23 }
 0x23b   : > { %1746 = vmatpush3.bf16.msra.mxu0 %v1825_v23 }
 0x23c   : > { %1747 = vmatprep.subr.bf16.mxu0 %v1826_v24 }
 0x23f   : > { %1748 = vmatpush3.bf16.msra.mxu0 %v1826_v24 }
 0x240   : > { %1749 = vmatprep.subr.bf16.mxu0 %v1827_v56 }
 0x243   : > { %1750 = vmatpush3.bf16.msra.mxu0 %v1827_v56 }
 0x244   : > { %1751 = vmatprep.subr.bf16.mxu0 %v1828_v25 }
 0x247   : > { %1752 = vmatpush3.bf16.msra.mxu0 %v1828_v25 }
 0x248   : > { %1753 = vmatprep.subr.bf16.mxu0 %v1829_v26 }
 0x24b   : > { %1754 = vmatpush3.bf16.msra.mxu0 %v1829_v26 }
 0x24e   : > { %1756 = vmatmul.mubr.bf16.vlgmr.msra.gmra.mxu0 %v1175_v28 }
 0x2e7   : > { %v1737_v31 = vpop.f32.mrf.mxu1 }
 0x2e9   : > { %v1134_v33 = vpop.f32.mrf.mxu1 }
 0x2eb   : > { %v1738_v38 = vpop.f32.mrf.mxu1 }
 0x2ed   : > { %v1137_v46 = vpop.f32.mrf.mxu1 }
 0x2ee   : > { %v1717_v29 = vpop.f32.mrf.mxu0 }
 0x2ef   : > { %v1143_v35 = vadd.f32 %v1737_v31, %v1717_v29 }
 0x2f0   : > { %v1035_v30 = vpop.f32.mrf.mxu0 }
 0x2f1   : > { %v1135_v39 = vadd.f32 %v1134_v33, %v1035_v30 }
 0x2f2   : > { %v1718_v32 = vpop.f32.mrf.mxu0 }
 0x2f3   : > { %v1146_v42 = vadd.f32 %v1738_v38, %v1718_v32 }
 0x2f4   : > { %v1038_v34 = vpop.f32.mrf.mxu0 }
 0x2f5   : > { %v1138_v50 = vadd.f32 %v1137_v46, %v1038_v34 }
 0x30e   : > { %v1757_v36 = vpop.f32.mrf.mxu0 }
 0x30f   : > { %v1277_v40 = vadd.f32 %v1757_v36, %v1143_v35 }
 0x310   : > { %v1260_v41 = vpop.f32.mrf.mxu0 }
 0x311   : > { %v1285_v43 = vmin.f32 %v1277_v40, 0.0  ;;  %v1275_v44 = vadd.f32 %v1260_v41, %v1135_v39  ;;  %vm1281_vm3 = vcmp.gt.f32.partialorder %v1277_v40, 0.0 }
 0x312   : > { %v1758_v45 = vpop.f32.mrf.mxu0 }
 0x313   : > { %v1291_v47 = vmul.f32 1.442695, %v1285_v43  ;;  %v1283_v48 = vmin.f32 %v1275_v44, 0.0  ;;  %v1278_v49 = vadd.f32 %v1758_v45, %v1146_v42  ;;  %vm1279_vm4 = vcmp.gt.f32.partialorder %v1275_v44, 0.0 }
 0x314   : > { %v1263_v51 = vpop.f32.mrf.mxu0 }
 0x315   : > { %1846 = vpow2.f32 %v1291_v47  ;;  %v1287_v52 = vmul.f32 1.442695, %v1283_v48  ;;  %v1286_v53 = vmin.f32 %v1278_v49, 0.0  ;;  %v1276_v54 = vadd.f32 %v1263_v51, %v1138_v50 }
 0x316   : > { %vm1282_vm5 = vcmp.gt.f32.partialorder %v1278_v49, 0.0 }
 0x317   : > { %1848 = vpow2.f32 %v1287_v52  ;;  %v1293_v55 = vmul.f32 1.442695, %v1286_v53  ;;  %v1284_v57 = vmin.f32 %v1276_v54, 0.0  ;;  %vm1280_vm6 = vcmp.gt.f32.partialorder %v1276_v54, 0.0 }
 0x319   : > { %1850 = vpow2.f32 %v1293_v55  ;;  %v1289_v58 = vmul.f32 1.442695, %v1284_v57 }
 0x31b   : > { %1852 = vpow2.f32 %v1289_v58 }
 0x322   : > { %v1847_v59 = vpop.eup %1846 }
 0x323   : > { %v1524_v60 = vadd.f32 -1.0, %v1847_v59 }
 0x324   : > { %v1849_v61 = vpop.eup %1848 }
 0x325   : > { %v1301_v37 = vsel %vm1281_vm3, %v1277_v40, %v1524_v60  ;;  %v1522_v62 = vadd.f32 -1.0, %v1849_v61 }
 0x326   : > { %v1851_v63 = vpop.eup %1850  ;;  %v1309_v0 = vadd.f32 %v1301_v37, %v1949_v15 }
 0x327   : > { %v1299_v1 = vsel %vm1279_vm4, %v1275_v44, %v1522_v62  ;;  %v1525_v2 = vadd.f32 -1.0, %v1851_v63 }
 0x328   : > { %1313 = vst [vmem:[%s224_s29 + $0x10] sm:$0xff] %v1309_v0  ;;  %v1307_v3 = vadd.f32 %v1299_v1, %v1945_v13  ;;  %v1853_v4 = vpop.eup %1852 }
 0x329   : > { %v1302_v5 = vsel %vm1282_vm5, %v1278_v49, %v1525_v2  ;;  %v1523_v7 = vadd.f32 -1.0, %v1853_v4 }
 0x32a   : > { %1311 = vst [vmem:[%s224_s29] sm:$0xff] %v1307_v3  ;;  %v1310_v6 = vadd.f32 %v1302_v5, %v1955_v17 }
 0x32b   : > { %v1300_v8 = vsel %vm1280_vm6, %v1276_v54, %v1523_v7 }
 0x32c   : > { %1314 = vst [vmem:[%s224_s29 + $0x18] sm:$0xff] %v1310_v6  ;;  %v1308_v9 = vadd.f32 %v1300_v8, %v1947_v14 }
 0x32e   : > { %1312 = vst [vmem:[%s224_s29 + $0x8] sm:$0xff] %v1308_v9 }
 0x32f PF: > { %s15_s18 = sadd.s32 1, %s1860_s18  }
 0x330   : > { %p12_p4 = scmp.ge.s32.totalorder %s15_s18, 4  }
 0x332   :  { %14 = sbr.rel (!%p12_p4) target bundleno = 1 (0x1), region = 74 }

// kernel: resnet1d_forward.15
= control target key start
LH: loop header
LB: loop body
LE: loop exit
PB: predicated region body
PF: predicated region fallthrough
CT: control target
= control target key end

     0   :  { %s1881_s21 = smov 0   ;;  %s2198_s0 = inlined_call_operand.vmem [shape: f32[2,32,128], index: 0, kind: input, shape index: {}]   ;;  %s2199_s1 = inlined_call_operand.vmem [shape: bf16[3,128,128], index: 1, kind: input, shape index: {}]   ;;  %s2200_s2 = inlined_call_operand.vmem [shape: bf16[1,128,128], index: 2, kind: input, shape index: {}]   ;;  %s2201_s3 = inlined_call_operand.vmem [shape: f32[1,128], index: 3, kind: input, shape index: {}]   ;;  %s2202_s4 = inlined_call_operand.vmem [shape: bf16[3,128,128], index: 4, kind: input, shape index: {}]   ;;  %s2203_s5 = inlined_call_operand.vmem [shape: bf16[1,128,128], index: 5, kind: input, shape index: {}]   ;;  %s2204_s6 = inlined_call_operand.vmem [shape: f32[2,16,128], index: 6, kind: output, shape index: {}]  }
   0x1 LB: > { %s1343_s22 = sadd.s32 4294967295, %s1842_s21   ;;  %p1347_p0 = scmp.ge.s32.totalorder %s1842_s21, 1  ;;  %s1842_s21 = sphi %s1881_s21, %s16_s21  }
   0x2   : > { %p212_p1 = scmp.lt.s32.totalorder %s1842_s21, 3 }
   0x4   : > { %p213_p2 = pnand %p1347_p0, %p212_p1 }
   0x5   : > { %p242_p3 = scmp.lt.s32.totalorder (!%p213_p2), %s1343_s22, 1 }
   0x6   : > { %216 = sbr.rel (%p213_p2) target bundleno = 807 (0x327), region = 44 }
   0xb   : > { %v1752_v0 = vld [vmem:[%s2199_s1 + $0x78] sm:$0xff]   ;;  %v1844_v1 = vmov 0.0   ;;  %v1754_v3 = vld [vmem:[%s2199_s1 + $0x70] sm:$0xff]   ;;  %vm1845_vm0 = vmmov 0   ;;  %v1756_v5 = vld [vmem:[%s2199_s1 + $0x68] sm:$0xff]   ;;  %s2208_s22 = smov (!%p242_p3, %s1343_s22), 1 }
   0xc   : > { %1582 = vmatprep.subr.bf16.mxu0 %v1844_v1  ;;  %253 = vst [vmem:[#allocation2] sm:$0x1] %v1844_v1  ;;  %1602 = vmatprep.subr.bf16.mxu1 %v1844_v1  ;;  %v1753_v2 = vld [vmem:[%s2199_s1 + $0x38] sm:$0xff]   ;;  %v1755_v4 = vld [vmem:[%s2199_s1 + $0x30] sm:$0xff]   ;;  %v1757_v6 = vld [vmem:[%s2199_s1 + $0x28] sm:$0xff]   ;;  %s1499_s13 = sshll.u32 %s2208_s22, 5 }
   0xd   : > { %1583 = vmatpush3.bf16.msra.mxu0 %v1752_v0  ;;  %1598 = vmatprep.mubr.msk.bf16.mxu0 %vm1845_vm0, %v1844_v1  ;;  %v1758_v7 = vld [vmem:[%s2199_s1 + $0x60] sm:$0xff]   ;;  %s246_s18 = scalar_lea.vmem %s2198_s0, %s1499_s13  ;;  %v1760_v9 = vld [vmem:[%s2199_s1 + $0x58] sm:$0xff]   ;;  %v1762_v15 = vld [vmem:[%s2199_s1 + $0x50] sm:$0xff]   ;;  %vm738_vm3 = vcmask 1040384   ;;  %vm739_vm4 = vsmask.f32 256 }
   0xe   : > { %1603 = vmatpush3.bf16.msra.mxu1 %v1753_v2  ;;  %1584 = vmatprep.subr.bf16.mxu0 %v1844_v1  ;;  %v1759_v8 = vld [vmem:[%s2199_s1 + $0x20] sm:$0xff]   ;;  %v1761_v10 = vld [vmem:[%s2199_s1 + $0x18] sm:$0xff]   ;;  %v256_v12 = vld [vmem:[%s246_s18 + $0x8] sm:$0xff]  ;;  %vm744_vm6 = vsmask.f32 7938  ;;  %vm789_vm9 = vcmask 1043456  }
   0xf   : > { %1604 = vmatprep.subr.bf16.mxu1 %v1844_v1  ;;  %1618 = vmatprep.mubr.msk.bf16.mxu1 %vm1845_vm0, %v1844_v1  ;;  %v255_v11 = vld [vmem:[%s246_s18] sm:$0xff]  ;;  %v257_v13 = vld [vmem:[%s246_s18 + $0x10] sm:$0xff]  ;;  %v258_v14 = vld [vmem:[%s246_s18 + $0x18] sm:$0xff]  ;;  %260 = vst [vmem:[#allocation2 + $0x9] sm:$0xff] %v256_v12  ;;  %vm767_vm12 = vsmask.f32 4368 }
  0x10   : > { %259 = vst [vmem:[#allocation2 + $0x1] sm:$0xff] %v255_v11  ;;  %261 = vst [vmem:[#allocation2 + $0x11] sm:$0xff] %v257_v13  ;;  %v1763_v16 = vld [vmem:[%s2199_s1 + $0x10] sm:$0xff]   ;;  %v1764_v17 = vld [vmem:[%s2199_s1 + $0x48] sm:$0xff]   ;;  %vm842_vm14 = vsmask.f32 7424 }
  0x11   : > { %1585 = vmatpush3.bf16.msra.mxu0 %v1754_v3  ;;  %262 = vst [vmem:[#allocation2 + $0x19] sm:$0xff] %v258_v14  ;;  %v1765_v18 = vld [vmem:[%s2199_s1 + $0x8] sm:$0xff]   ;;  %v1766_v19 = vld [vmem:[%s2199_s1 + $0x40] sm:$0xff]   ;;  %v1768_v25 = vld [vmem:[%s2199_s1 + $0xb8] sm:$0xff]   ;;  %vm1056_vm15 = vcmask 1046528   ;;  %s1500_s25 = sshll.u32 %s2208_s22, 4 }
  0x12   : > { %1605 = vmatpush3.bf16.msra.mxu1 %v1755_v4  ;;  %1586 = vmatprep.subr.bf16.mxu0 %v1844_v1  ;;  %v1767_v20 = vld [vmem:[%s2199_s1] sm:$0xff]   ;;  %v1769_v28 = vld [vmem:[%s2199_s1 + $0xb0] sm:$0xff]   ;;  %v1770_v29 = vld [vmem:[%s2199_s1 + $0xa8] sm:$0xff]   ;;  %s251_s28 = scalar_lea.vmem %s2204_s6, %s1500_s25 }
  0x13   : > { %1606 = vmatprep.subr.bf16.mxu1 %v1844_v1  ;;  %v1771_v30 = vld [vmem:[%s2199_s1 + $0xa0] sm:$0xff]   ;;  %v1772_v31 = vld [vmem:[%s2199_s1 + $0x98] sm:$0xff]   ;;  %v1773_v32 = vld [vmem:[%s2199_s1 + $0x90] sm:$0xff]  }
  0x14   : > { %v1774_v33 = vld [vmem:[%s2199_s1 + $0x88] sm:$0xff]   ;;  %v1775_v34 = vld [vmem:[%s2199_s1 + $0x80] sm:$0xff]   ;;  %v1776_v38 = vld [vmem:[%s2200_s2 + $0x38] sm:$0xff]  }
  0x15   : > { %1587 = vmatpush3.bf16.msra.mxu0 %v1756_v5  ;;  %v1777_v39 = vld [vmem:[%s2200_s2 + $0x30] sm:$0xff]   ;;  %v1778_v40 = vld [vmem:[%s2200_s2 + $0x28] sm:$0xff]   ;;  %v1779_v41 = vld [vmem:[%s2200_s2 + $0x20] sm:$0xff]  }
  0x16   : > { %1607 = vmatpush3.bf16.msra.mxu1 %v1757_v6  ;;  %1588 = vmatprep.subr.bf16.mxu0 %v1844_v1  ;;  %v1780_v42 = vld [vmem:[%s2200_s2 + $0x18] sm:$0xff]   ;;  %v1781_v43 = vld [vmem:[%s2200_s2 + $0x10] sm:$0xff]   ;;  %v1782_v44 = vld [vmem:[%s2200_s2 + $0x8] sm:$0xff]  }
  0x17   : > { %1608 = vmatprep.subr.bf16.mxu1 %v1844_v1  ;;  %v284_v21 = vld [vmem:[#allocation2 + $0x1] ss:$2 sm:$0xff]  ;;  %v263_v23 = vld [vmem:[#allocation2] ss:$2 sm:$0xff]  ;;  %v741_v11 = vld [vmem:[#allocation4] sm:$0x1] }
  0x18   : > { %v286_v22 = vld [vmem:[#allocation2 + $0x11] ss:$2 sm:$0xff]  ;;  %v265_v24 = vld [vmem:[#allocation2 + $0x10] ss:$2 sm:$0xff]  ;;  %v1783_v45 = vld [vmem:[%s2200_s2] sm:$0xff]  }
  0x19   : > { %1589 = vmatpush3.bf16.msra.mxu0 %v1758_v7  ;;  %v287_v26 = vpack.c.bf16 %v286_v22, %v284_v21  ;;  %v266_v27 = vpack.c.bf16 %v265_v24, %v263_v23  ;;  %v484_v35 = vld [vmem:[#allocation2 + $0x2] ss:$2 sm:$0xff]  ;;  %v486_v36 = vld [vmem:[#allocation2 + $0x12] ss:$2 sm:$0xff]  ;;  %vm2039_vm5 = vmand %vm738_vm3, %vm739_vm4 }
  0x1a   : > { %1609 = vmatpush3.bf16.msra.mxu1 %v1759_v8  ;;  %1590 = vmatprep.subr.bf16.mxu0 %v1844_v1  ;;  %v487_v37 = vpack.c.bf16 %v486_v36, %v484_v35  ;;  %v746_v13 = vld [vmem:[#allocation4 + $0x8] sm:$0x1]  ;;  %v742_v14 = vsel %vm2039_vm5, 0, %v741_v11  ;;  %vm745_vm7 = vmand %vm738_vm3, %vm744_vm6  ;;  %v1790_v21 = vld [vmem:[%s2202_s4 + $0x20] sm:$0xff]  }
  0x1b   : > { %1610 = vmatprep.subr.bf16.mxu1 %v1844_v1  ;;  %743 = vst [vmem:[#allocation4] sm:$0x1] %v742_v14  ;;  %v1791_v22 = vld [vmem:[%s2202_s4 + $0x68] sm:$0xff]   ;;  %v1792_v23 = vld [vmem:[%s2202_s4 + $0x18] sm:$0xff]   ;;  %v1793_v24 = vld [vmem:[%s2202_s4 + $0x60] sm:$0xff]  }
  0x1c   : > { %vm790_vm11 = vmand %vm789_vm9, %vm744_vm6 }
  0x1d   : > { %1591 = vmatpush3.bf16.msra.mxu0 %v1760_v9  ;;  %vm768_vm13 = vmor %vm739_vm4, %vm767_vm12 }
  0x1e   : > { %1611 = vmatpush3.bf16.msra.mxu1 %v1761_v10  ;;  %1592 = vmatprep.subr.bf16.mxu0 %v1844_v1 }
  0x1f   : > { %1612 = vmatprep.subr.bf16.mxu1 %v1844_v1 }
  0x21   : > { %1593 = vmatpush3.bf16.msra.mxu0 %v1762_v15  ;;  %v747_v15 = vsel %vm745_vm7, 0, %v746_v13 }
  0x22   : > { %1613 = vmatpush3.bf16.msra.mxu1 %v1763_v16  ;;  %1594 = vmatprep.subr.bf16.mxu0 %v1844_v1  ;;  %748 = vst [vmem:[#allocation4 + $0x8] sm:$0x1] %v747_v15  ;;  %v1785_v16 = vld [vmem:[%s2202_s4 + $0x38] sm:$0xff]  }
  0x23   : > { %1614 = vmatprep.subr.bf16.mxu1 %v1844_v1  ;;  %v1805_v15 = vld [vmem:[%s2202_s4 + $0xb8] sm:$0xff]  }
  0x25   : > { %1595 = vmatpush3.bf16.msra.mxu0 %v1764_v17  ;;  %v1786_v17 = vld [vmem:[%s2202_s4 + $0x30] sm:$0xff]  }
  0x26   : > { %1615 = vmatpush3.bf16.msra.mxu1 %v1765_v18  ;;  %1596 = vmatprep.subr.bf16.mxu0 %v1844_v1  ;;  %v1787_v18 = vld [vmem:[%s2202_s4 + $0x78] sm:$0xff]  }
  0x27   : > { %1616 = vmatprep.subr.bf16.mxu1 %v1844_v1 }
  0x29   : > { %1597 = vmatpush3.bf16.msra.mxu0 %v1766_v19  ;;  %v1788_v19 = vld [vmem:[%s2202_s4 + $0x28] sm:$0xff]  }
  0x2a   : > { %1617 = vmatpush3.bf16.msra.mxu1 %v1767_v20  ;;  %1622 = vmatprep.subr.bf16.mxu0 %v1844_v1  ;;  %v1789_v20 = vld [vmem:[%s2202_s4 + $0x70] sm:$0xff]  }
  0x2b   : > { %1642 = vmatprep.subr.bf16.mxu1 %v1844_v1 }
  0x2c   : > { %1599 = vmatmul.mubr.bf16.vlgmr.msra.gmra.mxu0 %v287_v26  ;;  %v1795_v26 = vld [vmem:[%s2202_s4 + $0x58] sm:$0xff]  }
  0x2d   : > { %1619 = vmatmul.mubr.bf16.vlgmr.msra.gmra.mxu1 %v266_v27  ;;  %1623 = vmatpush3.bf16.msra.mxu0 %v1768_v25  ;;  %v1794_v25 = vld [vmem:[%s2202_s4 + $0x10] sm:$0xff]   ;;  %v1796_v27 = vld [vmem:[%s2202_s4 + $0x8] sm:$0xff]  }
  0x2e   : > { %1624 = vmatprep.subr.bf16.mxu0 %v1844_v1  ;;  %1638 = vmatprep.mubr.msk.bf16.mxu0 %vm1845_vm0, %v1844_v1 }
  0x2f   : > { %1658 = vmatprep.mubr.msk.bf16.mxu1 %vm1845_vm0, %v1844_v1  ;;  %1643 = vmatpush3.bf16.msra.mxu1 %v1776_v38 }
  0x30   : > { %1644 = vmatprep.subr.bf16.mxu1 %v1844_v1 }
  0x31   : > { %1625 = vmatpush3.bf16.msra.mxu0 %v1769_v28  ;;  %v1797_v28 = vld [vmem:[%s2202_s4 + $0x50] sm:$0xff]  }
  0x32   : > { %1626 = vmatprep.subr.bf16.mxu0 %v1844_v1 }
  0x33   : > { %1645 = vmatpush3.bf16.msra.mxu1 %v1777_v39 }
  0x34   : > { %1646 = vmatprep.subr.bf16.mxu1 %v1844_v1 }
  0x35   : > { %1627 = vmatpush3.bf16.msra.mxu0 %v1770_v29  ;;  %v1798_v29 = vld [vmem:[%s2202_s4] sm:$0xff]  }
  0x36   : > { %1628 = vmatprep.subr.bf16.mxu0 %v1844_v1 }
  0x37   : > { %1647 = vmatpush3.bf16.msra.mxu1 %v1778_v40 }
  0x38   : > { %1648 = vmatprep.subr.bf16.mxu1 %v1844_v1 }
  0x39   : > { %1629 = vmatpush3.bf16.msra.mxu0 %v1771_v30  ;;  %v1799_v30 = vld [vmem:[%s2202_s4 + $0x48] sm:$0xff]  }
  0x3a   : > { %1630 = vmatprep.subr.bf16.mxu0 %v1844_v1 }
  0x3b   : > { %1649 = vmatpush3.bf16.msra.mxu1 %v1779_v41 }
  0x3c   : > { %1650 = vmatprep.subr.bf16.mxu1 %v1844_v1 }
  0x3d   : > { %1631 = vmatpush3.bf16.msra.mxu0 %v1772_v31  ;;  %v1802_v31 = vld [vmem:[%s2202_s4 + $0x40] sm:$0xff]  }
  0x3e   : > { %1632 = vmatprep.subr.bf16.mxu0 %v1844_v1 }
  0x3f   : > { %1651 = vmatpush3.bf16.msra.mxu1 %v1780_v42 }
  0x40   : > { %1652 = vmatprep.subr.bf16.mxu1 %v1844_v1 }
  0x41   : > { %1633 = vmatpush3.bf16.msra.mxu0 %v1773_v32  ;;  %v1412_v32 = vld [vmem:[%s2201_s3] ss:$0 sm:$0xff] }
  0x42   : > { %1634 = vmatprep.subr.bf16.mxu0 %v1844_v1 }
  0x43   : > { %1653 = vmatpush3.bf16.msra.mxu1 %v1781_v43 }
  0x44   : > { %1654 = vmatprep.subr.bf16.mxu1 %v1844_v1 }
  0x45   : > { %1635 = vmatpush3.bf16.msra.mxu0 %v1774_v33 }
  0x46   : > { %1636 = vmatprep.subr.bf16.mxu0 %v1844_v1 }
  0x47   : > { %1655 = vmatpush3.bf16.msra.mxu1 %v1782_v44 }
  0x48   : > { %1656 = vmatprep.subr.bf16.mxu1 %v1844_v1 }
  0x49   : > { %1637 = vmatpush3.bf16.msra.mxu0 %v1775_v34 }
  0x4a   : > { %1662 = vmatprep.subr.bf16.mxu0 %v1844_v1 }
  0x4b   : > { %1657 = vmatpush3.bf16.msra.mxu1 %v1783_v45 }
  0x4c   : > { %1639 = vmatmul.mubr.bf16.vlgmr.msra.gmra.mxu0 %v487_v37  ;;  %1682 = vmatprep.subr.bf16.mxu1 %v1844_v1 }
  0x4d   : > { %1678 = vmatprep.mubr.msk.bf16.mxu0 %vm1845_vm0, %v1844_v1  ;;  %1663 = vmatpush3.bf16.msra.mxu0 %v1787_v18  ;;  %v1807_v18 = vld [vmem:[%s2202_s4 + $0xb0] sm:$0xff]  }
  0x4e   : > { %1664 = vmatprep.subr.bf16.mxu0 %v1844_v1 }
  0x51   : > { %1665 = vmatpush3.bf16.msra.mxu0 %v1789_v20  ;;  %v1809_v20 = vld [vmem:[%s2202_s4 + $0xa8] sm:$0xff]  }
  0x52   : > { %1666 = vmatprep.subr.bf16.mxu0 %v1844_v1 }
  0x55   : > { %1667 = vmatpush3.bf16.msra.mxu0 %v1791_v22  ;;  %v1811_v22 = vld [vmem:[%s2202_s4 + $0xa0] sm:$0xff]  }
  0x56   : > { %1668 = vmatprep.subr.bf16.mxu0 %v1844_v1 }
  0x59   : > { %1669 = vmatpush3.bf16.msra.mxu0 %v1793_v24  ;;  %v1813_v24 = vld [vmem:[%s2202_s4 + $0x98] sm:$0xff]  }
  0x5a   : > { %1670 = vmatprep.subr.bf16.mxu0 %v1844_v1 }
  0x5d   : > { %1671 = vmatpush3.bf16.msra.mxu0 %v1795_v26  ;;  %v1815_v26 = vld [vmem:[%s2202_s4 + $0x90] sm:$0xff]  }
  0x5e   : > { %1672 = vmatprep.subr.bf16.mxu0 %v1844_v1 }
  0x61   : > { %1673 = vmatpush3.bf16.msra.mxu0 %v1797_v28  ;;  %v1164_v28 = vld [vmem:[#allocation2 + $0x1] ss:$2 sm:$0xff] }
  0x62   : > { %1674 = vmatprep.subr.bf16.mxu0 %v1844_v1 }
  0x65   : > { %1675 = vmatpush3.bf16.msra.mxu0 %v1799_v30  ;;  %v1817_v30 = vld [vmem:[%s2202_s4 + $0x88] sm:$0xff]  }
  0x66   : > { %1676 = vmatprep.subr.bf16.mxu0 %v1844_v1 }
  0x69   : > { %1677 = vmatpush3.bf16.msra.mxu0 %v1802_v31 }
  0x6a   : > { %1702 = vmatprep.subr.bf16.mxu0 %v1844_v1 }
  0xec   : > { %v387_v46 = vpop.f32.mrf.mxu0 }
  0xed   : > { %v476_v47 = vpop.f32.mrf.mxu1 }
  0xee   : > { %v1600_v48 = vpop.f32.mrf.mxu0  ;;  %v477_v54 = vadd.f32 %v476_v47, %v387_v46 }
  0xef   : > { %v1620_v49 = vpop.f32.mrf.mxu1 }
  0xf0   : > { %v390_v50 = vpop.f32.mrf.mxu0 }
  0xf1   : > { %v479_v51 = vpop.f32.mrf.mxu1 }
  0xf2   : > { %v1601_v52 = vpop.f32.mrf.mxu0  ;;  %v480_v58 = vadd.f32 %v479_v51, %v390_v50 }
  0xf3   : > { %v1621_v53 = vpop.f32.mrf.mxu1 }
 0x10c   : > { %v587_v55 = vpop.f32.mrf.mxu0 }
 0x10d   : > { %v594_v56 = vadd.f32 %v587_v55, %v477_v54  ;;  %v791_v54 = vld [vmem:[#allocation4] sm:$0xf] }
 0x10e   : > { %v1640_v57 = vpop.f32.mrf.mxu0 }
 0x10f   : > { %v598_v59 = vmin.f32 %v594_v56, 0.0  ;;  %vm596_vm1 = vcmp.gt.f32.partialorder %v594_v56, 0.0 }
 0x110   : > { %v590_v60 = vpop.f32.mrf.mxu0 }
 0x111   : > { %v600_v61 = vmul.f32 1.442695, %v598_v59  ;;  %v595_v62 = vadd.f32 %v590_v60, %v480_v58  ;;  %v795_v60 = vld [vmem:[#allocation4 + $0x8] sm:$0x1] }
 0x112   : > { %v1641_v63 = vpop.f32.mrf.mxu0 }
 0x113   : > { %1820 = vpow2.f32 %v600_v61  ;;  %v599_v0 = vmin.f32 %v595_v62, 0.0  ;;  %vm597_vm2 = vcmp.gt.f32.partialorder %v595_v62, 0.0 }
 0x115   : > { %v602_v2 = vmul.f32 1.442695, %v599_v0 }
 0x117   : > { %1822 = vpow2.f32 %v602_v2 }
 0x120   : > { %v1821_v3 = vpop.eup %1820 }
 0x121   : > { %v1408_v4 = vadd.f32 -1.0, %v1821_v3  ;;  %v1801_v3 = vld [vmem:[%s2203_s5 + $0x38] sm:$0xff]  }
 0x123   : > { %v606_v7 = vsel %vm596_vm1, %v594_v56, %v1408_v4 }
 0x124   : > { %v1823_v5 = vpop.eup %1822 }
 0x125   : > { %v1409_v6 = vadd.f32 -1.0, %v1823_v5 }
 0x127   : > { %v607_v8 = vsel %vm597_vm2, %v595_v62, %v1409_v6 }
 0x128   : > { %v1508_v9 = vpack.c.bf16 %v607_v8, %v606_v7 }
 0x12a   : > { %1509 = vst [vmem:[#allocation3] sm:$0xff] %v1508_v9  }
 0x131   : > { %v1784_v10 = vld [vmem:[#allocation3] sm:$0xff]  }
 0x132   : > { %1659 = vmatmul.mubr.bf16.vlgmr.msra.gmra.mxu1 %v1784_v10  ;;  %v1803_v10 = vld [vmem:[%s2203_s5 + $0x30] sm:$0xff]  }
 0x133   : > { %1698 = vmatprep.mubr.msk.bf16.mxu1 %vm1845_vm0, %v1844_v1  ;;  %1683 = vmatpush3.bf16.msra.mxu1 %v1785_v16  ;;  %v1806_v16 = vld [vmem:[%s2203_s5 + $0x28] sm:$0xff]  }
 0x134   : > { %1684 = vmatprep.subr.bf16.mxu1 %v1844_v1 }
 0x137   : > { %1685 = vmatpush3.bf16.msra.mxu1 %v1786_v17 }
 0x138   : > { %1686 = vmatprep.subr.bf16.mxu1 %v1844_v1 }
 0x13b   : > { %1687 = vmatpush3.bf16.msra.mxu1 %v1788_v19  ;;  %v1808_v19 = vld [vmem:[%s2203_s5 + $0x20] sm:$0xff]  }
 0x13c   : > { %1688 = vmatprep.subr.bf16.mxu1 %v1844_v1 }
 0x13f   : > { %1689 = vmatpush3.bf16.msra.mxu1 %v1790_v21  ;;  %v1810_v21 = vld [vmem:[%s2203_s5 + $0x18] sm:$0xff]  }
 0x140   : > { %1690 = vmatprep.subr.bf16.mxu1 %v1844_v1 }
 0x143   : > { %1691 = vmatpush3.bf16.msra.mxu1 %v1792_v23  ;;  %v1812_v23 = vld [vmem:[%s2203_s5 + $0x10] sm:$0xff]  }
 0x144   : > { %1692 = vmatprep.subr.bf16.mxu1 %v1844_v1 }
 0x147   : > { %1693 = vmatpush3.bf16.msra.mxu1 %v1794_v25  ;;  %v1814_v25 = vld [vmem:[%s2203_s5 + $0x8] sm:$0xff]  }
 0x148   : > { %1694 = vmatprep.subr.bf16.mxu1 %v1844_v1 }
 0x14b   : > { %1695 = vmatpush3.bf16.msra.mxu1 %v1796_v27  ;;  %v1816_v27 = vld [vmem:[%s2203_s5] sm:$0xff]  }
 0x14c   : > { %1696 = vmatprep.subr.bf16.mxu1 %v1844_v1 }
 0x14f   : > { %1697 = vmatpush3.bf16.msra.mxu1 %v1798_v29  ;;  %v1165_v29 = vld [vmem:[#allocation2 + $0x11] ss:$2 sm:$0xff] }
 0x150   : > { %1722 = vmatprep.subr.bf16.mxu1 %v1844_v1  ;;  %v1166_v31 = vpack.c.bf16 %v1165_v29, %v1164_v28 }
 0x1f2   : > { %v731_v33 = vpop.f32.mrf.mxu1 }
 0x1f3   : > { %v732_v34 = vadd.f32 %v1412_v32, %v731_v33 }
 0x1f4   : > { %v1660_v35 = vpop.f32.mrf.mxu1 }
 0x1f5   : > { %v751_v36 = vmin.f32 %v732_v34, 0.0  ;;  %vm749_vm8 = vcmp.gt.f32.partialorder %v732_v34, 0.0 }
 0x1f6   : > { %v734_v37 = vpop.f32.mrf.mxu1 }
 0x1f7   : > { %v753_v38 = vmul.f32 1.442695, %v751_v36  ;;  %v735_v39 = vadd.f32 %v1412_v32, %v734_v37 }
 0x1f8   : > { %v1661_v40 = vpop.f32.mrf.mxu1 }
 0x1f9   : > { %1824 = vpow2.f32 %v753_v38  ;;  %v752_v41 = vmin.f32 %v735_v39, 0.0  ;;  %vm750_vm10 = vcmp.gt.f32.partialorder %v735_v39, 0.0 }
 0x1fb   : > { %v755_v42 = vmul.f32 1.442695, %v752_v41 }
 0x1fd   : > { %1826 = vpow2.f32 %v755_v42 }
 0x206   : > { %v1825_v43 = vpop.eup %1824 }
 0x207   : > { %v1422_v44 = vadd.f32 -1.0, %v1825_v43 }
 0x209   : > { %v759_v45 = vsel %vm749_vm8, %v732_v34, %v1422_v44  ;;  %v1818_v34 = vld [vmem:[%s2202_s4 + $0x80] sm:$0xff]  }
 0x20a   : > { %v1827_v46 = vpop.eup %1826  ;;  %v1503_v47 = vpack.c.bf16 %v759_v45, %v759_v45 }
 0x20b   : > { %v1423_v48 = vadd.f32 -1.0, %v1827_v46 }
 0x20c   : > { %v770_v49 = vshrl.u32 %v1503_v47, 16  ;;  %v773_v52 = vshll.u32 %v1503_v47, 16 }
 0x20d   : > { %v760_v50 = vsel %vm750_vm10, %v735_v39, %v1423_v48 }
 0x20e   : > { %v772_v51 = vrot.slane %v770_v49, 7  ;;  %v1504_v53 = vpack.c.bf16 %v760_v50, %v760_v50 }
 0x210   : > { %v775_v55 = vor.u32 %v773_v52, %v772_v51  ;;  %v778_v56 = vshrl.u32 %v1504_v53, 16  ;;  %v781_v59 = vshll.u32 %v1504_v53, 16  ;;  %v776_v61 = vrot.slane %v772_v51, 4 }
 0x212   : > { %v792_v57 = vsel %vm790_vm11, %v775_v55, %v791_v54  ;;  %v780_v58 = vrot.slane %v778_v56, 7 }
 0x213   : > { %793 = vst [vmem:[#allocation4] sm:$0xf] %v792_v57 }
 0x214   : > { %v783_v62 = vor.u32 %v781_v59, %v780_v58  ;;  %v785_v63 = vrot.slane %v780_v58, 4 }
 0x216   : > { %v784_v0 = vsel %vm768_vm13, %v776_v61, %v783_v62  ;;  %v796_v2 = vsel %vm2039_vm5, %v785_v63, %v795_v60 }
 0x217   : > { %794 = vst [vmem:[#allocation4 + $0x4] sm:$0xf] %v784_v0  ;;  %797 = vst [vmem:[#allocation4 + $0x8] sm:$0x1] %v796_v2 }
 0x21a   : > { %v798_v4 = vld [vmem:[#allocation4] sm:$0xf] }
 0x21b   : > { %v1035_v32 = vld [vmem:[#allocation4] sm:$0xe] }
 0x21e   : > { %v2120_v5 = vld [vmem:[#allocation4 + $0x4] sm:$0xf]  ;;  %v2123_v7 = vld [vmem:[#allocation4 + $0x8] ss:$0 sps:$4 sm:$0x11]  }
 0x21f   : > { %v1442_v6 = vcombine.low %v798_v4, %v2120_v5  ;;  %v851_v9 = vshll.u32 %v2123_v7, 16  ;;  %v1476_v33 = vcombine.low %v1035_v32, %v2120_v5  ;;  %v1058_v36 = vrot.slane %v2123_v7, 1 }
 0x221   : > { %1699 = vmatmul.mubr.bf16.vlgmr.msra.gmra.mxu1 %v1442_v6  ;;  %v846_v8 = vshll.u32 %v1442_v6, 16  ;;  %v844_v11 = vshrl.u32 %v1442_v6, 16  ;;  %v853_v14 = vrot.slane %v851_v9, 1  ;;  %v1057_v35 = vrot.slane %v1476_v33, 1 }
 0x222   : > { %1723 = vmatpush3.bf16.msra.mxu1 %v1801_v3  ;;  %1738 = vmatprep.mubr.msk.bf16.mxu1 %vm1845_vm0, %v1844_v1 }
 0x223   : > { %1724 = vmatprep.subr.bf16.mxu1 %v1844_v1  ;;  %v848_v12 = vrot.slane %v846_v8, 1  ;;  %v1059_v37 = vsel %vm1056_vm15, %v1057_v35, %v1058_v36 }
 0x225   : > { %v849_v13 = vor.u32 %v848_v12, %v844_v11 }
 0x226   : > { %1725 = vmatpush3.bf16.msra.mxu1 %v1803_v10 }
 0x227   : > { %v854_v17 = vsel %vm842_vm14, %v849_v13, %v853_v14  ;;  %1726 = vmatprep.subr.bf16.mxu1 %v1844_v1 }
 0x228   : > { %1679 = vmatmul.mubr.bf16.vlgmr.msra.gmra.mxu0 %v854_v17 }
 0x229   : > { %1703 = vmatpush3.bf16.msra.mxu0 %v1805_v15  ;;  %1718 = vmatprep.mubr.msk.bf16.mxu0 %vm1845_vm0, %v1844_v1 }
 0x22a   : > { %1727 = vmatpush3.bf16.msra.mxu1 %v1806_v16  ;;  %1704 = vmatprep.subr.bf16.mxu0 %v1844_v1 }
 0x22b   : > { %1728 = vmatprep.subr.bf16.mxu1 %v1844_v1 }
 0x22d   : > { %1705 = vmatpush3.bf16.msra.mxu0 %v1807_v18 }
 0x22e   : > { %1729 = vmatpush3.bf16.msra.mxu1 %v1808_v19  ;;  %1706 = vmatprep.subr.bf16.mxu0 %v1844_v1 }
 0x22f   : > { %1730 = vmatprep.subr.bf16.mxu1 %v1844_v1 }
 0x231   : > { %1707 = vmatpush3.bf16.msra.mxu0 %v1809_v20 }
 0x232   : > { %1731 = vmatpush3.bf16.msra.mxu1 %v1810_v21  ;;  %1708 = vmatprep.subr.bf16.mxu0 %v1844_v1 }
 0x233   : > { %1732 = vmatprep.subr.bf16.mxu1 %v1844_v1 }
 0x235   : > { %1709 = vmatpush3.bf16.msra.mxu0 %v1811_v22 }
 0x236   : > { %1733 = vmatpush3.bf16.msra.mxu1 %v1812_v23  ;;  %1710 = vmatprep.subr.bf16.mxu0 %v1844_v1 }
 0x237   : > { %1734 = vmatprep.subr.bf16.mxu1 %v1844_v1 }
 0x239   : > { %1711 = vmatpush3.bf16.msra.mxu0 %v1813_v24 }
 0x23a   : > { %1735 = vmatpush3.bf16.msra.mxu1 %v1814_v25  ;;  %1712 = vmatprep.subr.bf16.mxu0 %v1844_v1 }
 0x23b   : > { %1736 = vmatprep.subr.bf16.mxu1 %v1844_v1 }
 0x23d   : > { %1713 = vmatpush3.bf16.msra.mxu0 %v1815_v26 }
 0x23e   : > { %1737 = vmatpush3.bf16.msra.mxu1 %v1816_v27  ;;  %1714 = vmatprep.subr.bf16.mxu0 %v1844_v1 }
 0x241   : > { %1715 = vmatpush3.bf16.msra.mxu0 %v1817_v30  ;;  %1739 = vmatmul.mubr.bf16.vlgmr.msra.gmra.mxu1 %v1166_v31 }
 0x242   : > { %1716 = vmatprep.subr.bf16.mxu0 %v1844_v1 }
 0x245   : > { %1717 = vmatpush3.bf16.msra.mxu0 %v1818_v34 }
 0x248   : > { %1719 = vmatmul.mubr.bf16.vlgmr.msra.gmra.mxu0 %v1059_v37 }
 0x2e1   : > { %v1028_v38 = vpop.f32.mrf.mxu1 }
 0x2e3   : > { %v1700_v39 = vpop.f32.mrf.mxu1 }
 0x2e5   : > { %v1031_v40 = vpop.f32.mrf.mxu1 }
 0x2e7   : > { %v1701_v41 = vpop.f32.mrf.mxu1 }
 0x2e8   : > { %v938_v42 = vpop.f32.mrf.mxu0 }
 0x2e9   : > { %v1029_v50 = vadd.f32 %v1028_v38, %v938_v42 }
 0x2ea   : > { %v1680_v43 = vpop.f32.mrf.mxu0 }
 0x2ec   : > { %v941_v44 = vpop.f32.mrf.mxu0 }
 0x2ed   : > { %v1032_v57 = vadd.f32 %v1031_v40, %v941_v44 }
 0x2ee   : > { %v1681_v45 = vpop.f32.mrf.mxu0 }
 0x301   : > { %v1265_v46 = vpop.f32.mrf.mxu1 }
 0x302   : > { %v1274_v47 = vmin.f32 %v1265_v46, 0.0  ;;  %vm1272_vm0 = vcmp.gt.f32.partialorder %v1265_v46, 0.0 }
 0x303   : > { %v1740_v48 = vpop.f32.mrf.mxu1 }
 0x304   : > { %v1276_v51 = vmul.f32 1.442695, %v1274_v47 }
 0x305   : > { %v1268_v49 = vpop.f32.mrf.mxu1 }
 0x306   : > { %v1275_v1 = vmin.f32 %v1268_v49, 0.0  ;;  %1828 = vpow2.f32 %v1276_v51  ;;  %vm1273_vm2 = vcmp.gt.f32.partialorder %v1268_v49, 0.0 }
 0x307   : > { %v1741_v52 = vpop.f32.mrf.mxu1 }
 0x308   : > { %v1143_v53 = vpop.f32.mrf.mxu0  ;;  %v1278_v55 = vmul.f32 1.442695, %v1275_v1 }
 0x309   : > { %v1150_v54 = vadd.f32 %v1143_v53, %v1029_v50 }
 0x30a   : > { %v1720_v56 = vpop.f32.mrf.mxu0  ;;  %1830 = vpow2.f32 %v1278_v55 }
 0x30b   : > { %v1154_v58 = vmin.f32 %v1150_v54, 0.0  ;;  %vm1152_vm1 = vcmp.gt.f32.partialorder %v1150_v54, 0.0 }
 0x30c   : > { %v1146_v59 = vpop.f32.mrf.mxu0 }
 0x30d   : > { %v1156_v60 = vmul.f32 1.442695, %v1154_v58  ;;  %v1151_v61 = vadd.f32 %v1146_v59, %v1032_v57 }
 0x30e   : > { %v1721_v62 = vpop.f32.mrf.mxu0 }
 0x30f   : > { %1832 = vpow2.f32 %v1156_v60  ;;  %v1155_v63 = vmin.f32 %v1151_v61, 0.0  ;;  %vm1153_vm3 = vcmp.gt.f32.partialorder %v1151_v61, 0.0 }
 0x311   : > { %v1158_v0 = vmul.f32 1.442695, %v1155_v63 }
 0x313   : > { %1834 = vpow2.f32 %v1158_v0  ;;  %v1829_v2 = vpop.eup %1828 }
 0x314   : > { %v1495_v4 = vadd.f32 -1.0, %v1829_v2 }
 0x316   : > { %v1282_v7 = vsel %vm1272_vm0, %v1265_v46, %v1495_v4 }
 0x317   : > { %v1831_v3 = vpop.eup %1830 }
 0x318   : > { %v1496_v8 = vadd.f32 -1.0, %v1831_v3 }
 0x31a   : > { %v1283_v13 = vsel %vm1273_vm2, %v1268_v49, %v1496_v8 }
 0x31c   : > { %v1833_v5 = vpop.eup %1832 }
 0x31d   : > { %v1485_v6 = vadd.f32 -1.0, %v1833_v5 }
 0x31f   : > { %v1162_v9 = vsel %vm1152_vm1, %v1150_v54, %v1485_v6 }
 0x320   : > { %v1835_v10 = vpop.eup %1834  ;;  %v1284_v11 = vadd.f32 %v1282_v7, %v1162_v9 }
 0x321   : > { %v1486_v12 = vadd.f32 -1.0, %v1835_v10 }
 0x322   : > { %1286 = vst [vmem:[%s251_s28] sm:$0xff] %v1284_v11 }
 0x323   : > { %v1163_v14 = vsel %vm1153_vm3, %v1151_v61, %v1486_v12 }
 0x324   : > { %v1285_v15 = vadd.f32 %v1283_v13, %v1163_v14 }
 0x326   : > { %1287 = vst [vmem:[%s251_s28 + $0x8] sm:$0xff] %v1285_v15 }
 0x327 PF: > { %s16_s21 = sadd.s32 1, %s1842_s21  }
 0x328   : > { %p13_p4 = scmp.ge.s32.totalorder %s16_s21, 4  }
 0x32a   :  { %15 = sbr.rel (!%p13_p4) target bundleno = 1 (0x1), region = 83 }

// kernel: resnet1d_forward.16
= control target key start
LH: loop header
LB: loop body
LE: loop exit
PB: predicated region body
PF: predicated region fallthrough
CT: control target
= control target key end

     0   :  { %s1671_s18 = smov 0   ;;  %s1960_s0 = inlined_call_operand.vmem [shape: f32[2,16,128], index: 0, kind: input, shape index: {}]   ;;  %s1961_s1 = inlined_call_operand.vmem [shape: bf16[3,128,128], index: 1, kind: input, shape index: {}]   ;;  %s1962_s2 = inlined_call_operand.vmem [shape: bf16[1,128,128], index: 2, kind: input, shape index: {}]   ;;  %s1963_s3 = inlined_call_operand.vmem [shape: f32[1,128], index: 3, kind: input, shape index: {}]   ;;  %s1964_s4 = inlined_call_operand.vmem [shape: bf16[3,128,128], index: 4, kind: input, shape index: {}]   ;;  %s1965_s5 = inlined_call_operand.vmem [shape: f32[2,16,128], index: 5, kind: output, shape index: {}]  }
   0x1 LB: > { %s1189_s19 = sadd.s32 4294967295, %s1637_s18   ;;  %p1193_p0 = scmp.ge.s32.totalorder %s1637_s18, 1  ;;  %s1637_s18 = sphi %s1671_s18, %s15_s18  }
   0x2   : > { %p187_p1 = scmp.lt.s32.totalorder %s1637_s18, 3 }
   0x4   : > { %p188_p2 = pnand %p1193_p0, %p187_p1 }
   0x5   : > { %p215_p3 = scmp.lt.s32.totalorder (!%p188_p2), %s1189_s19, 1 }
   0x6   : > { %191 = sbr.rel (%p188_p2) target bundleno = 807 (0x327), region = 40 }
   0xb   : > { %v1559_v0 = vld [vmem:[%s1961_s1 + $0x78] sm:$0xff]   ;;  %v1639_v1 = vmov 0.0   ;;  %v1561_v3 = vld [vmem:[%s1961_s1 + $0x70] sm:$0xff]   ;;  %vm1640_vm0 = vmmov 0   ;;  %v1563_v5 = vld [vmem:[%s1961_s1 + $0x68] sm:$0xff]   ;;  %s1969_s19 = smov (!%p215_p3, %s1189_s19), 1 }
   0xc   : > { %1409 = vmatprep.subr.bf16.mxu0 %v1639_v1  ;;  %226 = vst [vmem:[#allocation2] sm:$0x1] %v1639_v1  ;;  %227 = vst [vmem:[#allocation2 + $0x11] sm:$0x1] %v1639_v1  ;;  %1429 = vmatprep.subr.bf16.mxu1 %v1639_v1  ;;  %v1560_v2 = vld [vmem:[%s1961_s1 + $0x38] sm:$0xff]   ;;  %v1562_v4 = vld [vmem:[%s1961_s1 + $0x30] sm:$0xff]  }
   0xd   : > { %1410 = vmatpush3.bf16.msra.mxu0 %v1559_v0  ;;  %1425 = vmatprep.mubr.msk.bf16.mxu0 %vm1640_vm0, %v1639_v1  ;;  %v1564_v6 = vld [vmem:[%s1961_s1 + $0x28] sm:$0xff]   ;;  %v1565_v7 = vld [vmem:[%s1961_s1 + $0x60] sm:$0xff]   ;;  %s1335_s9 = sshll.u32 %s1969_s19, 4  ;;  %v1567_v9 = vld [vmem:[%s1961_s1 + $0x58] sm:$0xff]   ;;  %vm702_vm3 = vcmask 1040384   ;;  %vm753_vm9 = vcmask 1043456  }
   0xe   : > { %1430 = vmatpush3.bf16.msra.mxu1 %v1560_v2  ;;  %1411 = vmatprep.subr.bf16.mxu0 %v1639_v1  ;;  %v1566_v8 = vld [vmem:[%s1961_s1 + $0x20] sm:$0xff]   ;;  %s219_s14 = scalar_lea.vmem %s1960_s0, %s1335_s9  ;;  %v1568_v10 = vld [vmem:[%s1961_s1 + $0x18] sm:$0xff]   ;;  %v1569_v13 = vld [vmem:[%s1961_s1 + $0x50] sm:$0xff]   ;;  %vm703_vm4 = vsmask.f32 256  ;;  %vm1020_vm15 = vcmask 1046528   ;;  %s224_s29 = scalar_lea.vmem %s1965_s5, %s1335_s9 }
   0xf   : > { %1431 = vmatprep.subr.bf16.mxu1 %v1639_v1  ;;  %1445 = vmatprep.mubr.msk.bf16.mxu1 %vm1640_vm0, %v1639_v1  ;;  %v1733_v11 = vld [vmem:[%s219_s14] sm:$0xff]  ;;  %v1735_v12 = vld [vmem:[%s219_s14 + $0x8] sm:$0xff]  ;;  %v1570_v14 = vld [vmem:[%s1961_s1 + $0x10] sm:$0xff]   ;;  %vm708_vm6 = vsmask.f32 7938 }
  0x10   : > { %230 = vst [vmem:[#allocation2 + $0x1] sm:$0xff] %v1733_v11  ;;  %231 = vst [vmem:[#allocation2 + $0x9] sm:$0xff] %v1735_v12  ;;  %v1571_v15 = vld [vmem:[%s1961_s1 + $0x48] sm:$0xff]   ;;  %v1573_v17 = vld [vmem:[%s1961_s1 + $0x40] sm:$0xff]   ;;  %v253_v22 = vpack.c.bf16 %v1735_v12, %v1733_v11  ;;  %vm731_vm12 = vsmask.f32 4368 }
  0x11   : > { %1412 = vmatpush3.bf16.msra.mxu0 %v1561_v3  ;;  %v1572_v16 = vld [vmem:[%s1961_s1 + $0x8] sm:$0xff]   ;;  %v1574_v18 = vld [vmem:[%s1961_s1] sm:$0xff]   ;;  %v1575_v21 = vld [vmem:[%s1961_s1 + $0xb8] sm:$0xff]   ;;  %vm806_vm14 = vsmask.f32 7424 }
  0x12   : > { %1432 = vmatpush3.bf16.msra.mxu1 %v1562_v4  ;;  %1413 = vmatprep.subr.bf16.mxu0 %v1639_v1  ;;  %v1576_v24 = vld [vmem:[%s1961_s1 + $0xb0] sm:$0xff]   ;;  %v1577_v25 = vld [vmem:[%s1961_s1 + $0xa8] sm:$0xff]   ;;  %v1578_v26 = vld [vmem:[%s1961_s1 + $0xa0] sm:$0xff]  }
  0x13   : > { %1433 = vmatprep.subr.bf16.mxu1 %v1639_v1  ;;  %v1579_v27 = vld [vmem:[%s1961_s1 + $0x98] sm:$0xff]   ;;  %v1580_v28 = vld [vmem:[%s1961_s1 + $0x90] sm:$0xff]   ;;  %v1581_v29 = vld [vmem:[%s1961_s1 + $0x88] sm:$0xff]  }
  0x14   : > { %v1582_v30 = vld [vmem:[%s1961_s1 + $0x80] sm:$0xff]   ;;  %v1583_v34 = vld [vmem:[%s1962_s2 + $0x38] sm:$0xff]   ;;  %v1584_v35 = vld [vmem:[%s1962_s2 + $0x30] sm:$0xff]  }
  0x15   : > { %1414 = vmatpush3.bf16.msra.mxu0 %v1563_v5  ;;  %v1585_v36 = vld [vmem:[%s1962_s2 + $0x28] sm:$0xff]   ;;  %v1586_v37 = vld [vmem:[%s1962_s2 + $0x20] sm:$0xff]   ;;  %v1587_v38 = vld [vmem:[%s1962_s2 + $0x18] sm:$0xff]  }
  0x16   : > { %1434 = vmatpush3.bf16.msra.mxu1 %v1564_v6  ;;  %1415 = vmatprep.subr.bf16.mxu0 %v1639_v1  ;;  %v1588_v39 = vld [vmem:[%s1962_s2 + $0x10] sm:$0xff]   ;;  %v1589_v40 = vld [vmem:[%s1962_s2 + $0x8] sm:$0xff]   ;;  %v1590_v41 = vld [vmem:[%s1962_s2] sm:$0xff]  }
  0x17   : > { %1435 = vmatprep.subr.bf16.mxu1 %v1639_v1  ;;  %v232_v19 = vld [vmem:[#allocation2] sm:$0xff]  ;;  %v233_v20 = vld [vmem:[#allocation2 + $0x8] sm:$0xff]  ;;  %vm1840_vm5 = vmand %vm702_vm3, %vm703_vm4 }
  0x18   : > { %v234_v23 = vpack.c.bf16 %v233_v20, %v232_v19  ;;  %v449_v31 = vld [vmem:[#allocation2 + $0x2] sm:$0xff]  ;;  %v450_v32 = vld [vmem:[#allocation2 + $0xa] sm:$0xff]  ;;  %vm709_vm7 = vmand %vm702_vm3, %vm708_vm6 }
  0x19   : > { %1416 = vmatpush3.bf16.msra.mxu0 %v1565_v7  ;;  %v451_v33 = vpack.c.bf16 %v450_v32, %v449_v31  ;;  %v705_v7 = vld [vmem:[#allocation4] sm:$0x1]  ;;  %v1598_v20 = vld [vmem:[%s1964_s4 + $0x68] sm:$0xff]   ;;  %vm754_vm11 = vmand %vm753_vm9, %vm708_vm6 }
  0x1a   : > { %1436 = vmatpush3.bf16.msra.mxu1 %v1566_v8  ;;  %1417 = vmatprep.subr.bf16.mxu0 %v1639_v1  ;;  %v1597_v19 = vld [vmem:[%s1964_s4 + $0x20] sm:$0xff]   ;;  %vm732_vm13 = vmor %vm703_vm4, %vm731_vm12 }
  0x1b   : > { %1437 = vmatprep.subr.bf16.mxu1 %v1639_v1 }
  0x1d   : > { %1418 = vmatpush3.bf16.msra.mxu0 %v1567_v9  ;;  %v710_v9 = vld [vmem:[#allocation4 + $0x8] sm:$0x1] }
  0x1e   : > { %1438 = vmatpush3.bf16.msra.mxu1 %v1568_v10  ;;  %1419 = vmatprep.subr.bf16.mxu0 %v1639_v1  ;;  %v706_v10 = vsel %vm1840_vm5, 0, %v705_v7 }
  0x1f   : > { %1439 = vmatprep.subr.bf16.mxu1 %v1639_v1  ;;  %707 = vst [vmem:[#allocation4] sm:$0x1] %v706_v10 }
  0x21   : > { %1420 = vmatpush3.bf16.msra.mxu0 %v1569_v13  ;;  %v711_v13 = vsel %vm709_vm7, 0, %v710_v9 }
  0x22   : > { %1440 = vmatpush3.bf16.msra.mxu1 %v1570_v14  ;;  %1421 = vmatprep.subr.bf16.mxu0 %v1639_v1  ;;  %712 = vst [vmem:[#allocation4 + $0x8] sm:$0x1] %v711_v13  ;;  %v1592_v14 = vld [vmem:[%s1964_s4 + $0x38] sm:$0xff]  }
  0x23   : > { %1441 = vmatprep.subr.bf16.mxu1 %v1639_v1 }
  0x25   : > { %1422 = vmatpush3.bf16.msra.mxu0 %v1571_v15  ;;  %v1593_v15 = vld [vmem:[%s1964_s4 + $0x30] sm:$0xff]  }
  0x26   : > { %1442 = vmatpush3.bf16.msra.mxu1 %v1572_v16  ;;  %1423 = vmatprep.subr.bf16.mxu0 %v1639_v1  ;;  %v1594_v16 = vld [vmem:[%s1964_s4 + $0x78] sm:$0xff]  }
  0x27   : > { %1443 = vmatprep.subr.bf16.mxu1 %v1639_v1 }
  0x29   : > { %1424 = vmatpush3.bf16.msra.mxu0 %v1573_v17  ;;  %v1595_v17 = vld [vmem:[%s1964_s4 + $0x28] sm:$0xff]  }
  0x2a   : > { %1444 = vmatpush3.bf16.msra.mxu1 %v1574_v18  ;;  %1449 = vmatprep.subr.bf16.mxu0 %v1639_v1  ;;  %v1596_v18 = vld [vmem:[%s1964_s4 + $0x70] sm:$0xff]  }
  0x2b   : > { %1469 = vmatprep.subr.bf16.mxu1 %v1639_v1 }
  0x2c   : > { %1426 = vmatmul.mubr.bf16.vlgmr.msra.gmra.mxu0 %v253_v22  ;;  %v1600_v22 = vld [vmem:[%s1964_s4 + $0x60] sm:$0xff]  }
  0x2d   : > { %1446 = vmatmul.mubr.bf16.vlgmr.msra.gmra.mxu1 %v234_v23  ;;  %1450 = vmatpush3.bf16.msra.mxu0 %v1575_v21  ;;  %v1599_v21 = vld [vmem:[%s1964_s4 + $0x18] sm:$0xff]   ;;  %v1601_v23 = vld [vmem:[%s1964_s4 + $0x10] sm:$0xff]  }
  0x2e   : > { %1451 = vmatprep.subr.bf16.mxu0 %v1639_v1  ;;  %1465 = vmatprep.mubr.msk.bf16.mxu0 %vm1640_vm0, %v1639_v1 }
  0x2f   : > { %1485 = vmatprep.mubr.msk.bf16.mxu1 %vm1640_vm0, %v1639_v1  ;;  %1470 = vmatpush3.bf16.msra.mxu1 %v1583_v34 }
  0x30   : > { %1471 = vmatprep.subr.bf16.mxu1 %v1639_v1 }
  0x31   : > { %1452 = vmatpush3.bf16.msra.mxu0 %v1576_v24  ;;  %v1602_v24 = vld [vmem:[%s1964_s4 + $0x58] sm:$0xff]  }
  0x32   : > { %1453 = vmatprep.subr.bf16.mxu0 %v1639_v1 }
  0x33   : > { %1472 = vmatpush3.bf16.msra.mxu1 %v1584_v35 }
  0x34   : > { %1473 = vmatprep.subr.bf16.mxu1 %v1639_v1 }
  0x35   : > { %1454 = vmatpush3.bf16.msra.mxu0 %v1577_v25  ;;  %v1603_v25 = vld [vmem:[%s1964_s4 + $0x8] sm:$0xff]  }
  0x36   : > { %1455 = vmatprep.subr.bf16.mxu0 %v1639_v1 }
  0x37   : > { %1474 = vmatpush3.bf16.msra.mxu1 %v1585_v36 }
  0x38   : > { %1475 = vmatprep.subr.bf16.mxu1 %v1639_v1 }
  0x39   : > { %1456 = vmatpush3.bf16.msra.mxu0 %v1578_v26  ;;  %v1604_v26 = vld [vmem:[%s1964_s4 + $0x50] sm:$0xff]  }
  0x3a   : > { %1457 = vmatprep.subr.bf16.mxu0 %v1639_v1 }
  0x3b   : > { %1476 = vmatpush3.bf16.msra.mxu1 %v1586_v37 }
  0x3c   : > { %1477 = vmatprep.subr.bf16.mxu1 %v1639_v1 }
  0x3d   : > { %1458 = vmatpush3.bf16.msra.mxu0 %v1579_v27  ;;  %v1605_v27 = vld [vmem:[%s1964_s4] sm:$0xff]  }
  0x3e   : > { %1459 = vmatprep.subr.bf16.mxu0 %v1639_v1 }
  0x3f   : > { %1478 = vmatpush3.bf16.msra.mxu1 %v1587_v38 }
  0x40   : > { %1479 = vmatprep.subr.bf16.mxu1 %v1639_v1 }
  0x41   : > { %1460 = vmatpush3.bf16.msra.mxu0 %v1580_v28  ;;  %v1606_v28 = vld [vmem:[%s1964_s4 + $0x48] sm:$0xff]  }
  0x42   : > { %1461 = vmatprep.subr.bf16.mxu0 %v1639_v1 }
  0x43   : > { %1480 = vmatpush3.bf16.msra.mxu1 %v1588_v39 }
  0x44   : > { %1481 = vmatprep.subr.bf16.mxu1 %v1639_v1 }
  0x45   : > { %1462 = vmatpush3.bf16.msra.mxu0 %v1581_v29  ;;  %v1608_v29 = vld [vmem:[%s1964_s4 + $0x40] sm:$0xff]  }
  0x46   : > { %1463 = vmatprep.subr.bf16.mxu0 %v1639_v1 }
  0x47   : > { %1482 = vmatpush3.bf16.msra.mxu1 %v1589_v40 }
  0x48   : > { %1483 = vmatprep.subr.bf16.mxu1 %v1639_v1 }
  0x49   : > { %1464 = vmatpush3.bf16.msra.mxu0 %v1582_v30  ;;  %v1258_v30 = vld [vmem:[%s1963_s3] ss:$0 sm:$0xff] }
  0x4a   : > { %1489 = vmatprep.subr.bf16.mxu0 %v1639_v1 }
  0x4b   : > { %1484 = vmatpush3.bf16.msra.mxu1 %v1590_v41 }
  0x4c   : > { %1466 = vmatmul.mubr.bf16.vlgmr.msra.gmra.mxu0 %v451_v33  ;;  %1509 = vmatprep.subr.bf16.mxu1 %v1639_v1 }
  0x4d   : > { %1505 = vmatprep.mubr.msk.bf16.mxu0 %vm1640_vm0, %v1639_v1  ;;  %1490 = vmatpush3.bf16.msra.mxu0 %v1594_v16  ;;  %v1612_v16 = vld [vmem:[%s1964_s4 + $0xa8] sm:$0xff]  }
  0x4e   : > { %1491 = vmatprep.subr.bf16.mxu0 %v1639_v1 }
  0x51   : > { %1492 = vmatpush3.bf16.msra.mxu0 %v1596_v18  ;;  %v1614_v18 = vld [vmem:[%s1964_s4 + $0x98] sm:$0xff]  }
  0x52   : > { %1493 = vmatprep.subr.bf16.mxu0 %v1639_v1 }
  0x55   : > { %1494 = vmatpush3.bf16.msra.mxu0 %v1598_v20  ;;  %v1616_v20 = vld [vmem:[%s1964_s4 + $0x88] sm:$0xff]  }
  0x56   : > { %1495 = vmatprep.subr.bf16.mxu0 %v1639_v1 }
  0x59   : > { %1496 = vmatpush3.bf16.msra.mxu0 %v1600_v22 }
  0x5a   : > { %1497 = vmatprep.subr.bf16.mxu0 %v1639_v1 }
  0x5d   : > { %1498 = vmatpush3.bf16.msra.mxu0 %v1602_v24 }
  0x5e   : > { %1499 = vmatprep.subr.bf16.mxu0 %v1639_v1 }
  0x61   : > { %1500 = vmatpush3.bf16.msra.mxu0 %v1604_v26 }
  0x62   : > { %1501 = vmatprep.subr.bf16.mxu0 %v1639_v1 }
  0x65   : > { %1502 = vmatpush3.bf16.msra.mxu0 %v1606_v28 }
  0x66   : > { %1503 = vmatprep.subr.bf16.mxu0 %v1639_v1 }
  0x69   : > { %1504 = vmatpush3.bf16.msra.mxu0 %v1608_v29 }
  0x6a   : > { %1529 = vmatprep.subr.bf16.mxu0 %v1639_v1 }
  0xec   : > { %v353_v42 = vpop.f32.mrf.mxu0 }
  0xed   : > { %v442_v43 = vpop.f32.mrf.mxu1 }
  0xee   : > { %v1427_v44 = vpop.f32.mrf.mxu0  ;;  %v443_v50 = vadd.f32 %v442_v43, %v353_v42 }
  0xef   : > { %v1447_v45 = vpop.f32.mrf.mxu1 }
  0xf0   : > { %v356_v46 = vpop.f32.mrf.mxu0 }
  0xf1   : > { %v445_v47 = vpop.f32.mrf.mxu1 }
  0xf2   : > { %v1428_v48 = vpop.f32.mrf.mxu0  ;;  %v446_v54 = vadd.f32 %v445_v47, %v356_v46 }
  0xf3   : > { %v1448_v49 = vpop.f32.mrf.mxu1 }
 0x10c   : > { %v551_v51 = vpop.f32.mrf.mxu0 }
 0x10d   : > { %v558_v52 = vadd.f32 %v551_v51, %v443_v50 }
 0x10e   : > { %v1467_v53 = vpop.f32.mrf.mxu0 }
 0x10f   : > { %v562_v55 = vmin.f32 %v558_v52, 0.0  ;;  %vm560_vm1 = vcmp.gt.f32.partialorder %v558_v52, 0.0 }
 0x110   : > { %v554_v56 = vpop.f32.mrf.mxu0 }
 0x111   : > { %v564_v57 = vmul.f32 1.442695, %v562_v55  ;;  %v559_v58 = vadd.f32 %v554_v56, %v446_v54 }
 0x112   : > { %v1468_v59 = vpop.f32.mrf.mxu0 }
 0x113   : > { %1619 = vpow2.f32 %v564_v57  ;;  %v563_v60 = vmin.f32 %v559_v58, 0.0  ;;  %vm561_vm2 = vcmp.gt.f32.partialorder %v559_v58, 0.0 }
 0x115   : > { %v566_v61 = vmul.f32 1.442695, %v563_v60 }
 0x117   : > { %1621 = vpow2.f32 %v566_v61 }
 0x120   : > { %v1620_v62 = vpop.eup %1619 }
 0x121   : > { %v1254_v63 = vadd.f32 -1.0, %v1620_v62 }
 0x123   : > { %v570_v3 = vsel %vm560_vm1, %v558_v52, %v1254_v63  ;;  %v755_v52 = vld [vmem:[#allocation4] sm:$0xf] }
 0x124   : > { %v1622_v0 = vpop.eup %1621 }
 0x125   : > { %v1255_v2 = vadd.f32 -1.0, %v1622_v0 }
 0x127   : > { %v571_v4 = vsel %vm561_vm2, %v559_v58, %v1255_v2  ;;  %v759_v58 = vld [vmem:[#allocation4 + $0x8] sm:$0x1] }
 0x128   : > { %v1344_v5 = vpack.c.bf16 %v571_v4, %v570_v3 }
 0x12a   : > { %1345 = vst [vmem:[#allocation3] sm:$0xff] %v1344_v5  }
 0x131   : > { %v1591_v6 = vld [vmem:[#allocation3] sm:$0xff]  }
 0x132   : > { %1486 = vmatmul.mubr.bf16.vlgmr.msra.gmra.mxu1 %v1591_v6 }
 0x133   : > { %1525 = vmatprep.mubr.msk.bf16.mxu1 %vm1640_vm0, %v1639_v1  ;;  %1510 = vmatpush3.bf16.msra.mxu1 %v1592_v14  ;;  %v1610_v14 = vld [vmem:[%s1964_s4 + $0xb8] sm:$0xff]  }
 0x134   : > { %1511 = vmatprep.subr.bf16.mxu1 %v1639_v1 }
 0x137   : > { %1512 = vmatpush3.bf16.msra.mxu1 %v1593_v15  ;;  %v1611_v15 = vld [vmem:[%s1964_s4 + $0xb0] sm:$0xff]  }
 0x138   : > { %1513 = vmatprep.subr.bf16.mxu1 %v1639_v1 }
 0x13b   : > { %1514 = vmatpush3.bf16.msra.mxu1 %v1595_v17  ;;  %v1613_v17 = vld [vmem:[%s1964_s4 + $0xa0] sm:$0xff]  }
 0x13c   : > { %1515 = vmatprep.subr.bf16.mxu1 %v1639_v1 }
 0x13f   : > { %1516 = vmatpush3.bf16.msra.mxu1 %v1597_v19  ;;  %v1615_v19 = vld [vmem:[%s1964_s4 + $0x90] sm:$0xff]  }
 0x140   : > { %1517 = vmatprep.subr.bf16.mxu1 %v1639_v1 }
 0x143   : > { %1518 = vmatpush3.bf16.msra.mxu1 %v1599_v21 }
 0x144   : > { %1519 = vmatprep.subr.bf16.mxu1 %v1639_v1 }
 0x147   : > { %1520 = vmatpush3.bf16.msra.mxu1 %v1601_v23  ;;  %v1617_v23 = vld [vmem:[%s1964_s4 + $0x80] sm:$0xff]  }
 0x148   : > { %1521 = vmatprep.subr.bf16.mxu1 %v1639_v1 }
 0x14b   : > { %1522 = vmatpush3.bf16.msra.mxu1 %v1603_v25 }
 0x14c   : > { %1523 = vmatprep.subr.bf16.mxu1 %v1639_v1 }
 0x14f   : > { %1524 = vmatpush3.bf16.msra.mxu1 %v1605_v27 }
 0x1f2   : > { %v695_v31 = vpop.f32.mrf.mxu1 }
 0x1f3   : > { %v696_v32 = vadd.f32 %v1258_v30, %v695_v31 }
 0x1f4   : > { %v1487_v33 = vpop.f32.mrf.mxu1 }
 0x1f5   : > { %v715_v34 = vmin.f32 %v696_v32, 0.0  ;;  %vm713_vm8 = vcmp.gt.f32.partialorder %v696_v32, 0.0 }
 0x1f6   : > { %v698_v35 = vpop.f32.mrf.mxu1 }
 0x1f7   : > { %v717_v36 = vmul.f32 1.442695, %v715_v34  ;;  %v699_v37 = vadd.f32 %v1258_v30, %v698_v35 }
 0x1f8   : > { %v1488_v38 = vpop.f32.mrf.mxu1 }
 0x1f9   : > { %1623 = vpow2.f32 %v717_v36  ;;  %v716_v39 = vmin.f32 %v699_v37, 0.0  ;;  %vm714_vm10 = vcmp.gt.f32.partialorder %v699_v37, 0.0 }
 0x1fb   : > { %v719_v40 = vmul.f32 1.442695, %v716_v39 }
 0x1fd   : > { %1625 = vpow2.f32 %v719_v40 }
 0x206   : > { %v1624_v41 = vpop.eup %1623 }
 0x207   : > { %v1268_v42 = vadd.f32 -1.0, %v1624_v41 }
 0x209   : > { %v723_v43 = vsel %vm713_vm8, %v696_v32, %v1268_v42 }
 0x20a   : > { %v1626_v44 = vpop.eup %1625  ;;  %v1339_v45 = vpack.c.bf16 %v723_v43, %v723_v43 }
 0x20b   : > { %v1269_v46 = vadd.f32 -1.0, %v1626_v44 }
 0x20c   : > { %v734_v47 = vshrl.u32 %v1339_v45, 16  ;;  %v737_v50 = vshll.u32 %v1339_v45, 16 }
 0x20d   : > { %v724_v48 = vsel %vm714_vm10, %v699_v37, %v1269_v46 }
 0x20e   : > { %v736_v49 = vrot.slane %v734_v47, 7  ;;  %v1340_v51 = vpack.c.bf16 %v724_v48, %v724_v48 }
 0x210   : > { %v739_v53 = vor.u32 %v737_v50, %v736_v49  ;;  %v742_v54 = vshrl.u32 %v1340_v51, 16  ;;  %v745_v57 = vshll.u32 %v1340_v51, 16  ;;  %v740_v59 = vrot.slane %v736_v49, 4 }
 0x212   : > { %v756_v55 = vsel %vm754_vm11, %v739_v53, %v755_v52  ;;  %v744_v56 = vrot.slane %v742_v54, 7 }
 0x213   : > { %757 = vst [vmem:[#allocation4] sm:$0xf] %v756_v55 }
 0x214   : > { %v747_v60 = vor.u32 %v745_v57, %v744_v56  ;;  %v749_v61 = vrot.slane %v744_v56, 4 }
 0x216   : > { %v748_v62 = vsel %vm732_vm13, %v740_v59, %v747_v60  ;;  %v760_v63 = vsel %vm1840_vm5, %v749_v61, %v759_v58 }
 0x217   : > { %758 = vst [vmem:[#allocation4 + $0x4] sm:$0xf] %v748_v62  ;;  %761 = vst [vmem:[#allocation4 + $0x8] sm:$0x1] %v760_v63 }
 0x21a   : > { %v762_v0 = vld [vmem:[#allocation4] sm:$0xf] }
 0x21b   : > { %v999_v21 = vld [vmem:[#allocation4] sm:$0xe] }
 0x21e   : > { %v763_v2 = vld [vmem:[#allocation4 + $0x4] sm:$0xf]  ;;  %v1609_v4 = vld [vmem:[#allocation4 + $0x8] ss:$0 sps:$4 sm:$0x11]  }
 0x21f   : > { %v1288_v3 = vcombine.low %v762_v0, %v763_v2  ;;  %v815_v6 = vshll.u32 %v1609_v4, 16  ;;  %v1322_v22 = vcombine.low %v999_v21, %v763_v2  ;;  %v1022_v25 = vrot.slane %v1609_v4, 1 }
 0x221   : > { %1526 = vmatmul.mubr.bf16.vlgmr.msra.gmra.mxu1 %v1288_v3  ;;  %v810_v5 = vshll.u32 %v1288_v3, 16  ;;  %v808_v7 = vshrl.u32 %v1288_v3, 16  ;;  %v817_v13 = vrot.slane %v815_v6, 1  ;;  %v1021_v24 = vrot.slane %v1322_v22, 1 }
 0x223   : > { %v812_v9 = vrot.slane %v810_v5, 1  ;;  %v1023_v26 = vsel %vm1020_vm15, %v1021_v24, %v1022_v25 }
 0x225   : > { %v813_v10 = vor.u32 %v812_v9, %v808_v7 }
 0x227   : > { %v818_v8 = vsel %vm806_vm14, %v813_v10, %v817_v13 }
 0x228   : > { %1506 = vmatmul.mubr.bf16.vlgmr.msra.gmra.mxu0 %v818_v8 }
 0x229   : > { %1530 = vmatpush3.bf16.msra.mxu0 %v1610_v14  ;;  %1545 = vmatprep.mubr.msk.bf16.mxu0 %vm1640_vm0, %v1639_v1 }
 0x22a   : > { %1531 = vmatprep.subr.bf16.mxu0 %v1639_v1 }
 0x22d   : > { %1532 = vmatpush3.bf16.msra.mxu0 %v1611_v15 }
 0x22e   : > { %1533 = vmatprep.subr.bf16.mxu0 %v1639_v1 }
 0x231   : > { %1534 = vmatpush3.bf16.msra.mxu0 %v1612_v16 }
 0x232   : > { %1535 = vmatprep.subr.bf16.mxu0 %v1639_v1 }
 0x235   : > { %1536 = vmatpush3.bf16.msra.mxu0 %v1613_v17 }
 0x236   : > { %1537 = vmatprep.subr.bf16.mxu0 %v1639_v1 }
 0x239   : > { %1538 = vmatpush3.bf16.msra.mxu0 %v1614_v18 }
 0x23a   : > { %1539 = vmatprep.subr.bf16.mxu0 %v1639_v1 }
 0x23d   : > { %1540 = vmatpush3.bf16.msra.mxu0 %v1615_v19 }
 0x23e   : > { %1541 = vmatprep.subr.bf16.mxu0 %v1639_v1 }
 0x241   : > { %1542 = vmatpush3.bf16.msra.mxu0 %v1616_v20 }
 0x242   : > { %1543 = vmatprep.subr.bf16.mxu0 %v1639_v1 }
 0x245   : > { %1544 = vmatpush3.bf16.msra.mxu0 %v1617_v23 }
 0x248   : > { %1546 = vmatmul.mubr.bf16.vlgmr.msra.gmra.mxu0 %v1023_v26 }
 0x2e1   : > { %v992_v27 = vpop.f32.mrf.mxu1 }
 0x2e3   : > { %v1527_v28 = vpop.f32.mrf.mxu1 }
 0x2e5   : > { %v995_v29 = vpop.f32.mrf.mxu1 }
 0x2e7   : > { %v1528_v30 = vpop.f32.mrf.mxu1 }
 0x2e8   : > { %v902_v31 = vpop.f32.mrf.mxu0 }
 0x2e9   : > { %v993_v35 = vadd.f32 %v992_v27, %v902_v31 }
 0x2ea   : > { %v1507_v32 = vpop.f32.mrf.mxu0 }
 0x2ec   : > { %v905_v33 = vpop.f32.mrf.mxu0 }
 0x2ed   : > { %v996_v1 = vadd.f32 %v995_v29, %v905_v33 }
 0x2ee   : > { %v1508_v34 = vpop.f32.mrf.mxu0 }
 0x308   : > { %v1107_v36 = vpop.f32.mrf.mxu0 }
 0x309   : > { %v1114_v37 = vadd.f32 %v1107_v36, %v993_v35 }
 0x30a   : > { %v1547_v38 = vpop.f32.mrf.mxu0 }
 0x30b   : > { %v1118_v39 = vmin.f32 %v1114_v37, 0.0  ;;  %vm1116_vm0 = vcmp.gt.f32.partialorder %v1114_v37, 0.0 }
 0x30c   : > { %v1110_v40 = vpop.f32.mrf.mxu0 }
 0x30d   : > { %v1120_v41 = vmul.f32 1.442695, %v1118_v39  ;;  %v1115_v42 = vadd.f32 %v1110_v40, %v996_v1 }
 0x30e   : > { %v1548_v43 = vpop.f32.mrf.mxu0 }
 0x30f   : > { %1627 = vpow2.f32 %v1120_v41  ;;  %v1119_v44 = vmin.f32 %v1115_v42, 0.0  ;;  %vm1117_vm1 = vcmp.gt.f32.partialorder %v1115_v42, 0.0 }
 0x311   : > { %v1122_v45 = vmul.f32 1.442695, %v1119_v44 }
 0x313   : > { %1629 = vpow2.f32 %v1122_v45 }
 0x31c   : > { %v1628_v46 = vpop.eup %1627 }
 0x31d   : > { %v1331_v47 = vadd.f32 -1.0, %v1628_v46 }
 0x31f   : > { %v1126_v48 = vsel %vm1116_vm0, %v1114_v37, %v1331_v47 }
 0x320   : > { %v1630_v49 = vpop.eup %1629  ;;  %v1130_v50 = vadd.f32 %v1126_v48, %v1733_v11 }
 0x321   : > { %v1332_v51 = vadd.f32 -1.0, %v1630_v49 }
 0x322   : > { %1132 = vst [vmem:[%s224_s29] sm:$0xff] %v1130_v50 }
 0x323   : > { %v1127_v52 = vsel %vm1117_vm1, %v1115_v42, %v1332_v51 }
 0x324   : > { %v1131_v53 = vadd.f32 %v1127_v52, %v1735_v12 }
 0x326   : > { %1133 = vst [vmem:[%s224_s29 + $0x8] sm:$0xff] %v1131_v53 }
 0x327 PF: > { %s15_s18 = sadd.s32 1, %s1637_s18  }
 0x328   : > { %p12_p4 = scmp.ge.s32.totalorder %s15_s18, 4  }
 0x32a   :  { %14 = sbr.rel (!%p12_p4) target bundleno = 1 (0x1), region = 74 }

// kernel: resnet1d_forward.21
= control target key start
LH: loop header
LB: loop body
LE: loop exit
PB: predicated region body
PF: predicated region fallthrough
CT: control target
= control target key end

     0   :  { %s406_s0 = inlined_call_operand.vmem [shape: f32[2,8,128], index: 0, kind: input, shape index: {}]   ;;  %s407_s1 = inlined_call_operand.vmem [shape: f32[1,128], index: 1, kind: input, shape index: {}]   ;;  %s408_s2 = inlined_call_operand.vmem [shape: f32[1,128], index: 2, kind: input, shape index: {}]   ;;  %s409_s3 = inlined_call_operand.vmem [shape: f32[128,3], index: 3, kind: input, shape index: {}]   ;;  %s410_s4 = inlined_call_operand.vmem [shape: f32[1,3], index: 4, kind: input, shape index: {}]   ;;  %s411_s5 = inlined_call_operand.hbm [shape: f32[2,3], index: 5, kind: output, shape index: {}]  }
   0x1   :  { %v21_v0 = vld [vmem:[%s406_s0] sm:$0xff]  ;;  %v22_v1 = vld [vmem:[%s406_s0 + $0x8] sm:$0xff] }
   0x2   :  { %10 = vsyncpa [#allocation3], 0  ;;  %v23_v2 = vrot.slane %v21_v0, 4  ;;  %v29_v3 = vrot.slane %v22_v1, 4  ;;  %vm57_vm0 = vcmask 1041409   ;;  %vm60_vm1 = vcmask 1041408  }
   0x3   :  { %v117_v30 = vld [vmem:[%s409_s3 + $0x78] sm:$0xff]  ;;  %v303_v31 = vmov 0.0   ;;  %v116_v32 = vld [vmem:[%s409_s3 + $0x70] sm:$0xff]  ;;  %v115_v33 = vld [vmem:[%s409_s3 + $0x68] sm:$0xff]  ;;  %v52_v35 = vlaneseq  ;;  %vm304_vm3 = vmmov 0   ;;  %vm201_vm4 = vcmask 17408  }
   0x4   :  { %v24_v4 = vadd.f32 %v23_v2, %v21_v0  ;;  %v30_v5 = vadd.f32 %v29_v3, %v22_v1  ;;  %v39_v6 = vmax.f32 %v21_v0, %v23_v2  ;;  %v45_v7 = vmax.f32 %v22_v1, %v29_v3  ;;  %237 = vmatprep.subr.mxu0 %v303_v31  ;;  %v114_v34 = vld [vmem:[%s409_s3 + $0x60] sm:$0xff]  ;;  %v113_v47 = vld [vmem:[%s409_s3 + $0x58] sm:$0xff]  ;;  %v112_v48 = vld [vmem:[%s409_s3 + $0x50] sm:$0xff] }
   0x5   :  { %238 = vmatpush3.msra.mxu0 %v117_v30  ;;  %v53_v39 = vand.u32 127, %v52_v35  ;;  %v111_v49 = vld [vmem:[%s409_s3 + $0x48] sm:$0xff]  ;;  %v110_v50 = vld [vmem:[%s409_s3 + $0x40] sm:$0xff]  ;;  %269 = vmatprep.mubr.msk.f32.mxu0 %vm304_vm3, %v303_v31  ;;  %v109_v51 = vld [vmem:[%s409_s3 + $0x38] sm:$0xff] }
   0x6   :  { %v25_v8 = vrot.slane %v24_v4, 2  ;;  %v31_v9 = vrot.slane %v30_v5, 2  ;;  %v40_v10 = vrot.slane %v39_v6, 2  ;;  %v46_v11 = vrot.slane %v45_v7, 2  ;;  %239 = vmatprep.subr.mxu0 %v303_v31  ;;  %v108_v52 = vld [vmem:[%s409_s3 + $0x30] sm:$0xff]  ;;  %v107_v53 = vld [vmem:[%s409_s3 + $0x28] sm:$0xff] }
   0x7   :  { %240 = vmatpush3.msra.mxu0 %v116_v32  ;;  %vm54_vm2 = vcmp.lt.s32.totalorder %v53_v39, 54  ;;  %v106_v54 = vld [vmem:[%s409_s3 + $0x20] sm:$0xff]  ;;  %v105_v55 = vld [vmem:[%s409_s3 + $0x18] sm:$0xff]  ;;  %v104_v56 = vld [vmem:[%s409_s3 + $0x10] sm:$0xff] }
   0x8   :  { %v26_v12 = vadd.f32 %v25_v8, %v24_v4  ;;  %v32_v13 = vadd.f32 %v31_v9, %v30_v5  ;;  %v41_v14 = vmax.f32 %v39_v6, %v40_v10  ;;  %v47_v15 = vmax.f32 %v45_v7, %v46_v11  ;;  %241 = vmatprep.subr.mxu0 %v303_v31  ;;  %v103_v57 = vld [vmem:[%s409_s3 + $0x8] sm:$0xff]  ;;  %v102_v58 = vld [vmem:[%s409_s3] sm:$0xff] }
   0x9   :  { %242 = vmatpush3.msra.mxu0 %v115_v33  ;;  %v217_v63 = vld [vmem:[%s407_s1] ss:$0 sm:$0xff]  ;;  %s305_s1 = smov [#allocation2]  }
   0xa   :  { %v27_v16 = vrot.slane %v26_v12, 1  ;;  %v33_v17 = vrot.slane %v32_v13, 1  ;;  %v42_v18 = vrot.slane %v41_v14, 1  ;;  %v48_v19 = vrot.slane %v47_v15, 1  ;;  %243 = vmatprep.subr.mxu0 %v303_v31  ;;  %v218_v1 = vld [vmem:[%s408_s2] ss:$0 sm:$0xff] }
   0xb   :  { %244 = vmatpush3.msra.mxu0 %v114_v34  ;;  %v219_v4 = vld [vmem:[%s410_s4] ss:$0 sm:$0xff]  ;;  %s209_s7 = sshll.u32 %s305_s1, 4  ;;  %s210_s7 = int_to_ptr.vmem [resolvable:$true] %s209_s7 }
   0xc   :  { %v28_v20 = vadd.f32 %v27_v16, %v26_v12  ;;  %v34_v21 = vadd.f32 %v33_v17, %v32_v13  ;;  %v43_v22 = vmax.f32 %v41_v14, %v42_v18  ;;  %v49_v23 = vmax.f32 %v47_v15, %v48_v19  ;;  %245 = vmatprep.subr.mxu0 %v303_v31  ;;  %s281_s2 = scalar_lea.vmem %s210_s7, 32  ;;  %p286_p1 = scmp.lt.s32.totalorder %s210_s7, %s210_s7 }
   0xd   :  { %246 = vmatpush3.msra.mxu0 %v113_v47  ;;  %p282_p0 = scmp.ne.s32.totalorder %s210_s7, %s281_s2  ;;  %p287_p2 = scmp.lt.s32.totalorder %s281_s2, %s281_s2 }
   0xe   :  { %v36_v24 = vmul.f32 0.125, %v28_v20  ;;  %v37_v25 = vmul.f32 0.125, %v34_v21  ;;  %247 = vmatprep.subr.mxu0 %v303_v31 }
   0xf   :  { %248 = vmatpush3.msra.mxu0 %v112_v48  ;;  %p288_p3 = por %p287_p2, %p286_p1 }
  0x10   :  { %v50_v26 = vmul.f32 %v43_v22, %v36_v24  ;;  %v51_v27 = vmul.f32 %v49_v23, %v37_v25  ;;  %249 = vmatprep.subr.mxu0 %v303_v31 }
  0x11   :  { %250 = vmatpush3.msra.mxu0 %v111_v49  ;;  %p289_p4 = pnand %p288_p3, %p282_p0 }
  0x12   :  { %v58_v28 = vsel %vm57_vm0, %v51_v27, %v50_v26  ;;  %251 = vmatprep.subr.mxu0 %v303_v31 }
  0x13   :  { %v61_v29 = vsel %vm60_vm1, %v58_v28, 0.0  ;;  %252 = vmatpush3.msra.mxu0 %v110_v50 }
  0x14   :  { %62 = vadd.xlane.f32.xlu0 %v61_v29  ;;  %253 = vmatprep.subr.mxu0 %v303_v31 }
  0x15   :  { %254 = vmatpush3.msra.mxu0 %v109_v51 }
  0x16   :  { %255 = vmatprep.subr.mxu0 %v303_v31 }
  0x17   :  { %256 = vmatpush3.msra.mxu0 %v108_v52 }
  0x18   :  { %257 = vmatprep.subr.mxu0 %v303_v31 }
  0x19   :  { %258 = vmatpush3.msra.mxu0 %v107_v53 }
  0x1a   :  { %259 = vmatprep.subr.mxu0 %v303_v31 }
  0x1b   :  { %260 = vmatpush3.msra.mxu0 %v106_v54 }
  0x1c   :  { %261 = vmatprep.subr.mxu0 %v303_v31 }
  0x1d   :  { %262 = vmatpush3.msra.mxu0 %v105_v55 }
  0x1e   :  { %263 = vmatprep.subr.mxu0 %v303_v31 }
  0x1f   :  { %264 = vmatpush3.msra.mxu0 %v104_v56 }
  0x20   :  { %265 = vmatprep.subr.mxu0 %v303_v31 }
  0x21   :  { %266 = vmatpush3.msra.mxu0 %v103_v57 }
  0x22   :  { %267 = vmatprep.subr.mxu0 %v303_v31 }
  0x23   :  { %268 = vmatpush3.msra.mxu0 %v102_v58 }
  0x9d   :  { %v63_v36 = vpop.xlane.xlu0 %62 }
  0x9e   :  { %v65_v37 = vmul.f32 0.018518519, %v63_v36 }
  0xa0   :  { %v67_v38 = vrot.slane %v65_v37, 1  ;;  %v70_v41 = vsub.f32 %v50_v26, %v65_v37 }
  0xa2   :  { %v71_v40 = vsub.f32 %v51_v27, %v67_v38 }
  0xa4   :  { %v74_v42 = vrot.slane %v71_v40, 7 }
  0xa6   :  { %v75_v43 = vsel %vm57_vm0, %v74_v42, %v70_v41 }
  0xa7   :  { %v77_v44 = vsel %vm54_vm2, %v75_v43, 0.0 }
  0xa8   :  { %v78_v45 = vmul.f32 %v77_v44, %v77_v44 }
  0xaa   :  { %v79_v46 = vsel %vm60_vm1, %v78_v45, 0.0 }
  0xab   :  { %80 = vadd.xlane.f32.xlu0 %v79_v46 }
 0x134   :  { %v81_v59 = vpop.xlane.xlu0 %80 }
 0x135   :  { %v82_v60 = vmul.f32 0.018518519, %v81_v59 }
 0x137   :  { %v83_v61 = vadd.f32 1e-05, %v82_v60 }
 0x139   :  { %275 = vrsqrt.f32 %v83_v61 }
 0x146   :  { %v276_v62 = vpop.eup %275 }
 0x147   :  { %v85_v0 = vmul.f32 %v276_v62, %v77_v44 }
 0x149   :  { %v93_v2 = vmul.f32 %v217_v63, %v85_v0 }
 0x14b   :  { %v101_v3 = vadd.f32 %v218_v1, %v93_v2 }
 0x14d   :  { %270 = vmatmul.mubr.f32.vlgmr.msra.gmra.mxu0 %v101_v3 }
 0x20d   :  { %v191_v5 = vpop.f32.mrf.mxu0 }
 0x20e   :  { %v192_v6 = vadd.f32 %v219_v4, %v191_v5 }
 0x20f   :  { %v271_v7 = vpop.f32.mrf.mxu0 }
 0x210   :  { %v195_v8 = vsub.f32 0.0, %v192_v6 }
 0x212   :  { %v196_v9 = vmul.f32 1.442695, %v195_v8 }
 0x214   :  { %277 = vpow2.f32 %v196_v9 }
 0x221   :  { %v278_v10 = vpop.eup %277 }
 0x222   :  { %v198_v11 = vadd.f32 1.0, %v278_v10 }
 0x224   :  { %279 = vrcp.f32 %v198_v11 }
 0x231   :  { %v280_v12 = vpop.eup %279 }
 0x232   :  { %202 = vst.msk [vmem:[#allocation2] sm:$0x3] %vm201_vm4, %v280_v12 }
 0x233   :  { %292 = shalt.err (!%p289_p4)
}
 0x234   :  { %212 = dma.vmem_to_hbm [thread:$0]  %s210_s7, 32, %s411_s5, [#allocation3]  }
 0x235   :  { %301 = dma.done.wait [#allocation3], 32  }
 0x236   :  { %302 = vsyncadd [#allocation3], 4294967264 }
 0x237   :  { %216 = vsyncpa [#allocation3], 1 }

// kernel: resnet1d_forward.19
= control target key start
LH: loop header
LB: loop body
LE: loop exit
PB: predicated region body
PF: predicated region fallthrough
CT: control target
= control target key end

     0   :  { %s1887_s18 = smov 0   ;;  %s2263_s0 = inlined_call_operand.vmem [shape: f32[2,8,128], index: 0, kind: input, shape index: {}]   ;;  %s2264_s1 = inlined_call_operand.vmem [shape: bf16[3,128,128], index: 1, kind: input, shape index: {}]   ;;  %s2265_s2 = inlined_call_operand.vmem [shape: bf16[1,128,256], index: 2, kind: input, shape index: {}]   ;;  %s2266_s3 = inlined_call_operand.vmem [shape: f32[1,256], index: 3, kind: input, shape index: {}]   ;;  %s2267_s4 = inlined_call_operand.vmem [shape: bf16[3,256,128], index: 4, kind: input, shape index: {}]   ;;  %s2268_s5 = inlined_call_operand.vmem [shape: f32[2,8,128], index: 5, kind: output, shape index: {}]  }
   0x1 LB: > { %s1371_s19 = sadd.s32 4294967295, %s1852_s18   ;;  %p1375_p0 = scmp.ge.s32.totalorder %s1852_s18, 1  ;;  %s1852_s18 = sphi %s1887_s18, %s15_s18  }
   0x2   : > { %p186_p1 = scmp.lt.s32.totalorder %s1852_s18, 3 }
   0x4   : > { %p187_p2 = pnand %p1375_p0, %p186_p1 }
   0x5   : > { %p212_p3 = scmp.lt.s32.totalorder (!%p187_p2), %s1371_s19, 1 }
   0x6   : > { %190 = sbr.rel (%p187_p2) target bundleno = 801 (0x321), region = 40 }
   0xb   : > { %v1740_v0 = vld [vmem:[%s2264_s1 + $0x78] sm:$0xff]   ;;  %v1854_v1 = vmov 0.0   ;;  %v1742_v3 = vld [vmem:[%s2264_s1 + $0x70] sm:$0xff]   ;;  %vm1855_vm0 = vmmov 0   ;;  %v1744_v5 = vld [vmem:[%s2264_s1 + $0x68] sm:$0xff]   ;;  %s2278_s19 = smov (!%p212_p3, %s1371_s19), 1 }
   0xc   : > { %1669 = vmatprep.subr.bf16.mxu0 %v1854_v1  ;;  %221 = vst [vmem:[#allocation2] sm:$0x1] %v1854_v1  ;;  %222 = vst [vmem:[#allocation2 + $0x9] sm:$0x1] %v1854_v1  ;;  %1689 = vmatprep.subr.bf16.mxu1 %v1854_v1  ;;  %v1741_v2 = vld [vmem:[%s2264_s1 + $0x38] sm:$0xff]   ;;  %v1743_v4 = vld [vmem:[%s2264_s1 + $0x30] sm:$0xff]  }
   0xd   : > { %1670 = vmatpush3.bf16.msra.mxu0 %v1740_v0  ;;  %1685 = vmatprep.mubr.msk.bf16.mxu0 %vm1855_vm0, %v1854_v1  ;;  %v1745_v6 = vld [vmem:[%s2264_s1 + $0x28] sm:$0xff]   ;;  %v1746_v7 = vld [vmem:[%s2264_s1 + $0x60] sm:$0xff]   ;;  %s1376_s9 = sshll.u32 %s2278_s19, 3  ;;  %v1748_v9 = vld [vmem:[%s2264_s1 + $0x58] sm:$0xff]   ;;  %v1856_v47 = vmov 0   ;;  %vm704_vm2 = vcmask 1040384  }
   0xe   : > { %1690 = vmatpush3.bf16.msra.mxu1 %v1741_v2  ;;  %1671 = vmatprep.subr.bf16.mxu0 %v1854_v1  ;;  %v1747_v8 = vld [vmem:[%s2264_s1 + $0x20] sm:$0xff]   ;;  %s215_s14 = scalar_lea.vmem %s2263_s0, %s1376_s9  ;;  %v1749_v10 = vld [vmem:[%s2264_s1 + $0x18] sm:$0xff]   ;;  %v1750_v12 = vld [vmem:[%s2264_s1 + $0x50] sm:$0xff]   ;;  %vm705_vm3 = vsmask.f32 256  ;;  %vm707_vm4 = vcmask 1044484   ;;  %s219_s27 = scalar_lea.vmem %s2268_s5, %s1376_s9 }
   0xf   : > { %1691 = vmatprep.subr.bf16.mxu1 %v1854_v1  ;;  %1705 = vmatprep.mubr.msk.bf16.mxu1 %vm1855_vm0, %v1854_v1  ;;  %v1949_v11 = vld [vmem:[%s215_s14] sm:$0xff]  ;;  %v1751_v13 = vld [vmem:[%s2264_s1 + $0x10] sm:$0xff]   ;;  %v1752_v14 = vld [vmem:[%s2264_s1 + $0x48] sm:$0xff]   ;;  %vm708_vm5 = vsmask.f32 4352  ;;  %vm751_vm14 = vcmask 1043456  }
  0x10   : > { %224 = vst [vmem:[#allocation2 + $0x1] sm:$0xff] %v1949_v11  ;;  %v1753_v15 = vld [vmem:[%s2264_s1 + $0x8] sm:$0xff]   ;;  %v1754_v16 = vld [vmem:[%s2264_s1 + $0x40] sm:$0xff]   ;;  %v1756_v19 = vld [vmem:[%s2264_s1 + $0xb8] sm:$0xff]   ;;  %v244_v20 = vpack.c.bf16 %v1949_v11, %v1949_v11  ;;  %vm714_vm7 = vsmask.f32 7938 }
  0x11   : > { %1672 = vmatpush3.bf16.msra.mxu0 %v1742_v3  ;;  %v1755_v17 = vld [vmem:[%s2264_s1] sm:$0xff]   ;;  %v1757_v22 = vld [vmem:[%s2264_s1 + $0xb0] sm:$0xff]   ;;  %v1758_v23 = vld [vmem:[%s2264_s1 + $0xa8] sm:$0xff]   ;;  %vm716_vm9 = vsmask.f32 7954  ;;  %vm753_vm15 = vcmask 1047556  }
  0x12   : > { %1692 = vmatpush3.bf16.msra.mxu1 %v1743_v4  ;;  %1673 = vmatprep.subr.bf16.mxu0 %v1854_v1  ;;  %v1759_v24 = vld [vmem:[%s2264_s1 + $0xa0] sm:$0xff]   ;;  %v1760_v25 = vld [vmem:[%s2264_s1 + $0x98] sm:$0xff]   ;;  %v1761_v26 = vld [vmem:[%s2264_s1 + $0x90] sm:$0xff]  }
  0x13   : > { %1693 = vmatprep.subr.bf16.mxu1 %v1854_v1  ;;  %v1762_v27 = vld [vmem:[%s2264_s1 + $0x88] sm:$0xff]   ;;  %v1763_v28 = vld [vmem:[%s2264_s1 + $0x80] sm:$0xff]   ;;  %v1766_v31 = vld [vmem:[%s2265_s2 + $0x74] ss:$8 sps:$4 sm:$0xff]  }
  0x14   : > { %v1764_v32 = vld [vmem:[%s2265_s2 + $0x70] ss:$8 sps:$4 sm:$0xff]   ;;  %v1769_v33 = vld [vmem:[%s2265_s2 + $0x64] ss:$8 sps:$4 sm:$0xff]   ;;  %v1767_v34 = vld [vmem:[%s2265_s2 + $0x60] ss:$8 sps:$4 sm:$0xff]  }
  0x15   : > { %1674 = vmatpush3.bf16.msra.mxu0 %v1744_v5  ;;  %v1772_v35 = vld [vmem:[%s2265_s2 + $0x54] ss:$8 sps:$4 sm:$0xff]   ;;  %v1770_v36 = vld [vmem:[%s2265_s2 + $0x50] ss:$8 sps:$4 sm:$0xff]   ;;  %v1775_v37 = vld [vmem:[%s2265_s2 + $0x44] ss:$8 sps:$4 sm:$0xff]  }
  0x16   : > { %1694 = vmatpush3.bf16.msra.mxu1 %v1745_v6  ;;  %1675 = vmatprep.subr.bf16.mxu0 %v1854_v1  ;;  %v1773_v38 = vld [vmem:[%s2265_s2 + $0x40] ss:$8 sps:$4 sm:$0xff]   ;;  %v1778_v39 = vld [vmem:[%s2265_s2 + $0x34] ss:$8 sps:$4 sm:$0xff]   ;;  %v1776_v40 = vld [vmem:[%s2265_s2 + $0x30] ss:$8 sps:$4 sm:$0xff]  }
  0x17   : > { %1695 = vmatprep.subr.bf16.mxu1 %v1854_v1  ;;  %v225_v18 = vld [vmem:[#allocation2] sm:$0xff]  ;;  %v1784_v43 = vld [vmem:[%s2265_s2 + $0x14] ss:$8 sps:$4 sm:$0xff]   ;;  %v1782_v44 = vld [vmem:[%s2265_s2 + $0x10] ss:$8 sps:$4 sm:$0xff]  }
  0x18   : > { %v226_v21 = vpack.c.bf16 %v225_v18, %v225_v18  ;;  %v438_v29 = vld [vmem:[#allocation2 + $0x2] sm:$0xff]  ;;  %v1788_v5 = vld [vmem:[%s2267_s4 + $0x78] sm:$0xff]   ;;  %vm2100_vm6 = vmand %vm704_vm2, %vm705_vm3 }
  0x19   : > { %1676 = vmatpush3.bf16.msra.mxu0 %v1746_v7  ;;  %v439_v30 = vpack.c.bf16 %v438_v29, %v438_v29  ;;  %v1781_v41 = vld [vmem:[%s2265_s2 + $0x24] ss:$8 sps:$4 sm:$0xff]   ;;  %v1779_v42 = vld [vmem:[%s2265_s2 + $0x20] ss:$8 sps:$4 sm:$0xff]   ;;  %v1789_v6 = vld [vmem:[%s2267_s4 + $0x38] sm:$0xff]  }
  0x1a   : > { %1696 = vmatpush3.bf16.msra.mxu1 %v1747_v8  ;;  %1677 = vmatprep.subr.bf16.mxu0 %v1854_v1  ;;  %v1787_v45 = vld [vmem:[%s2265_s2 + $0x4] ss:$8 sps:$4 sm:$0xff]   ;;  %v1785_v46 = vld [vmem:[%s2265_s2] ss:$8 sps:$4 sm:$0xff]   ;;  %v1790_v7 = vld [vmem:[%s2267_s4 + $0x70] sm:$0xff]  }
  0x1b   : > { %1697 = vmatprep.subr.bf16.mxu1 %v1854_v1  ;;  %v1792_v8 = vld [vmem:[%s2267_s4 + $0x30] sm:$0xff]   ;;  %v1804_v18 = vld [vmem:[%s2267_s4 + $0x18] sm:$0xff]   ;;  %vm2105_vm8 = vmand %vm707_vm4, %vm708_vm5 }
  0x1c   : > { %vm710_vm10 = vmor %vm2105_vm8, %vm2100_vm6  ;;  %v1810_v29 = vld [vmem:[%s2267_s4 + $0x48] sm:$0xff]  }
  0x1d   : > { %1678 = vmatpush3.bf16.msra.mxu0 %v1748_v9  ;;  %v1794_v9 = vld [vmem:[%s2267_s4 + $0x68] sm:$0xff]   ;;  %vm715_vm11 = vmand %vm704_vm2, %vm714_vm7 }
  0x1e   : > { %1698 = vmatpush3.bf16.msra.mxu1 %v1749_v10  ;;  %1679 = vmatprep.subr.bf16.mxu0 %v1854_v1  ;;  %v1796_v10 = vld [vmem:[%s2267_s4 + $0x28] sm:$0xff]   ;;  %vm717_vm12 = vmand %vm707_vm4, %vm716_vm9 }
  0x1f   : > { %1699 = vmatprep.subr.bf16.mxu1 %v1854_v1  ;;  %vm718_vm13 = vmor %vm717_vm12, %vm715_vm11 }
  0x21   : > { %1680 = vmatpush3.bf16.msra.mxu0 %v1750_v12  ;;  %v1798_v12 = vld [vmem:[%s2267_s4 + $0x60] sm:$0xff]  }
  0x22   : > { %1700 = vmatpush3.bf16.msra.mxu1 %v1751_v13  ;;  %1681 = vmatprep.subr.bf16.mxu0 %v1854_v1  ;;  %v1791_v13 = vld [vmem:[%s2267_s4 + $0xf8] sm:$0xff]  }
  0x23   : > { %1701 = vmatprep.subr.bf16.mxu1 %v1854_v1 }
  0x25   : > { %1682 = vmatpush3.bf16.msra.mxu0 %v1752_v14  ;;  %v1800_v14 = vld [vmem:[%s2267_s4 + $0x20] sm:$0xff]  }
  0x26   : > { %1702 = vmatpush3.bf16.msra.mxu1 %v1753_v15  ;;  %1683 = vmatprep.subr.bf16.mxu0 %v1854_v1  ;;  %v1793_v15 = vld [vmem:[%s2267_s4 + $0xb8] sm:$0xff]  }
  0x27   : > { %1703 = vmatprep.subr.bf16.mxu1 %v1854_v1 }
  0x29   : > { %1684 = vmatpush3.bf16.msra.mxu0 %v1754_v16  ;;  %v1802_v16 = vld [vmem:[%s2267_s4 + $0x58] sm:$0xff]  }
  0x2a   : > { %1704 = vmatpush3.bf16.msra.mxu1 %v1755_v17  ;;  %1709 = vmatprep.subr.bf16.mxu0 %v1854_v1  ;;  %v1795_v17 = vld [vmem:[%s2267_s4 + $0xf0] sm:$0xff]  }
  0x2b   : > { %663 = vmatprep.subr.bf16.mxu1 %v1766_v31  ;;  %v1803_v31 = vld [vmem:[%s2267_s4 + $0xe0] sm:$0xff]  }
  0x2c   : > { %1686 = vmatmul.mubr.bf16.vlgmr.msra.gmra.mxu0 %v244_v20  ;;  %v711_v20 = vld [vmem:[#allocation4] sm:$0x11] }
  0x2d   : > { %1706 = vmatmul.mubr.bf16.vlgmr.msra.gmra.mxu1 %v226_v21  ;;  %1710 = vmatpush3.bf16.msra.mxu0 %v1756_v19 }
  0x2e   : > { %1711 = vmatprep.subr.bf16.mxu0 %v1854_v1  ;;  %1725 = vmatprep.mubr.msk.bf16.mxu0 %vm1855_vm0, %v1854_v1  ;;  %vm2150_vm0 = vmand %vm751_vm14, %vm714_vm7 }
  0x2f   : > { %664 = vmatpush1.bf16.msra.mxu1 %v1764_v32  ;;  %695 = vmatprep.mubr.bf16.mxu1 %v1856_v47  ;;  %v1812_v32 = vld [vmem:[%s2267_s4 + $0x8] sm:$0xff]   ;;  %v573_v47 = vlaneseq }
  0x30   : > { %665 = vmatprep.subr.bf16.mxu1 %v1769_v33  ;;  %v1805_v33 = vld [vmem:[%s2267_s4 + $0xa0] sm:$0xff]  }
  0x31   : > { %1712 = vmatpush3.bf16.msra.mxu0 %v1757_v22  ;;  %v719_v22 = vld [vmem:[#allocation4 + $0x8] sm:$0x11] }
  0x32   : > { %1713 = vmatprep.subr.bf16.mxu0 %v1854_v1 }
  0x33   : > { %666 = vmatpush1.bf16.msra.mxu1 %v1767_v34 }
  0x34   : > { %667 = vmatprep.subr.bf16.mxu1 %v1772_v35  ;;  %v1814_v35 = vld [vmem:[%s2267_s4 + $0x40] sm:$0xff]  }
  0x35   : > { %1714 = vmatpush3.bf16.msra.mxu0 %v1758_v23  ;;  %v1797_v23 = vld [vmem:[%s2267_s4 + $0xb0] sm:$0xff]  }
  0x36   : > { %1715 = vmatprep.subr.bf16.mxu0 %v1854_v1 }
  0x37   : > { %668 = vmatpush1.bf16.msra.mxu1 %v1770_v36  ;;  %v1826_v36 = vld [vmem:[%s2267_s4 + $0x168] sm:$0xff]  }
  0x38   : > { %669 = vmatprep.subr.bf16.mxu1 %v1775_v37  ;;  %v1807_v37 = vld [vmem:[%s2267_s4 + $0xd8] sm:$0xff]  }
  0x39   : > { %1716 = vmatpush3.bf16.msra.mxu0 %v1759_v24  ;;  %v1799_v24 = vld [vmem:[%s2267_s4 + $0xe8] sm:$0xff]  }
  0x3a   : > { %1717 = vmatprep.subr.bf16.mxu0 %v1854_v1 }
  0x3b   : > { %670 = vmatpush1.bf16.msra.mxu1 %v1773_v38  ;;  %v1816_v38 = vld [vmem:[%s2267_s4] sm:$0xff]  }
  0x3c   : > { %671 = vmatprep.subr.bf16.mxu1 %v1778_v39  ;;  %v1809_v39 = vld [vmem:[%s2267_s4 + $0x98] sm:$0xff]  }
  0x3d   : > { %1718 = vmatpush3.bf16.msra.mxu0 %v1760_v25  ;;  %v1806_v25 = vld [vmem:[%s2267_s4 + $0x50] sm:$0xff]  }
  0x3e   : > { %1719 = vmatprep.subr.bf16.mxu0 %v1854_v1 }
  0x3f   : > { %672 = vmatpush1.bf16.msra.mxu1 %v1776_v40  ;;  %v1811_v40 = vld [vmem:[%s2267_s4 + $0xd0] sm:$0xff]  }
  0x40   : > { %673 = vmatprep.subr.bf16.mxu1 %v1781_v41  ;;  %v1813_v41 = vld [vmem:[%s2267_s4 + $0x90] sm:$0xff]  }
  0x41   : > { %1720 = vmatpush3.bf16.msra.mxu0 %v1761_v26  ;;  %v712_v26 = vsel %vm710_vm10, 0, %v711_v20 }
  0x42   : > { %1721 = vmatprep.subr.bf16.mxu0 %v1854_v1  ;;  %713 = vst [vmem:[#allocation4] sm:$0x11] %v712_v26 }
  0x43   : > { %674 = vmatpush1.bf16.msra.mxu1 %v1779_v42  ;;  %v1815_v42 = vld [vmem:[%s2267_s4 + $0xc8] sm:$0xff]  }
  0x44   : > { %675 = vmatprep.subr.bf16.mxu1 %v1784_v43  ;;  %v1817_v43 = vld [vmem:[%s2267_s4 + $0x88] sm:$0xff]  }
  0x45   : > { %1722 = vmatpush3.bf16.msra.mxu0 %v1762_v27  ;;  %v1801_v27 = vld [vmem:[%s2267_s4 + $0xa8] sm:$0xff]  }
  0x46   : > { %1723 = vmatprep.subr.bf16.mxu0 %v1854_v1 }
  0x47   : > { %676 = vmatpush1.bf16.msra.mxu1 %v1782_v44  ;;  %v1818_v44 = vld [vmem:[%s2267_s4 + $0xc0] sm:$0xff]  }
  0x48   : > { %677 = vmatprep.subr.bf16.mxu1 %v1787_v45  ;;  %v1819_v45 = vld [vmem:[%s2267_s4 + $0x80] sm:$0xff]  }
  0x49   : > { %1724 = vmatpush3.bf16.msra.mxu0 %v1763_v28  ;;  %v1808_v28 = vld [vmem:[%s2267_s4 + $0x10] sm:$0xff]  }
  0x4a   : > { %1603 = vmatprep.subr.bf16.mxu0 %v1791_v13 }
  0x4b   : > { %678 = vmatpush1.bf16.msra.mxu1 %v1785_v46  ;;  %v1820_v46 = vld [vmem:[%s2267_s4 + $0x178] sm:$0xff]  }
  0x4c   : > { %1726 = vmatmul.mubr.bf16.vlgmr.msra.gmra.mxu0 %v439_v30  ;;  %1625 = vmatprep.subr.bf16.mxu1 %v1788_v5  ;;  %v720_v30 = vsel %vm718_vm13, 0, %v719_v22 }
  0x4d   : > { %1604 = vmatpush3.bf16.msra.mxu0 %v1793_v15  ;;  %721 = vst [vmem:[#allocation4 + $0x8] sm:$0x11] %v720_v30 }
  0x4e   : > { %1605 = vmatprep.subr.bf16.mxu0 %v1795_v17 }
  0x51   : > { %1606 = vmatpush3.bf16.msra.mxu0 %v1797_v23 }
  0x52   : > { %1607 = vmatprep.subr.bf16.mxu0 %v1799_v24 }
  0x55   : > { %1608 = vmatpush3.bf16.msra.mxu0 %v1801_v27 }
  0x56   : > { %1609 = vmatprep.subr.bf16.mxu0 %v1803_v31 }
  0x59   : > { %1610 = vmatpush3.bf16.msra.mxu0 %v1805_v33  ;;  %v1824_v33 = vld [vmem:[%s2267_s4 + $0x170] sm:$0xff]  }
  0x5a   : > { %1611 = vmatprep.subr.bf16.mxu0 %v1807_v37  ;;  %v1827_v37 = vld [vmem:[%s2267_s4 + $0x128] sm:$0xff]  }
  0x5d   : > { %1612 = vmatpush3.bf16.msra.mxu0 %v1809_v39  ;;  %v1829_v39 = vld [vmem:[%s2267_s4 + $0x120] sm:$0xff]  }
  0x5e   : > { %1613 = vmatprep.subr.bf16.mxu0 %v1811_v40  ;;  %v1830_v40 = vld [vmem:[%s2267_s4 + $0x158] sm:$0xff]  }
  0x61   : > { %1614 = vmatpush3.bf16.msra.mxu0 %v1813_v41  ;;  %v1831_v41 = vld [vmem:[%s2267_s4 + $0x118] sm:$0xff]  }
  0x62   : > { %1615 = vmatprep.subr.bf16.mxu0 %v1815_v42  ;;  %v1832_v42 = vld [vmem:[%s2267_s4 + $0x150] sm:$0xff]  }
  0x65   : > { %1616 = vmatpush3.bf16.msra.mxu0 %v1817_v43  ;;  %v1833_v43 = vld [vmem:[%s2267_s4 + $0x110] sm:$0xff]  }
  0x66   : > { %1617 = vmatprep.subr.bf16.mxu0 %v1818_v44  ;;  %v1834_v44 = vld [vmem:[%s2267_s4 + $0x148] sm:$0xff]  }
  0x69   : > { %1618 = vmatpush3.bf16.msra.mxu0 %v1819_v45  ;;  %v1835_v45 = vld [vmem:[%s2267_s4 + $0x108] sm:$0xff]  }
  0x6a   : > { %1647 = vmatprep.subr.bf16.mxu0 %v1820_v46  ;;  %v1836_v46 = vld [vmem:[%s2267_s4 + $0x140] sm:$0xff]  }
  0xec   : > { %v344_v48 = vpop.f32.mrf.mxu0 }
  0xed   : > { %v432_v49 = vpop.f32.mrf.mxu1 }
  0xee   : > { %v1687_v50 = vpop.f32.mrf.mxu0  ;;  %v433_v56 = vadd.f32 %v432_v49, %v344_v48  ;;  %v574_v48 = vshrl.u32 %v573_v47, 7  ;;  %v1837_v47 = vld [vmem:[%s2267_s4 + $0x100] sm:$0xff]  }
  0xef   : > { %v1707_v51 = vpop.f32.mrf.mxu1  ;;  %v571_v50 = vld [vmem:[%s2266_s3] sm:$0x3] }
  0xf0   : > { %v347_v52 = vpop.f32.mrf.mxu0  ;;  %v575_v49 = vsub.s32 0, %v574_v48  ;;  %v579_v51 = vsub.s32 1, %v574_v48 }
  0xf1   : > { %v435_v53 = vpop.f32.mrf.mxu1 }
  0xf2   : > { %v1688_v54 = vpop.f32.mrf.mxu0  ;;  %v576_v52 = vrot.slane %v571_v50, %v575_v49  ;;  %v580_v53 = vrot.slane %v571_v50, %v579_v51 }
  0xf3   : > { %v1708_v55 = vpop.f32.mrf.mxu1 }
 0x10c   : > { %v539_v57 = vpop.f32.mrf.mxu0 }
 0x10d   : > { %v545_v58 = vadd.f32 %v539_v57, %v433_v56 }
 0x10e   : > { %v1727_v59 = vpop.f32.mrf.mxu0 }
 0x10f   : > { %v547_v60 = vmin.f32 %v545_v58, 0.0  ;;  %vm546_vm1 = vcmp.gt.f32.partialorder %v545_v58, 0.0 }
 0x110   : > { %v542_v61 = vpop.f32.mrf.mxu0 }
 0x111   : > { %v548_v62 = vmul.f32 1.442695, %v547_v60 }
 0x112   : > { %v1728_v63 = vpop.f32.mrf.mxu0 }
 0x113   : > { %1838 = vpow2.f32 %v548_v62 }
 0x120   : > { %v1839_v0 = vpop.eup %1838 }
 0x121   : > { %v1434_v1 = vadd.f32 -1.0, %v1839_v0 }
 0x123   : > { %v551_v2 = vsel %vm546_vm1, %v545_v58, %v1434_v1  ;;  %vm2158_vm1 = vmand %vm753_vm15, %vm716_vm9 }
 0x124   : > { %v552_v3 = vpack.c.bf16 %v551_v2, %v551_v2  ;;  %vm755_vm2 = vmor %vm2158_vm1, %vm2150_vm0 }
 0x126   : > { %553 = vst [vmem:[#allocation3] sm:$0xf] %v552_v3 }
 0x12d   : > { %v554_v4 = vld [vmem:[#allocation3] sm:$0xf] }
 0x12e   : > { %696 = vmatmul.mubr.bf16.vlgmr.msra.gmra.mxu1 %v554_v4 }
 0x12f   : > { %1626 = vmatpush3.bf16.msra.mxu1 %v1789_v6 }
 0x130   : > { %1627 = vmatprep.subr.bf16.mxu1 %v1790_v7 }
 0x133   : > { %1628 = vmatpush3.bf16.msra.mxu1 %v1792_v8 }
 0x134   : > { %1629 = vmatprep.subr.bf16.mxu1 %v1794_v9 }
 0x137   : > { %1630 = vmatpush3.bf16.msra.mxu1 %v1796_v10  ;;  %v756_v10 = vld [vmem:[#allocation4] sm:$0xff] }
 0x138   : > { %1631 = vmatprep.subr.bf16.mxu1 %v1798_v12  ;;  %v759_v12 = vld [vmem:[#allocation4 + $0x8] sm:$0x11] }
 0x13b   : > { %1632 = vmatpush3.bf16.msra.mxu1 %v1800_v14 }
 0x13c   : > { %1633 = vmatprep.subr.bf16.mxu1 %v1802_v16 }
 0x13f   : > { %1634 = vmatpush3.bf16.msra.mxu1 %v1804_v18 }
 0x140   : > { %1635 = vmatprep.subr.bf16.mxu1 %v1806_v25 }
 0x143   : > { %1636 = vmatpush3.bf16.msra.mxu1 %v1808_v28 }
 0x144   : > { %1637 = vmatprep.subr.bf16.mxu1 %v1810_v29 }
 0x147   : > { %1638 = vmatpush3.bf16.msra.mxu1 %v1812_v32  ;;  %v1821_v32 = vld [vmem:[%s2267_s4 + $0x138] sm:$0xff]  }
 0x148   : > { %1639 = vmatprep.subr.bf16.mxu1 %v1814_v35  ;;  %v1825_v35 = vld [vmem:[%s2267_s4 + $0x130] sm:$0xff]  }
 0x14b   : > { %1640 = vmatpush3.bf16.msra.mxu1 %v1816_v38  ;;  %v1828_v38 = vld [vmem:[%s2267_s4 + $0x160] sm:$0xff]  }
 0x1ee   : > { %v697_v54 = vpop.f32.mrf.mxu1 }
 0x1ef   : > { %v698_v55 = vadd.f32 %v697_v54, %v576_v52 }
 0x1f0   : > { %v699_v56 = vpop.f32.mrf.mxu1 }
 0x1f1   : > { %v724_v57 = vmin.f32 %v698_v55, 0.0  ;;  %v700_v58 = vadd.f32 %v699_v56, %v580_v53  ;;  %vm722_vm3 = vcmp.gt.f32.partialorder %v698_v55, 0.0 }
 0x1f2   : > { %v701_v59 = vpop.f32.mrf.mxu1 }
 0x1f3   : > { %v726_v60 = vmul.f32 1.442695, %v724_v57  ;;  %v725_v61 = vmin.f32 %v700_v58, 0.0  ;;  %vm723_vm4 = vcmp.gt.f32.partialorder %v700_v58, 0.0 }
 0x1f4   : > { %v702_v62 = vpop.f32.mrf.mxu1 }
 0x1f5   : > { %1840 = vpow2.f32 %v726_v60  ;;  %v728_v63 = vmul.f32 1.442695, %v725_v61 }
 0x1f7   : > { %1842 = vpow2.f32 %v728_v63 }
 0x202   : > { %v1841_v0 = vpop.eup %1840 }
 0x203   : > { %v1451_v1 = vadd.f32 -1.0, %v1841_v0 }
 0x204   : > { %v1843_v2 = vpop.eup %1842 }
 0x205   : > { %v1452_v3 = vadd.f32 -1.0, %v1843_v2  ;;  %v732_v4 = vsel %vm722_vm3, %v698_v55, %v1451_v1 }
 0x207   : > { %v733_v5 = vsel %vm723_vm4, %v700_v58, %v1452_v3 }
 0x208   : > { %v1575_v6 = vpack.c.bf16 %v733_v5, %v732_v4 }
 0x20a   : > { %v742_v7 = vshrl.u32 %v1575_v6, 16  ;;  %v745_v9 = vshll.u32 %v1575_v6, 16 }
 0x20c   : > { %v744_v8 = vrot.slane %v742_v7, 7 }
 0x20e   : > { %v747_v13 = vor.u32 %v745_v9, %v744_v8  ;;  %v748_v14 = vrot.slane %v744_v8, 4 }
 0x210   : > { %v757_v15 = vsel %vm755_vm2, %v747_v13, %v756_v10  ;;  %v760_v16 = vsel %vm710_vm10, %v748_v14, %v759_v12 }
 0x211   : > { %758 = vst [vmem:[#allocation4] sm:$0xff] %v757_v15  ;;  %761 = vst [vmem:[#allocation4 + $0x8] sm:$0x11] %v760_v16  ;;  %v1505_v17 = vcombine.high %v757_v15, %v757_v15  ;;  %v1504_v18 = vcombine.low %v757_v15, %v757_v15 }
 0x213   : > { %1121 = vmatprep.mubr.bf16.mxu1 %v1505_v17 }
 0x214   : > { %1122 = vmatmul.mubr.bf16.vlgmr.msra.gmra.mxu1 %v1504_v18 }
 0x218   : > { %v795_v20 = vld [vmem:[#allocation4 + $0x8] sm:$0x11]  ;;  %v1129_v24 = vld [vmem:[#allocation4] sm:$0xee] }
 0x219   : > { %v1487_v22 = vcombine.high %v757_v15, %v795_v20  ;;  %v1486_v23 = vcombine.low %v757_v15, %v795_v20  ;;  %v1555_v27 = vcombine.high %v1129_v24, %v795_v20  ;;  %v1554_v48 = vcombine.low %v1129_v24, %v795_v20 }
 0x21b   : > { %v847_v25 = vshll.u32 %v1487_v22, 16  ;;  %v840_v26 = vshll.u32 %v1486_v23, 16  ;;  %v845_v28 = vshrl.u32 %v1487_v22, 16  ;;  %v838_v21 = vshrl.u32 %v1486_v23, 16 }
 0x21c   : > { %v1169_v34 = vrot.slane %v1555_v27, 1  ;;  %v1168_v49 = vrot.slane %v1554_v48, 1 }
 0x21d   : > { %v849_v29 = vrot.slane %v847_v25, 1  ;;  %v842_v30 = vrot.slane %v840_v26, 1 }
 0x21f   : > { %v850_v19 = vor.u32 %v849_v29, %v845_v28  ;;  %v843_v31 = vor.u32 %v842_v30, %v838_v21 }
 0x221   : > { %981 = vmatprep.mubr.bf16.mxu0 %v850_v19 }
 0x222   : > { %982 = vmatmul.mubr.bf16.vlgmr.msra.gmra.mxu0 %v843_v31 }
 0x223   : > { %1648 = vmatpush3.bf16.msra.mxu0 %v1821_v32  ;;  %1300 = vmatprep.mubr.bf16.mxu0 %v1169_v34 }
 0x224   : > { %1649 = vmatprep.subr.bf16.mxu0 %v1824_v33 }
 0x227   : > { %1650 = vmatpush3.bf16.msra.mxu0 %v1825_v35 }
 0x228   : > { %1651 = vmatprep.subr.bf16.mxu0 %v1826_v36 }
 0x22b   : > { %1652 = vmatpush3.bf16.msra.mxu0 %v1827_v37 }
 0x22c   : > { %1653 = vmatprep.subr.bf16.mxu0 %v1828_v38 }
 0x22f   : > { %1654 = vmatpush3.bf16.msra.mxu0 %v1829_v39 }
 0x230   : > { %1655 = vmatprep.subr.bf16.mxu0 %v1830_v40 }
 0x233   : > { %1656 = vmatpush3.bf16.msra.mxu0 %v1831_v41 }
 0x234   : > { %1657 = vmatprep.subr.bf16.mxu0 %v1832_v42 }
 0x237   : > { %1658 = vmatpush3.bf16.msra.mxu0 %v1833_v43 }
 0x238   : > { %1659 = vmatprep.subr.bf16.mxu0 %v1834_v44 }
 0x23b   : > { %1660 = vmatpush3.bf16.msra.mxu0 %v1835_v45 }
 0x23c   : > { %1661 = vmatprep.subr.bf16.mxu0 %v1836_v46 }
 0x23f   : > { %1662 = vmatpush3.bf16.msra.mxu0 %v1837_v47 }
 0x242   : > { %1301 = vmatmul.mubr.bf16.vlgmr.msra.gmra.mxu0 %v1168_v49 }
 0x2d4   : > { %v1641_v50 = vpop.f32.mrf.mxu1 }
 0x2d6   : > { %v1642_v51 = vpop.f32.mrf.mxu1 }
 0x2d7   : > { %v1643_v60 = vadd.f32 %v1642_v51, %v1641_v50 }
 0x2d8   : > { %v1644_v52 = vpop.f32.mrf.mxu1 }
 0x2da   : > { %v1645_v53 = vpop.f32.mrf.mxu1 }
 0x2e2   : > { %v1619_v54 = vpop.f32.mrf.mxu0 }
 0x2e4   : > { %v1620_v55 = vpop.f32.mrf.mxu0 }
 0x2e5   : > { %v1621_v58 = vadd.f32 %v1620_v55, %v1619_v54 }
 0x2e6   : > { %v1622_v56 = vpop.f32.mrf.mxu0 }
 0x2e7   : > { %v1124_v62 = vadd.f32 %v1643_v60, %v1621_v58 }
 0x2e8   : > { %v1623_v57 = vpop.f32.mrf.mxu0 }
 0x302   : > { %v1663_v59 = vpop.f32.mrf.mxu0 }
 0x304   : > { %v1664_v61 = vpop.f32.mrf.mxu0 }
 0x305   : > { %v1665_v63 = vadd.f32 %v1664_v61, %v1663_v59 }
 0x306   : > { %v1666_v0 = vpop.f32.mrf.mxu0 }
 0x307   : > { %v1308_v1 = vadd.f32 %v1665_v63, %v1124_v62 }
 0x308   : > { %v1667_v2 = vpop.f32.mrf.mxu0 }
 0x309   : > { %v1310_v3 = vmin.f32 %v1308_v1, 0.0  ;;  %vm1309_vm5 = vcmp.gt.f32.partialorder %v1308_v1, 0.0 }
 0x30b   : > { %v1311_v4 = vmul.f32 1.442695, %v1310_v3 }
 0x30d   : > { %1844 = vpow2.f32 %v1311_v4 }
 0x31a   : > { %v1845_v5 = vpop.eup %1844 }
 0x31b   : > { %v1572_v6 = vadd.f32 -1.0, %v1845_v5 }
 0x31d   : > { %v1314_v7 = vsel %vm1309_vm5, %v1308_v1, %v1572_v6 }
 0x31e   : > { %v1316_v8 = vadd.f32 %v1314_v7, %v1949_v11 }
 0x320   : > { %1317 = vst [vmem:[%s219_s27] sm:$0xff] %v1316_v8 }
 0x321 PF: > { %s15_s18 = sadd.s32 1, %s1852_s18  }
 0x322   : > { %p12_p4 = scmp.ge.s32.totalorder %s15_s18, 4  }
 0x324   :  { %14 = sbr.rel (!%p12_p4) target bundleno = 1 (0x1), region = 74 }

// kernel: resnet1d_forward.18
= control target key start
LH: loop header
LB: loop body
LE: loop exit
PB: predicated region body
PF: predicated region fallthrough
CT: control target
= control target key end

     0   :  { %s2087_s21 = smov 0   ;;  %s2497_s0 = inlined_call_operand.vmem [shape: f32[2,16,128], index: 0, kind: input, shape index: {}]   ;;  %s2498_s1 = inlined_call_operand.vmem [shape: bf16[3,128,128], index: 1, kind: input, shape index: {}]   ;;  %s2499_s2 = inlined_call_operand.vmem [shape: bf16[1,128,256], index: 2, kind: input, shape index: {}]   ;;  %s2500_s3 = inlined_call_operand.vmem [shape: f32[1,256], index: 3, kind: input, shape index: {}]   ;;  %s2501_s4 = inlined_call_operand.vmem [shape: bf16[3,256,128], index: 4, kind: input, shape index: {}]   ;;  %s2502_s5 = inlined_call_operand.vmem [shape: bf16[1,128,128], index: 5, kind: input, shape index: {}]   ;;  %s2503_s6 = inlined_call_operand.vmem [shape: f32[2,8,128], index: 6, kind: output, shape index: {}]  }
   0x1 LB: > { %s1516_s22 = sadd.s32 4294967295, %s2047_s21   ;;  %p1520_p0 = scmp.ge.s32.totalorder %s2047_s21, 1  ;;  %s2047_s21 = sphi %s2087_s21, %s16_s21  }
   0x2   : > { %p212_p1 = scmp.lt.s32.totalorder %s2047_s21, 3 }
   0x4   : > { %p213_p2 = pnand %p1520_p0, %p212_p1 }
   0x5   : > { %p241_p3 = scmp.lt.s32.totalorder (!%p213_p2), %s1516_s22, 1 }
   0x6   : > { %216 = sbr.rel (%p213_p2) target bundleno = 801 (0x321), region = 44 }
   0xb   : > { %v1925_v0 = vld [vmem:[%s2498_s1 + $0x78] sm:$0xff]   ;;  %v2049_v1 = vmov 0.0   ;;  %v1927_v3 = vld [vmem:[%s2498_s1 + $0x70] sm:$0xff]   ;;  %vm2050_vm0 = vmmov 0   ;;  %v1929_v5 = vld [vmem:[%s2498_s1 + $0x68] sm:$0xff]   ;;  %s2513_s22 = smov (!%p241_p3, %s1516_s22), 1 }
   0xc   : > { %1834 = vmatprep.subr.bf16.mxu0 %v2049_v1  ;;  %251 = vst [vmem:[#allocation2] sm:$0x1] %v2049_v1  ;;  %1854 = vmatprep.subr.bf16.mxu1 %v2049_v1  ;;  %v1926_v2 = vld [vmem:[%s2498_s1 + $0x38] sm:$0xff]   ;;  %v1928_v4 = vld [vmem:[%s2498_s1 + $0x30] sm:$0xff]   ;;  %v1930_v6 = vld [vmem:[%s2498_s1 + $0x28] sm:$0xff]   ;;  %s1730_s13 = sshll.u32 %s2513_s22, 4 }
   0xd   : > { %1835 = vmatpush3.bf16.msra.mxu0 %v1925_v0  ;;  %1850 = vmatprep.mubr.msk.bf16.mxu0 %vm2050_vm0, %v2049_v1  ;;  %v1931_v7 = vld [vmem:[%s2498_s1 + $0x60] sm:$0xff]   ;;  %s245_s18 = scalar_lea.vmem %s2497_s0, %s1730_s13  ;;  %v1933_v9 = vld [vmem:[%s2498_s1 + $0x58] sm:$0xff]   ;;  %v1935_v13 = vld [vmem:[%s2498_s1 + $0x50] sm:$0xff]   ;;  %v2051_v49 = vmov 0   ;;  %vm738_vm2 = vcmask 1040384   ;;  %vm741_vm4 = vcmask 1044484  }
   0xe   : > { %1855 = vmatpush3.bf16.msra.mxu1 %v1926_v2  ;;  %1836 = vmatprep.subr.bf16.mxu0 %v2049_v1  ;;  %v1932_v8 = vld [vmem:[%s2498_s1 + $0x20] sm:$0xff]   ;;  %v1934_v10 = vld [vmem:[%s2498_s1 + $0x18] sm:$0xff]   ;;  %v254_v12 = vld [vmem:[%s245_s18 + $0x8] sm:$0xff]  ;;  %vm739_vm3 = vsmask.f32 256  ;;  %vm785_vm14 = vcmask 1043456  }
   0xf   : > { %1856 = vmatprep.subr.bf16.mxu1 %v2049_v1  ;;  %1870 = vmatprep.mubr.msk.bf16.mxu1 %vm2050_vm0, %v2049_v1  ;;  %v253_v11 = vld [vmem:[%s245_s18] sm:$0xff]  ;;  %256 = vst [vmem:[#allocation2 + $0x9] sm:$0xff] %v254_v12  ;;  %v1936_v14 = vld [vmem:[%s2498_s1 + $0x10] sm:$0xff]   ;;  %v1937_v15 = vld [vmem:[%s2498_s1 + $0x48] sm:$0xff]   ;;  %vm742_vm5 = vsmask.f32 4352 }
  0x10   : > { %255 = vst [vmem:[#allocation2 + $0x1] sm:$0xff] %v253_v11  ;;  %v1938_v16 = vld [vmem:[%s2498_s1 + $0x8] sm:$0xff]   ;;  %v1939_v17 = vld [vmem:[%s2498_s1 + $0x40] sm:$0xff]   ;;  %v1941_v21 = vld [vmem:[%s2498_s1 + $0xb8] sm:$0xff]   ;;  %vm748_vm7 = vsmask.f32 7938 }
  0x11   : > { %1837 = vmatpush3.bf16.msra.mxu0 %v1927_v3  ;;  %v1940_v18 = vld [vmem:[%s2498_s1] sm:$0xff]   ;;  %v1942_v24 = vld [vmem:[%s2498_s1 + $0xb0] sm:$0xff]   ;;  %v1943_v25 = vld [vmem:[%s2498_s1 + $0xa8] sm:$0xff]   ;;  %vm750_vm9 = vsmask.f32 7954  ;;  %vm787_vm15 = vcmask 1047556  }
  0x12   : > { %1857 = vmatpush3.bf16.msra.mxu1 %v1928_v4  ;;  %1838 = vmatprep.subr.bf16.mxu0 %v2049_v1  ;;  %v1944_v26 = vld [vmem:[%s2498_s1 + $0xa0] sm:$0xff]   ;;  %v1945_v27 = vld [vmem:[%s2498_s1 + $0x98] sm:$0xff]   ;;  %v1946_v28 = vld [vmem:[%s2498_s1 + $0x90] sm:$0xff]   ;;  %s1523_s23 = sshll.u32 %s2513_s22, 3 }
  0x13   : > { %1858 = vmatprep.subr.bf16.mxu1 %v2049_v1  ;;  %v1947_v29 = vld [vmem:[%s2498_s1 + $0x88] sm:$0xff]   ;;  %v1948_v30 = vld [vmem:[%s2498_s1 + $0x80] sm:$0xff]   ;;  %v1951_v33 = vld [vmem:[%s2499_s2 + $0x74] ss:$8 sps:$4 sm:$0xff]   ;;  %s249_s26 = scalar_lea.vmem %s2503_s6, %s1523_s23 }
  0x14   : > { %v1949_v34 = vld [vmem:[%s2499_s2 + $0x70] ss:$8 sps:$4 sm:$0xff]   ;;  %v1954_v35 = vld [vmem:[%s2499_s2 + $0x64] ss:$8 sps:$4 sm:$0xff]   ;;  %v1952_v36 = vld [vmem:[%s2499_s2 + $0x60] ss:$8 sps:$4 sm:$0xff]  }
  0x15   : > { %1839 = vmatpush3.bf16.msra.mxu0 %v1929_v5  ;;  %v1957_v37 = vld [vmem:[%s2499_s2 + $0x54] ss:$8 sps:$4 sm:$0xff]   ;;  %v1955_v38 = vld [vmem:[%s2499_s2 + $0x50] ss:$8 sps:$4 sm:$0xff]   ;;  %v1960_v39 = vld [vmem:[%s2499_s2 + $0x44] ss:$8 sps:$4 sm:$0xff]  }
  0x16   : > { %1859 = vmatpush3.bf16.msra.mxu1 %v1930_v6  ;;  %1840 = vmatprep.subr.bf16.mxu0 %v2049_v1  ;;  %v1958_v40 = vld [vmem:[%s2499_s2 + $0x40] ss:$8 sps:$4 sm:$0xff]   ;;  %v1963_v41 = vld [vmem:[%s2499_s2 + $0x34] ss:$8 sps:$4 sm:$0xff]   ;;  %v1961_v42 = vld [vmem:[%s2499_s2 + $0x30] ss:$8 sps:$4 sm:$0xff]  }
  0x17   : > { %1860 = vmatprep.subr.bf16.mxu1 %v2049_v1  ;;  %v276_v19 = vld [vmem:[#allocation2 + $0x1] ss:$2 sm:$0xff]  ;;  %v257_v20 = vld [vmem:[#allocation2] ss:$2 sm:$0xff]  ;;  %v1969_v45 = vld [vmem:[%s2499_s2 + $0x14] ss:$8 sps:$4 sm:$0xff]  }
  0x18   : > { %v277_v22 = vpack.c.bf16 %v276_v19, %v276_v19  ;;  %v258_v23 = vpack.c.bf16 %v257_v20, %v257_v20  ;;  %v472_v31 = vld [vmem:[#allocation2 + $0x2] ss:$2 sm:$0xff]  ;;  %v1988_v19 = vld [vmem:[%s2501_s4 + $0x18] sm:$0xff]   ;;  %vm2292_vm6 = vmand %vm738_vm2, %vm739_vm3 }
  0x19   : > { %1841 = vmatpush3.bf16.msra.mxu0 %v1931_v7  ;;  %v473_v32 = vpack.c.bf16 %v472_v31, %v472_v31  ;;  %v1966_v43 = vld [vmem:[%s2499_s2 + $0x24] ss:$8 sps:$4 sm:$0xff]   ;;  %v1964_v44 = vld [vmem:[%s2499_s2 + $0x20] ss:$8 sps:$4 sm:$0xff]   ;;  %v1967_v46 = vld [vmem:[%s2499_s2 + $0x10] ss:$8 sps:$4 sm:$0xff]  }
  0x1a   : > { %1861 = vmatpush3.bf16.msra.mxu1 %v1932_v8  ;;  %1842 = vmatprep.subr.bf16.mxu0 %v2049_v1  ;;  %v1972_v47 = vld [vmem:[%s2499_s2 + $0x4] ss:$8 sps:$4 sm:$0xff]   ;;  %v1970_v48 = vld [vmem:[%s2499_s2] ss:$8 sps:$4 sm:$0xff]   ;;  %v1973_v8 = vld [vmem:[%s2501_s4 + $0x78] sm:$0xff]  }
  0x1b   : > { %1862 = vmatprep.subr.bf16.mxu1 %v2049_v1  ;;  %v1976_v11 = vld [vmem:[%s2501_s4 + $0x30] sm:$0xff]   ;;  %v1979_v12 = vld [vmem:[%s2501_s4 + $0x68] sm:$0xff]   ;;  %vm2297_vm8 = vmand %vm741_vm4, %vm742_vm5 }
  0x1c   : > { %v1981_v20 = vld [vmem:[%s2501_s4 + $0xf0] sm:$0xff]   ;;  %vm744_vm10 = vmor %vm2297_vm8, %vm2292_vm6  ;;  %v1995_v31 = vld [vmem:[%s2501_s4 + $0x48] sm:$0xff]  }
  0x1d   : > { %1843 = vmatpush3.bf16.msra.mxu0 %v1933_v9  ;;  %v1974_v9 = vld [vmem:[%s2501_s4 + $0x38] sm:$0xff]   ;;  %vm749_vm11 = vmand %vm738_vm2, %vm748_vm7 }
  0x1e   : > { %1863 = vmatpush3.bf16.msra.mxu1 %v1934_v10  ;;  %1844 = vmatprep.subr.bf16.mxu0 %v2049_v1  ;;  %v1975_v10 = vld [vmem:[%s2501_s4 + $0x70] sm:$0xff]   ;;  %vm751_vm12 = vmand %vm741_vm4, %vm750_vm9 }
  0x1f   : > { %1864 = vmatprep.subr.bf16.mxu1 %v2049_v1  ;;  %vm752_vm13 = vmor %vm751_vm12, %vm749_vm11 }
  0x20   : > { %vm2353_vm2 = vmand %vm787_vm15, %vm750_vm9 }
  0x21   : > { %1845 = vmatpush3.bf16.msra.mxu0 %v1935_v13  ;;  %v1980_v13 = vld [vmem:[%s2501_s4 + $0x28] sm:$0xff]  }
  0x22   : > { %1865 = vmatpush3.bf16.msra.mxu1 %v1936_v14  ;;  %1846 = vmatprep.subr.bf16.mxu0 %v2049_v1  ;;  %v1983_v14 = vld [vmem:[%s2501_s4 + $0x60] sm:$0xff]  }
  0x23   : > { %1866 = vmatprep.subr.bf16.mxu1 %v2049_v1 }
  0x25   : > { %1847 = vmatpush3.bf16.msra.mxu0 %v1937_v15  ;;  %v1984_v15 = vld [vmem:[%s2501_s4 + $0x20] sm:$0xff]  }
  0x26   : > { %1867 = vmatpush3.bf16.msra.mxu1 %v1938_v16  ;;  %1848 = vmatprep.subr.bf16.mxu0 %v2049_v1  ;;  %v1977_v16 = vld [vmem:[%s2501_s4 + $0xf8] sm:$0xff]  }
  0x27   : > { %1868 = vmatprep.subr.bf16.mxu1 %v2049_v1 }
  0x29   : > { %1849 = vmatpush3.bf16.msra.mxu0 %v1939_v17  ;;  %v1978_v17 = vld [vmem:[%s2501_s4 + $0xb8] sm:$0xff]  }
  0x2a   : > { %1869 = vmatpush3.bf16.msra.mxu1 %v1940_v18  ;;  %1874 = vmatprep.subr.bf16.mxu0 %v2049_v1  ;;  %v1987_v18 = vld [vmem:[%s2501_s4 + $0x58] sm:$0xff]  }
  0x2b   : > { %697 = vmatprep.subr.bf16.mxu1 %v1951_v33 }
  0x2c   : > { %1851 = vmatmul.mubr.bf16.vlgmr.msra.gmra.mxu0 %v277_v22  ;;  %v745_v22 = vld [vmem:[#allocation4] sm:$0x11] }
  0x2d   : > { %1871 = vmatmul.mubr.bf16.vlgmr.msra.gmra.mxu1 %v258_v23  ;;  %1875 = vmatpush3.bf16.msra.mxu0 %v1941_v21 }
  0x2e   : > { %1876 = vmatprep.subr.bf16.mxu0 %v2049_v1  ;;  %1890 = vmatprep.mubr.msk.bf16.mxu0 %vm2050_vm0, %v2049_v1 }
  0x2f   : > { %698 = vmatpush1.bf16.msra.mxu1 %v1949_v34  ;;  %729 = vmatprep.mubr.bf16.mxu1 %v2051_v49  ;;  %v1989_v34 = vld [vmem:[%s2501_s4 + $0xe0] sm:$0xff]   ;;  %v607_v49 = vlaneseq }
  0x30   : > { %699 = vmatprep.subr.bf16.mxu1 %v1954_v35  ;;  %v1990_v35 = vld [vmem:[%s2501_s4 + $0xa0] sm:$0xff]  }
  0x31   : > { %1877 = vmatpush3.bf16.msra.mxu0 %v1942_v24  ;;  %v753_v24 = vld [vmem:[#allocation4 + $0x8] sm:$0x11] }
  0x32   : > { %1878 = vmatprep.subr.bf16.mxu0 %v2049_v1  ;;  %v754_v33 = vsel %vm752_vm13, 0, %v753_v24  ;;  %v2006_v24 = vld [vmem:[%s2502_s5 + $0x30] sm:$0xff]  }
  0x33   : > { %700 = vmatpush1.bf16.msra.mxu1 %v1952_v36  ;;  %755 = vst [vmem:[#allocation4 + $0x8] sm:$0x11] %v754_v33  ;;  %v1999_v36 = vld [vmem:[%s2501_s4 + $0x40] sm:$0xff]  }
  0x34   : > { %701 = vmatprep.subr.bf16.mxu1 %v1957_v37 }
  0x35   : > { %1879 = vmatpush3.bf16.msra.mxu0 %v1943_v25  ;;  %v1982_v25 = vld [vmem:[%s2501_s4 + $0xb0] sm:$0xff]  }
  0x36   : > { %1880 = vmatprep.subr.bf16.mxu0 %v2049_v1 }
  0x37   : > { %702 = vmatpush1.bf16.msra.mxu1 %v1955_v38  ;;  %v2000_v38 = vld [vmem:[%s2501_s4] sm:$0xff]  }
  0x38   : > { %703 = vmatprep.subr.bf16.mxu1 %v1960_v39  ;;  %v2012_v39 = vld [vmem:[%s2501_s4 + $0x170] sm:$0xff]  }
  0x39   : > { %1881 = vmatpush3.bf16.msra.mxu0 %v1944_v26  ;;  %v1985_v26 = vld [vmem:[%s2501_s4 + $0xe8] sm:$0xff]  }
  0x3a   : > { %1882 = vmatprep.subr.bf16.mxu0 %v2049_v1 }
  0x3b   : > { %704 = vmatpush1.bf16.msra.mxu1 %v1958_v40  ;;  %v1993_v40 = vld [vmem:[%s2501_s4 + $0xd8] sm:$0xff]  }
  0x3c   : > { %705 = vmatprep.subr.bf16.mxu1 %v1963_v41  ;;  %v1994_v41 = vld [vmem:[%s2501_s4 + $0x98] sm:$0xff]  }
  0x3d   : > { %1883 = vmatpush3.bf16.msra.mxu0 %v1945_v27  ;;  %v1991_v27 = vld [vmem:[%s2501_s4 + $0x50] sm:$0xff]  }
  0x3e   : > { %1884 = vmatprep.subr.bf16.mxu0 %v2049_v1 }
  0x3f   : > { %706 = vmatpush1.bf16.msra.mxu1 %v1961_v42  ;;  %v1997_v42 = vld [vmem:[%s2501_s4 + $0xd0] sm:$0xff]  }
  0x40   : > { %707 = vmatprep.subr.bf16.mxu1 %v1966_v43  ;;  %v1998_v43 = vld [vmem:[%s2501_s4 + $0x90] sm:$0xff]  }
  0x41   : > { %1885 = vmatpush3.bf16.msra.mxu0 %v1946_v28  ;;  %v746_v28 = vsel %vm744_vm10, 0, %v745_v22  ;;  %v2003_v22 = vld [vmem:[%s2502_s5 + $0x38] sm:$0xff]  }
  0x42   : > { %1886 = vmatprep.subr.bf16.mxu0 %v2049_v1  ;;  %747 = vst [vmem:[#allocation4] sm:$0x11] %v746_v28 }
  0x43   : > { %708 = vmatpush1.bf16.msra.mxu1 %v1964_v44  ;;  %v2001_v44 = vld [vmem:[%s2501_s4 + $0xc8] sm:$0xff]  }
  0x44   : > { %709 = vmatprep.subr.bf16.mxu1 %v1969_v45  ;;  %v2002_v45 = vld [vmem:[%s2501_s4 + $0x88] sm:$0xff]  }
  0x45   : > { %1887 = vmatpush3.bf16.msra.mxu0 %v1947_v29  ;;  %v1986_v29 = vld [vmem:[%s2501_s4 + $0xa8] sm:$0xff]  }
  0x46   : > { %1888 = vmatprep.subr.bf16.mxu0 %v2049_v1 }
  0x47   : > { %710 = vmatpush1.bf16.msra.mxu1 %v1967_v46  ;;  %v2004_v46 = vld [vmem:[%s2501_s4 + $0xc0] sm:$0xff]  }
  0x48   : > { %711 = vmatprep.subr.bf16.mxu1 %v1972_v47  ;;  %v2005_v47 = vld [vmem:[%s2501_s4 + $0x80] sm:$0xff]  }
  0x49   : > { %1889 = vmatpush3.bf16.msra.mxu0 %v1948_v30  ;;  %v1992_v30 = vld [vmem:[%s2501_s4 + $0x10] sm:$0xff]  }
  0x4a   : > { %1759 = vmatprep.subr.bf16.mxu0 %v1977_v16 }
  0x4b   : > { %712 = vmatpush1.bf16.msra.mxu1 %v1970_v48  ;;  %v2007_v48 = vld [vmem:[%s2501_s4 + $0x178] sm:$0xff]  }
  0x4c   : > { %1891 = vmatmul.mubr.bf16.vlgmr.msra.gmra.mxu0 %v473_v32  ;;  %1781 = vmatprep.subr.bf16.mxu1 %v1973_v8  ;;  %v1996_v32 = vld [vmem:[%s2501_s4 + $0x8] sm:$0xff]  }
  0x4d   : > { %1760 = vmatpush3.bf16.msra.mxu0 %v1978_v17 }
  0x4e   : > { %1761 = vmatprep.subr.bf16.mxu0 %v1981_v20 }
  0x51   : > { %1762 = vmatpush3.bf16.msra.mxu0 %v1982_v25 }
  0x52   : > { %1763 = vmatprep.subr.bf16.mxu0 %v1985_v26 }
  0x55   : > { %1764 = vmatpush3.bf16.msra.mxu0 %v1986_v29 }
  0x56   : > { %1765 = vmatprep.subr.bf16.mxu0 %v1989_v34 }
  0x59   : > { %1766 = vmatpush3.bf16.msra.mxu0 %v1990_v35  ;;  %v2014_v35 = vld [vmem:[%s2502_s5 + $0x20] sm:$0xff]  }
  0x5a   : > { %1767 = vmatprep.subr.bf16.mxu0 %v1993_v40 }
  0x5d   : > { %1768 = vmatpush3.bf16.msra.mxu0 %v1994_v41  ;;  %v2017_v41 = vld [vmem:[%s2502_s5 + $0x18] sm:$0xff]  }
  0x5e   : > { %1769 = vmatprep.subr.bf16.mxu0 %v1997_v42  ;;  %v2013_v42 = vld [vmem:[%s2501_s4 + $0x130] sm:$0xff]  }
  0x61   : > { %1770 = vmatpush3.bf16.msra.mxu0 %v1998_v43  ;;  %v2015_v43 = vld [vmem:[%s2501_s4 + $0x168] sm:$0xff]  }
  0x62   : > { %1771 = vmatprep.subr.bf16.mxu0 %v2001_v44  ;;  %v2020_v44 = vld [vmem:[%s2502_s5 + $0x10] sm:$0xff]  }
  0x65   : > { %1772 = vmatpush3.bf16.msra.mxu0 %v2002_v45  ;;  %v2016_v45 = vld [vmem:[%s2501_s4 + $0x128] sm:$0xff]  }
  0x66   : > { %1773 = vmatprep.subr.bf16.mxu0 %v2004_v46  ;;  %v2018_v46 = vld [vmem:[%s2501_s4 + $0x160] sm:$0xff]  }
  0x69   : > { %1774 = vmatpush3.bf16.msra.mxu0 %v2005_v47  ;;  %v2023_v47 = vld [vmem:[%s2502_s5 + $0x8] sm:$0xff]  }
  0x6a   : > { %1803 = vmatprep.subr.bf16.mxu0 %v2007_v48  ;;  %v2019_v48 = vld [vmem:[%s2501_s4 + $0x120] sm:$0xff]  }
  0xec   : > { %v377_v50 = vpop.f32.mrf.mxu0 }
  0xed   : > { %v465_v51 = vpop.f32.mrf.mxu1 }
  0xee   : > { %v1852_v52 = vpop.f32.mrf.mxu0  ;;  %v466_v58 = vadd.f32 %v465_v51, %v377_v50  ;;  %v608_v50 = vshrl.u32 %v607_v49, 7  ;;  %v2021_v49 = vld [vmem:[%s2501_s4 + $0x158] sm:$0xff]  }
  0xef   : > { %v1872_v53 = vpop.f32.mrf.mxu1  ;;  %v605_v52 = vld [vmem:[%s2500_s3] sm:$0x3] }
  0xf0   : > { %v380_v54 = vpop.f32.mrf.mxu0  ;;  %v609_v51 = vsub.s32 0, %v608_v50  ;;  %v613_v53 = vsub.s32 1, %v608_v50  ;;  %v2026_v50 = vld [vmem:[%s2502_s5] sm:$0xff]  }
  0xf1   : > { %v468_v55 = vpop.f32.mrf.mxu1 }
  0xf2   : > { %v1853_v56 = vpop.f32.mrf.mxu0  ;;  %v610_v54 = vrot.slane %v605_v52, %v609_v51  ;;  %v614_v55 = vrot.slane %v605_v52, %v613_v53  ;;  %v1349_v51 = vld [vmem:[#allocation2 + $0x1] ss:$2 sm:$0xff]  ;;  %v2022_v52 = vld [vmem:[%s2501_s4 + $0x118] sm:$0xff]   ;;  %v2024_v53 = vld [vmem:[%s2501_s4 + $0x150] sm:$0xff]  }
  0xf3   : > { %v1873_v57 = vpop.f32.mrf.mxu1 }
 0x10c   : > { %v573_v59 = vpop.f32.mrf.mxu0 }
 0x10d   : > { %v579_v60 = vadd.f32 %v573_v59, %v466_v58 }
 0x10e   : > { %v1892_v61 = vpop.f32.mrf.mxu0 }
 0x10f   : > { %v581_v62 = vmin.f32 %v579_v60, 0.0  ;;  %vm580_vm1 = vcmp.gt.f32.partialorder %v579_v60, 0.0 }
 0x110   : > { %v576_v63 = vpop.f32.mrf.mxu0 }
 0x111   : > { %v582_v0 = vmul.f32 1.442695, %v581_v62 }
 0x112   : > { %v1893_v2 = vpop.f32.mrf.mxu0 }
 0x113   : > { %2031 = vpow2.f32 %v582_v0 }
 0x120   : > { %v2032_v3 = vpop.eup %2031 }
 0x121   : > { %v1580_v4 = vadd.f32 -1.0, %v2032_v3 }
 0x123   : > { %v585_v5 = vsel %vm580_vm1, %v579_v60, %v1580_v4  ;;  %vm2345_vm1 = vmand %vm785_vm14, %vm748_vm7 }
 0x124   : > { %v586_v6 = vpack.c.bf16 %v585_v5, %v585_v5  ;;  %vm789_vm3 = vmor %vm2353_vm2, %vm2345_vm1 }
 0x126   : > { %587 = vst [vmem:[#allocation3] sm:$0xf] %v586_v6 }
 0x12d   : > { %v588_v7 = vld [vmem:[#allocation3] sm:$0xf] }
 0x12e   : > { %730 = vmatmul.mubr.bf16.vlgmr.msra.gmra.mxu1 %v588_v7 }
 0x12f   : > { %1782 = vmatpush3.bf16.msra.mxu1 %v1974_v9 }
 0x130   : > { %1783 = vmatprep.subr.bf16.mxu1 %v1975_v10 }
 0x133   : > { %1784 = vmatpush3.bf16.msra.mxu1 %v1976_v11 }
 0x134   : > { %1785 = vmatprep.subr.bf16.mxu1 %v1979_v12 }
 0x137   : > { %1786 = vmatpush3.bf16.msra.mxu1 %v1980_v13  ;;  %v790_v13 = vld [vmem:[#allocation4] sm:$0xff] }
 0x138   : > { %1787 = vmatprep.subr.bf16.mxu1 %v1983_v14  ;;  %v793_v14 = vld [vmem:[#allocation4 + $0x8] sm:$0x11] }
 0x13b   : > { %1788 = vmatpush3.bf16.msra.mxu1 %v1984_v15 }
 0x13c   : > { %1789 = vmatprep.subr.bf16.mxu1 %v1987_v18 }
 0x13f   : > { %1790 = vmatpush3.bf16.msra.mxu1 %v1988_v19 }
 0x140   : > { %1791 = vmatprep.subr.bf16.mxu1 %v1991_v27  ;;  %v2011_v27 = vld [vmem:[%s2502_s5 + $0x28] sm:$0xff]  }
 0x143   : > { %1792 = vmatpush3.bf16.msra.mxu1 %v1992_v30 }
 0x144   : > { %1793 = vmatprep.subr.bf16.mxu1 %v1995_v31 }
 0x147   : > { %1794 = vmatpush3.bf16.msra.mxu1 %v1996_v32 }
 0x148   : > { %1795 = vmatprep.subr.bf16.mxu1 %v1999_v36 }
 0x14b   : > { %1796 = vmatpush3.bf16.msra.mxu1 %v2000_v38  ;;  %v2008_v38 = vld [vmem:[%s2501_s4 + $0x138] sm:$0xff]  }
 0x14c   : > { %1894 = vmatprep.subr.bf16.mxu1 %v2049_v1 }
 0x1ee   : > { %v731_v56 = vpop.f32.mrf.mxu1 }
 0x1ef   : > { %v732_v57 = vadd.f32 %v731_v56, %v610_v54  ;;  %v1350_v54 = vpack.c.bf16 %v1349_v51, %v1349_v51  ;;  %v2028_v56 = vld [vmem:[%s2501_s4 + $0x108] sm:$0xff]  }
 0x1f0   : > { %v733_v58 = vpop.f32.mrf.mxu1 }
 0x1f1   : > { %v758_v59 = vmin.f32 %v732_v57, 0.0  ;;  %v734_v60 = vadd.f32 %v733_v58, %v614_v55  ;;  %vm756_vm4 = vcmp.gt.f32.partialorder %v732_v57, 0.0  ;;  %v2025_v55 = vld [vmem:[%s2501_s4 + $0x110] sm:$0xff]   ;;  %v2030_v58 = vld [vmem:[%s2501_s4 + $0x100] sm:$0xff]  }
 0x1f2   : > { %v735_v61 = vpop.f32.mrf.mxu1 }
 0x1f3   : > { %v760_v62 = vmul.f32 1.442695, %v758_v59  ;;  %v759_v63 = vmin.f32 %v734_v60, 0.0  ;;  %vm757_vm5 = vcmp.gt.f32.partialorder %v734_v60, 0.0 }
 0x1f4   : > { %v736_v0 = vpop.f32.mrf.mxu1 }
 0x1f5   : > { %2033 = vpow2.f32 %v760_v62  ;;  %v762_v2 = vmul.f32 1.442695, %v759_v63 }
 0x1f7   : > { %2035 = vpow2.f32 %v762_v2 }
 0x202   : > { %v2034_v3 = vpop.eup %2033 }
 0x203   : > { %v1597_v4 = vadd.f32 -1.0, %v2034_v3 }
 0x204   : > { %v2036_v5 = vpop.eup %2035 }
 0x205   : > { %v1598_v6 = vadd.f32 -1.0, %v2036_v5  ;;  %v766_v7 = vsel %vm756_vm4, %v732_v57, %v1597_v4  ;;  %v2029_v57 = vld [vmem:[%s2501_s4 + $0x140] sm:$0xff]  }
 0x207   : > { %v767_v8 = vsel %vm757_vm5, %v734_v60, %v1598_v6 }
 0x208   : > { %v1731_v9 = vpack.c.bf16 %v767_v8, %v766_v7 }
 0x20a   : > { %v776_v10 = vshrl.u32 %v1731_v9, 16  ;;  %v779_v12 = vshll.u32 %v1731_v9, 16 }
 0x20c   : > { %v778_v11 = vrot.slane %v776_v10, 7 }
 0x20e   : > { %v781_v15 = vor.u32 %v779_v12, %v778_v11  ;;  %v782_v16 = vrot.slane %v778_v11, 4 }
 0x210   : > { %v791_v17 = vsel %vm789_vm3, %v781_v15, %v790_v13  ;;  %v794_v18 = vsel %vm744_vm10, %v782_v16, %v793_v14 }
 0x211   : > { %792 = vst [vmem:[#allocation4] sm:$0xff] %v791_v17  ;;  %795 = vst [vmem:[#allocation4 + $0x8] sm:$0x11] %v794_v18  ;;  %v1651_v19 = vcombine.high %v791_v17, %v791_v17  ;;  %v1650_v20 = vcombine.low %v791_v17, %v791_v17 }
 0x213   : > { %1155 = vmatprep.mubr.bf16.mxu1 %v1651_v19 }
 0x214   : > { %1156 = vmatmul.mubr.bf16.vlgmr.msra.gmra.mxu1 %v1650_v20 }
 0x215   : > { %1895 = vmatpush3.bf16.msra.mxu1 %v2003_v22  ;;  %1910 = vmatprep.mubr.msk.bf16.mxu1 %vm2050_vm0, %v2049_v1 }
 0x216   : > { %1896 = vmatprep.subr.bf16.mxu1 %v2049_v1 }
 0x218   : > { %v2411_v21 = vld [vmem:[#allocation4 + $0x8] sm:$0x11]  ;;  %v2415_v26 = vld [vmem:[#allocation4] sm:$0xee] }
 0x219   : > { %1897 = vmatpush3.bf16.msra.mxu1 %v2006_v24  ;;  %v1633_v23 = vcombine.high %v791_v17, %v2411_v21  ;;  %v1632_v25 = vcombine.low %v791_v17, %v2411_v21  ;;  %v1701_v30 = vcombine.high %v2415_v26, %v2411_v21  ;;  %v1700_v59 = vcombine.low %v2415_v26, %v2411_v21 }
 0x21a   : > { %1898 = vmatprep.subr.bf16.mxu1 %v2049_v1 }
 0x21b   : > { %v881_v28 = vshll.u32 %v1633_v23, 16  ;;  %v874_v29 = vshll.u32 %v1632_v25, 16  ;;  %v879_v31 = vshrl.u32 %v1633_v23, 16  ;;  %v872_v33 = vshrl.u32 %v1632_v25, 16 }
 0x21c   : > { %v1203_v40 = vrot.slane %v1701_v30, 1  ;;  %v1202_v60 = vrot.slane %v1700_v59, 1 }
 0x21d   : > { %v883_v32 = vrot.slane %v881_v28, 1  ;;  %v876_v34 = vrot.slane %v874_v29, 1  ;;  %1899 = vmatpush3.bf16.msra.mxu1 %v2011_v27 }
 0x21e   : > { %1900 = vmatprep.subr.bf16.mxu1 %v2049_v1 }
 0x21f   : > { %v884_v36 = vor.u32 %v883_v32, %v879_v31  ;;  %v877_v37 = vor.u32 %v876_v34, %v872_v33 }
 0x221   : > { %1015 = vmatprep.mubr.bf16.mxu0 %v884_v36  ;;  %1901 = vmatpush3.bf16.msra.mxu1 %v2014_v35 }
 0x222   : > { %1016 = vmatmul.mubr.bf16.vlgmr.msra.gmra.mxu0 %v877_v37  ;;  %1902 = vmatprep.subr.bf16.mxu1 %v2049_v1 }
 0x223   : > { %1804 = vmatpush3.bf16.msra.mxu0 %v2008_v38  ;;  %1334 = vmatprep.mubr.bf16.mxu0 %v1203_v40 }
 0x224   : > { %1805 = vmatprep.subr.bf16.mxu0 %v2012_v39 }
 0x225   : > { %1903 = vmatpush3.bf16.msra.mxu1 %v2017_v41 }
 0x226   : > { %1904 = vmatprep.subr.bf16.mxu1 %v2049_v1 }
 0x227   : > { %1806 = vmatpush3.bf16.msra.mxu0 %v2013_v42 }
 0x228   : > { %1807 = vmatprep.subr.bf16.mxu0 %v2015_v43 }
 0x229   : > { %1905 = vmatpush3.bf16.msra.mxu1 %v2020_v44 }
 0x22a   : > { %1906 = vmatprep.subr.bf16.mxu1 %v2049_v1 }
 0x22b   : > { %1808 = vmatpush3.bf16.msra.mxu0 %v2016_v45 }
 0x22c   : > { %1809 = vmatprep.subr.bf16.mxu0 %v2018_v46 }
 0x22d   : > { %1907 = vmatpush3.bf16.msra.mxu1 %v2023_v47 }
 0x22e   : > { %1908 = vmatprep.subr.bf16.mxu1 %v2049_v1  ;;  %v2027_v1 = vld [vmem:[%s2501_s4 + $0x148] sm:$0xff]  }
 0x22f   : > { %1810 = vmatpush3.bf16.msra.mxu0 %v2019_v48 }
 0x230   : > { %1811 = vmatprep.subr.bf16.mxu0 %v2021_v49 }
 0x231   : > { %1909 = vmatpush3.bf16.msra.mxu1 %v2026_v50 }
 0x233   : > { %1812 = vmatpush3.bf16.msra.mxu0 %v2022_v52 }
 0x234   : > { %1813 = vmatprep.subr.bf16.mxu0 %v2024_v53  ;;  %1911 = vmatmul.mubr.bf16.vlgmr.msra.gmra.mxu1 %v1350_v54 }
 0x237   : > { %1814 = vmatpush3.bf16.msra.mxu0 %v2025_v55 }
 0x238   : > { %1815 = vmatprep.subr.bf16.mxu0 %v2027_v1 }
 0x23b   : > { %1816 = vmatpush3.bf16.msra.mxu0 %v2028_v56 }
 0x23c   : > { %1817 = vmatprep.subr.bf16.mxu0 %v2029_v57 }
 0x23f   : > { %1818 = vmatpush3.bf16.msra.mxu0 %v2030_v58 }
 0x242   : > { %1335 = vmatmul.mubr.bf16.vlgmr.msra.gmra.mxu0 %v1202_v60 }
 0x2d4   : > { %v1797_v61 = vpop.f32.mrf.mxu1 }
 0x2d6   : > { %v1798_v62 = vpop.f32.mrf.mxu1 }
 0x2d7   : > { %v1799_v13 = vadd.f32 %v1798_v62, %v1797_v61 }
 0x2d8   : > { %v1800_v63 = vpop.f32.mrf.mxu1 }
 0x2da   : > { %v1801_v0 = vpop.f32.mrf.mxu1 }
 0x2e2   : > { %v1775_v2 = vpop.f32.mrf.mxu0 }
 0x2e4   : > { %v1776_v3 = vpop.f32.mrf.mxu0 }
 0x2e5   : > { %v1777_v10 = vadd.f32 %v1776_v3, %v1775_v2 }
 0x2e6   : > { %v1778_v4 = vpop.f32.mrf.mxu0 }
 0x2e7   : > { %v1158_v15 = vadd.f32 %v1799_v13, %v1777_v10 }
 0x2e8   : > { %v1779_v5 = vpop.f32.mrf.mxu0 }
 0x2f4   : > { %v1449_v6 = vpop.f32.mrf.mxu1 }
 0x2f5   : > { %v1456_v11 = vmin.f32 %v1449_v6, 0.0  ;;  %vm1455_vm0 = vcmp.gt.f32.partialorder %v1449_v6, 0.0 }
 0x2f6   : > { %v1912_v7 = vpop.f32.mrf.mxu1 }
 0x2f7   : > { %v1457_v16 = vmul.f32 1.442695, %v1456_v11 }
 0x2f8   : > { %v1452_v8 = vpop.f32.mrf.mxu1 }
 0x2f9   : > { %2037 = vpow2.f32 %v1457_v16 }
 0x2fa   : > { %v1913_v9 = vpop.f32.mrf.mxu1 }
 0x302   : > { %v1819_v12 = vpop.f32.mrf.mxu0 }
 0x304   : > { %v1820_v14 = vpop.f32.mrf.mxu0 }
 0x305   : > { %v1821_v17 = vadd.f32 %v1820_v14, %v1819_v12 }
 0x306   : > { %v1822_v18 = vpop.f32.mrf.mxu0  ;;  %v2038_v21 = vpop.eup %2037 }
 0x307   : > { %v1342_v19 = vadd.f32 %v1821_v17, %v1158_v15  ;;  %v1727_v23 = vadd.f32 -1.0, %v2038_v21 }
 0x308   : > { %v1823_v20 = vpop.f32.mrf.mxu0 }
 0x309   : > { %v1344_v22 = vmin.f32 %v1342_v19, 0.0  ;;  %vm1343_vm6 = vcmp.gt.f32.partialorder %v1342_v19, 0.0  ;;  %v1460_v27 = vsel %vm1455_vm0, %v1449_v6, %v1727_v23 }
 0x30b   : > { %v1345_v24 = vmul.f32 1.442695, %v1344_v22 }
 0x30d   : > { %2039 = vpow2.f32 %v1345_v24 }
 0x31a   : > { %v2040_v25 = vpop.eup %2039 }
 0x31b   : > { %v1718_v26 = vadd.f32 -1.0, %v2040_v25 }
 0x31d   : > { %v1348_v28 = vsel %vm1343_vm6, %v1342_v19, %v1718_v26 }
 0x31e   : > { %v1461_v29 = vadd.f32 %v1460_v27, %v1348_v28 }
 0x320   : > { %1462 = vst [vmem:[%s249_s26] sm:$0xff] %v1461_v29 }
 0x321 PF: > { %s16_s21 = sadd.s32 1, %s2047_s21  }
 0x322   : > { %p13_p4 = scmp.ge.s32.totalorder %s16_s21, 4  }
 0x324   :  { %15 = sbr.rel (!%p13_p4) target bundleno = 1 (0x1), region = 80 }

</bundles_post_ra>
